<compile_context>
chip_gen: v7x
topology: tpu7x:2x2x1
jax: 0.10.0
libtpu: 0.0.40
codegen_flags: <defaults>
</compile_context>

<pallas_src>
import functools

import jax
import jax.numpy as jnp
from jax.experimental import pallas as pl
from jax.experimental.pallas import tpu as pltpu


def _round_up(x, m):
    return (x + m - 1) // m * m


def _layer_kernel(x_ref, w_ref, b_ref, hseq_ref, comb_ref, slab_ref, c_ref,
                  *, H, W, k, p, cin, ch, Bg, Tc):
    """One ConvLSTM layer over a chunk of Tc time steps.

    grid = (batch_group, time_chunk).  Recurrent state lives in VMEM scratch:
    comb_ref holds the zero-padded [x_t || h_t] image, c_ref the cell state.
    Both persist across the "arbitrary" time-chunk axis.
    """
    C = cin + ch
    rows = Bg * H * W

    @pl.when(pl.program_id(1) == 0)
    def _init():
        # init_hidden: h = c = 0.  Also zeroes the conv halo and the im2col
        # K-padding columns once; those are never written afterwards.
        comb_ref[...] = jnp.zeros_like(comb_ref)
        slab_ref[...] = jnp.zeros_like(slab_ref)
        c_ref[...] = jnp.zeros_like(c_ref)

    for tt in range(Tc):                       # unrolled; Tc is small/static
        # Frame x_t into the interior x-channels of the padded scratch.
        comb_ref[:, p:p + H, p:p + W, 0:cin] = (
            x_ref[tt * Bg:(tt + 1) * Bg].astype(comb_ref.dtype))

        # im2col: k*k shifted windows of the combined [x || h] image, written
        # tap-major along K into the bf16 slab (static lane offsets).
        for dy in range(k):
            for dx in range(k):
                off = (dy * k + dx) * C
                win = comb_ref[:, dy:dy + H, dx:dx + W, :].reshape(rows, C)
                slab_ref[:, off:off + C] = win.astype(slab_ref.dtype)

        # Single wide-K MXU matmul covering all four gates of both the x- and
        # h-path convolutions (zero-padded K columns x zero weight rows = 0).
        acc = jnp.dot(slab_ref[...], w_ref[...],
                      preferred_element_type=jnp.float32)
        acc = acc + b_ref[...]                              # (1, 4*ch) bcast

        # Gate layout i | f | o | c: one contiguous sigmoid over 3*ch lanes,
        # tanh over the trailing ch.  (Peephole c*Wci / c*Wcf / cc*Wco terms
        # are identically zero in the reference forward and are folded out.)
        sig = jax.nn.sigmoid(acc[:, :3 * ch])
        i_g = sig[:, 0 * ch:1 * ch]
        f_g = sig[:, 1 * ch:2 * ch]
        o_g = sig[:, 2 * ch:3 * ch]
        g_g = jnp.tanh(acc[:, 3 * ch:])

        c_new = f_g * c_ref[...] + i_g * g_g
        h_new = o_g * jnp.tanh(c_new)
        c_ref[...] = c_new

        # h_t back into the interior h-channels (used by step t+1's conv).
        h_nhwc = h_new.reshape(Bg, H, W, ch)
        comb_ref[:, p:p + H, p:p + W, cin:C] = h_nhwc

        # Lane-dense output slab (Bg*H, W*ch) so the h-sequence stores are
        # wide/unmasked.  Built from supported slice + lane-concat ops rather
        # than a sublane->lane reshape.
        h_dense = jnp.concatenate(
            [h_nhwc[:, :, wcol, :].reshape(Bg * H, ch) for wcol in range(W)],
            axis=-1)
        hseq_ref[tt * Bg * H:(tt + 1) * Bg * H, :] = h_dense


def convlstm_layer(x_seq, w, b, *, kernel_size, hidden_channels,
                   batch_groups=1, time_chunk=None):
    """Run one ConvLSTM layer over the whole sequence.

    x_seq: [S, B, H, W, cin] float32
    w:     [Kpad, 4*ch] bfloat16; Kpad = round_up(k*k*(cin+ch), 128); rows are
           tap-major ([x-chans || h-chans] per tap) with zero rows padding K.
           Gate order along the last axis: i | f | o | c.
    b:     [1, 4*ch] float32
    returns the hidden-state sequence [S, B, H, W, ch] float32.
    """
    S, B, H, W, cin = x_seq.shape
    ch = hidden_channels
    k = kernel_size
    p = (k - 1) // 2
    C = cin + ch
    Kpad = _round_up(k * k * C, 128)
    assert w.shape == (Kpad, 4 * ch)

    G = batch_groups                     # keep 1 on single-TC chips (v5e/v6e)
    assert B % G == 0
    Bg = B // G
    Tc = S if time_chunk is None else time_chunk
    assert S % Tc == 0
    nchunks = S // Tc
    if nchunks > 1 or G > 1:
        assert (Tc * Bg * H) % 8 == 0, "output chunk must stay sublane aligned"

    Hp, Wp = H + 2 * p, W + 2 * p
    rows = Bg * H * W

    # Batch-group-major, bf16 input frames (halves the HBM->VMEM frame DMA).
    xg = x_seq.reshape(S, G, Bg, H, W, cin).transpose(1, 0, 2, 3, 4, 5)
    x_flat = xg.reshape(G * S * Bg, H, W, cin).astype(jnp.bfloat16)

    kernel = functools.partial(_layer_kernel, H=H, W=W, k=k, p=p, cin=cin,
                               ch=ch, Bg=Bg, Tc=Tc)

    flops = 2 * G * S * rows * Kpad * (4 * ch)
    transc = G * S * rows * 5 * ch
    bytes_acc = int(x_flat.size * x_flat.dtype.itemsize
                    + G * S * Bg * H * W * ch * 4
                    + w.size * w.dtype.itemsize
                    + b.size * b.dtype.itemsize)

    h_flat = pl.pallas_call(
        kernel,
        out_shape=jax.ShapeDtypeStruct((G * S * Bg * H, W * ch), jnp.float32),
        grid=(G, nchunks),
        in_specs=[
            pl.BlockSpec((Tc * Bg, H, W, cin),
                         lambda g, c: (g * nchunks + c, 0, 0, 0)),   # frames
            pl.BlockSpec((Kpad, 4 * ch), lambda g, c: (0, 0)),       # fused W
            pl.BlockSpec((1, 4 * ch), lambda g, c: (0, 0)),          # bias
        ],
        out_specs=pl.BlockSpec((Tc * Bg * H, W * ch),
                               lambda g, c: (g * nchunks + c, 0)),   # h seq
        scratch_shapes=[
            pltpu.VMEM((Bg, Hp, Wp, C), jnp.float32),     # padded [x || h]
            pltpu.VMEM((rows, Kpad), jnp.bfloat16),       # im2col slab
            pltpu.VMEM((rows, ch), jnp.float32),          # cell state c
        ],
        compiler_params=pltpu.CompilerParams(
            dimension_semantics=("parallel", "arbitrary"),
            vmem_limit_bytes=32 * 1024 * 1024),
        cost_estimate=pl.CostEstimate(flops=flops, transcendentals=transc,
                                      bytes_accessed=bytes_acc),
    )(x_flat, w, b)

    # (G*S*Bg*H, W*ch) -> (S, B, H, W, ch)
    h = h_flat.reshape(G, S, Bg, H, W, ch).transpose(1, 0, 2, 3, 4, 5)
    return h.reshape(S, B, H, W, ch)


class ConvLSTM:
    """JAX/Pallas re-implementation of the PyTorch ConvLSTM forward pass."""

    def __init__(self, input_channels, hidden_channels, kernel_size,
                 step=1, effective_step=(1,), *, key, batch_groups=1,
                 time_chunk=None):
        self.input_channels = [input_channels] + list(hidden_channels)
        self.hidden_channels = list(hidden_channels)
        self.kernel_size = kernel_size
        self.num_layers = len(hidden_channels)
        self.step = step
        self.effective_step = list(effective_step)
        # batch_groups > 1 only helps on v7x (2 TensorCores) and only while
        # Bg*H*W stays >= 256; leave it at 1 on v5e/v6e.
        self.batch_groups = batch_groups
        self.time_chunk = time_chunk

        k = kernel_size
        self.params = []
        for i in range(self.num_layers):
            cin, ch = self.input_channels[i], self.hidden_channels[i]
            C = cin + ch
            Kpad = _round_up(k * k * C, 128)
            key, k1, k2, k3 = jax.random.split(key, 4)
            # PyTorch Conv2d default init: U(-1/sqrt(fan_in), 1/sqrt(fan_in)).
            bound_x = 1.0 / float(cin * k * k) ** 0.5
            bound_h = 1.0 / float(ch * k * k) ** 0.5
            # Gate order along the last axis: i | f | o | c.
            wx = jax.random.uniform(k1, (k * k, cin, 4 * ch),
                                    jnp.float32, -bound_x, bound_x)
            wh = jax.random.uniform(k3, (k * k, ch, 4 * ch),
                                    jnp.float32, -bound_h, bound_h)
            # Only the x-path convs carry a bias in the reference (Wh* use
            # bias=False), so one bias per gate drawn with the x-path bound.
            bias = jax.random.uniform(k2, (1, 4 * ch),
                                      jnp.float32, -bound_x, bound_x)
            # Fuse x-path and h-path weights tap-major along the contraction
            # axis, zero-pad K to a lane multiple, store bf16 (MXU native;
            # accumulation in the kernel is f32).
            w = jnp.concatenate([wx, wh], axis=1).reshape(k * k * C, 4 * ch)
            w = jnp.pad(w, ((0, Kpad - k * k * C), (0, 0)))
            self.params.append((w.astype(jnp.bfloat16), bias))

    def __call__(self, x):
        # x: [B, T, C, H, W] (PyTorch NCHW per frame), float32
        B, T, C, H, W = x.shape
        assert self.step <= T
        # NCHW -> [S, B, H, W, C]
        seq = jnp.transpose(x[:, :self.step], (1, 0, 3, 4, 2))
        for i in range(self.num_layers):
            w, bias = self.params[i]
            seq = convlstm_layer(seq, w, bias,
                                 kernel_size=self.kernel_size,
                                 hidden_channels=self.hidden_channels[i],
                                 batch_groups=self.batch_groups,
                                 time_chunk=self.time_chunk)
        # seq: last layer's hidden state at every step, [S, B, H, W, ch]
        outs = jnp.stack([seq[s] for s in self.effective_step], axis=0)
        outputs = jnp.transpose(outs, (1, 0, 4, 2, 3))   # [B, n_eff, ch, H, W]
        # Matches the reference `return x[0], outputs` (batch element 0).
        last = jnp.transpose(seq[self.step - 1], (0, 3, 1, 2))[0]  # [ch, H, W]
        return last, outputs


if __name__ == "__main__":
    key = jax.random.PRNGKey(0)
    key, kin, kparam = jax.random.split(key, 3)

    B, T, Cin, H, W = 2, 4, 4, 8, 8
    hidden = [32, 32]
    kernel_size = 3

    model = ConvLSTM(Cin, hidden, kernel_size,
                     step=T, effective_step=[1, 3], key=kparam)

    x = jax.random.normal(kin, (B, T, Cin, H, W), jnp.float32)
    last, outs = model(x)
    jax.block_until_ready((last, outs))

    assert last.shape == (hidden[-1], H, W)
    assert outs.shape == (B, 2, hidden[-1], H, W)
    print("KERNEL_OK")
</pallas_src>

<mosaic_0001>
module attributes {stable_mosaic.version = 11 : i64} {
  func.func @_layer_kernel(%arg0: i32, %arg1: i32, %arg2: memref<8x8x8x4xbf16, #tpu.memory_space<vmem>>, %arg3: memref<384x128xbf16, #tpu.memory_space<vmem>>, %arg4: memref<1x128xf32, #tpu.memory_space<vmem>>, %arg5: memref<64x256xf32, #tpu.memory_space<vmem>>, %arg6: memref<2x10x10x36xf32, #tpu.memory_space<vmem>>, %arg7: memref<128x384xbf16, #tpu.memory_space<vmem>>, %arg8: memref<128x32xf32, #tpu.memory_space<vmem>>) attributes {dimension_semantics = [#tpu.dimension_semantics<parallel>, #tpu.dimension_semantics<arbitrary>], iteration_bounds = array<i64: 1, 1>, scalar_prefetch = 0 : i64, scratch_operands = 3 : i64, tpu.core_type = #tpu.core_type<tc>, window_params = [{transform_indices = @transform_0, window_bounds = array<i64: 8, 8, 8, 4>}, {pipeline_mode = #tpu.pipeline_mode<synchronous>, transform_indices = @transform_1, window_bounds = array<i64: 384, 128>}, {pipeline_mode = #tpu.pipeline_mode<synchronous>, transform_indices = @transform_2, window_bounds = array<i64: 1, 128>}, {transform_indices = @transform_3, window_bounds = array<i64: 64, 256>}]} {
    %c0_i32 = arith.constant 0 : i32
    %0 = arith.cmpi eq, %arg1, %c0_i32 : i32
    %1 = arith.extui %0 : i1 to i32
    %c0_i32_0 = arith.constant 0 : i32
    %2 = arith.cmpi ne, %1, %c0_i32_0 : i32
    scf.if %2 {
      %cst_304 = arith.constant 0.000000e+00 : f32
      %367 = vector.broadcast %cst_304 : f32 to vector<2x10x10x36xf32>
      %c0_305 = arith.constant 0 : index
      %c0_306 = arith.constant 0 : index
      %c0_307 = arith.constant 0 : index
      %c0_308 = arith.constant 0 : index
      %368 = vector.load %arg6[%c0_305, %c0_306, %c0_307, %c0_308] : memref<2x10x10x36xf32, #tpu.memory_space<vmem>>, vector<2x10x10x36xf32>
      tpu.vector_store %arg6[%c0_305, %c0_306, %c0_307, %c0_308], %367 {strides = array<i32>} : memref<2x10x10x36xf32, #tpu.memory_space<vmem>>, vector<2x10x10x36xf32>,
      %cst_309 = arith.constant 0.000000e+00 : bf16
      %369 = vector.broadcast %cst_309 : bf16 to vector<128x384xbf16>
      %c0_310 = arith.constant 0 : index
      %c0_311 = arith.constant 0 : index
      %370 = vector.load %arg7[%c0_310, %c0_311] : memref<128x384xbf16, #tpu.memory_space<vmem>>, vector<128x384xbf16>
      tpu.vector_store %arg7[%c0_310, %c0_311], %369 {strides = array<i32>} : memref<128x384xbf16, #tpu.memory_space<vmem>>, vector<128x384xbf16>,
      %cst_312 = arith.constant 0.000000e+00 : f32
      %371 = vector.broadcast %cst_312 : f32 to vector<128x32xf32>
      %c0_313 = arith.constant 0 : index
      %c0_314 = arith.constant 0 : index
      %372 = vector.load %arg8[%c0_313, %c0_314] : memref<128x32xf32, #tpu.memory_space<vmem>>, vector<128x32xf32>
      tpu.vector_store %arg8[%c0_313, %c0_314], %371 {strides = array<i32>} : memref<128x32xf32, #tpu.memory_space<vmem>>, vector<128x32xf32>,
    } else {
    }
    %c0 = arith.constant 0 : index
    %c0_1 = arith.constant 0 : index
    %c0_2 = arith.constant 0 : index
    %c0_3 = arith.constant 0 : index
    %3 = vector.load %arg2[%c0, %c0_1, %c0_2, %c0_3] : memref<8x8x8x4xbf16, #tpu.memory_space<vmem>>, vector<2x8x8x4xbf16>
    %4 = arith.extf %3 : vector<2x8x8x4xbf16> to vector<2x8x8x4xf32>
    %c0_4 = arith.constant 0 : index
    %c1 = arith.constant 1 : index
    %c1_5 = arith.constant 1 : index
    %c0_6 = arith.constant 0 : index
    %5 = vector.load %arg6[%c0_4, %c1, %c1_5, %c0_6] : memref<2x10x10x36xf32, #tpu.memory_space<vmem>>, vector<2x8x8x4xf32>
    tpu.vector_store %arg6[%c0_4, %c1, %c1_5, %c0_6], %4 {strides = array<i32>} : memref<2x10x10x36xf32, #tpu.memory_space<vmem>>, vector<2x8x8x4xf32>,
    %c0_7 = arith.constant 0 : index
    %c0_8 = arith.constant 0 : index
    %c0_9 = arith.constant 0 : index
    %c0_10 = arith.constant 0 : index
    %6 = vector.load %arg6[%c0_7, %c0_8, %c0_9, %c0_10] : memref<2x10x10x36xf32, #tpu.memory_space<vmem>>, vector<2x8x8x36xf32>
    %7 = vector.shape_cast %6 : vector<2x8x8x36xf32> to vector<128x36xf32>
    %8 = arith.truncf %7 : vector<128x36xf32> to vector<128x36xbf16>
    %c0_11 = arith.constant 0 : index
    %c0_12 = arith.constant 0 : index
    %9 = vector.load %arg7[%c0_11, %c0_12] : memref<128x384xbf16, #tpu.memory_space<vmem>>, vector<128x36xbf16>
    tpu.vector_store %arg7[%c0_11, %c0_12], %8 {strides = array<i32>} : memref<128x384xbf16, #tpu.memory_space<vmem>>, vector<128x36xbf16>,
    %c0_13 = arith.constant 0 : index
    %c0_14 = arith.constant 0 : index
    %c1_15 = arith.constant 1 : index
    %c0_16 = arith.constant 0 : index
    %10 = vector.load %arg6[%c0_13, %c0_14, %c1_15, %c0_16] : memref<2x10x10x36xf32, #tpu.memory_space<vmem>>, vector<2x8x8x36xf32>
    %11 = vector.shape_cast %10 : vector<2x8x8x36xf32> to vector<128x36xf32>
    %12 = arith.truncf %11 : vector<128x36xf32> to vector<128x36xbf16>
    %c0_17 = arith.constant 0 : index
    %c36 = arith.constant 36 : index
    %13 = vector.load %arg7[%c0_17, %c36] : memref<128x384xbf16, #tpu.memory_space<vmem>>, vector<128x36xbf16>
    tpu.vector_store %arg7[%c0_17, %c36], %12 {strides = array<i32>} : memref<128x384xbf16, #tpu.memory_space<vmem>>, vector<128x36xbf16>,
    %c0_18 = arith.constant 0 : index
    %c0_19 = arith.constant 0 : index
    %c2 = arith.constant 2 : index
    %c0_20 = arith.constant 0 : index
    %14 = vector.load %arg6[%c0_18, %c0_19, %c2, %c0_20] : memref<2x10x10x36xf32, #tpu.memory_space<vmem>>, vector<2x8x8x36xf32>
    %15 = vector.shape_cast %14 : vector<2x8x8x36xf32> to vector<128x36xf32>
    %16 = arith.truncf %15 : vector<128x36xf32> to vector<128x36xbf16>
    %c0_21 = arith.constant 0 : index
    %c72 = arith.constant 72 : index
    %17 = vector.load %arg7[%c0_21, %c72] : memref<128x384xbf16, #tpu.memory_space<vmem>>, vector<128x36xbf16>
    tpu.vector_store %arg7[%c0_21, %c72], %16 {strides = array<i32>} : memref<128x384xbf16, #tpu.memory_space<vmem>>, vector<128x36xbf16>,
    %c0_22 = arith.constant 0 : index
    %c1_23 = arith.constant 1 : index
    %c0_24 = arith.constant 0 : index
    %c0_25 = arith.constant 0 : index
    %18 = vector.load %arg6[%c0_22, %c1_23, %c0_24, %c0_25] : memref<2x10x10x36xf32, #tpu.memory_space<vmem>>, vector<2x8x8x36xf32>
    %19 = vector.shape_cast %18 : vector<2x8x8x36xf32> to vector<128x36xf32>
    %20 = arith.truncf %19 : vector<128x36xf32> to vector<128x36xbf16>
    %c0_26 = arith.constant 0 : index
    %c108 = arith.constant 108 : index
    %21 = vector.load %arg7[%c0_26, %c108] : memref<128x384xbf16, #tpu.memory_space<vmem>>, vector<128x36xbf16>
    tpu.vector_store %arg7[%c0_26, %c108], %20 {strides = array<i32>} : memref<128x384xbf16, #tpu.memory_space<vmem>>, vector<128x36xbf16>,
    %c0_27 = arith.constant 0 : index
    %c1_28 = arith.constant 1 : index
    %c1_29 = arith.constant 1 : index
    %c0_30 = arith.constant 0 : index
    %22 = vector.load %arg6[%c0_27, %c1_28, %c1_29, %c0_30] : memref<2x10x10x36xf32, #tpu.memory_space<vmem>>, vector<2x8x8x36xf32>
    %23 = vector.shape_cast %22 : vector<2x8x8x36xf32> to vector<128x36xf32>
    %24 = arith.truncf %23 : vector<128x36xf32> to vector<128x36xbf16>
    %c0_31 = arith.constant 0 : index
    %c144 = arith.constant 144 : index
    %25 = vector.load %arg7[%c0_31, %c144] : memref<128x384xbf16, #tpu.memory_space<vmem>>, vector<128x36xbf16>
    tpu.vector_store %arg7[%c0_31, %c144], %24 {strides = array<i32>} : memref<128x384xbf16, #tpu.memory_space<vmem>>, vector<128x36xbf16>,
    %c0_32 = arith.constant 0 : index
    %c1_33 = arith.constant 1 : index
    %c2_34 = arith.constant 2 : index
    %c0_35 = arith.constant 0 : index
    %26 = vector.load %arg6[%c0_32, %c1_33, %c2_34, %c0_35] : memref<2x10x10x36xf32, #tpu.memory_space<vmem>>, vector<2x8x8x36xf32>
    %27 = vector.shape_cast %26 : vector<2x8x8x36xf32> to vector<128x36xf32>
    %28 = arith.truncf %27 : vector<128x36xf32> to vector<128x36xbf16>
    %c0_36 = arith.constant 0 : index
    %c180 = arith.constant 180 : index
    %29 = vector.load %arg7[%c0_36, %c180] : memref<128x384xbf16, #tpu.memory_space<vmem>>, vector<128x36xbf16>
    tpu.vector_store %arg7[%c0_36, %c180], %28 {strides = array<i32>} : memref<128x384xbf16, #tpu.memory_space<vmem>>, vector<128x36xbf16>,
    %c0_37 = arith.constant 0 : index
    %c2_38 = arith.constant 2 : index
    %c0_39 = arith.constant 0 : index
    %c0_40 = arith.constant 0 : index
    %30 = vector.load %arg6[%c0_37, %c2_38, %c0_39, %c0_40] : memref<2x10x10x36xf32, #tpu.memory_space<vmem>>, vector<2x8x8x36xf32>
    %31 = vector.shape_cast %30 : vector<2x8x8x36xf32> to vector<128x36xf32>
    %32 = arith.truncf %31 : vector<128x36xf32> to vector<128x36xbf16>
    %c0_41 = arith.constant 0 : index
    %c216 = arith.constant 216 : index
    %33 = vector.load %arg7[%c0_41, %c216] : memref<128x384xbf16, #tpu.memory_space<vmem>>, vector<128x36xbf16>
    tpu.vector_store %arg7[%c0_41, %c216], %32 {strides = array<i32>} : memref<128x384xbf16, #tpu.memory_space<vmem>>, vector<128x36xbf16>,
    %c0_42 = arith.constant 0 : index
    %c2_43 = arith.constant 2 : index
    %c1_44 = arith.constant 1 : index
    %c0_45 = arith.constant 0 : index
    %34 = vector.load %arg6[%c0_42, %c2_43, %c1_44, %c0_45] : memref<2x10x10x36xf32, #tpu.memory_space<vmem>>, vector<2x8x8x36xf32>
    %35 = vector.shape_cast %34 : vector<2x8x8x36xf32> to vector<128x36xf32>
    %36 = arith.truncf %35 : vector<128x36xf32> to vector<128x36xbf16>
    %c0_46 = arith.constant 0 : index
    %c252 = arith.constant 252 : index
    %37 = vector.load %arg7[%c0_46, %c252] : memref<128x384xbf16, #tpu.memory_space<vmem>>, vector<128x36xbf16>
    tpu.vector_store %arg7[%c0_46, %c252], %36 {strides = array<i32>} : memref<128x384xbf16, #tpu.memory_space<vmem>>, vector<128x36xbf16>,
    %c0_47 = arith.constant 0 : index
    %c2_48 = arith.constant 2 : index
    %c2_49 = arith.constant 2 : index
    %c0_50 = arith.constant 0 : index
    %38 = vector.load %arg6[%c0_47, %c2_48, %c2_49, %c0_50] : memref<2x10x10x36xf32, #tpu.memory_space<vmem>>, vector<2x8x8x36xf32>
    %39 = vector.shape_cast %38 : vector<2x8x8x36xf32> to vector<128x36xf32>
    %40 = arith.truncf %39 : vector<128x36xf32> to vector<128x36xbf16>
    %c0_51 = arith.constant 0 : index
    %c288 = arith.constant 288 : index
    %41 = vector.load %arg7[%c0_51, %c288] : memref<128x384xbf16, #tpu.memory_space<vmem>>, vector<128x36xbf16>
    tpu.vector_store %arg7[%c0_51, %c288], %40 {strides = array<i32>} : memref<128x384xbf16, #tpu.memory_space<vmem>>, vector<128x36xbf16>,
    %c0_52 = arith.constant 0 : index
    %c0_53 = arith.constant 0 : index
    %42 = vector.load %arg7[%c0_52, %c0_53] : memref<128x384xbf16, #tpu.memory_space<vmem>>, vector<128x384xbf16>
    %c0_54 = arith.constant 0 : index
    %c0_55 = arith.constant 0 : index
    %43 = vector.load %arg3[%c0_54, %c0_55] : memref<384x128xbf16, #tpu.memory_space<vmem>>, vector<384x128xbf16>
    %cst = arith.constant dense<0.000000e+00> : vector<128x128xf32>
    %44 = tpu.matmul %42, %43, %cst {dimension_numbers = #tpu.dot_dimension_numbers<[1], [0], [0], [1], [0, 0, 1, 1], [], []>} : vector<128x384xbf16>, vector<384x128xbf16>, vector<128x128xf32> -> vector<128x128xf32>
    %c0_56 = arith.constant 0 : index
    %c0_57 = arith.constant 0 : index
    %45 = vector.load %arg4[%c0_56, %c0_57] : memref<1x128xf32, #tpu.memory_space<vmem>>, vector<1x128xf32>
    %46 = vector.broadcast %45 : vector<1x128xf32> to vector<128x128xf32>
    %47 = arith.addf %44, %46 : vector<128x128xf32>
    %48 = vector.extract_strided_slice %47 {offsets = [0, 0], sizes = [128, 96], strides = [1, 1]} : vector<128x128xf32> to vector<128x96xf32>
    %49 = arith.negf %48 : vector<128x96xf32>
    %50 = math.exp %49 : vector<128x96xf32>
    %cst_58 = arith.constant 1.000000e+00 : f32
    %51 = vector.broadcast %cst_58 : f32 to vector<128x96xf32>
    %52 = arith.addf %51, %50 : vector<128x96xf32>
    %53 = arith.divf %51, %52 : vector<128x96xf32>
    %54 = vector.extract_strided_slice %53 {offsets = [0, 0], sizes = [128, 32], strides = [1, 1]} : vector<128x96xf32> to vector<128x32xf32>
    %55 = vector.extract_strided_slice %53 {offsets = [0, 32], sizes = [128, 32], strides = [1, 1]} : vector<128x96xf32> to vector<128x32xf32>
    %56 = vector.extract_strided_slice %53 {offsets = [0, 64], sizes = [128, 32], strides = [1, 1]} : vector<128x96xf32> to vector<128x32xf32>
    %57 = vector.extract_strided_slice %47 {offsets = [0, 96], sizes = [128, 32], strides = [1, 1]} : vector<128x128xf32> to vector<128x32xf32>
    %58 = math.tanh %57 : vector<128x32xf32>
    %c0_59 = arith.constant 0 : index
    %c0_60 = arith.constant 0 : index
    %59 = vector.load %arg8[%c0_59, %c0_60] : memref<128x32xf32, #tpu.memory_space<vmem>>, vector<128x32xf32>
    %60 = arith.mulf %55, %59 : vector<128x32xf32>
    %61 = arith.mulf %54, %58 : vector<128x32xf32>
    %62 = arith.addf %60, %61 : vector<128x32xf32>
    %63 = math.tanh %62 : vector<128x32xf32>
    %64 = arith.mulf %56, %63 : vector<128x32xf32>
    %c0_61 = arith.constant 0 : index
    %c0_62 = arith.constant 0 : index
    %65 = vector.load %arg8[%c0_61, %c0_62] : memref<128x32xf32, #tpu.memory_space<vmem>>, vector<128x32xf32>
    tpu.vector_store %arg8[%c0_61, %c0_62], %62 {strides = array<i32>} : memref<128x32xf32, #tpu.memory_space<vmem>>, vector<128x32xf32>,
    %66 = vector.shape_cast %64 : vector<128x32xf32> to vector<2x8x8x32xf32>
    %c0_63 = arith.constant 0 : index
    %c1_64 = arith.constant 1 : index
    %c1_65 = arith.constant 1 : index
    %c4 = arith.constant 4 : index
    %67 = vector.load %arg6[%c0_63, %c1_64, %c1_65, %c4] : memref<2x10x10x36xf32, #tpu.memory_space<vmem>>, vector<2x8x8x32xf32>
    tpu.vector_store %arg6[%c0_63, %c1_64, %c1_65, %c4], %66 {strides = array<i32>} : memref<2x10x10x36xf32, #tpu.memory_space<vmem>>, vector<2x8x8x32xf32>,
    %68 = vector.extract_strided_slice %66 {offsets = [0, 0, 0, 0], sizes = [2, 8, 1, 32], strides = [1, 1, 1, 1]} : vector<2x8x8x32xf32> to vector<2x8x1x32xf32>
    %69 = vector.shape_cast %68 : vector<2x8x1x32xf32> to vector<2x8x32xf32>
    %70 = vector.shape_cast %69 : vector<2x8x32xf32> to vector<16x32xf32>
    %71 = vector.extract_strided_slice %66 {offsets = [0, 0, 1, 0], sizes = [2, 8, 1, 32], strides = [1, 1, 1, 1]} : vector<2x8x8x32xf32> to vector<2x8x1x32xf32>
    %72 = vector.shape_cast %71 : vector<2x8x1x32xf32> to vector<2x8x32xf32>
    %73 = vector.shape_cast %72 : vector<2x8x32xf32> to vector<16x32xf32>
    %74 = vector.extract_strided_slice %66 {offsets = [0, 0, 2, 0], sizes = [2, 8, 1, 32], strides = [1, 1, 1, 1]} : vector<2x8x8x32xf32> to vector<2x8x1x32xf32>
    %75 = vector.shape_cast %74 : vector<2x8x1x32xf32> to vector<2x8x32xf32>
    %76 = vector.shape_cast %75 : vector<2x8x32xf32> to vector<16x32xf32>
    %77 = vector.extract_strided_slice %66 {offsets = [0, 0, 3, 0], sizes = [2, 8, 1, 32], strides = [1, 1, 1, 1]} : vector<2x8x8x32xf32> to vector<2x8x1x32xf32>
    %78 = vector.shape_cast %77 : vector<2x8x1x32xf32> to vector<2x8x32xf32>
    %79 = vector.shape_cast %78 : vector<2x8x32xf32> to vector<16x32xf32>
    %80 = vector.extract_strided_slice %66 {offsets = [0, 0, 4, 0], sizes = [2, 8, 1, 32], strides = [1, 1, 1, 1]} : vector<2x8x8x32xf32> to vector<2x8x1x32xf32>
    %81 = vector.shape_cast %80 : vector<2x8x1x32xf32> to vector<2x8x32xf32>
    %82 = vector.shape_cast %81 : vector<2x8x32xf32> to vector<16x32xf32>
    %83 = vector.extract_strided_slice %66 {offsets = [0, 0, 5, 0], sizes = [2, 8, 1, 32], strides = [1, 1, 1, 1]} : vector<2x8x8x32xf32> to vector<2x8x1x32xf32>
    %84 = vector.shape_cast %83 : vector<2x8x1x32xf32> to vector<2x8x32xf32>
    %85 = vector.shape_cast %84 : vector<2x8x32xf32> to vector<16x32xf32>
    %86 = vector.extract_strided_slice %66 {offsets = [0, 0, 6, 0], sizes = [2, 8, 1, 32], strides = [1, 1, 1, 1]} : vector<2x8x8x32xf32> to vector<2x8x1x32xf32>
    %87 = vector.shape_cast %86 : vector<2x8x1x32xf32> to vector<2x8x32xf32>
    %88 = vector.shape_cast %87 : vector<2x8x32xf32> to vector<16x32xf32>
    %89 = vector.extract_strided_slice %66 {offsets = [0, 0, 7, 0], sizes = [2, 8, 1, 32], strides = [1, 1, 1, 1]} : vector<2x8x8x32xf32> to vector<2x8x1x32xf32>
    %90 = vector.shape_cast %89 : vector<2x8x1x32xf32> to vector<2x8x32xf32>
    %91 = vector.shape_cast %90 : vector<2x8x32xf32> to vector<16x32xf32>
    %92 = tpu.concatenate %70, %73, %76, %79, %82, %85, %88, %91 in 1 : vector<16x32xf32>, vector<16x32xf32>, vector<16x32xf32>, vector<16x32xf32>, vector<16x32xf32>, vector<16x32xf32>, vector<16x32xf32>, vector<16x32xf32> -> vector<16x256xf32>
    %c0_66 = arith.constant 0 : index
    %c0_67 = arith.constant 0 : index
    %93 = vector.load %arg5[%c0_66, %c0_67] : memref<64x256xf32, #tpu.memory_space<vmem>>, vector<16x256xf32>
    tpu.vector_store %arg5[%c0_66, %c0_67], %92 {strides = array<i32>} : memref<64x256xf32, #tpu.memory_space<vmem>>, vector<16x256xf32>,
    %c2_68 = arith.constant 2 : index
    %c0_69 = arith.constant 0 : index
    %c0_70 = arith.constant 0 : index
    %c0_71 = arith.constant 0 : index
    %94 = vector.load %arg2[%c2_68, %c0_69, %c0_70, %c0_71] : memref<8x8x8x4xbf16, #tpu.memory_space<vmem>>, vector<2x8x8x4xbf16>
    %95 = arith.extf %94 : vector<2x8x8x4xbf16> to vector<2x8x8x4xf32>
    %c0_72 = arith.constant 0 : index
    %c1_73 = arith.constant 1 : index
    %c1_74 = arith.constant 1 : index
    %c0_75 = arith.constant 0 : index
    %96 = vector.load %arg6[%c0_72, %c1_73, %c1_74, %c0_75] : memref<2x10x10x36xf32, #tpu.memory_space<vmem>>, vector<2x8x8x4xf32>
    tpu.vector_store %arg6[%c0_72, %c1_73, %c1_74, %c0_75], %95 {strides = array<i32>} : memref<2x10x10x36xf32, #tpu.memory_space<vmem>>, vector<2x8x8x4xf32>,
    %c0_76 = arith.constant 0 : index
    %c0_77 = arith.constant 0 : index
    %c0_78 = arith.constant 0 : index
    %c0_79 = arith.constant 0 : index
    %97 = vector.load %arg6[%c0_76, %c0_77, %c0_78, %c0_79] : memref<2x10x10x36xf32, #tpu.memory_space<vmem>>, vector<2x8x8x36xf32>
    %98 = vector.shape_cast %97 : vector<2x8x8x36xf32> to vector<128x36xf32>
    %99 = arith.truncf %98 : vector<128x36xf32> to vector<128x36xbf16>
    %c0_80 = arith.constant 0 : index
    %c0_81 = arith.constant 0 : index
    %100 = vector.load %arg7[%c0_80, %c0_81] : memref<128x384xbf16, #tpu.memory_space<vmem>>, vector<128x36xbf16>
    tpu.vector_store %arg7[%c0_80, %c0_81], %99 {strides = array<i32>} : memref<128x384xbf16, #tpu.memory_space<vmem>>, vector<128x36xbf16>,
    %c0_82 = arith.constant 0 : index
    %c0_83 = arith.constant 0 : index
    %c1_84 = arith.constant 1 : index
    %c0_85 = arith.constant 0 : index
    %101 = vector.load %arg6[%c0_82, %c0_83, %c1_84, %c0_85] : memref<2x10x10x36xf32, #tpu.memory_space<vmem>>, vector<2x8x8x36xf32>
    %102 = vector.shape_cast %101 : vector<2x8x8x36xf32> to vector<128x36xf32>
    %103 = arith.truncf %102 : vector<128x36xf32> to vector<128x36xbf16>
    %c0_86 = arith.constant 0 : index
    %c36_87 = arith.constant 36 : index
    %104 = vector.load %arg7[%c0_86, %c36_87] : memref<128x384xbf16, #tpu.memory_space<vmem>>, vector<128x36xbf16>
    tpu.vector_store %arg7[%c0_86, %c36_87], %103 {strides = array<i32>} : memref<128x384xbf16, #tpu.memory_space<vmem>>, vector<128x36xbf16>,
    %c0_88 = arith.constant 0 : index
    %c0_89 = arith.constant 0 : index
    %c2_90 = arith.constant 2 : index
    %c0_91 = arith.constant 0 : index
    %105 = vector.load %arg6[%c0_88, %c0_89, %c2_90, %c0_91] : memref<2x10x10x36xf32, #tpu.memory_space<vmem>>, vector<2x8x8x36xf32>
    %106 = vector.shape_cast %105 : vector<2x8x8x36xf32> to vector<128x36xf32>
    %107 = arith.truncf %106 : vector<128x36xf32> to vector<128x36xbf16>
    %c0_92 = arith.constant 0 : index
    %c72_93 = arith.constant 72 : index
    %108 = vector.load %arg7[%c0_92, %c72_93] : memref<128x384xbf16, #tpu.memory_space<vmem>>, vector<128x36xbf16>
    tpu.vector_store %arg7[%c0_92, %c72_93], %107 {strides = array<i32>} : memref<128x384xbf16, #tpu.memory_space<vmem>>, vector<128x36xbf16>,
    %c0_94 = arith.constant 0 : index
    %c1_95 = arith.constant 1 : index
    %c0_96 = arith.constant 0 : index
    %c0_97 = arith.constant 0 : index
    %109 = vector.load %arg6[%c0_94, %c1_95, %c0_96, %c0_97] : memref<2x10x10x36xf32, #tpu.memory_space<vmem>>, vector<2x8x8x36xf32>
    %110 = vector.shape_cast %109 : vector<2x8x8x36xf32> to vector<128x36xf32>
    %111 = arith.truncf %110 : vector<128x36xf32> to vector<128x36xbf16>
    %c0_98 = arith.constant 0 : index
    %c108_99 = arith.constant 108 : index
    %112 = vector.load %arg7[%c0_98, %c108_99] : memref<128x384xbf16, #tpu.memory_space<vmem>>, vector<128x36xbf16>
    tpu.vector_store %arg7[%c0_98, %c108_99], %111 {strides = array<i32>} : memref<128x384xbf16, #tpu.memory_space<vmem>>, vector<128x36xbf16>,
    %c0_100 = arith.constant 0 : index
    %c1_101 = arith.constant 1 : index
    %c1_102 = arith.constant 1 : index
    %c0_103 = arith.constant 0 : index
    %113 = vector.load %arg6[%c0_100, %c1_101, %c1_102, %c0_103] : memref<2x10x10x36xf32, #tpu.memory_space<vmem>>, vector<2x8x8x36xf32>
    %114 = vector.shape_cast %113 : vector<2x8x8x36xf32> to vector<128x36xf32>
    %115 = arith.truncf %114 : vector<128x36xf32> to vector<128x36xbf16>
    %c0_104 = arith.constant 0 : index
    %c144_105 = arith.constant 144 : index
    %116 = vector.load %arg7[%c0_104, %c144_105] : memref<128x384xbf16, #tpu.memory_space<vmem>>, vector<128x36xbf16>
    tpu.vector_store %arg7[%c0_104, %c144_105], %115 {strides = array<i32>} : memref<128x384xbf16, #tpu.memory_space<vmem>>, vector<128x36xbf16>,
    %c0_106 = arith.constant 0 : index
    %c1_107 = arith.constant 1 : index
    %c2_108 = arith.constant 2 : index
    %c0_109 = arith.constant 0 : index
    %117 = vector.load %arg6[%c0_106, %c1_107, %c2_108, %c0_109] : memref<2x10x10x36xf32, #tpu.memory_space<vmem>>, vector<2x8x8x36xf32>
    %118 = vector.shape_cast %117 : vector<2x8x8x36xf32> to vector<128x36xf32>
    %119 = arith.truncf %118 : vector<128x36xf32> to vector<128x36xbf16>
    %c0_110 = arith.constant 0 : index
    %c180_111 = arith.constant 180 : index
    %120 = vector.load %arg7[%c0_110, %c180_111] : memref<128x384xbf16, #tpu.memory_space<vmem>>, vector<128x36xbf16>
    tpu.vector_store %arg7[%c0_110, %c180_111], %119 {strides = array<i32>} : memref<128x384xbf16, #tpu.memory_space<vmem>>, vector<128x36xbf16>,
    %c0_112 = arith.constant 0 : index
    %c2_113 = arith.constant 2 : index
    %c0_114 = arith.constant 0 : index
    %c0_115 = arith.constant 0 : index
    %121 = vector.load %arg6[%c0_112, %c2_113, %c0_114, %c0_115] : memref<2x10x10x36xf32, #tpu.memory_space<vmem>>, vector<2x8x8x36xf32>
    %122 = vector.shape_cast %121 : vector<2x8x8x36xf32> to vector<128x36xf32>
    %123 = arith.truncf %122 : vector<128x36xf32> to vector<128x36xbf16>
    %c0_116 = arith.constant 0 : index
    %c216_117 = arith.constant 216 : index
    %124 = vector.load %arg7[%c0_116, %c216_117] : memref<128x384xbf16, #tpu.memory_space<vmem>>, vector<128x36xbf16>
    tpu.vector_store %arg7[%c0_116, %c216_117], %123 {strides = array<i32>} : memref<128x384xbf16, #tpu.memory_space<vmem>>, vector<128x36xbf16>,
    %c0_118 = arith.constant 0 : index
    %c2_119 = arith.constant 2 : index
    %c1_120 = arith.constant 1 : index
    %c0_121 = arith.constant 0 : index
    %125 = vector.load %arg6[%c0_118, %c2_119, %c1_120, %c0_121] : memref<2x10x10x36xf32, #tpu.memory_space<vmem>>, vector<2x8x8x36xf32>
    %126 = vector.shape_cast %125 : vector<2x8x8x36xf32> to vector<128x36xf32>
    %127 = arith.truncf %126 : vector<128x36xf32> to vector<128x36xbf16>
    %c0_122 = arith.constant 0 : index
    %c252_123 = arith.constant 252 : index
    %128 = vector.load %arg7[%c0_122, %c252_123] : memref<128x384xbf16, #tpu.memory_space<vmem>>, vector<128x36xbf16>
    tpu.vector_store %arg7[%c0_122, %c252_123], %127 {strides = array<i32>} : memref<128x384xbf16, #tpu.memory_space<vmem>>, vector<128x36xbf16>,
    %c0_124 = arith.constant 0 : index
    %c2_125 = arith.constant 2 : index
    %c2_126 = arith.constant 2 : index
    %c0_127 = arith.constant 0 : index
    %129 = vector.load %arg6[%c0_124, %c2_125, %c2_126, %c0_127] : memref<2x10x10x36xf32, #tpu.memory_space<vmem>>, vector<2x8x8x36xf32>
    %130 = vector.shape_cast %129 : vector<2x8x8x36xf32> to vector<128x36xf32>
    %131 = arith.truncf %130 : vector<128x36xf32> to vector<128x36xbf16>
    %c0_128 = arith.constant 0 : index
    %c288_129 = arith.constant 288 : index
    %132 = vector.load %arg7[%c0_128, %c288_129] : memref<128x384xbf16, #tpu.memory_space<vmem>>, vector<128x36xbf16>
    tpu.vector_store %arg7[%c0_128, %c288_129], %131 {strides = array<i32>} : memref<128x384xbf16, #tpu.memory_space<vmem>>, vector<128x36xbf16>,
    %c0_130 = arith.constant 0 : index
    %c0_131 = arith.constant 0 : index
    %133 = vector.load %arg7[%c0_130, %c0_131] : memref<128x384xbf16, #tpu.memory_space<vmem>>, vector<128x384xbf16>
    %c0_132 = arith.constant 0 : index
    %c0_133 = arith.constant 0 : index
    %134 = vector.load %arg3[%c0_132, %c0_133] : memref<384x128xbf16, #tpu.memory_space<vmem>>, vector<384x128xbf16>
    %cst_134 = arith.constant dense<0.000000e+00> : vector<128x128xf32>
    %135 = tpu.matmul %133, %134, %cst_134 {dimension_numbers = #tpu.dot_dimension_numbers<[1], [0], [0], [1], [0, 0, 1, 1], [], []>} : vector<128x384xbf16>, vector<384x128xbf16>, vector<128x128xf32> -> vector<128x128xf32>
    %c0_135 = arith.constant 0 : index
    %c0_136 = arith.constant 0 : index
    %136 = vector.load %arg4[%c0_135, %c0_136] : memref<1x128xf32, #tpu.memory_space<vmem>>, vector<1x128xf32>
    %137 = vector.broadcast %136 : vector<1x128xf32> to vector<128x128xf32>
    %138 = arith.addf %135, %137 : vector<128x128xf32>
    %139 = vector.extract_strided_slice %138 {offsets = [0, 0], sizes = [128, 96], strides = [1, 1]} : vector<128x128xf32> to vector<128x96xf32>
    %140 = arith.negf %139 : vector<128x96xf32>
    %141 = math.exp %140 : vector<128x96xf32>
    %cst_137 = arith.constant 1.000000e+00 : f32
    %142 = vector.broadcast %cst_137 : f32 to vector<128x96xf32>
    %143 = arith.addf %142, %141 : vector<128x96xf32>
    %144 = arith.divf %142, %143 : vector<128x96xf32>
    %145 = vector.extract_strided_slice %144 {offsets = [0, 0], sizes = [128, 32], strides = [1, 1]} : vector<128x96xf32> to vector<128x32xf32>
    %146 = vector.extract_strided_slice %144 {offsets = [0, 32], sizes = [128, 32], strides = [1, 1]} : vector<128x96xf32> to vector<128x32xf32>
    %147 = vector.extract_strided_slice %144 {offsets = [0, 64], sizes = [128, 32], strides = [1, 1]} : vector<128x96xf32> to vector<128x32xf32>
    %148 = vector.extract_strided_slice %138 {offsets = [0, 96], sizes = [128, 32], strides = [1, 1]} : vector<128x128xf32> to vector<128x32xf32>
    %149 = math.tanh %148 : vector<128x32xf32>
    %c0_138 = arith.constant 0 : index
    %c0_139 = arith.constant 0 : index
    %150 = vector.load %arg8[%c0_138, %c0_139] : memref<128x32xf32, #tpu.memory_space<vmem>>, vector<128x32xf32>
    %151 = arith.mulf %146, %150 : vector<128x32xf32>
    %152 = arith.mulf %145, %149 : vector<128x32xf32>
    %153 = arith.addf %151, %152 : vector<128x32xf32>
    %154 = math.tanh %153 : vector<128x32xf32>
    %155 = arith.mulf %147, %154 : vector<128x32xf32>
    %c0_140 = arith.constant 0 : index
    %c0_141 = arith.constant 0 : index
    %156 = vector.load %arg8[%c0_140, %c0_141] : memref<128x32xf32, #tpu.memory_space<vmem>>, vector<128x32xf32>
    tpu.vector_store %arg8[%c0_140, %c0_141], %153 {strides = array<i32>} : memref<128x32xf32, #tpu.memory_space<vmem>>, vector<128x32xf32>,
    %157 = vector.shape_cast %155 : vector<128x32xf32> to vector<2x8x8x32xf32>
    %c0_142 = arith.constant 0 : index
    %c1_143 = arith.constant 1 : index
    %c1_144 = arith.constant 1 : index
    %c4_145 = arith.constant 4 : index
    %158 = vector.load %arg6[%c0_142, %c1_143, %c1_144, %c4_145] : memref<2x10x10x36xf32, #tpu.memory_space<vmem>>, vector<2x8x8x32xf32>
    tpu.vector_store %arg6[%c0_142, %c1_143, %c1_144, %c4_145], %157 {strides = array<i32>} : memref<2x10x10x36xf32, #tpu.memory_space<vmem>>, vector<2x8x8x32xf32>,
    %159 = vector.extract_strided_slice %157 {offsets = [0, 0, 0, 0], sizes = [2, 8, 1, 32], strides = [1, 1, 1, 1]} : vector<2x8x8x32xf32> to vector<2x8x1x32xf32>
    %160 = vector.shape_cast %159 : vector<2x8x1x32xf32> to vector<2x8x32xf32>
    %161 = vector.shape_cast %160 : vector<2x8x32xf32> to vector<16x32xf32>
    %162 = vector.extract_strided_slice %157 {offsets = [0, 0, 1, 0], sizes = [2, 8, 1, 32], strides = [1, 1, 1, 1]} : vector<2x8x8x32xf32> to vector<2x8x1x32xf32>
    %163 = vector.shape_cast %162 : vector<2x8x1x32xf32> to vector<2x8x32xf32>
    %164 = vector.shape_cast %163 : vector<2x8x32xf32> to vector<16x32xf32>
    %165 = vector.extract_strided_slice %157 {offsets = [0, 0, 2, 0], sizes = [2, 8, 1, 32], strides = [1, 1, 1, 1]} : vector<2x8x8x32xf32> to vector<2x8x1x32xf32>
    %166 = vector.shape_cast %165 : vector<2x8x1x32xf32> to vector<2x8x32xf32>
    %167 = vector.shape_cast %166 : vector<2x8x32xf32> to vector<16x32xf32>
    %168 = vector.extract_strided_slice %157 {offsets = [0, 0, 3, 0], sizes = [2, 8, 1, 32], strides = [1, 1, 1, 1]} : vector<2x8x8x32xf32> to vector<2x8x1x32xf32>
    %169 = vector.shape_cast %168 : vector<2x8x1x32xf32> to vector<2x8x32xf32>
    %170 = vector.shape_cast %169 : vector<2x8x32xf32> to vector<16x32xf32>
    %171 = vector.extract_strided_slice %157 {offsets = [0, 0, 4, 0], sizes = [2, 8, 1, 32], strides = [1, 1, 1, 1]} : vector<2x8x8x32xf32> to vector<2x8x1x32xf32>
    %172 = vector.shape_cast %171 : vector<2x8x1x32xf32> to vector<2x8x32xf32>
    %173 = vector.shape_cast %172 : vector<2x8x32xf32> to vector<16x32xf32>
    %174 = vector.extract_strided_slice %157 {offsets = [0, 0, 5, 0], sizes = [2, 8, 1, 32], strides = [1, 1, 1, 1]} : vector<2x8x8x32xf32> to vector<2x8x1x32xf32>
    %175 = vector.shape_cast %174 : vector<2x8x1x32xf32> to vector<2x8x32xf32>
    %176 = vector.shape_cast %175 : vector<2x8x32xf32> to vector<16x32xf32>
    %177 = vector.extract_strided_slice %157 {offsets = [0, 0, 6, 0], sizes = [2, 8, 1, 32], strides = [1, 1, 1, 1]} : vector<2x8x8x32xf32> to vector<2x8x1x32xf32>
    %178 = vector.shape_cast %177 : vector<2x8x1x32xf32> to vector<2x8x32xf32>
    %179 = vector.shape_cast %178 : vector<2x8x32xf32> to vector<16x32xf32>
    %180 = vector.extract_strided_slice %157 {offsets = [0, 0, 7, 0], sizes = [2, 8, 1, 32], strides = [1, 1, 1, 1]} : vector<2x8x8x32xf32> to vector<2x8x1x32xf32>
    %181 = vector.shape_cast %180 : vector<2x8x1x32xf32> to vector<2x8x32xf32>
    %182 = vector.shape_cast %181 : vector<2x8x32xf32> to vector<16x32xf32>
    %183 = tpu.concatenate %161, %164, %167, %170, %173, %176, %179, %182 in 1 : vector<16x32xf32>, vector<16x32xf32>, vector<16x32xf32>, vector<16x32xf32>, vector<16x32xf32>, vector<16x32xf32>, vector<16x32xf32>, vector<16x32xf32> -> vector<16x256xf32>
    %c16 = arith.constant 16 : index
    %c0_146 = arith.constant 0 : index
    %184 = vector.load %arg5[%c16, %c0_146] : memref<64x256xf32, #tpu.memory_space<vmem>>, vector<16x256xf32>
    tpu.vector_store %arg5[%c16, %c0_146], %183 {strides = array<i32>} : memref<64x256xf32, #tpu.memory_space<vmem>>, vector<16x256xf32>,
    %c4_147 = arith.constant 4 : index
    %c0_148 = arith.constant 0 : index
    %c0_149 = arith.constant 0 : index
    %c0_150 = arith.constant 0 : index
    %185 = vector.load %arg2[%c4_147, %c0_148, %c0_149, %c0_150] : memref<8x8x8x4xbf16, #tpu.memory_space<vmem>>, vector<2x8x8x4xbf16>
    %186 = arith.extf %185 : vector<2x8x8x4xbf16> to vector<2x8x8x4xf32>
    %c0_151 = arith.constant 0 : index
    %c1_152 = arith.constant 1 : index
    %c1_153 = arith.constant 1 : index
    %c0_154 = arith.constant 0 : index
    %187 = vector.load %arg6[%c0_151, %c1_152, %c1_153, %c0_154] : memref<2x10x10x36xf32, #tpu.memory_space<vmem>>, vector<2x8x8x4xf32>
    tpu.vector_store %arg6[%c0_151, %c1_152, %c1_153, %c0_154], %186 {strides = array<i32>} : memref<2x10x10x36xf32, #tpu.memory_space<vmem>>, vector<2x8x8x4xf32>,
    %c0_155 = arith.constant 0 : index
    %c0_156 = arith.constant 0 : index
    %c0_157 = arith.constant 0 : index
    %c0_158 = arith.constant 0 : index
    %188 = vector.load %arg6[%c0_155, %c0_156, %c0_157, %c0_158] : memref<2x10x10x36xf32, #tpu.memory_space<vmem>>, vector<2x8x8x36xf32>
    %189 = vector.shape_cast %188 : vector<2x8x8x36xf32> to vector<128x36xf32>
    %190 = arith.truncf %189 : vector<128x36xf32> to vector<128x36xbf16>
    %c0_159 = arith.constant 0 : index
    %c0_160 = arith.constant 0 : index
    %191 = vector.load %arg7[%c0_159, %c0_160] : memref<128x384xbf16, #tpu.memory_space<vmem>>, vector<128x36xbf16>
    tpu.vector_store %arg7[%c0_159, %c0_160], %190 {strides = array<i32>} : memref<128x384xbf16, #tpu.memory_space<vmem>>, vector<128x36xbf16>,
    %c0_161 = arith.constant 0 : index
    %c0_162 = arith.constant 0 : index
    %c1_163 = arith.constant 1 : index
    %c0_164 = arith.constant 0 : index
    %192 = vector.load %arg6[%c0_161, %c0_162, %c1_163, %c0_164] : memref<2x10x10x36xf32, #tpu.memory_space<vmem>>, vector<2x8x8x36xf32>
    %193 = vector.shape_cast %192 : vector<2x8x8x36xf32> to vector<128x36xf32>
    %194 = arith.truncf %193 : vector<128x36xf32> to vector<128x36xbf16>
    %c0_165 = arith.constant 0 : index
    %c36_166 = arith.constant 36 : index
    %195 = vector.load %arg7[%c0_165, %c36_166] : memref<128x384xbf16, #tpu.memory_space<vmem>>, vector<128x36xbf16>
    tpu.vector_store %arg7[%c0_165, %c36_166], %194 {strides = array<i32>} : memref<128x384xbf16, #tpu.memory_space<vmem>>, vector<128x36xbf16>,
    %c0_167 = arith.constant 0 : index
    %c0_168 = arith.constant 0 : index
    %c2_169 = arith.constant 2 : index
    %c0_170 = arith.constant 0 : index
    %196 = vector.load %arg6[%c0_167, %c0_168, %c2_169, %c0_170] : memref<2x10x10x36xf32, #tpu.memory_space<vmem>>, vector<2x8x8x36xf32>
    %197 = vector.shape_cast %196 : vector<2x8x8x36xf32> to vector<128x36xf32>
    %198 = arith.truncf %197 : vector<128x36xf32> to vector<128x36xbf16>
    %c0_171 = arith.constant 0 : index
    %c72_172 = arith.constant 72 : index
    %199 = vector.load %arg7[%c0_171, %c72_172] : memref<128x384xbf16, #tpu.memory_space<vmem>>, vector<128x36xbf16>
    tpu.vector_store %arg7[%c0_171, %c72_172], %198 {strides = array<i32>} : memref<128x384xbf16, #tpu.memory_space<vmem>>, vector<128x36xbf16>,
    %c0_173 = arith.constant 0 : index
    %c1_174 = arith.constant 1 : index
    %c0_175 = arith.constant 0 : index
    %c0_176 = arith.constant 0 : index
    %200 = vector.load %arg6[%c0_173, %c1_174, %c0_175, %c0_176] : memref<2x10x10x36xf32, #tpu.memory_space<vmem>>, vector<2x8x8x36xf32>
    %201 = vector.shape_cast %200 : vector<2x8x8x36xf32> to vector<128x36xf32>
    %202 = arith.truncf %201 : vector<128x36xf32> to vector<128x36xbf16>
    %c0_177 = arith.constant 0 : index
    %c108_178 = arith.constant 108 : index
    %203 = vector.load %arg7[%c0_177, %c108_178] : memref<128x384xbf16, #tpu.memory_space<vmem>>, vector<128x36xbf16>
    tpu.vector_store %arg7[%c0_177, %c108_178], %202 {strides = array<i32>} : memref<128x384xbf16, #tpu.memory_space<vmem>>, vector<128x36xbf16>,
    %c0_179 = arith.constant 0 : index
    %c1_180 = arith.constant 1 : index
    %c1_181 = arith.constant 1 : index
    %c0_182 = arith.constant 0 : index
    %204 = vector.load %arg6[%c0_179, %c1_180, %c1_181, %c0_182] : memref<2x10x10x36xf32, #tpu.memory_space<vmem>>, vector<2x8x8x36xf32>
    %205 = vector.shape_cast %204 : vector<2x8x8x36xf32> to vector<128x36xf32>
    %206 = arith.truncf %205 : vector<128x36xf32> to vector<128x36xbf16>
    %c0_183 = arith.constant 0 : index
    %c144_184 = arith.constant 144 : index
    %207 = vector.load %arg7[%c0_183, %c144_184] : memref<128x384xbf16, #tpu.memory_space<vmem>>, vector<128x36xbf16>
    tpu.vector_store %arg7[%c0_183, %c144_184], %206 {strides = array<i32>} : memref<128x384xbf16, #tpu.memory_space<vmem>>, vector<128x36xbf16>,
    %c0_185 = arith.constant 0 : index
    %c1_186 = arith.constant 1 : index
    %c2_187 = arith.constant 2 : index
    %c0_188 = arith.constant 0 : index
    %208 = vector.load %arg6[%c0_185, %c1_186, %c2_187, %c0_188] : memref<2x10x10x36xf32, #tpu.memory_space<vmem>>, vector<2x8x8x36xf32>
    %209 = vector.shape_cast %208 : vector<2x8x8x36xf32> to vector<128x36xf32>
    %210 = arith.truncf %209 : vector<128x36xf32> to vector<128x36xbf16>
    %c0_189 = arith.constant 0 : index
    %c180_190 = arith.constant 180 : index
    %211 = vector.load %arg7[%c0_189, %c180_190] : memref<128x384xbf16, #tpu.memory_space<vmem>>, vector<128x36xbf16>
    tpu.vector_store %arg7[%c0_189, %c180_190], %210 {strides = array<i32>} : memref<128x384xbf16, #tpu.memory_space<vmem>>, vector<128x36xbf16>,
    %c0_191 = arith.constant 0 : index
    %c2_192 = arith.constant 2 : index
    %c0_193 = arith.constant 0 : index
    %c0_194 = arith.constant 0 : index
    %212 = vector.load %arg6[%c0_191, %c2_192, %c0_193, %c0_194] : memref<2x10x10x36xf32, #tpu.memory_space<vmem>>, vector<2x8x8x36xf32>
    %213 = vector.shape_cast %212 : vector<2x8x8x36xf32> to vector<128x36xf32>
    %214 = arith.truncf %213 : vector<128x36xf32> to vector<128x36xbf16>
    %c0_195 = arith.constant 0 : index
    %c216_196 = arith.constant 216 : index
    %215 = vector.load %arg7[%c0_195, %c216_196] : memref<128x384xbf16, #tpu.memory_space<vmem>>, vector<128x36xbf16>
    tpu.vector_store %arg7[%c0_195, %c216_196], %214 {strides = array<i32>} : memref<128x384xbf16, #tpu.memory_space<vmem>>, vector<128x36xbf16>,
    %c0_197 = arith.constant 0 : index
    %c2_198 = arith.constant 2 : index
    %c1_199 = arith.constant 1 : index
    %c0_200 = arith.constant 0 : index
    %216 = vector.load %arg6[%c0_197, %c2_198, %c1_199, %c0_200] : memref<2x10x10x36xf32, #tpu.memory_space<vmem>>, vector<2x8x8x36xf32>
    %217 = vector.shape_cast %216 : vector<2x8x8x36xf32> to vector<128x36xf32>
    %218 = arith.truncf %217 : vector<128x36xf32> to vector<128x36xbf16>
    %c0_201 = arith.constant 0 : index
    %c252_202 = arith.constant 252 : index
    %219 = vector.load %arg7[%c0_201, %c252_202] : memref<128x384xbf16, #tpu.memory_space<vmem>>, vector<128x36xbf16>
    tpu.vector_store %arg7[%c0_201, %c252_202], %218 {strides = array<i32>} : memref<128x384xbf16, #tpu.memory_space<vmem>>, vector<128x36xbf16>,
    %c0_203 = arith.constant 0 : index
    %c2_204 = arith.constant 2 : index
    %c2_205 = arith.constant 2 : index
    %c0_206 = arith.constant 0 : index
    %220 = vector.load %arg6[%c0_203, %c2_204, %c2_205, %c0_206] : memref<2x10x10x36xf32, #tpu.memory_space<vmem>>, vector<2x8x8x36xf32>
    %221 = vector.shape_cast %220 : vector<2x8x8x36xf32> to vector<128x36xf32>
    %222 = arith.truncf %221 : vector<128x36xf32> to vector<128x36xbf16>
    %c0_207 = arith.constant 0 : index
    %c288_208 = arith.constant 288 : index
    %223 = vector.load %arg7[%c0_207, %c288_208] : memref<128x384xbf16, #tpu.memory_space<vmem>>, vector<128x36xbf16>
    tpu.vector_store %arg7[%c0_207, %c288_208], %222 {strides = array<i32>} : memref<128x384xbf16, #tpu.memory_space<vmem>>, vector<128x36xbf16>,
    %c0_209 = arith.constant 0 : index
    %c0_210 = arith.constant 0 : index
    %224 = vector.load %arg7[%c0_209, %c0_210] : memref<128x384xbf16, #tpu.memory_space<vmem>>, vector<128x384xbf16>
    %c0_211 = arith.constant 0 : index
    %c0_212 = arith.constant 0 : index
    %225 = vector.load %arg3[%c0_211, %c0_212] : memref<384x128xbf16, #tpu.memory_space<vmem>>, vector<384x128xbf16>
    %cst_213 = arith.constant dense<0.000000e+00> : vector<128x128xf32>
    %226 = tpu.matmul %224, %225, %cst_213 {dimension_numbers = #tpu.dot_dimension_numbers<[1], [0], [0], [1], [0, 0, 1, 1], [], []>} : vector<128x384xbf16>, vector<384x128xbf16>, vector<128x128xf32> -> vector<128x128xf32>
    %c0_214 = arith.constant 0 : index
    %c0_215 = arith.constant 0 : index
    %227 = vector.load %arg4[%c0_214, %c0_215] : memref<1x128xf32, #tpu.memory_space<vmem>>, vector<1x128xf32>
    %228 = vector.broadcast %227 : vector<1x128xf32> to vector<128x128xf32>
    %229 = arith.addf %226, %228 : vector<128x128xf32>
    %230 = vector.extract_strided_slice %229 {offsets = [0, 0], sizes = [128, 96], strides = [1, 1]} : vector<128x128xf32> to vector<128x96xf32>
    %231 = arith.negf %230 : vector<128x96xf32>
    %232 = math.exp %231 : vector<128x96xf32>
    %cst_216 = arith.constant 1.000000e+00 : f32
    %233 = vector.broadcast %cst_216 : f32 to vector<128x96xf32>
    %234 = arith.addf %233, %232 : vector<128x96xf32>
    %235 = arith.divf %233, %234 : vector<128x96xf32>
    %236 = vector.extract_strided_slice %235 {offsets = [0, 0], sizes = [128, 32], strides = [1, 1]} : vector<128x96xf32> to vector<128x32xf32>
    %237 = vector.extract_strided_slice %235 {offsets = [0, 32], sizes = [128, 32], strides = [1, 1]} : vector<128x96xf32> to vector<128x32xf32>
    %238 = vector.extract_strided_slice %235 {offsets = [0, 64], sizes = [128, 32], strides = [1, 1]} : vector<128x96xf32> to vector<128x32xf32>
    %239 = vector.extract_strided_slice %229 {offsets = [0, 96], sizes = [128, 32], strides = [1, 1]} : vector<128x128xf32> to vector<128x32xf32>
    %240 = math.tanh %239 : vector<128x32xf32>
    %c0_217 = arith.constant 0 : index
    %c0_218 = arith.constant 0 : index
    %241 = vector.load %arg8[%c0_217, %c0_218] : memref<128x32xf32, #tpu.memory_space<vmem>>, vector<128x32xf32>
    %242 = arith.mulf %237, %241 : vector<128x32xf32>
    %243 = arith.mulf %236, %240 : vector<128x32xf32>
    %244 = arith.addf %242, %243 : vector<128x32xf32>
    %245 = math.tanh %244 : vector<128x32xf32>
    %246 = arith.mulf %238, %245 : vector<128x32xf32>
    %c0_219 = arith.constant 0 : index
    %c0_220 = arith.constant 0 : index
    %247 = vector.load %arg8[%c0_219, %c0_220] : memref<128x32xf32, #tpu.memory_space<vmem>>, vector<128x32xf32>
    tpu.vector_store %arg8[%c0_219, %c0_220], %244 {strides = array<i32>} : memref<128x32xf32, #tpu.memory_space<vmem>>, vector<128x32xf32>,
    %248 = vector.shape_cast %246 : vector<128x32xf32> to vector<2x8x8x32xf32>
    %c0_221 = arith.constant 0 : index
    %c1_222 = arith.constant 1 : index
    %c1_223 = arith.constant 1 : index
    %c4_224 = arith.constant 4 : index
    %249 = vector.load %arg6[%c0_221, %c1_222, %c1_223, %c4_224] : memref<2x10x10x36xf32, #tpu.memory_space<vmem>>, vector<2x8x8x32xf32>
    tpu.vector_store %arg6[%c0_221, %c1_222, %c1_223, %c4_224], %248 {strides = array<i32>} : memref<2x10x10x36xf32, #tpu.memory_space<vmem>>, vector<2x8x8x32xf32>,
    %250 = vector.extract_strided_slice %248 {offsets = [0, 0, 0, 0], sizes = [2, 8, 1, 32], strides = [1, 1, 1, 1]} : vector<2x8x8x32xf32> to vector<2x8x1x32xf32>
    %251 = vector.shape_cast %250 : vector<2x8x1x32xf32> to vector<2x8x32xf32>
    %252 = vector.shape_cast %251 : vector<2x8x32xf32> to vector<16x32xf32>
    %253 = vector.extract_strided_slice %248 {offsets = [0, 0, 1, 0], sizes = [2, 8, 1, 32], strides = [1, 1, 1, 1]} : vector<2x8x8x32xf32> to vector<2x8x1x32xf32>
    %254 = vector.shape_cast %253 : vector<2x8x1x32xf32> to vector<2x8x32xf32>
    %255 = vector.shape_cast %254 : vector<2x8x32xf32> to vector<16x32xf32>
    %256 = vector.extract_strided_slice %248 {offsets = [0, 0, 2, 0], sizes = [2, 8, 1, 32], strides = [1, 1, 1, 1]} : vector<2x8x8x32xf32> to vector<2x8x1x32xf32>
    %257 = vector.shape_cast %256 : vector<2x8x1x32xf32> to vector<2x8x32xf32>
    %258 = vector.shape_cast %257 : vector<2x8x32xf32> to vector<16x32xf32>
    %259 = vector.extract_strided_slice %248 {offsets = [0, 0, 3, 0], sizes = [2, 8, 1, 32], strides = [1, 1, 1, 1]} : vector<2x8x8x32xf32> to vector<2x8x1x32xf32>
    %260 = vector.shape_cast %259 : vector<2x8x1x32xf32> to vector<2x8x32xf32>
    %261 = vector.shape_cast %260 : vector<2x8x32xf32> to vector<16x32xf32>
    %262 = vector.extract_strided_slice %248 {offsets = [0, 0, 4, 0], sizes = [2, 8, 1, 32], strides = [1, 1, 1, 1]} : vector<2x8x8x32xf32> to vector<2x8x1x32xf32>
    %263 = vector.shape_cast %262 : vector<2x8x1x32xf32> to vector<2x8x32xf32>
    %264 = vector.shape_cast %263 : vector<2x8x32xf32> to vector<16x32xf32>
    %265 = vector.extract_strided_slice %248 {offsets = [0, 0, 5, 0], sizes = [2, 8, 1, 32], strides = [1, 1, 1, 1]} : vector<2x8x8x32xf32> to vector<2x8x1x32xf32>
    %266 = vector.shape_cast %265 : vector<2x8x1x32xf32> to vector<2x8x32xf32>
    %267 = vector.shape_cast %266 : vector<2x8x32xf32> to vector<16x32xf32>
    %268 = vector.extract_strided_slice %248 {offsets = [0, 0, 6, 0], sizes = [2, 8, 1, 32], strides = [1, 1, 1, 1]} : vector<2x8x8x32xf32> to vector<2x8x1x32xf32>
    %269 = vector.shape_cast %268 : vector<2x8x1x32xf32> to vector<2x8x32xf32>
    %270 = vector.shape_cast %269 : vector<2x8x32xf32> to vector<16x32xf32>
    %271 = vector.extract_strided_slice %248 {offsets = [0, 0, 7, 0], sizes = [2, 8, 1, 32], strides = [1, 1, 1, 1]} : vector<2x8x8x32xf32> to vector<2x8x1x32xf32>
    %272 = vector.shape_cast %271 : vector<2x8x1x32xf32> to vector<2x8x32xf32>
    %273 = vector.shape_cast %272 : vector<2x8x32xf32> to vector<16x32xf32>
    %274 = tpu.concatenate %252, %255, %258, %261, %264, %267, %270, %273 in 1 : vector<16x32xf32>, vector<16x32xf32>, vector<16x32xf32>, vector<16x32xf32>, vector<16x32xf32>, vector<16x32xf32>, vector<16x32xf32>, vector<16x32xf32> -> vector<16x256xf32>
    %c32 = arith.constant 32 : index
    %c0_225 = arith.constant 0 : index
    %275 = vector.load %arg5[%c32, %c0_225] : memref<64x256xf32, #tpu.memory_space<vmem>>, vector<16x256xf32>
    tpu.vector_store %arg5[%c32, %c0_225], %274 {strides = array<i32>} : memref<64x256xf32, #tpu.memory_space<vmem>>, vector<16x256xf32>,
    %c6 = arith.constant 6 : index
    %c0_226 = arith.constant 0 : index
    %c0_227 = arith.constant 0 : index
    %c0_228 = arith.constant 0 : index
    %276 = vector.load %arg2[%c6, %c0_226, %c0_227, %c0_228] : memref<8x8x8x4xbf16, #tpu.memory_space<vmem>>, vector<2x8x8x4xbf16>
    %277 = arith.extf %276 : vector<2x8x8x4xbf16> to vector<2x8x8x4xf32>
    %c0_229 = arith.constant 0 : index
    %c1_230 = arith.constant 1 : index
    %c1_231 = arith.constant 1 : index
    %c0_232 = arith.constant 0 : index
    %278 = vector.load %arg6[%c0_229, %c1_230, %c1_231, %c0_232] : memref<2x10x10x36xf32, #tpu.memory_space<vmem>>, vector<2x8x8x4xf32>
    tpu.vector_store %arg6[%c0_229, %c1_230, %c1_231, %c0_232], %277 {strides = array<i32>} : memref<2x10x10x36xf32, #tpu.memory_space<vmem>>, vector<2x8x8x4xf32>,
    %c0_233 = arith.constant 0 : index
    %c0_234 = arith.constant 0 : index
    %c0_235 = arith.constant 0 : index
    %c0_236 = arith.constant 0 : index
    %279 = vector.load %arg6[%c0_233, %c0_234, %c0_235, %c0_236] : memref<2x10x10x36xf32, #tpu.memory_space<vmem>>, vector<2x8x8x36xf32>
    %280 = vector.shape_cast %279 : vector<2x8x8x36xf32> to vector<128x36xf32>
    %281 = arith.truncf %280 : vector<128x36xf32> to vector<128x36xbf16>
    %c0_237 = arith.constant 0 : index
    %c0_238 = arith.constant 0 : index
    %282 = vector.load %arg7[%c0_237, %c0_238] : memref<128x384xbf16, #tpu.memory_space<vmem>>, vector<128x36xbf16>
    tpu.vector_store %arg7[%c0_237, %c0_238], %281 {strides = array<i32>} : memref<128x384xbf16, #tpu.memory_space<vmem>>, vector<128x36xbf16>,
    %c0_239 = arith.constant 0 : index
    %c0_240 = arith.constant 0 : index
    %c1_241 = arith.constant 1 : index
    %c0_242 = arith.constant 0 : index
    %283 = vector.load %arg6[%c0_239, %c0_240, %c1_241, %c0_242] : memref<2x10x10x36xf32, #tpu.memory_space<vmem>>, vector<2x8x8x36xf32>
    %284 = vector.shape_cast %283 : vector<2x8x8x36xf32> to vector<128x36xf32>
    %285 = arith.truncf %284 : vector<128x36xf32> to vector<128x36xbf16>
    %c0_243 = arith.constant 0 : index
    %c36_244 = arith.constant 36 : index
    %286 = vector.load %arg7[%c0_243, %c36_244] : memref<128x384xbf16, #tpu.memory_space<vmem>>, vector<128x36xbf16>
    tpu.vector_store %arg7[%c0_243, %c36_244], %285 {strides = array<i32>} : memref<128x384xbf16, #tpu.memory_space<vmem>>, vector<128x36xbf16>,
    %c0_245 = arith.constant 0 : index
    %c0_246 = arith.constant 0 : index
    %c2_247 = arith.constant 2 : index
    %c0_248 = arith.constant 0 : index
    %287 = vector.load %arg6[%c0_245, %c0_246, %c2_247, %c0_248] : memref<2x10x10x36xf32, #tpu.memory_space<vmem>>, vector<2x8x8x36xf32>
    %288 = vector.shape_cast %287 : vector<2x8x8x36xf32> to vector<128x36xf32>
    %289 = arith.truncf %288 : vector<128x36xf32> to vector<128x36xbf16>
    %c0_249 = arith.constant 0 : index
    %c72_250 = arith.constant 72 : index
    %290 = vector.load %arg7[%c0_249, %c72_250] : memref<128x384xbf16, #tpu.memory_space<vmem>>, vector<128x36xbf16>
    tpu.vector_store %arg7[%c0_249, %c72_250], %289 {strides = array<i32>} : memref<128x384xbf16, #tpu.memory_space<vmem>>, vector<128x36xbf16>,
    %c0_251 = arith.constant 0 : index
    %c1_252 = arith.constant 1 : index
    %c0_253 = arith.constant 0 : index
    %c0_254 = arith.constant 0 : index
    %291 = vector.load %arg6[%c0_251, %c1_252, %c0_253, %c0_254] : memref<2x10x10x36xf32, #tpu.memory_space<vmem>>, vector<2x8x8x36xf32>
    %292 = vector.shape_cast %291 : vector<2x8x8x36xf32> to vector<128x36xf32>
    %293 = arith.truncf %292 : vector<128x36xf32> to vector<128x36xbf16>
    %c0_255 = arith.constant 0 : index
    %c108_256 = arith.constant 108 : index
    %294 = vector.load %arg7[%c0_255, %c108_256] : memref<128x384xbf16, #tpu.memory_space<vmem>>, vector<128x36xbf16>
    tpu.vector_store %arg7[%c0_255, %c108_256], %293 {strides = array<i32>} : memref<128x384xbf16, #tpu.memory_space<vmem>>, vector<128x36xbf16>,
    %c0_257 = arith.constant 0 : index
    %c1_258 = arith.constant 1 : index
    %c1_259 = arith.constant 1 : index
    %c0_260 = arith.constant 0 : index
    %295 = vector.load %arg6[%c0_257, %c1_258, %c1_259, %c0_260] : memref<2x10x10x36xf32, #tpu.memory_space<vmem>>, vector<2x8x8x36xf32>
    %296 = vector.shape_cast %295 : vector<2x8x8x36xf32> to vector<128x36xf32>
    %297 = arith.truncf %296 : vector<128x36xf32> to vector<128x36xbf16>
    %c0_261 = arith.constant 0 : index
    %c144_262 = arith.constant 144 : index
    %298 = vector.load %arg7[%c0_261, %c144_262] : memref<128x384xbf16, #tpu.memory_space<vmem>>, vector<128x36xbf16>
    tpu.vector_store %arg7[%c0_261, %c144_262], %297 {strides = array<i32>} : memref<128x384xbf16, #tpu.memory_space<vmem>>, vector<128x36xbf16>,
    %c0_263 = arith.constant 0 : index
    %c1_264 = arith.constant 1 : index
    %c2_265 = arith.constant 2 : index
    %c0_266 = arith.constant 0 : index
    %299 = vector.load %arg6[%c0_263, %c1_264, %c2_265, %c0_266] : memref<2x10x10x36xf32, #tpu.memory_space<vmem>>, vector<2x8x8x36xf32>
    %300 = vector.shape_cast %299 : vector<2x8x8x36xf32> to vector<128x36xf32>
    %301 = arith.truncf %300 : vector<128x36xf32> to vector<128x36xbf16>
    %c0_267 = arith.constant 0 : index
    %c180_268 = arith.constant 180 : index
    %302 = vector.load %arg7[%c0_267, %c180_268] : memref<128x384xbf16, #tpu.memory_space<vmem>>, vector<128x36xbf16>
    tpu.vector_store %arg7[%c0_267, %c180_268], %301 {strides = array<i32>} : memref<128x384xbf16, #tpu.memory_space<vmem>>, vector<128x36xbf16>,
    %c0_269 = arith.constant 0 : index
    %c2_270 = arith.constant 2 : index
    %c0_271 = arith.constant 0 : index
    %c0_272 = arith.constant 0 : index
    %303 = vector.load %arg6[%c0_269, %c2_270, %c0_271, %c0_272] : memref<2x10x10x36xf32, #tpu.memory_space<vmem>>, vector<2x8x8x36xf32>
    %304 = vector.shape_cast %303 : vector<2x8x8x36xf32> to vector<128x36xf32>
    %305 = arith.truncf %304 : vector<128x36xf32> to vector<128x36xbf16>
    %c0_273 = arith.constant 0 : index
    %c216_274 = arith.constant 216 : index
    %306 = vector.load %arg7[%c0_273, %c216_274] : memref<128x384xbf16, #tpu.memory_space<vmem>>, vector<128x36xbf16>
    tpu.vector_store %arg7[%c0_273, %c216_274], %305 {strides = array<i32>} : memref<128x384xbf16, #tpu.memory_space<vmem>>, vector<128x36xbf16>,
    %c0_275 = arith.constant 0 : index
    %c2_276 = arith.constant 2 : index
    %c1_277 = arith.constant 1 : index
    %c0_278 = arith.constant 0 : index
    %307 = vector.load %arg6[%c0_275, %c2_276, %c1_277, %c0_278] : memref<2x10x10x36xf32, #tpu.memory_space<vmem>>, vector<2x8x8x36xf32>
    %308 = vector.shape_cast %307 : vector<2x8x8x36xf32> to vector<128x36xf32>
    %309 = arith.truncf %308 : vector<128x36xf32> to vector<128x36xbf16>
    %c0_279 = arith.constant 0 : index
    %c252_280 = arith.constant 252 : index
    %310 = vector.load %arg7[%c0_279, %c252_280] : memref<128x384xbf16, #tpu.memory_space<vmem>>, vector<128x36xbf16>
    tpu.vector_store %arg7[%c0_279, %c252_280], %309 {strides = array<i32>} : memref<128x384xbf16, #tpu.memory_space<vmem>>, vector<128x36xbf16>,
    %c0_281 = arith.constant 0 : index
    %c2_282 = arith.constant 2 : index
    %c2_283 = arith.constant 2 : index
    %c0_284 = arith.constant 0 : index
    %311 = vector.load %arg6[%c0_281, %c2_282, %c2_283, %c0_284] : memref<2x10x10x36xf32, #tpu.memory_space<vmem>>, vector<2x8x8x36xf32>
    %312 = vector.shape_cast %311 : vector<2x8x8x36xf32> to vector<128x36xf32>
    %313 = arith.truncf %312 : vector<128x36xf32> to vector<128x36xbf16>
    %c0_285 = arith.constant 0 : index
    %c288_286 = arith.constant 288 : index
    %314 = vector.load %arg7[%c0_285, %c288_286] : memref<128x384xbf16, #tpu.memory_space<vmem>>, vector<128x36xbf16>
    tpu.vector_store %arg7[%c0_285, %c288_286], %313 {strides = array<i32>} : memref<128x384xbf16, #tpu.memory_space<vmem>>, vector<128x36xbf16>,
    %c0_287 = arith.constant 0 : index
    %c0_288 = arith.constant 0 : index
    %315 = vector.load %arg7[%c0_287, %c0_288] : memref<128x384xbf16, #tpu.memory_space<vmem>>, vector<128x384xbf16>
    %c0_289 = arith.constant 0 : index
    %c0_290 = arith.constant 0 : index
    %316 = vector.load %arg3[%c0_289, %c0_290] : memref<384x128xbf16, #tpu.memory_space<vmem>>, vector<384x128xbf16>
    %cst_291 = arith.constant dense<0.000000e+00> : vector<128x128xf32>
    %317 = tpu.matmul %315, %316, %cst_291 {dimension_numbers = #tpu.dot_dimension_numbers<[1], [0], [0], [1], [0, 0, 1, 1], [], []>} : vector<128x384xbf16>, vector<384x128xbf16>, vector<128x128xf32> -> vector<128x128xf32>
    %c0_292 = arith.constant 0 : index
    %c0_293 = arith.constant 0 : index
    %318 = vector.load %arg4[%c0_292, %c0_293] : memref<1x128xf32, #tpu.memory_space<vmem>>, vector<1x128xf32>
    %319 = vector.broadcast %318 : vector<1x128xf32> to vector<128x128xf32>
    %320 = arith.addf %317, %319 : vector<128x128xf32>
    %321 = vector.extract_strided_slice %320 {offsets = [0, 0], sizes = [128, 96], strides = [1, 1]} : vector<128x128xf32> to vector<128x96xf32>
    %322 = arith.negf %321 : vector<128x96xf32>
    %323 = math.exp %322 : vector<128x96xf32>
    %cst_294 = arith.constant 1.000000e+00 : f32
    %324 = vector.broadcast %cst_294 : f32 to vector<128x96xf32>
    %325 = arith.addf %324, %323 : vector<128x96xf32>
    %326 = arith.divf %324, %325 : vector<128x96xf32>
    %327 = vector.extract_strided_slice %326 {offsets = [0, 0], sizes = [128, 32], strides = [1, 1]} : vector<128x96xf32> to vector<128x32xf32>
    %328 = vector.extract_strided_slice %326 {offsets = [0, 32], sizes = [128, 32], strides = [1, 1]} : vector<128x96xf32> to vector<128x32xf32>
    %329 = vector.extract_strided_slice %326 {offsets = [0, 64], sizes = [128, 32], strides = [1, 1]} : vector<128x96xf32> to vector<128x32xf32>
    %330 = vector.extract_strided_slice %320 {offsets = [0, 96], sizes = [128, 32], strides = [1, 1]} : vector<128x128xf32> to vector<128x32xf32>
    %331 = math.tanh %330 : vector<128x32xf32>
    %c0_295 = arith.constant 0 : index
    %c0_296 = arith.constant 0 : index
    %332 = vector.load %arg8[%c0_295, %c0_296] : memref<128x32xf32, #tpu.memory_space<vmem>>, vector<128x32xf32>
    %333 = arith.mulf %328, %332 : vector<128x32xf32>
    %334 = arith.mulf %327, %331 : vector<128x32xf32>
    %335 = arith.addf %333, %334 : vector<128x32xf32>
    %336 = math.tanh %335 : vector<128x32xf32>
    %337 = arith.mulf %329, %336 : vector<128x32xf32>
    %c0_297 = arith.constant 0 : index
    %c0_298 = arith.constant 0 : index
    %338 = vector.load %arg8[%c0_297, %c0_298] : memref<128x32xf32, #tpu.memory_space<vmem>>, vector<128x32xf32>
    tpu.vector_store %arg8[%c0_297, %c0_298], %335 {strides = array<i32>} : memref<128x32xf32, #tpu.memory_space<vmem>>, vector<128x32xf32>,
    %339 = vector.shape_cast %337 : vector<128x32xf32> to vector<2x8x8x32xf32>
    %c0_299 = arith.constant 0 : index
    %c1_300 = arith.constant 1 : index
    %c1_301 = arith.constant 1 : index
    %c4_302 = arith.constant 4 : index
    %340 = vector.load %arg6[%c0_299, %c1_300, %c1_301, %c4_302] : memref<2x10x10x36xf32, #tpu.memory_space<vmem>>, vector<2x8x8x32xf32>
    tpu.vector_store %arg6[%c0_299, %c1_300, %c1_301, %c4_302], %339 {strides = array<i32>} : memref<2x10x10x36xf32, #tpu.memory_space<vmem>>, vector<2x8x8x32xf32>,
    %341 = vector.extract_strided_slice %339 {offsets = [0, 0, 0, 0], sizes = [2, 8, 1, 32], strides = [1, 1, 1, 1]} : vector<2x8x8x32xf32> to vector<2x8x1x32xf32>
    %342 = vector.shape_cast %341 : vector<2x8x1x32xf32> to vector<2x8x32xf32>
    %343 = vector.shape_cast %342 : vector<2x8x32xf32> to vector<16x32xf32>
    %344 = vector.extract_strided_slice %339 {offsets = [0, 0, 1, 0], sizes = [2, 8, 1, 32], strides = [1, 1, 1, 1]} : vector<2x8x8x32xf32> to vector<2x8x1x32xf32>
    %345 = vector.shape_cast %344 : vector<2x8x1x32xf32> to vector<2x8x32xf32>
    %346 = vector.shape_cast %345 : vector<2x8x32xf32> to vector<16x32xf32>
    %347 = vector.extract_strided_slice %339 {offsets = [0, 0, 2, 0], sizes = [2, 8, 1, 32], strides = [1, 1, 1, 1]} : vector<2x8x8x32xf32> to vector<2x8x1x32xf32>
    %348 = vector.shape_cast %347 : vector<2x8x1x32xf32> to vector<2x8x32xf32>
    %349 = vector.shape_cast %348 : vector<2x8x32xf32> to vector<16x32xf32>
    %350 = vector.extract_strided_slice %339 {offsets = [0, 0, 3, 0], sizes = [2, 8, 1, 32], strides = [1, 1, 1, 1]} : vector<2x8x8x32xf32> to vector<2x8x1x32xf32>
    %351 = vector.shape_cast %350 : vector<2x8x1x32xf32> to vector<2x8x32xf32>
    %352 = vector.shape_cast %351 : vector<2x8x32xf32> to vector<16x32xf32>
    %353 = vector.extract_strided_slice %339 {offsets = [0, 0, 4, 0], sizes = [2, 8, 1, 32], strides = [1, 1, 1, 1]} : vector<2x8x8x32xf32> to vector<2x8x1x32xf32>
    %354 = vector.shape_cast %353 : vector<2x8x1x32xf32> to vector<2x8x32xf32>
    %355 = vector.shape_cast %354 : vector<2x8x32xf32> to vector<16x32xf32>
    %356 = vector.extract_strided_slice %339 {offsets = [0, 0, 5, 0], sizes = [2, 8, 1, 32], strides = [1, 1, 1, 1]} : vector<2x8x8x32xf32> to vector<2x8x1x32xf32>
    %357 = vector.shape_cast %356 : vector<2x8x1x32xf32> to vector<2x8x32xf32>
    %358 = vector.shape_cast %357 : vector<2x8x32xf32> to vector<16x32xf32>
    %359 = vector.extract_strided_slice %339 {offsets = [0, 0, 6, 0], sizes = [2, 8, 1, 32], strides = [1, 1, 1, 1]} : vector<2x8x8x32xf32> to vector<2x8x1x32xf32>
    %360 = vector.shape_cast %359 : vector<2x8x1x32xf32> to vector<2x8x32xf32>
    %361 = vector.shape_cast %360 : vector<2x8x32xf32> to vector<16x32xf32>
    %362 = vector.extract_strided_slice %339 {offsets = [0, 0, 7, 0], sizes = [2, 8, 1, 32], strides = [1, 1, 1, 1]} : vector<2x8x8x32xf32> to vector<2x8x1x32xf32>
    %363 = vector.shape_cast %362 : vector<2x8x1x32xf32> to vector<2x8x32xf32>
    %364 = vector.shape_cast %363 : vector<2x8x32xf32> to vector<16x32xf32>
    %365 = tpu.concatenate %343, %346, %349, %352, %355, %358, %361, %364 in 1 : vector<16x32xf32>, vector<16x32xf32>, vector<16x32xf32>, vector<16x32xf32>, vector<16x32xf32>, vector<16x32xf32>, vector<16x32xf32>, vector<16x32xf32> -> vector<16x256xf32>
    %c48 = arith.constant 48 : index
    %c0_303 = arith.constant 0 : index
    %366 = vector.load %arg5[%c48, %c0_303] : memref<64x256xf32, #tpu.memory_space<vmem>>, vector<16x256xf32>
    tpu.vector_store %arg5[%c48, %c0_303], %365 {strides = array<i32>} : memref<64x256xf32, #tpu.memory_space<vmem>>, vector<16x256xf32>,
    return
  }
  func.func @transform_0(%arg0: i32, %arg1: i32) -> (i32, i32, i32, i32) {
    %c1_i32 = arith.constant 1 : i32
    %0 = arith.muli %arg0, %c1_i32 : i32
    %1 = arith.addi %0, %arg1 : i32
    %c0_i32 = arith.constant 0 : i32
    %c0_i32_0 = arith.constant 0 : i32
    %c0_i32_1 = arith.constant 0 : i32
    %c0_i32_2 = arith.constant 0 : i32
    return %1, %c0_i32, %c0_i32_0, %c0_i32_1 : i32, i32, i32, i32
  }
  func.func @transform_1(%arg0: i32, %arg1: i32) -> (i32, i32) {
    %c0_i32 = arith.constant 0 : i32
    %c0_i32_0 = arith.constant 0 : i32
    %c0_i32_1 = arith.constant 0 : i32
    return %c0_i32, %c0_i32_0 : i32, i32
  }
  func.func @transform_2(%arg0: i32, %arg1: i32) -> (i32, i32) {
    %c0_i32 = arith.constant 0 : i32
    %c0_i32_0 = arith.constant 0 : i32
    %c0_i32_1 = arith.constant 0 : i32
    return %c0_i32, %c0_i32_0 : i32, i32
  }
  func.func @transform_3(%arg0: i32, %arg1: i32) -> (i32, i32) {
    %c1_i32 = arith.constant 1 : i32
    %0 = arith.muli %arg0, %c1_i32 : i32
    %1 = arith.addi %0, %arg1 : i32
    %c0_i32 = arith.constant 0 : i32
    %c0_i32_0 = arith.constant 0 : i32
    return %1, %c0_i32 : i32, i32
  }
}

</mosaic_0001>

<bundles_post_ra>
// kernel: tpu_custom_call.1
= control target key start
LH: loop header
LB: loop body
LE: loop exit
PB: predicated region body
PF: predicated region fallthrough
CT: control target
= control target key end

     0   :  { %vm12944_vm0 = vcmask 293888   ;;  %vm49_vm1 = vcmask 287744   ;;  %vm12945_vm2 = vcmask 31744   ;;  %v9366_v1 = vmov 0.0   ;;  %s9368_s9 = smov 52   ;;  %s9369_s10 = smov 108   ;;  %s12936_s0 = inlined_call_operand.vmem [shape: bf16[8,8,8,4], index: 0, kind: input, shape index: {}]   ;;  %s12937_s1 = inlined_call_operand.vmem [shape: bf16[384,128], index: 1, kind: input, shape index: {}]   ;;  %s12938_s2 = inlined_call_operand.vmem [shape: f32[1,128], index: 2, kind: input, shape index: {}]   ;;  %s12939_s3 = inlined_call_operand.hbm [shape: f32[64,256], index: 3, kind: output, shape index: {}]  }
   0x1   :  { %v9404_v0 = vld [vmem:[%s12936_s0] sm:$0xff]   ;;  %51 = vst.msk [vmem:[#allocation2 + $0x10] sm:$0xff] %vm12944_vm0, %v9366_v1  ;;  %53 = vst.msk [vmem:[#allocation2 + $0x20] sm:$0xff] %vm12944_vm0, %v9366_v1  ;;  %v8240_v4 = vld [vmem:[%s12936_s0 + $0x8] sm:$0xff]   ;;  %v9367_v14 = vmov 0   ;;  %vm12941_vm3 = vcmask 261120  }
   0x2   :  { %52 = vst.msk [vmem:[#allocation2 + $0x18] sm:$0x3] %vm49_vm1, %v9366_v1  ;;  %54 = vst.msk [vmem:[#allocation2 + $0x28] sm:$0x3] %vm49_vm1, %v9366_v1  ;;  %v8114_v2 = vunpack.c.l.bf16 %v9404_v0  ;;  %v8115_v3 = vunpack.c.h.bf16 %v9404_v0  ;;  %v8241_v5 = vld [vmem:[%s12936_s0 + $0x10] sm:$0xff]   ;;  %v8242_v6 = vld [vmem:[%s12936_s0 + $0x18] sm:$0xff]   ;;  %v8118_v7 = vunpack.c.l.bf16 %v8240_v4  ;;  %v8119_v8 = vunpack.c.h.bf16 %v8240_v4 }
   0x3   :  { %48 = vst.msk [vmem:[#allocation2] sm:$0xff] %vm12944_vm0, %v9366_v1  ;;  %55 = vst.msk [vmem:[#allocation2 + $0x30] sm:$0xff] %vm12944_vm0, %v9366_v1  ;;  %v8122_v9 = vunpack.c.l.bf16 %v8241_v5  ;;  %v8123_v10 = vunpack.c.h.bf16 %v8241_v5  ;;  %v8243_v11 = vld [vmem:[%s12936_s0 + $0x20] sm:$0xff]   ;;  %v8244_v12 = vld [vmem:[%s12936_s0 + $0x28] sm:$0xff]   ;;  %v8126_v15 = vunpack.c.l.bf16 %v8242_v6  ;;  %v8127_v16 = vunpack.c.h.bf16 %v8242_v6  ;;  %s9370_s11 = smov 36   ;;  %s9371_s12 = smov 16  }
   0x4   :  { %50 = vst.msk [vmem:[#allocation2 + $0x8] sm:$0x3] %vm49_vm1, %v9366_v1  ;;  %56 = vst.msk [vmem:[#allocation2 + $0x38] sm:$0x3] %vm49_vm1, %v9366_v1  ;;  %v8245_v13 = vld [vmem:[%s12936_s0 + $0x30] sm:$0xff]   ;;  %v8130_v17 = vunpack.c.l.bf16 %v8243_v11  ;;  %v8131_v18 = vunpack.c.h.bf16 %v8243_v11  ;;  %v8134_v19 = vunpack.c.l.bf16 %v8244_v12  ;;  %v8135_v20 = vunpack.c.h.bf16 %v8244_v12  ;;  %v8734_v23 = vld [vmem:[%s12937_s1 + $0x40] sm:$0xff]  }
   0x5   :  { %57 = vst.msk [vmem:[#allocation2 + $0x40] sm:$0xff] %vm12944_vm0, %v9366_v1  ;;  %59 = vst.msk [vmem:[#allocation2 + $0x50] sm:$0xff] %vm12944_vm0, %v9366_v1  ;;  %v8138_v21 = vunpack.c.l.bf16 %v8245_v13  ;;  %v8139_v22 = vunpack.c.h.bf16 %v8245_v13  ;;  %v8246_v24 = vld [vmem:[%s12936_s0 + $0x38] sm:$0xff]   ;;  %v8735_v26 = vld [vmem:[%s12937_s1] sm:$0xff]   ;;  %8271 = vmatprep.subr.bf16.mxu0 %v8734_v23  ;;  %s9372_s13 = smov 72   ;;  %s9373_s14 = smov 88  }
   0x6   :  { %58 = vst.msk [vmem:[#allocation2 + $0x48] sm:$0x3] %vm49_vm1, %v9366_v1  ;;  %60 = vst.msk [vmem:[#allocation2 + $0x58] sm:$0x3] %vm49_vm1, %v9366_v1  ;;  %v8142_v25 = vunpack.c.l.bf16 %v8246_v24  ;;  %v8143_v27 = vunpack.c.h.bf16 %v8246_v24  ;;  %v8736_v28 = vld [vmem:[%s12937_s1 + $0x48] sm:$0xff]   ;;  %8272 = vmatpush3.bf16.msra.mxu0 %v8735_v26  ;;  %s9374_s17 = smov 124  }
   0x7   :  { %61 = vst.msk [vmem:[#allocation2 + $0x60] sm:$0xff] %vm12944_vm0, %v9366_v1  ;;  %63 = vst.msk [vmem:[#allocation2 + $0x70] sm:$0xff] %vm12944_vm0, %v9366_v1  ;;  %v8737_v29 = vld [vmem:[%s12937_s1 + $0x8] sm:$0xff]   ;;  %8273 = vmatprep.subr.bf16.mxu0 %v8736_v28  ;;  %v8739_v5 = vld [vmem:[%s12937_s1 + $0x10] sm:$0xff]   ;;  %s9375_s7 = smov 32  }
   0x8   :  { %62 = vst.msk [vmem:[#allocation2 + $0x68] sm:$0x3] %vm49_vm1, %v9366_v1  ;;  %64 = vst.msk [vmem:[#allocation2 + $0x78] sm:$0x3] %vm49_vm1, %v9366_v1  ;;  %v8740_v6 = vld [vmem:[%s12937_s1 + $0x58] sm:$0xff]   ;;  %v8742_v11 = vld [vmem:[%s12937_s1 + $0x80] sm:$0xff]  }
   0x9   :  { %65 = vst.msk [vmem:[#allocation2 + $0x80] sm:$0xff] %vm12944_vm0, %v9366_v1  ;;  %67 = vst.msk [vmem:[#allocation2 + $0x90] sm:$0xff] %vm12944_vm0, %v9366_v1  ;;  %v8743_v13 = vld [vmem:[%s12937_s1 + $0x60] sm:$0xff]   ;;  %8591 = vmatprep.subr.bf16.mxu1 %v8742_v11  ;;  %v8749_v23 = vld [vmem:[%s12937_s1 + $0x70] sm:$0xff]  }
   0xa   :  { %66 = vst.msk [vmem:[#allocation2 + $0x88] sm:$0x3] %vm49_vm1, %v9366_v1  ;;  %68 = vst.msk [vmem:[#allocation2 + $0x98] sm:$0x3] %vm49_vm1, %v9366_v1  ;;  %8274 = vmatpush3.bf16.msra.mxu0 %v8737_v29  ;;  %8592 = vmatpush3.bf16.msra.mxu1 %v8742_v11  ;;  %v8750_v24 = vld [vmem:[%s12937_s1 + $0x30] sm:$0xff]   ;;  %v8751_v26 = vld [vmem:[%s12937_s1 + $0x98] sm:$0xff]  }
   0xb   :  { %69 = vst.msk [vmem:[#allocation2 + $0xa0] sm:$0xff] %vm12944_vm0, %v9366_v1  ;;  %71 = vst.msk [vmem:[#allocation2 + $0xb0] sm:$0xff] %vm12944_vm0, %v9366_v1  ;;  %v213_v30 = vld [vmem:[#allocation2 + $0x1] sm:$0xff]  ;;  %v8752_v28 = vld [vmem:[%s12937_s1 + $0x78] sm:$0xff]  }
   0xc   :  { %70 = vst.msk [vmem:[#allocation2 + $0xa8] sm:$0x3] %vm49_vm1, %v9366_v1  ;;  %72 = vst.msk [vmem:[#allocation2 + $0xb8] sm:$0x3] %vm49_vm1, %v9366_v1  ;;  %v278_v43 = vld [vmem:[#allocation2 + $0x2] sm:$0xff] }
   0xd   :  { %73 = vst.msk [vmem:[#allocation2 + $0xc0] sm:$0xff] %vm12944_vm0, %v9366_v1  ;;  %75 = vst.msk [vmem:[#allocation2 + $0xd0] sm:$0xff] %vm12944_vm0, %v9366_v1 }
   0xe   :  { %74 = vst.msk [vmem:[#allocation2 + $0xc8] sm:$0x3] %vm49_vm1, %v9366_v1  ;;  %76 = vst.msk [vmem:[#allocation2 + $0xd8] sm:$0x3] %vm49_vm1, %v9366_v1 }
   0xf   :  { %77 = vst.msk [vmem:[#allocation2 + $0xe0] sm:$0xff] %vm12944_vm0, %v9366_v1  ;;  %79 = vst.msk [vmem:[#allocation2 + $0xf0] sm:$0xff] %vm12944_vm0, %v9366_v1 }
  0x10   :  { %78 = vst.msk [vmem:[#allocation2 + $0xe8] sm:$0x3] %vm49_vm1, %v9366_v1  ;;  %80 = vst.msk [vmem:[#allocation2 + $0xf8] sm:$0x3] %vm49_vm1, %v9366_v1 }
  0x11   :  { %81 = vst.msk [vmem:[#allocation2 + $0x100] sm:$0xff] %vm12944_vm0, %v9366_v1  ;;  %83 = vst.msk [vmem:[#allocation2 + $0x110] sm:$0xff] %vm12944_vm0, %v9366_v1 }
  0x12   :  { %82 = vst.msk [vmem:[#allocation2 + $0x108] sm:$0x3] %vm49_vm1, %v9366_v1  ;;  %84 = vst.msk [vmem:[#allocation2 + $0x118] sm:$0x3] %vm49_vm1, %v9366_v1 }
  0x13   :  { %85 = vst.msk [vmem:[#allocation2 + $0x120] sm:$0xff] %vm12944_vm0, %v9366_v1  ;;  %87 = vst.msk [vmem:[#allocation2 + $0x130] sm:$0xff] %vm12944_vm0, %v9366_v1 }
  0x14   :  { %86 = vst.msk [vmem:[#allocation2 + $0x128] sm:$0x3] %vm49_vm1, %v9366_v1  ;;  %88 = vst.msk [vmem:[#allocation2 + $0x138] sm:$0x3] %vm49_vm1, %v9366_v1 }
  0x15   :  { %90 = vst [vmem:[#allocation3 + $0x8] sm:$0xff] %v9367_v14  ;;  %89 = vst [vmem:[#allocation3] sm:$0xff] %v9367_v14 }
  0x16   :  { %91 = vst [vmem:[#allocation3 + $0x10] sm:$0xff] %v9367_v14  ;;  %92 = vst [vmem:[#allocation3 + $0x18] sm:$0xff] %v9367_v14 }
  0x17   :  { %93 = vst [vmem:[#allocation3 + $0x20] sm:$0xff] %v9367_v14  ;;  %94 = vst [vmem:[#allocation3 + $0x28] sm:$0xff] %v9367_v14 }
  0x18   :  { %95 = vst [vmem:[#allocation3 + $0x30] sm:$0xff] %v9367_v14  ;;  %96 = vst [vmem:[#allocation3 + $0x38] sm:$0xff] %v9367_v14 }
  0x19   :  { %97 = vst [vmem:[#allocation3 + $0x40] sm:$0xff] %v9367_v14  ;;  %98 = vst [vmem:[#allocation3 + $0x48] sm:$0xff] %v9367_v14 }
  0x1a   :  { %99 = vst [vmem:[#allocation3 + $0x50] sm:$0xff] %v9367_v14  ;;  %100 = vst [vmem:[#allocation3 + $0x58] sm:$0xff] %v9367_v14 }
  0x1b   :  { %101 = vst [vmem:[#allocation3 + $0x60] sm:$0xff] %v9367_v14  ;;  %102 = vst [vmem:[#allocation3 + $0x68] sm:$0xff] %v9367_v14 }
  0x1c   :  { %103 = vst [vmem:[#allocation3 + $0x70] sm:$0xff] %v9367_v14  ;;  %104 = vst [vmem:[#allocation3 + $0x78] sm:$0xff] %v9367_v14 }
  0x1d   :  { %105 = vst [vmem:[#allocation3 + $0x80] sm:$0xff] %v9367_v14  ;;  %106 = vst [vmem:[#allocation3 + $0x88] sm:$0xff] %v9367_v14 }
  0x1e   :  { %107 = vst [vmem:[#allocation3 + $0x90] sm:$0xff] %v9367_v14  ;;  %108 = vst [vmem:[#allocation3 + $0x98] sm:$0xff] %v9367_v14 }
  0x1f   :  { %109 = vst [vmem:[#allocation3 + $0xa0] sm:$0xff] %v9367_v14  ;;  %110 = vst [vmem:[#allocation3 + $0xa8] sm:$0xff] %v9367_v14 }
  0x20   :  { %111 = vst [vmem:[#allocation3 + $0xb0] sm:$0xff] %v9367_v14  ;;  %112 = vst [vmem:[#allocation3 + $0xb8] sm:$0xff] %v9367_v14 }
  0x21   :  { %164 = vst.msk [vmem:[#allocation2 + $0x11] sm:$0xff] %vm12945_vm2, %v8114_v2  ;;  %165 = vst.msk [vmem:[#allocation2 + $0x21] sm:$0xff] %vm12945_vm2, %v8115_v3  ;;  %v8738_v3 = vld [vmem:[%s12937_s1 + $0x50] sm:$0xff]  }
  0x22   :  { %166 = vst.msk [vmem:[#allocation2 + $0x31] sm:$0xff] %vm12945_vm2, %v8118_v7  ;;  %167 = vst.msk [vmem:[#allocation2 + $0x41] sm:$0xff] %vm12945_vm2, %v8119_v8  ;;  %8275 = vmatprep.subr.bf16.mxu0 %v8738_v3  ;;  %v8741_v8 = vld [vmem:[%s12937_s1 + $0x18] sm:$0xff]  }
  0x23   :  { %168 = vst.msk [vmem:[#allocation2 + $0x51] sm:$0xff] %vm12945_vm2, %v8122_v9  ;;  %169 = vst.msk [vmem:[#allocation2 + $0x61] sm:$0xff] %vm12945_vm2, %v8123_v10  ;;  %8276 = vmatpush3.bf16.msra.mxu0 %v8739_v5  ;;  %v180_v9 = vld [vmem:[#allocation2] sm:$0xff] }
  0x24   :  { %170 = vst.msk [vmem:[#allocation2 + $0x71] sm:$0xff] %vm12945_vm2, %v8126_v15  ;;  %171 = vst.msk [vmem:[#allocation2 + $0x81] sm:$0xff] %vm12945_vm2, %v8127_v16  ;;  %8277 = vmatprep.subr.bf16.mxu0 %v8740_v6  ;;  %v8744_v15 = vld [vmem:[%s12937_s1 + $0x20] sm:$0xff]  }
  0x25   :  { %172 = vst.msk [vmem:[#allocation2 + $0xb1] sm:$0xff] %vm12945_vm2, %v8130_v17  ;;  %173 = vst.msk [vmem:[#allocation2 + $0xc1] sm:$0xff] %vm12945_vm2, %v8131_v18  ;;  %v8745_v17 = vld [vmem:[%s12937_s1 + $0x88] sm:$0xff]  }
  0x26   :  { %174 = vst.msk [vmem:[#allocation2 + $0xd1] sm:$0xff] %vm12945_vm2, %v8134_v19  ;;  %175 = vst.msk [vmem:[#allocation2 + $0xe1] sm:$0xff] %vm12945_vm2, %v8135_v20  ;;  %v8746_v18 = vld [vmem:[%s12937_s1 + $0x68] sm:$0xff]   ;;  %8593 = vmatprep.subr.bf16.mxu1 %v8745_v17 }
  0x27   :  { %176 = vst.msk [vmem:[#allocation2 + $0xf1] sm:$0xff] %vm12945_vm2, %v8138_v21  ;;  %177 = vst.msk [vmem:[#allocation2 + $0x101] sm:$0xff] %vm12945_vm2, %v8139_v22  ;;  %8278 = vmatpush3.bf16.msra.mxu0 %v8741_v8  ;;  %v8747_v21 = vld [vmem:[%s12937_s1 + $0x28] sm:$0xff]   ;;  %v8748_v22 = vld [vmem:[%s12937_s1 + $0x90] sm:$0xff]   ;;  %8594 = vmatpush3.bf16.msra.mxu1 %v8745_v17 }
  0x28   :  { %178 = vst.msk [vmem:[#allocation2 + $0x111] sm:$0xff] %vm12945_vm2, %v8142_v25  ;;  %179 = vst.msk [vmem:[#allocation2 + $0x121] sm:$0xff] %vm12945_vm2, %v8143_v27  ;;  %v482_v31 = vld [vmem:[#allocation2 + $0x12] sm:$0xff]  ;;  %v9541_v32 = vld [vmem:[#allocation2 + $0x22] sm:$0xff]  ;;  %8279 = vmatprep.subr.bf16.mxu0 %v8743_v13  ;;  %8595 = vmatprep.subr.bf16.mxu1 %v8748_v22 }
  0x29   :  { %v9543_v33 = vld [vmem:[#allocation2 + $0x10] sm:$0xff]  ;;  %v498_v34 = vpack.c.bf16 %v9541_v32, %v482_v31  ;;  %v344_v35 = vld [vmem:[#allocation2 + $0x20] sm:$0xff]  ;;  %114 = vst.msk [vmem:[#allocation4] sm:$0xff] %vm12941_vm3, %v9366_v1  ;;  %115 = vst.msk [vmem:[#allocation4 + $0x8] sm:$0xff] %vm12941_vm3, %v9366_v1  ;;  %v294_v49 = vpack.c.bf16 %v482_v31, %v278_v43 }
  0x2a   :  { %v417_v36 = vld [vmem:[#allocation2 + $0x11] sm:$0xff]  ;;  %v418_v37 = vld [vmem:[#allocation2 + $0x21] sm:$0xff]  ;;  %116 = vst.msk [vmem:[#allocation4 + $0x10] sm:$0xff] %vm12941_vm3, %v9366_v1  ;;  %117 = vst.msk [vmem:[#allocation4 + $0x18] sm:$0xff] %vm12941_vm3, %v9366_v1  ;;  %v359_v38 = vpack.c.bf16 %v344_v35, %v9543_v33  ;;  %v196_v10 = vpack.c.bf16 %v9543_v33, %v180_v9 }
  0x2b   :  { %118 = vst.msk [vmem:[#allocation4 + $0x20] sm:$0xff] %vm12941_vm3, %v9366_v1  ;;  %119 = vst.msk [vmem:[#allocation4 + $0x28] sm:$0xff] %vm12941_vm3, %v9366_v1  ;;  %v549_v39 = vld [vmem:[#allocation2 + $0x30] sm:$0xff]  ;;  %514 = vrot.lane.b32.xlu1 %v498_v34, %s9368_s9  ;;  %v229_v40 = vpack.c.bf16 %v417_v36, %v213_v30  ;;  %v433_v42 = vpack.c.bf16 %v418_v37, %v417_v36  ;;  %v346_v44 = vld [vmem:[#allocation2 + $0x40] sm:$0xff]  ;;  %8280 = vmatpush3.bf16.msra.mxu0 %v8744_v15 }
  0x2c   :  { %120 = vst.msk [vmem:[#allocation4 + $0x30] sm:$0xff] %vm12941_vm3, %v9366_v1  ;;  %121 = vst.msk [vmem:[#allocation4 + $0x38] sm:$0xff] %vm12941_vm3, %v9366_v1  ;;  %v564_v41 = vpack.c.bf16 %v549_v39, %v344_v35  ;;  %375 = vrot.lane.b32.xlu0 %v359_v38, %s9369_s10  ;;  %v9581_v45 = vld [vmem:[#allocation2 + $0x50] sm:$0xff]  ;;  %v9585_v47 = vld [vmem:[#allocation2 + $0x60] sm:$0xff]  ;;  %v360_v54 = vpack.c.bf16 %v346_v44, %v549_v39  ;;  %8281 = vmatprep.subr.bf16.mxu0 %v8746_v18 }
  0x2d   :  { %122 = vst.msk [vmem:[#allocation4 + $0x40] sm:$0xff] %vm12941_vm3, %v9366_v1  ;;  %123 = vst.msk [vmem:[#allocation4 + $0x48] sm:$0xff] %vm12941_vm3, %v9366_v1  ;;  %v565_v46 = vpack.c.bf16 %v9581_v45, %v346_v44  ;;  %v9587_v48 = vld [vmem:[#allocation2 + $0x70] sm:$0xff]  ;;  %v9598_v52 = vld [vmem:[#allocation2 + $0xc0] sm:$0xff]  ;;  %v361_v27 = vpack.c.bf16 %v9585_v47, %v9581_v45  ;;  %8596 = vmatpush3.bf16.msra.mxu1 %v8748_v22 }
  0x2e   :  { %124 = vst.msk [vmem:[#allocation4 + $0x50] sm:$0xff] %vm12941_vm3, %v9366_v1  ;;  %125 = vst.msk [vmem:[#allocation4 + $0x58] sm:$0xff] %vm12941_vm3, %v9366_v1  ;;  %v9592_v50 = vpack.c.bf16 %v9587_v48, %v9585_v47  ;;  %v614_v51 = vld [vmem:[#allocation2 + $0x31] sm:$0xff]  ;;  %v485_v58 = vld [vmem:[#allocation2 + $0x42] sm:$0xff]  ;;  %8597 = vmatprep.subr.bf16.mxu1 %v8751_v26 }
  0x2f   :  { %126 = vst.msk [vmem:[#allocation4 + $0x60] sm:$0xff] %vm12941_vm3, %v9366_v1  ;;  %127 = vst.msk [vmem:[#allocation4 + $0x68] sm:$0xff] %vm12941_vm3, %v9366_v1  ;;  %245 = vrot.lane.b32.xlu1 %v229_v40, %s9370_s11  ;;  %v9600_v53 = vld [vmem:[#allocation2 + $0xd0] sm:$0xff]  ;;  %v629_v57 = vpack.c.bf16 %v614_v51, %v418_v37  ;;  %v9608_v59 = vld [vmem:[#allocation2 + $0xe0] sm:$0xff]  ;;  %8282 = vmatpush3.bf16.msra.mxu0 %v8747_v21 }
  0x30   :  { %128 = vst.msk [vmem:[#allocation4 + $0x70] sm:$0xff] %vm12941_vm3, %v9366_v1  ;;  %129 = vst.msk [vmem:[#allocation4 + $0x78] sm:$0xff] %vm12941_vm3, %v9366_v1  ;;  %449 = vrot.lane.b32.xlu0 %v433_v42, %s9371_s12  ;;  %v484_v55 = vld [vmem:[#allocation2 + $0x32] sm:$0xff]  ;;  %v9605_v56 = vpack.c.bf16 %v9600_v53, %v9598_v52  ;;  %v420_v61 = vld [vmem:[#allocation2 + $0x41] sm:$0xff]  ;;  %8283 = vmatprep.subr.bf16.mxu0 %v8749_v23 }
  0x31   :  { %206 = vst.msk [vmem:[#allocation3 + $0x18] sm:$0xff] %vm12944_vm0, %v564_v41  ;;  %207 = vst.msk [vmem:[#allocation3 + $0x30] sm:$0xff] %vm12944_vm0, %v565_v46  ;;  %v9610_v60 = vld [vmem:[#allocation2 + $0xf0] sm:$0xff]  ;;  %v9618_v63 = vld [vmem:[#allocation2 + $0x100] sm:$0xff]  ;;  %v499_v1 = vpack.c.bf16 %v485_v58, %v484_v55  ;;  %v434_v4 = vpack.c.bf16 %v420_v61, %v614_v51  ;;  %v703_v14 = vpack.c.bf16 %v484_v55, %v9541_v32  ;;  %8598 = vmatpush3.bf16.msra.mxu1 %v8751_v26 }
  0x32   :  { %208 = vst.msk [vmem:[#allocation3 + $0x48] sm:$0xff] %vm12944_vm0, %v9592_v50  ;;  %v9614_v62 = vpack.c.bf16 %v9610_v60, %v9608_v59  ;;  %210 = vst.msk [vmem:[#allocation3 + $0x78] sm:$0xff] %vm12944_vm0, %v9605_v56  ;;  %v9620_v0 = vld [vmem:[#allocation2 + $0x110] sm:$0xff]  ;;  %v422_v19 = vld [vmem:[#allocation2 + $0x61] sm:$0xff] }
  0x33   :  { %310 = vrot.lane.b32.xlu1 %v294_v49, %s9372_s13  ;;  %v9625_v2 = vpack.c.bf16 %v9620_v0, %v9618_v63  ;;  %v616_v7 = vld [vmem:[#allocation2 + $0x51] sm:$0xff]  ;;  %205 = vst.msk [vmem:[#allocation3] sm:$0xff] %vm12944_vm0, %v196_v10  ;;  %v487_v29 = vld [vmem:[#allocation2 + $0x62] sm:$0xff]  ;;  %8284 = vmatpush3.bf16.msra.mxu0 %v8750_v24 }
  0x34   :  { %580 = vrot.lane.b32.xlu0 %v564_v41, %s9373_s14  ;;  %211 = vst.msk [vmem:[#allocation3 + $0x90] sm:$0xff] %vm12944_vm0, %v9614_v62  ;;  %v690_v12 = vld [vmem:[#allocation2 + $0x52] sm:$0xff]  ;;  %v630_v16 = vpack.c.bf16 %v616_v7, %v420_v61  ;;  %v435_v25 = vpack.c.bf16 %v422_v19, %v616_v7  ;;  %v8754_v30 = vld [vmem:[%s12937_s1 + $0xa0] sm:$0xff]   ;;  %8285 = vmatprep.subr.bf16.mxu0 %v8752_v28  ;;  %v8755_v33 = vld [vmem:[%s12937_s1 + $0xa8] sm:$0xff]  }
  0x35   :  { %212 = vst.msk [vmem:[#allocation3 + $0xa8] sm:$0xff] %vm12944_vm0, %v9625_v2  ;;  %v704_v20 = vpack.c.bf16 %v690_v12, %v485_v58  ;;  %v8753_v31 = vld [vmem:[%s12937_s1 + $0x38] sm:$0xff]   ;;  %v500_v32 = vpack.c.bf16 %v487_v29, %v690_v12  ;;  %v350_v34 = vld [vmem:[#allocation2 + $0x80] sm:$0xff]  ;;  %8599 = vmatprep.subr.bf16.mxu1 %v8754_v30  ;;  %v8756_v36 = vld [vmem:[%s12937_s1 + $0xb0] sm:$0xff]  }
  0x36   :  { %v618_v35 = vld [vmem:[#allocation2 + $0x71] sm:$0xff]  ;;  %8600 = vmatpush3.bf16.msra.mxu1 %v8754_v30  ;;  %v362_v38 = vpack.c.bf16 %v350_v34, %v9587_v48  ;;  %v619_v39 = vld [vmem:[#allocation2 + $0x81] sm:$0xff] }
  0x37   :  { %377 = vrot.lane.b32.xlu1 %v360_v54, %s9369_s10  ;;  %8286 = vmatpush3.bf16.msra.mxu0 %v8753_v31  ;;  %v692_v37 = vld [vmem:[#allocation2 + $0x72] sm:$0xff]  ;;  %v631_v41 = vpack.c.bf16 %v618_v35, %v422_v19  ;;  %v693_v43 = vld [vmem:[#allocation2 + $0x82] sm:$0xff]  ;;  %v436_v48 = vpack.c.bf16 %v619_v39, %v618_v35 }
  0x38   :  { %645 = vrot.lane.b32.xlu0 %v629_v57, %s9374_s17  ;;  %8601 = vmatprep.subr.bf16.mxu1 %v8755_v33  ;;  %v620_v40 = vld [vmem:[#allocation2 + $0x91] sm:$0xff]  ;;  %v705_v45 = vpack.c.bf16 %v692_v37, %v487_v29  ;;  %v426_v55 = vld [vmem:[#allocation2 + $0xc1] sm:$0xff] }
  0x39   :  { %v8757_v42 = vld [vmem:[%s12937_s1 + $0xb8] sm:$0xff]   ;;  %v555_v49 = vld [vmem:[#allocation2 + $0x90] sm:$0xff]  ;;  %v491_v5 = vld [vmem:[#allocation2 + $0xc2] sm:$0xff] }
  0x3a   :  { %8602 = vmatpush3.bf16.msra.mxu1 %v8755_v33  ;;  %v694_v44 = vld [vmem:[#allocation2 + $0x92] sm:$0xff]  ;;  %v567_v61 = vpack.c.bf16 %v555_v49, %v350_v34  ;;  %v286_v7 = vld [vmem:[#allocation2 + $0xa2] sm:$0xff] }
  0x3b   :  { %516 = vrot.lane.b32.xlu1 %v499_v1, %s9368_s9  ;;  %8603 = vmatprep.subr.bf16.mxu1 %v8756_v36  ;;  %v706_v47 = vpack.c.bf16 %v694_v44, %v693_v43  ;;  %v351_v51 = vld [vmem:[#allocation2 + $0xb0] sm:$0xff]  ;;  %v221_v1 = vld [vmem:[#allocation2 + $0xa1] sm:$0xff] }
  0x3c   :  { %451 = vrot.lane.b32.xlu0 %v434_v4, %s9371_s12  ;;  %v425_v54 = vld [vmem:[#allocation2 + $0xb1] sm:$0xff]  ;;  %v363_v6 = vpack.c.bf16 %v9598_v52, %v351_v51  ;;  %v493_v13 = vld [vmem:[#allocation2 + $0xe2] sm:$0xff]  ;;  %v364_v52 = vpack.c.bf16 %v9608_v59, %v9600_v53 }
  0x3d   :  { %v437_v3 = vpack.c.bf16 %v426_v55, %v425_v54  ;;  %v490_v4 = vld [vmem:[#allocation2 + $0xb2] sm:$0xff]  ;;  %v233_v8 = vpack.c.bf16 %v425_v54, %v221_v1 }
  0x3e   :  { %8604 = vmatpush3.bf16.msra.mxu1 %v8756_v36  ;;  %v502_v9 = vpack.c.bf16 %v491_v5, %v490_v4  ;;  %v298_v10 = vpack.c.bf16 %v490_v4, %v286_v7  ;;  %v622_v11 = vld [vmem:[#allocation2 + $0xd1] sm:$0xff] }
  0x3f   :  { %582 = vrot.lane.b32.xlu1 %v565_v46, %s9373_s14  ;;  %v632_v46 = vpack.c.bf16 %v620_v40, %v619_v39  ;;  %8605 = vmatprep.subr.bf16.mxu1 %v8757_v42  ;;  %v492_v12 = vld [vmem:[#allocation2 + $0xd2] sm:$0xff]  ;;  %v633_v15 = vpack.c.bf16 %v622_v11, %v426_v55 }
  0x40   :  { %247 = vrot.lane.b32.xlu0 %v629_v57, %s9370_s11  ;;  %v188_v57 = vld [vmem:[#allocation2 + $0xa0] sm:$0xff]  ;;  %v624_v18 = vld [vmem:[#allocation2 + $0xf1] sm:$0xff] }
  0x41   :  { %v200_v58 = vpack.c.bf16 %v351_v51, %v188_v57 }
  0x42   :  { %8606 = vmatpush3.bf16.msra.mxu1 %v8757_v42 }
  0x43   :  { %719 = vrot.lane.b32.xlu1 %v703_v14, %s9375_s7  ;;  %209 = vst.msk [vmem:[#allocation3 + $0x60] sm:$0xff] %vm12944_vm0, %v200_v58 }
  0x44   :  { %647 = vrot.lane.b32.xlu0 %v630_v16, %s9374_s17 }
  0x47   :  { %721 = vrot.lane.b32.xlu1 %v704_v20, %s9375_s7 }
  0x48   :  { %312 = vrot.lane.b32.xlu0 %v703_v14, %s9372_s13  ;;  %v428_v14 = vld [vmem:[#allocation2 + $0xe1] sm:$0xff] }
  0x49   :  { %v438_v17 = vpack.c.bf16 %v428_v14, %v622_v11 }
  0x4b   :  { %453 = vrot.lane.b32.xlu1 %v435_v25, %s9371_s12 }
  0x4c   :  { %379 = vrot.lane.b32.xlu0 %v361_v27, %s9369_s10 }
  0x4f   :  { %249 = vrot.lane.b32.xlu1 %v630_v16, %s9370_s11  ;;  %v503_v16 = vpack.c.bf16 %v493_v13, %v492_v12 }
  0x50   :  { %518 = vrot.lane.b32.xlu0 %v500_v32, %s9368_s9 }
  0x53   :  { %314 = vrot.lane.b32.xlu1 %v704_v20, %s9372_s13 }
  0x54   :  { %584 = vrot.lane.b32.xlu0 %v9592_v50, %s9373_s14  ;;  %v501_v50 = vpack.c.bf16 %v693_v43, %v692_v37 }
  0x57   :  { %381 = vrot.lane.b32.xlu1 %v362_v38, %s9369_s10 }
  0x58   :  { %649 = vrot.lane.b32.xlu0 %v631_v41, %s9374_s17 }
  0x5b   :  { %723 = vrot.lane.b32.xlu1 %v705_v45, %s9375_s7 }
  0x5c   :  { %651 = vrot.lane.b32.xlu0 %v632_v46, %s9374_s17 }
  0x5f   :  { %725 = vrot.lane.b32.xlu1 %v706_v47, %s9375_s7 }
  0x60   :  { %455 = vrot.lane.b32.xlu0 %v436_v48, %s9371_s12 }
  0x63   :  { %251 = vrot.lane.b32.xlu1 %v631_v41, %s9370_s11 }
  0x64   :  { %520 = vrot.lane.b32.xlu0 %v501_v50, %s9368_s9 }
  0x67   :  { %316 = vrot.lane.b32.xlu1 %v705_v45, %s9372_s13 }
  0x68   :  { %586 = vrot.lane.b32.xlu0 %v567_v61, %s9373_s14 }
  0x6b   :  { %457 = vrot.lane.b32.xlu1 %v437_v3, %s9371_s12 }
  0x6c   :  { %383 = vrot.lane.b32.xlu0 %v363_v6, %s9369_s10 }
  0x6f   :  { %253 = vrot.lane.b32.xlu1 %v233_v8, %s9370_s11 }
  0x70   :  { %522 = vrot.lane.b32.xlu0 %v502_v9, %s9368_s9 }
  0x73   :  { %318 = vrot.lane.b32.xlu1 %v298_v10, %s9372_s13 }
  0x74   :  { %588 = vrot.lane.b32.xlu0 %v9605_v56, %s9373_s14 }
  0x77   :  { %385 = vrot.lane.b32.xlu1 %v364_v52, %s9369_s10 }
  0x78   :  { %653 = vrot.lane.b32.xlu0 %v633_v15, %s9374_s17 }
  0x7b   :  { %524 = vrot.lane.b32.xlu1 %v503_v16, %s9368_s9 }
  0x7c   :  { %459 = vrot.lane.b32.xlu0 %v438_v17, %s9371_s12 }
  0x7d   :  { %8 = vsyncpa [#allocation6], 0  ;;  %v707_v53 = vpack.c.bf16 %v492_v12, %v491_v5  ;;  %v634_v56 = vpack.c.bf16 %v624_v18, %v428_v14  ;;  %v698_v59 = vld [vmem:[#allocation2 + $0xf2] sm:$0xff]  ;;  %v430_v20 = vld [vmem:[#allocation2 + $0x101] sm:$0xff]  ;;  %v365_v22 = vpack.c.bf16 %v9618_v63, %v9610_v60  ;;  %vm401_vm4 = vcmask 130048   ;;  %s9376_s20 = smov 68  }
  0x7e   :  { %v708_v19 = vpack.c.bf16 %v698_v59, %v493_v13  ;;  %v439_v21 = vpack.c.bf16 %v430_v20, %v624_v18  ;;  %v358_v24 = vld [vmem:[#allocation2 + $0x120] sm:$0xff]  ;;  %v626_v25 = vld [vmem:[#allocation2 + $0x111] sm:$0xff]  ;;  %vm269_vm5 = vcmask 589088   ;;  %vm12950_vm6 = vcmask 425088   ;;  %s9377_s4 = smov 96  }
  0x7f   :  { %590 = vrot.lane.b32.xlu1 %v9614_v62, %s9373_s14  ;;  %v495_v62 = vld [vmem:[#allocation2 + $0x102] sm:$0xff]  ;;  %v366_v26 = vpack.c.bf16 %v358_v24, %v9620_v0  ;;  %v635_v60 = vpack.c.bf16 %v626_v25, %v430_v20  ;;  %v700_v63 = vld [vmem:[#allocation2 + $0x112] sm:$0xff]  ;;  %vm12948_vm7 = vcmask 720288   ;;  %vm334_vm8 = vcmask 884288  }
  0x80   :  { %255 = vrot.lane.b32.xlu0 %v633_v15, %s9370_s11  ;;  %v504_v23 = vpack.c.bf16 %v495_v62, %v698_v59  ;;  %v627_v27 = vld [vmem:[#allocation2 + $0x121] sm:$0xff]  ;;  %v628_v28 = vld [vmem:[#allocation2 + $0x131] sm:$0xff]  ;;  %v709_v29 = vpack.c.bf16 %v700_v63, %v495_v62  ;;  %vm12949_vm9 = vcmask 1015488   ;;  %vm399_vm10 = vcmask 1048416  }
  0x81   :  { %v636_v30 = vpack.c.bf16 %v628_v28, %v627_v27  ;;  %v701_v31 = vld [vmem:[#allocation2 + $0x122] sm:$0xff]  ;;  %v702_v32 = vld [vmem:[#allocation2 + $0x132] sm:$0xff]  ;;  %v440_v0 = vpack.c.bf16 %v627_v27, %v626_v25  ;;  %vm12942_vm11 = vcmask 1048544   ;;  %vm12940_vm12 = vcmask 556288  }
  0x82   :  { %v710_v33 = vpack.c.bf16 %v702_v32, %v701_v31  ;;  %v505_v35 = vpack.c.bf16 %v701_v31, %v700_v63  ;;  %v563_v37 = vld [vmem:[#allocation2 + $0x130] sm:$0xff]  ;;  %vm1795_vm13 = vcmask 1041409   ;;  %vm1798_vm14 = vcmask 1042434  }
  0x83   :  { %727 = vrot.lane.b32.xlu1 %v707_v53, %s9375_s7  ;;  %v571_v39 = vpack.c.bf16 %v563_v37, %v358_v24  ;;  %vm1801_vm15 = vcmask 1043459   ;;  %vm1804_vm1 = vcmask 1044484  }
  0x84   :  { %655 = vrot.lane.b32.xlu0 %v634_v56, %s9374_s17 }
  0x87   :  { %729 = vrot.lane.b32.xlu1 %v708_v19, %s9375_s7 }
  0x88   :  { %320 = vrot.lane.b32.xlu0 %v707_v53, %s9372_s13 }
  0x8b   :  { %461 = vrot.lane.b32.xlu1 %v439_v21, %s9371_s12 }
  0x8c   :  { %387 = vrot.lane.b32.xlu0 %v365_v22, %s9369_s10 }
  0x8f   :  { %257 = vrot.lane.b32.xlu1 %v634_v56, %s9370_s11 }
  0x90   :  { %526 = vrot.lane.b32.xlu0 %v504_v23, %s9368_s9 }
  0x93   :  { %322 = vrot.lane.b32.xlu1 %v708_v19, %s9372_s13 }
  0x94   :  { %592 = vrot.lane.b32.xlu0 %v9625_v2, %s9373_s14 }
  0x97   :  { %389 = vrot.lane.b32.xlu1 %v366_v26, %s9369_s10 }
  0x98   :  { %657 = vrot.lane.b32.xlu0 %v635_v60, %s9374_s17 }
  0x9b   :  { %731 = vrot.lane.b32.xlu1 %v709_v29, %s9375_s7 }
  0x9c   :  { %659 = vrot.lane.b32.xlu0 %v636_v30, %s9374_s17 }
  0x9d   :  { %v515_v2 = vpop.permute.xlu1 %514 }
  0x9e   :  { %v376_v34 = vpop.permute.xlu0 %375 }
  0x9f   :  { %402 = vst.msk [vmem:[#allocation3 + $0x8] sm:$0xff] %vm401_vm4, %v376_v34  ;;  %733 = vrot.lane.b32.xlu1 %v710_v33, %s9375_s7 }
  0xa0   :  { %463 = vrot.lane.b32.xlu0 %v440_v0, %s9371_s12 }
  0xa1   :  { %v246_v36 = vpop.permute.xlu1 %245 }
  0xa2   :  { %v450_v38 = vpop.permute.xlu0 %449  ;;  %270 = vst.msk [vmem:[#allocation3] sm:$0xff] %vm269_vm5, %v246_v36 }
  0xa3   :  { %474 = vst.msk [vmem:[#allocation3 + $0x8] sm:$0xff] %vm12950_vm6, %v450_v38  ;;  %259 = vrot.lane.b32.xlu1 %v635_v60, %s9370_s11 }
  0xa4   :  { %528 = vrot.lane.b32.xlu0 %v505_v35, %s9368_s9  ;;  %539 = vst.msk [vmem:[#allocation3 + $0x8] sm:$0xff] %vm12948_vm7, %v515_v2 }
  0xa5   :  { %v311_v40 = vpop.permute.xlu1 %310 }
  0xa6   :  { %v581_v41 = vpop.permute.xlu0 %580  ;;  %335 = vst.msk [vmem:[#allocation3] sm:$0xff] %vm334_vm8, %v311_v40 }
  0xa7   :  { %605 = vst.msk [vmem:[#allocation3 + $0x8] sm:$0xff] %vm12949_vm9, %v581_v41  ;;  %324 = vrot.lane.b32.xlu1 %v709_v29, %s9372_s13 }
  0xa8   :  { %400 = vst.msk [vmem:[#allocation3] sm:$0xff] %vm399_vm10, %v376_v34  ;;  %594 = vrot.lane.b32.xlu0 %v571_v39, %s9373_s14 }
  0xa9   :  { %v378_v42 = vpop.permute.xlu1 %377 }
  0xaa   :  { %v646_v43 = vpop.permute.xlu0 %645  ;;  %404 = vst.msk [vmem:[#allocation3 + $0x20] sm:$0xff] %vm401_vm4, %v378_v42 }
  0xab   :  { %670 = vst.msk [vmem:[#allocation3 + $0x8] sm:$0xff] %vm12942_vm11, %v646_v43 }
  0xac   :  { %672 = vst.msk [vmem:[#allocation3 + $0x10] sm:$0xff] %vm12941_vm3, %v646_v43 }
  0xad   :  { %v517_v44 = vpop.permute.xlu1 %516 }
  0xae   :  { %v452_v45 = vpop.permute.xlu0 %451 }
  0xaf   :  { %475 = vst.msk [vmem:[#allocation3 + $0x20] sm:$0xff] %vm12950_vm6, %v452_v45  ;;  %v752_v49 = vld [vmem:[#allocation3] sm:$0xff] }
  0xb0   :  { %540 = vst.msk [vmem:[#allocation3 + $0x20] sm:$0xff] %vm12948_vm7, %v517_v44 }
  0xb1   :  { %v583_v46 = vpop.permute.xlu1 %582 }
  0xb2   :  { %v248_v47 = vpop.permute.xlu0 %247  ;;  %606 = vst.msk [vmem:[#allocation3 + $0x20] sm:$0xff] %vm12949_vm9, %v583_v46  ;;  %v753_v48 = vld [vmem:[#allocation3 + $0x8] sm:$0xff] }
  0xb3   :  { %271 = vst.msk [vmem:[#allocation3 + $0x18] sm:$0xff] %vm269_vm5, %v248_v47  ;;  %1007 = vmatprep.mubr.bf16.mxu0 %v753_v48 }
  0xb4   :  { %1008 = vmatmul.mubr.bf16.vlgmr.msra.gmra.mrb[0].mxu0 %v752_v49 }
  0xb5   :  { %v720_v50 = vpop.permute.xlu1 %719 }
  0xb6   :  { %v648_v51 = vpop.permute.xlu0 %647  ;;  %744 = vst.msk [vmem:[#allocation3 + $0x10] sm:$0xff] %vm12940_vm12, %v720_v50 }
  0xb7   :  { %673 = vst.msk [vmem:[#allocation3 + $0x20] sm:$0xff] %vm12942_vm11, %v648_v51 }
  0xb8   :  { %674 = vst.msk [vmem:[#allocation3 + $0x28] sm:$0xff] %vm12941_vm3, %v648_v51 }
  0xb9   :  { %v722_v54 = vpop.permute.xlu1 %721 }
  0xba   :  { %v313_v55 = vpop.permute.xlu0 %312  ;;  %745 = vst.msk [vmem:[#allocation3 + $0x28] sm:$0xff] %vm12940_vm12, %v722_v54 }
  0xbb   :  { %336 = vst.msk [vmem:[#allocation3 + $0x18] sm:$0xff] %vm334_vm8, %v313_v55 }
  0xbc   :  { %403 = vst.msk [vmem:[#allocation3 + $0x18] sm:$0xff] %vm399_vm10, %v378_v42 }
  0xbd   :  { %v454_v57 = vpop.permute.xlu1 %453  ;;  %v754_v58 = vld [vmem:[#allocation3 + $0x10] sm:$0xff] }
  0xbe   :  { %v380_v61 = vpop.permute.xlu0 %379  ;;  %8607 = vmatprep.mubr.bf16.mxu1 %v754_v58  ;;  %v756_v1 = vld [vmem:[#allocation3 + $0x20] sm:$0xff] }
  0xbf   :  { %406 = vst.msk [vmem:[#allocation3 + $0x38] sm:$0xff] %vm401_vm4, %v380_v61  ;;  %1015 = vmatprep.mubr.bf16.mxu0 %v756_v1 }
  0xc0   :  { %476 = vst.msk [vmem:[#allocation3 + $0x38] sm:$0xff] %vm12950_vm6, %v454_v57 }
  0xc1   :  { %v250_v3 = vpop.permute.xlu1 %249  ;;  %v757_v4 = vld [vmem:[#allocation3 + $0x28] sm:$0xff] }
  0xc2   :  { %v519_v5 = vpop.permute.xlu0 %518  ;;  %272 = vst.msk [vmem:[#allocation3 + $0x30] sm:$0xff] %vm269_vm5, %v250_v3  ;;  %8608 = vmatmul.mubr.bf16.vlgmr.msra.gmra.mrb[0].mxu1 %v757_v4 }
  0xc3   :  { %541 = vst.msk [vmem:[#allocation3 + $0x38] sm:$0xff] %vm12948_vm7, %v519_v5  ;;  %v755_v6 = vld [vmem:[#allocation3 + $0x18] sm:$0xff] }
  0xc4   :  { %1016 = vmatmul.mubr.bf16.gmra.mrb[4].mxu0 %v755_v6 }
  0xc5   :  { %v315_v7 = vpop.permute.xlu1 %314 }
  0xc6   :  { %v585_v8 = vpop.permute.xlu0 %584  ;;  %337 = vst.msk [vmem:[#allocation3 + $0x30] sm:$0xff] %vm334_vm8, %v315_v7 }
  0xc7   :  { %607 = vst.msk [vmem:[#allocation3 + $0x38] sm:$0xff] %vm12949_vm9, %v585_v8 }
  0xc8   :  { %405 = vst.msk [vmem:[#allocation3 + $0x30] sm:$0xff] %vm399_vm10, %v380_v61 }
  0xc9   :  { %v382_v9 = vpop.permute.xlu1 %381 }
  0xca   :  { %v650_v10 = vpop.permute.xlu0 %649  ;;  %408 = vst.msk [vmem:[#allocation3 + $0x50] sm:$0xff] %vm401_vm4, %v382_v9 }
  0xcb   :  { %675 = vst.msk [vmem:[#allocation3 + $0x38] sm:$0xff] %vm12942_vm11, %v650_v10 }
  0xcc   :  { %676 = vst.msk [vmem:[#allocation3 + $0x40] sm:$0xff] %vm12941_vm3, %v650_v10 }
  0xcd   :  { %v724_v11 = vpop.permute.xlu1 %723 }
  0xce   :  { %v652_v12 = vpop.permute.xlu0 %651  ;;  %746 = vst.msk [vmem:[#allocation3 + $0x40] sm:$0xff] %vm12940_vm12, %v724_v11  ;;  %v9848_v11 = vld [vmem:[%s12938_s2] ss:$0 sm:$0xff] }
  0xcf   :  { %678 = vst.msk [vmem:[#allocation3 + $0x58] sm:$0xff] %vm12941_vm3, %v652_v12  ;;  %v758_v15 = vld [vmem:[#allocation3 + $0x30] sm:$0xff] }
  0xd1   :  { %v726_v13 = vpop.permute.xlu1 %725 }
  0xd2   :  { %v456_v52 = vpop.permute.xlu0 %455  ;;  %747 = vst.msk [vmem:[#allocation3 + $0x58] sm:$0xff] %vm12940_vm12, %v726_v13  ;;  %v759_v14 = vld [vmem:[#allocation3 + $0x38] sm:$0xff] }
  0xd3   :  { %477 = vst.msk [vmem:[#allocation3 + $0x50] sm:$0xff] %vm12950_vm6, %v456_v52  ;;  %1023 = vmatprep.mubr.bf16.mxu0 %v759_v14 }
  0xd4   :  { %1024 = vmatmul.mubr.bf16.gmra.mrb[8].mxu0 %v758_v15 }
  0xd5   :  { %v252_v16 = vpop.permute.xlu1 %251  ;;  %v760_v17 = vld [vmem:[#allocation3 + $0x40] sm:$0xff] }
  0xd6   :  { %v521_v18 = vpop.permute.xlu0 %520  ;;  %273 = vst.msk [vmem:[#allocation3 + $0x48] sm:$0xff] %vm269_vm5, %v252_v16  ;;  %8611 = vmatprep.mubr.bf16.mxu1 %v760_v17 }
  0xd7   :  { %542 = vst.msk [vmem:[#allocation3 + $0x50] sm:$0xff] %vm12948_vm7, %v521_v18 }
  0xd9   :  { %v317_v53 = vpop.permute.xlu1 %316  ;;  %v763_v56 = vld [vmem:[#allocation3 + $0x58] sm:$0xff] }
  0xda   :  { %v587_v59 = vpop.permute.xlu0 %586  ;;  %338 = vst.msk [vmem:[#allocation3 + $0x48] sm:$0xff] %vm334_vm8, %v317_v53  ;;  %8612 = vmatmul.mubr.bf16.gmra.mrb[4].mxu1 %v763_v56 }
  0xdb   :  { %608 = vst.msk [vmem:[#allocation3 + $0x50] sm:$0xff] %vm12949_vm9, %v587_v59 }
  0xdc   :  { %407 = vst.msk [vmem:[#allocation3 + $0x48] sm:$0xff] %vm399_vm10, %v382_v9 }
  0xdd   :  { %677 = vst.msk [vmem:[#allocation3 + $0x50] sm:$0xff] %vm12942_vm11, %v652_v12  ;;  %v458_v19 = vpop.permute.xlu1 %457 }
  0xde   :  { %v384_v20 = vpop.permute.xlu0 %383 }
  0xdf   :  { %410 = vst.msk [vmem:[#allocation3 + $0x68] sm:$0xff] %vm401_vm4, %v384_v20 }
  0xe0   :  { %478 = vst.msk [vmem:[#allocation3 + $0x68] sm:$0xff] %vm12950_vm6, %v458_v19 }
  0xe1   :  { %v254_v21 = vpop.permute.xlu1 %253 }
  0xe2   :  { %v523_v22 = vpop.permute.xlu0 %522  ;;  %274 = vst.msk [vmem:[#allocation3 + $0x60] sm:$0xff] %vm269_vm5, %v254_v21 }
  0xe3   :  { %v761_v62 = vld [vmem:[#allocation3 + $0x48] sm:$0xff]  ;;  %543 = vst.msk [vmem:[#allocation3 + $0x68] sm:$0xff] %vm12948_vm7, %v523_v22 }
  0xe4   :  { %v762_v23 = vld [vmem:[#allocation3 + $0x50] sm:$0xff] }
  0xe5   :  { %1031 = vmatprep.mubr.bf16.mxu0 %v762_v23  ;;  %v319_v24 = vpop.permute.xlu1 %318 }
  0xe6   :  { %1032 = vmatmul.mubr.bf16.gmra.mrb[12].mxu0 %v761_v62  ;;  %v589_v25 = vpop.permute.xlu0 %588  ;;  %339 = vst.msk [vmem:[#allocation3 + $0x60] sm:$0xff] %vm334_vm8, %v319_v24 }
  0xe7   :  { %609 = vst.msk [vmem:[#allocation3 + $0x68] sm:$0xff] %vm12949_vm9, %v589_v25 }
  0xe8   :  { %409 = vst.msk [vmem:[#allocation3 + $0x60] sm:$0xff] %vm399_vm10, %v384_v20 }
  0xe9   :  { %v386_v26 = vpop.permute.xlu1 %385 }
  0xea   :  { %v654_v60 = vpop.permute.xlu0 %653  ;;  %412 = vst.msk [vmem:[#allocation3 + $0x80] sm:$0xff] %vm401_vm4, %v386_v26 }
  0xeb   :  { %679 = vst.msk [vmem:[#allocation3 + $0x68] sm:$0xff] %vm12942_vm11, %v654_v60 }
  0xec   :  { %680 = vst.msk [vmem:[#allocation3 + $0x70] sm:$0xff] %vm12941_vm3, %v654_v60 }
  0xed   :  { %v525_v63 = vpop.permute.xlu1 %524 }
  0xee   :  { %v460_v27 = vpop.permute.xlu0 %459 }
  0xef   :  { %479 = vst.msk [vmem:[#allocation3 + $0x80] sm:$0xff] %vm12950_vm6, %v460_v27  ;;  %v764_v31 = vld [vmem:[#allocation3 + $0x60] sm:$0xff] }
  0xf0   :  { %544 = vst.msk [vmem:[#allocation3 + $0x80] sm:$0xff] %vm12948_vm7, %v525_v63 }
  0xf1   :  { %v591_v28 = vpop.permute.xlu1 %590 }
  0xf2   :  { %v256_v29 = vpop.permute.xlu0 %255  ;;  %610 = vst.msk [vmem:[#allocation3 + $0x80] sm:$0xff] %vm12949_vm9, %v591_v28  ;;  %v765_v30 = vld [vmem:[#allocation3 + $0x68] sm:$0xff] }
  0xf3   :  { %275 = vst.msk [vmem:[#allocation3 + $0x78] sm:$0xff] %vm269_vm5, %v256_v29  ;;  %1039 = vmatprep.mubr.bf16.mxu0 %v765_v30 }
  0xf4   :  { %1040 = vmatmul.mubr.bf16.gmra.mrb[16].mxu0 %v764_v31 }
  0xf5   :  { %v728_v32 = vpop.permute.xlu1 %727 }
  0xf6   :  { %v656_v33 = vpop.permute.xlu0 %655  ;;  %748 = vst.msk [vmem:[#allocation3 + $0x70] sm:$0xff] %vm12940_vm12, %v728_v32 }
  0xf7   :  { %681 = vst.msk [vmem:[#allocation3 + $0x80] sm:$0xff] %vm12942_vm11, %v656_v33 }
  0xf8   :  { %682 = vst.msk [vmem:[#allocation3 + $0x88] sm:$0xff] %vm12941_vm3, %v656_v33 }
  0xf9   :  { %v730_v0 = vpop.permute.xlu1 %729 }
  0xfa   :  { %v321_v2 = vpop.permute.xlu0 %320  ;;  %749 = vst.msk [vmem:[#allocation3 + $0x88] sm:$0xff] %vm12940_vm12, %v730_v0 }
  0xfb   :  { %340 = vst.msk [vmem:[#allocation3 + $0x78] sm:$0xff] %vm334_vm8, %v321_v2 }
  0xfc   :  { %411 = vst.msk [vmem:[#allocation3 + $0x78] sm:$0xff] %vm399_vm10, %v386_v26 }
  0xfd   :  { %v462_v34 = vpop.permute.xlu1 %461  ;;  %v766_v35 = vld [vmem:[#allocation3 + $0x70] sm:$0xff] }
  0xfe   :  { %v388_v36 = vpop.permute.xlu0 %387  ;;  %8615 = vmatprep.mubr.bf16.mxu1 %v766_v35  ;;  %v768_v37 = vld [vmem:[#allocation3 + $0x80] sm:$0xff] }
  0xff   :  { %414 = vst.msk [vmem:[#allocation3 + $0x98] sm:$0xff] %vm401_vm4, %v388_v36  ;;  %1047 = vmatprep.mubr.bf16.mxu0 %v768_v37 }
 0x100   :  { %480 = vst.msk [vmem:[#allocation3 + $0x98] sm:$0xff] %vm12950_vm6, %v462_v34 }
 0x101   :  { %v258_v38 = vpop.permute.xlu1 %257  ;;  %v769_v39 = vld [vmem:[#allocation3 + $0x88] sm:$0xff] }
 0x102   :  { %v527_v40 = vpop.permute.xlu0 %526  ;;  %276 = vst.msk [vmem:[#allocation3 + $0x90] sm:$0xff] %vm269_vm5, %v258_v38  ;;  %8616 = vmatmul.mubr.bf16.gmra.mrb[8].mxu1 %v769_v39 }
 0x103   :  { %545 = vst.msk [vmem:[#allocation3 + $0x98] sm:$0xff] %vm12948_vm7, %v527_v40  ;;  %v767_v41 = vld [vmem:[#allocation3 + $0x78] sm:$0xff] }
 0x104   :  { %1048 = vmatmul.mubr.bf16.gmra.mrb[20].mxu0 %v767_v41 }
 0x105   :  { %v323_v42 = vpop.permute.xlu1 %322 }
 0x106   :  { %v593_v43 = vpop.permute.xlu0 %592  ;;  %341 = vst.msk [vmem:[#allocation3 + $0x90] sm:$0xff] %vm334_vm8, %v323_v42 }
 0x107   :  { %611 = vst.msk [vmem:[#allocation3 + $0x98] sm:$0xff] %vm12949_vm9, %v593_v43 }
 0x108   :  { %413 = vst.msk [vmem:[#allocation3 + $0x90] sm:$0xff] %vm399_vm10, %v388_v36 }
 0x109   :  { %v390_v44 = vpop.permute.xlu1 %389 }
 0x10a   :  { %v658_v45 = vpop.permute.xlu0 %657  ;;  %416 = vst.msk [vmem:[#allocation3 + $0xb0] sm:$0xff] %vm401_vm4, %v390_v44 }
 0x10b   :  { %683 = vst.msk [vmem:[#allocation3 + $0x98] sm:$0xff] %vm12942_vm11, %v658_v45 }
 0x10c   :  { %684 = vst.msk [vmem:[#allocation3 + $0xa0] sm:$0xff] %vm12941_vm3, %v658_v45 }
 0x10d   :  { %v732_v46 = vpop.permute.xlu1 %731 }
 0x10e   :  { %v660_v47 = vpop.permute.xlu0 %659  ;;  %750 = vst.msk [vmem:[#allocation3 + $0xa0] sm:$0xff] %vm12940_vm12, %v732_v46 }
 0x10f   :  { %686 = vst.msk [vmem:[#allocation3 + $0xb8] sm:$0xff] %vm12941_vm3, %v660_v47  ;;  %v770_v51 = vld [vmem:[#allocation3 + $0x90] sm:$0xff]  ;;  %vm12943_vm3 = vcmask 1046534  }
 0x111   :  { %v734_v48 = vpop.permute.xlu1 %733 }
 0x112   :  { %v464_v49 = vpop.permute.xlu0 %463  ;;  %751 = vst.msk [vmem:[#allocation3 + $0xb8] sm:$0xff] %vm12940_vm12, %v734_v48  ;;  %v771_v50 = vld [vmem:[#allocation3 + $0x98] sm:$0xff]  ;;  %vm12951_vm12 = vcmask 1045509  }
 0x113   :  { %481 = vst.msk [vmem:[#allocation3 + $0xb0] sm:$0xff] %vm12950_vm6, %v464_v49  ;;  %1055 = vmatprep.mubr.bf16.mxu0 %v771_v50 }
 0x114   :  { %1056 = vmatmul.mubr.bf16.gmra.mrb[24].mxu0 %v770_v51 }
 0x115   :  { %v260_v54 = vpop.permute.xlu1 %259  ;;  %v772_v55 = vld [vmem:[#allocation3 + $0xa0] sm:$0xff] }
 0x116   :  { %v529_v57 = vpop.permute.xlu0 %528  ;;  %277 = vst.msk [vmem:[#allocation3 + $0xa8] sm:$0xff] %vm269_vm5, %v260_v54  ;;  %8619 = vmatprep.mubr.bf16.mxu1 %v772_v55 }
 0x117   :  { %546 = vst.msk [vmem:[#allocation3 + $0xb0] sm:$0xff] %vm12948_vm7, %v529_v57 }
 0x119   :  { %v325_v58 = vpop.permute.xlu1 %324  ;;  %v775_v61 = vld [vmem:[#allocation3 + $0xb8] sm:$0xff] }
 0x11a   :  { %v595_v1 = vpop.permute.xlu0 %594  ;;  %342 = vst.msk [vmem:[#allocation3 + $0xa8] sm:$0xff] %vm334_vm8, %v325_v58  ;;  %8620 = vmatmul.mubr.bf16.gmra.mrb[12].mxu1 %v775_v61 }
 0x11b   :  { %612 = vst.msk [vmem:[#allocation3 + $0xb0] sm:$0xff] %vm12949_vm9, %v595_v1 }
 0x11c   :  { %415 = vst.msk [vmem:[#allocation3 + $0xa8] sm:$0xff] %vm399_vm10, %v390_v44 }
 0x11d   :  { %685 = vst.msk [vmem:[#allocation3 + $0xb0] sm:$0xff] %vm12942_vm11, %v660_v47  ;;  %vm12947_vm11 = vcmask 1047559  }
 0x123   :  { %v773_v3 = vld [vmem:[#allocation3 + $0xa8] sm:$0xff] }
 0x124   :  { %v774_v4 = vld [vmem:[#allocation3 + $0xb0] sm:$0xff] }
 0x125   :  { %1063 = vmatprep.mubr.bf16.mxu0 %v774_v4 }
 0x126   :  { %1064 = vmatmul.mubr.bf16.gmra.mrb[28].mxu0 %v773_v3 }
 0x187   :  { %v8287_v5 = vpop.f32.mrb[0].mxu0 }
 0x188   :  { %v8288_v6 = vpop.f32.mrb[1].mxu0 }
 0x189   :  { %v8289_v7 = vadd.f32 %v8288_v6, %v8287_v5  ;;  %v8290_v8 = vpop.f32.mrb[2].mxu0 }
 0x18a   :  { %v8291_v9 = vpop.f32.mrb[3].mxu0 }
 0x18b   :  { %v8292_v10 = vadd.f32 %v8291_v9, %v8290_v8  ;;  %v1010_v13 = vadd.f32 %v8289_v7, %v9848_v11 }
 0x18d   :  { %v1013_v17 = vadd.f32 %v8292_v10, %v9848_v11 }
 0x195   :  { %v8609_v12 = vpop.f32.mrb[0].mxu1 }
 0x196   :  { %v1106_v52 = vpop.f32.mrb[1].mxu1 }
 0x197   :  { %v8293_v14 = vpop.f32.mrb[4].mxu0  ;;  %v9851_v15 = vadd.f32 %v1106_v52, %v1010_v13  ;;  %v8610_v16 = vpop.f32.mrb[2].mxu1 }
 0x198   :  { %v8294_v18 = vpop.f32.mrb[5].mxu0  ;;  %v1109_v53 = vpop.f32.mrb[3].mxu1 }
 0x199   :  { %8830 = vtanh.f32 %v9851_v15  ;;  %v8295_v56 = vadd.f32 %v8294_v18, %v8293_v14  ;;  %v8296_v59 = vpop.f32.mrb[6].mxu0  ;;  %v9855_v19 = vadd.f32 %v1109_v53, %v1013_v17 }
 0x19a   :  { %v8297_v20 = vpop.f32.mrb[7].mxu0 }
 0x19b   :  { %v1018_v21 = vadd.f32 %v8295_v56, %v9848_v11  ;;  %v8298_v22 = vadd.f32 %v8297_v20, %v8296_v59  ;;  %8832 = vtanh.f32 %v9855_v19 }
 0x19d   :  { %v9859_v62 = vadd.f32 %v8609_v12, %v1018_v21  ;;  %v1021_v23 = vadd.f32 %v8298_v22, %v9848_v11 }
 0x19f   :  { %8834 = vtanh.f32 %v9859_v62  ;;  %v9863_v24 = vadd.f32 %v8610_v16, %v1021_v23 }
 0x1a1   :  { %8836 = vtanh.f32 %v9863_v24 }
 0x1a3   :  { %v8831_v25 = vpop.eup %8830 }
 0x1a4   :  { %1393 = vrot.lane.b32.xlu0 %v8831_v25, %s9375_s7 }
 0x1a5   :  { %v8833_v26 = vpop.eup %8832 }
 0x1a6   :  { %1395 = vrot.lane.b32.xlu1 %v8833_v26, %s9375_s7 }
 0x1a7   :  { %v8299_v60 = vpop.f32.mrb[8].mxu0 }
 0x1a8   :  { %v8300_v63 = vpop.f32.mrb[9].mxu0 }
 0x1a9   :  { %v8835_v27 = vpop.eup %8834  ;;  %v8301_v28 = vadd.f32 %v8300_v63, %v8299_v60  ;;  %v8302_v29 = vpop.f32.mrb[10].mxu0 }
 0x1aa   :  { %v8303_v30 = vpop.f32.mrb[11].mxu0  ;;  %1397 = vrot.lane.b32.xlu0 %v8835_v27, %s9375_s7 }
 0x1ab   :  { %v8304_v31 = vadd.f32 %v8303_v30, %v8302_v29  ;;  %v8837_v32 = vpop.eup %8836  ;;  %v1026_v0 = vadd.f32 %v8301_v28, %v9848_v11 }
 0x1ac   :  { %1399 = vrot.lane.b32.xlu1 %v8837_v32, %s9375_s7 }
 0x1ad   :  { %v8613_v33 = vpop.f32.mrb[4].mxu1  ;;  %v1029_v36 = vadd.f32 %v8304_v31, %v9848_v11 }
 0x1ae   :  { %v1122_v2 = vpop.f32.mrb[5].mxu1 }
 0x1af   :  { %v9871_v34 = vadd.f32 %v1122_v2, %v1026_v0  ;;  %v8614_v35 = vpop.f32.mrb[6].mxu1 }
 0x1b0   :  { %v1125_v37 = vpop.f32.mrb[7].mxu1 }
 0x1b1   :  { %8838 = vtanh.f32 %v9871_v34  ;;  %v9875_v38 = vadd.f32 %v1125_v37, %v1029_v36  ;;  %v7925_v37 = vmul.f32 -1.442695, %v9851_v15 }
 0x1b3   :  { %8840 = vtanh.f32 %v9875_v38 }
 0x1b9   :  { %v8305_v39 = vpop.f32.mrb[12].mxu0 }
 0x1ba   :  { %v8306_v40 = vpop.f32.mrb[13].mxu0 }
 0x1bb   :  { %v8307_v41 = vadd.f32 %v8306_v40, %v8305_v39  ;;  %v8308_v42 = vpop.f32.mrb[14].mxu0  ;;  %v8839_v43 = vpop.eup %8838 }
 0x1bc   :  { %v8309_v44 = vpop.f32.mrb[15].mxu0  ;;  %1401 = vrot.lane.b32.xlu0 %v8839_v43, %s9375_s7 }
 0x1bd   :  { %v1034_v45 = vadd.f32 %v8307_v41, %v9848_v11  ;;  %v8310_v46 = vadd.f32 %v8309_v44, %v8308_v42  ;;  %v8841_v47 = vpop.eup %8840  ;;  %v7926_v41 = vmul.f32 -1.442695, %v9855_v19  ;;  %v7928_v19 = vmul.f32 -1.442695, %v9863_v24  ;;  %v1281_v24 = vld [vmem:[#allocation4] sm:$0xff] }
 0x1be   :  { %1403 = vrot.lane.b32.xlu1 %v8841_v47, %s9375_s7 }
 0x1bf   :  { %v9880_v48 = vadd.f32 %v8613_v33, %v1034_v45  ;;  %v1037_v49 = vadd.f32 %v8310_v46, %v9848_v11  ;;  %v7927_v46 = vmul.f32 -1.442695, %v9859_v62 }
 0x1c1   :  { %v9884_v50 = vadd.f32 %v8614_v35, %v1037_v49  ;;  %8842 = vtanh.f32 %v9880_v48 }
 0x1c3   :  { %8844 = vtanh.f32 %v9884_v50 }
 0x1c7   :  { %v8311_v51 = vpop.f32.mrb[16].mxu0 }
 0x1c8   :  { %v8312_v54 = vpop.f32.mrb[17].mxu0 }
 0x1c9   :  { %v8313_v55 = vadd.f32 %v8312_v54, %v8311_v51  ;;  %v8314_v57 = vpop.f32.mrb[18].mxu0 }
 0x1ca   :  { %v8315_v58 = vpop.f32.mrb[19].mxu0 }
 0x1cb   :  { %v8843_v61 = vpop.eup %8842  ;;  %v8316_v1 = vadd.f32 %v8315_v58, %v8314_v57  ;;  %v1042_v5 = vadd.f32 %v8313_v55, %v9848_v11  ;;  %v1282_v57 = vld [vmem:[#allocation4 + $0x8] sm:$0xff] }
 0x1cc   :  { %1405 = vrot.lane.b32.xlu0 %v8843_v61, %s9375_s7 }
 0x1cd   :  { %v8845_v3 = vpop.eup %8844  ;;  %v1045_v10 = vadd.f32 %v8316_v1, %v9848_v11 }
 0x1ce   :  { %1407 = vrot.lane.b32.xlu1 %v8845_v3, %s9375_s7 }
 0x1d5   :  { %v8617_v4 = vpop.f32.mrb[8].mxu1 }
 0x1d6   :  { %v1138_v6 = vpop.f32.mrb[9].mxu1 }
 0x1d7   :  { %v8317_v7 = vpop.f32.mrb[20].mxu0  ;;  %v9891_v8 = vadd.f32 %v1138_v6, %v1042_v5  ;;  %v8618_v9 = vpop.f32.mrb[10].mxu1 }
 0x1d8   :  { %v8318_v12 = vpop.f32.mrb[21].mxu0  ;;  %v1141_v13 = vpop.f32.mrb[11].mxu1 }
 0x1d9   :  { %8846 = vtanh.f32 %v9891_v8  ;;  %v8319_v52 = vadd.f32 %v8318_v12, %v8317_v7  ;;  %v8320_v14 = vpop.f32.mrb[22].mxu0  ;;  %v9895_v16 = vadd.f32 %v1141_v13, %v1045_v10  ;;  %v7929_v7 = vmul.f32 -1.442695, %v9871_v34 }
 0x1da   :  { %v8321_v17 = vpop.f32.mrb[23].mxu0  ;;  %v7930_v10 = vmul.f32 -1.442695, %v9875_v38 }
 0x1db   :  { %v1050_v18 = vadd.f32 %v8319_v52, %v9848_v11  ;;  %v8322_v53 = vadd.f32 %v8321_v17, %v8320_v14  ;;  %8848 = vtanh.f32 %v9895_v16 }
 0x1dd   :  { %v9899_v56 = vadd.f32 %v8617_v4, %v1050_v18  ;;  %v1053_v59 = vadd.f32 %v8322_v53, %v9848_v11  ;;  %v1283_v18 = vld [vmem:[#allocation4 + $0x10] sm:$0xff] }
 0x1df   :  { %8850 = vtanh.f32 %v9899_v56  ;;  %v9903_v20 = vadd.f32 %v8618_v9, %v1053_v59 }
 0x1e1   :  { %8852 = vtanh.f32 %v9903_v20 }
 0x1e3   :  { %v8847_v21 = vpop.eup %8846 }
 0x1e4   :  { %1409 = vrot.lane.b32.xlu0 %v8847_v21, %s9375_s7 }
 0x1e5   :  { %v8849_v22 = vpop.eup %8848 }
 0x1e6   :  { %1411 = vrot.lane.b32.xlu1 %v8849_v22, %s9375_s7  ;;  %v1284_v22 = vld [vmem:[#allocation4 + $0x18] sm:$0xff] }
 0x1e7   :  { %v8323_v23 = vpop.f32.mrb[24].mxu0 }
 0x1e8   :  { %v8324_v25 = vpop.f32.mrb[25].mxu0 }
 0x1e9   :  { %v8851_v26 = vpop.eup %8850  ;;  %v8325_v60 = vadd.f32 %v8324_v25, %v8323_v23  ;;  %v8326_v63 = vpop.f32.mrb[26].mxu0  ;;  %v7931_v23 = vmul.f32 -1.442695, %v9880_v48  ;;  %v1286_v48 = vld [vmem:[#allocation4 + $0x28] sm:$0xff] }
 0x1ea   :  { %v8327_v27 = vpop.f32.mrb[27].mxu0  ;;  %1413 = vrot.lane.b32.xlu0 %v8851_v26, %s9375_s7 }
 0x1eb   :  { %v8328_v28 = vadd.f32 %v8327_v27, %v8326_v63  ;;  %v8853_v29 = vpop.eup %8852  ;;  %v1058_v31 = vadd.f32 %v8325_v60, %v9848_v11 }
 0x1ec   :  { %1415 = vrot.lane.b32.xlu1 %v8853_v29, %s9375_s7  ;;  %v7932_v29 = vmul.f32 -1.442695, %v9884_v50 }
 0x1ed   :  { %v8621_v30 = vpop.f32.mrb[12].mxu1  ;;  %v1061_v2 = vadd.f32 %v8328_v28, %v9848_v11  ;;  %v1285_v28 = vld [vmem:[#allocation4 + $0x20] sm:$0xff] }
 0x1ee   :  { %v1154_v32 = vpop.f32.mrb[13].mxu1 }
 0x1ef   :  { %v9911_v33 = vadd.f32 %v1154_v32, %v1058_v31  ;;  %v8622_v0 = vpop.f32.mrb[14].mxu1  ;;  %v1287_v31 = vld [vmem:[#allocation4 + $0x30] sm:$0xff] }
 0x1f0   :  { %v1157_v35 = vpop.f32.mrb[15].mxu1 }
 0x1f1   :  { %8854 = vtanh.f32 %v9911_v33  ;;  %v9915_v36 = vadd.f32 %v1157_v35, %v1061_v2  ;;  %v1288_v35 = vld [vmem:[#allocation4 + $0x38] sm:$0xff] }
 0x1f3   :  { %8856 = vtanh.f32 %v9915_v36 }
 0x1f4   :  { %8858 = vpow2.f32 %v7925_v37 }
 0x1f5   :  { %8860 = vpow2.f32 %v7926_v41 }
 0x1f6   :  { %8862 = vpow2.f32 %v7927_v46  ;;  %v7934_v46 = vmul.f32 -1.442695, %v9895_v16 }
 0x1f9   :  { %v8329_v39 = vpop.f32.mrb[28].mxu0 }
 0x1fa   :  { %v8330_v40 = vpop.f32.mrb[29].mxu0 }
 0x1fb   :  { %v8331_v42 = vadd.f32 %v8330_v40, %v8329_v39  ;;  %v8332_v43 = vpop.f32.mrb[30].mxu0  ;;  %v8855_v44 = vpop.eup %8854 }
 0x1fc   :  { %v8333_v45 = vpop.f32.mrb[31].mxu0  ;;  %1417 = vrot.lane.b32.xlu0 %v8855_v44, %s9375_s7 }
 0x1fd   :  { %v1066_v47 = vadd.f32 %v8331_v42, %v9848_v11  ;;  %v8334_v49 = vadd.f32 %v8333_v45, %v8332_v43  ;;  %v8857_v51 = vpop.eup %8856  ;;  %v1289_v42 = vld [vmem:[#allocation4 + $0x40] sm:$0xff]  ;;  %v7933_v45 = vmul.f32 -1.442695, %v9891_v8 }
 0x1fe   :  { %1419 = vrot.lane.b32.xlu1 %v8857_v51, %s9375_s7  ;;  %v8859_v62 = vpop.eup %8858 }
 0x1ff   :  { %v9923_v54 = vadd.f32 %v8621_v30, %v1066_v47  ;;  %v1069_v15 = vadd.f32 %v8334_v49, %v9848_v11  ;;  %v8861_v58 = vpop.eup %8860  ;;  %v1217_v61 = vadd.f32 1.0, %v8859_v62  ;;  %v7935_v47 = vmul.f32 -1.442695, %v9899_v56  ;;  %v1290_v56 = vld [vmem:[#allocation4 + $0x48] sm:$0xff] }
 0x200   :  { %v8863_v1 = vpop.eup %8862  ;;  %v1218_v3 = vadd.f32 1.0, %v8861_v58 }
 0x201   :  { %v9928_v55 = vadd.f32 %v8622_v0, %v1069_v15  ;;  %8864 = vtanh.f32 %v9923_v54  ;;  %v1219_v5 = vadd.f32 1.0, %v8863_v1 }
 0x202   :  { %1315 = vrot.lane.b32.xlu1 %v1282_v57, %s9375_s7  ;;  %8866 = vpow2.f32 %v7928_v19  ;;  %v7936_v19 = vmul.f32 -1.442695, %v9903_v20 }
 0x203   :  { %8868 = vtanh.f32 %v9928_v55 }
 0x204   :  { %8870 = vrcp.f32 %v1217_v61 }
 0x205   :  { %8872 = vrcp.f32 %v1218_v3 }
 0x206   :  { %8874 = vrcp.f32 %v1219_v5  ;;  %v7938_v5 = vmul.f32 -1.442695, %v9915_v36 }
 0x207   :  { %8876 = vpow2.f32 %v7929_v7 }
 0x20b   :  { %v8865_v11 = vpop.eup %8864 }
 0x20c   :  { %1421 = vrot.lane.b32.xlu0 %v8865_v11, %s9375_s7  ;;  %v8867_v4 = vpop.eup %8866 }
 0x20d   :  { %v8869_v6 = vpop.eup %8868  ;;  %v1220_v9 = vadd.f32 1.0, %v8867_v4 }
 0x20e   :  { %1423 = vrot.lane.b32.xlu1 %v8869_v6, %s9375_s7  ;;  %v9938_v12 = vpop.eup %8870 }
 0x20f   :  { %8878 = vrcp.f32 %v1220_v9  ;;  %v9941_v14 = vpop.eup %8872 }
 0x210   :  { %1313 = vrot.lane.b32.xlu0 %v1281_v24, %s9375_s7  ;;  %8880 = vpow2.f32 %v7930_v10  ;;  %v9945_v53 = vpop.eup %8874  ;;  %v7937_v24 = vmul.f32 -1.442695, %v9911_v33  ;;  %v1291_v33 = vld [vmem:[#allocation4 + $0x50] sm:$0xff] }
 0x211   :  { %v8877_v59 = vpop.eup %8876  ;;  %8882 = vpow2.f32 %v7931_v23 }
 0x212   :  { %v1221_v60 = vadd.f32 1.0, %v8877_v59  ;;  %v7939_v59 = vmul.f32 -1.442695, %v9923_v54  ;;  %v1294_v54 = vld [vmem:[#allocation4 + $0x68] sm:$0xff] }
 0x214   :  { %8884 = vrcp.f32 %v1221_v60 }
 0x215   :  { %8886 = vpow2.f32 %v7932_v29  ;;  %v1295_v29 = vld [vmem:[#allocation4 + $0x70] sm:$0xff] }
 0x216   :  { %v1394_v13 = vpop.permute.xlu0 %1393 }
 0x217   :  { %v1441_v52 = vmul.f32 %v9938_v12, %v1394_v13 }
 0x218   :  { %v1396_v17 = vpop.permute.xlu1 %1395 }
 0x219   :  { %1473 = vrot.lane.b32.xlu0 %v1441_v52, %s9375_s7  ;;  %v1442_v34 = vmul.f32 %v9941_v14, %v1396_v17  ;;  %v9951_v26 = vpop.eup %8878 }
 0x21a   :  { %v8881_v63 = vpop.eup %8880 }
 0x21b   :  { %1475 = vrot.lane.b32.xlu1 %v1442_v34, %s9375_s7  ;;  %v1222_v30 = vadd.f32 1.0, %v8881_v63  ;;  %v8883_v32 = vpop.eup %8882  ;;  %v1293_v63 = vld [vmem:[#allocation4 + $0x60] sm:$0xff] }
 0x21c   :  { %v1398_v38 = vpop.permute.xlu0 %1397  ;;  %v1223_v37 = vadd.f32 1.0, %v8883_v32  ;;  %v1296_v32 = vld [vmem:[#allocation4 + $0x78] sm:$0xff] }
 0x21d   :  { %v1443_v21 = vmul.f32 %v9945_v53, %v1398_v38  ;;  %1317 = vrot.lane.b32.xlu0 %v1283_v18, %s9375_s7  ;;  %8888 = vrcp.f32 %v1222_v30  ;;  %v1292_v38 = vld [vmem:[#allocation4 + $0x58] sm:$0xff] }
 0x21e   :  { %v1400_v25 = vpop.permute.xlu1 %1399  ;;  %v9961_v0 = vpop.eup %8884  ;;  %8890 = vrcp.f32 %v1223_v37 }
 0x21f   :  { %1477 = vrot.lane.b32.xlu1 %v1443_v21, %s9375_s7  ;;  %v1444_v27 = vmul.f32 %v9951_v26, %v1400_v25  ;;  %v8887_v39 = vpop.eup %8886 }
 0x220   :  { %v1224_v44 = vadd.f32 1.0, %v8887_v39 }
 0x221   :  { %1319 = vrot.lane.b32.xlu0 %v1284_v22, %s9375_s7 }
 0x222   :  { %8892 = vrcp.f32 %v1224_v44 }
 0x223   :  { %1479 = vrot.lane.b32.xlu1 %v1444_v27, %s9375_s7  ;;  %8894 = vpow2.f32 %v7933_v45  ;;  %v7940_v27 = vmul.f32 -1.442695, %v9928_v55 }
 0x224   :  { %8896 = vpow2.f32 %v7934_v46 }
 0x225   :  { %1321 = vrot.lane.b32.xlu0 %v1285_v28, %s9375_s7  ;;  %8898 = vpow2.f32 %v7935_v47 }
 0x226   :  { %8900 = vpow2.f32 %v7936_v19 }
 0x227   :  { %v9966_v41 = vpop.eup %8888 }
 0x228   :  { %v9974_v49 = vpop.eup %8890 }
 0x229   :  { %1323 = vrot.lane.b32.xlu0 %v1286_v48, %s9375_s7 }
 0x22c   :  { %v9979_v57 = vpop.eup %8892 }
 0x22d   :  { %1325 = vrot.lane.b32.xlu0 %v1287_v31, %s9375_s7  ;;  %v8895_v16 = vpop.eup %8894 }
 0x22e   :  { %v1402_v2 = vpop.permute.xlu0 %1401  ;;  %v8897_v58 = vpop.eup %8896  ;;  %v1225_v61 = vadd.f32 1.0, %v8895_v16 }
 0x22f   :  { %v1445_v50 = vmul.f32 %v9961_v0, %v1402_v2  ;;  %v8899_v1 = vpop.eup %8898  ;;  %v1226_v11 = vadd.f32 1.0, %v8897_v58 }
 0x230   :  { %v1404_v40 = vpop.permute.xlu1 %1403  ;;  %8902 = vrcp.f32 %v1225_v61  ;;  %v1227_v20 = vadd.f32 1.0, %v8899_v1  ;;  %v8901_v3 = vpop.eup %8900 }
 0x231   :  { %1481 = vrot.lane.b32.xlu1 %v1445_v50, %s9375_s7  ;;  %1327 = vrot.lane.b32.xlu0 %v1288_v35, %s9375_s7  ;;  %v1446_v43 = vmul.f32 %v9966_v41, %v1404_v40  ;;  %8904 = vrcp.f32 %v1226_v11  ;;  %v1228_v4 = vadd.f32 1.0, %v8901_v3 }
 0x232   :  { %8906 = vrcp.f32 %v1227_v20 }
 0x233   :  { %8908 = vpow2.f32 %v7937_v24 }
 0x234   :  { %8910 = vrcp.f32 %v1228_v4 }
 0x235   :  { %1483 = vrot.lane.b32.xlu1 %v1446_v43, %s9375_s7  ;;  %1329 = vrot.lane.b32.xlu0 %v1289_v42, %s9375_s7  ;;  %8912 = vpow2.f32 %v7938_v5 }
 0x236   :  { %8914 = vpow2.f32 %v7939_v59 }
 0x23a   :  { %v9986_v6 = vpop.eup %8902 }
 0x23b   :  { %v9989_v10 = vpop.eup %8904 }
 0x23c   :  { %v9993_v17 = vpop.eup %8906 }
 0x23d   :  { %v8909_v34 = vpop.eup %8908 }
 0x23e   :  { %v1406_v51 = vpop.permute.xlu0 %1405  ;;  %v9999_v22 = vpop.eup %8910  ;;  %v1229_v23 = vadd.f32 1.0, %v8909_v34 }
 0x23f   :  { %v1447_v15 = vmul.f32 %v9974_v49, %v1406_v51  ;;  %v8913_v25 = vpop.eup %8912 }
 0x240   :  { %v1408_v8 = vpop.permute.xlu1 %1407  ;;  %8916 = vrcp.f32 %v1229_v23  ;;  %v1230_v28 = vadd.f32 1.0, %v8913_v25  ;;  %v8915_v30 = vpop.eup %8914 }
 0x241   :  { %1485 = vrot.lane.b32.xlu1 %v1447_v15, %s9375_s7  ;;  %v1448_v62 = vmul.f32 %v9979_v57, %v1408_v8  ;;  %8918 = vpow2.f32 %v7940_v27  ;;  %v1231_v2 = vadd.f32 1.0, %v8915_v30 }
 0x242   :  { %8920 = vrcp.f32 %v1230_v28 }
 0x243   :  { %8922 = vrcp.f32 %v1231_v2 }
 0x245   :  { %1487 = vrot.lane.b32.xlu1 %v1448_v62, %s9375_s7 }
 0x249   :  { %1331 = vrot.lane.b32.xlu1 %v1290_v56, %s9375_s7 }
 0x24a   :  { %v10009_v48 = vpop.eup %8916 }
 0x24b   :  { %v8919_v35 = vpop.eup %8918 }
 0x24c   :  { %v10014_v37 = vpop.eup %8920  ;;  %v1232_v40 = vadd.f32 1.0, %v8919_v35 }
 0x24d   :  { %v10018_v42 = vpop.eup %8922 }
 0x24e   :  { %8924 = vrcp.f32 %v1232_v40 }
 0x256   :  { %v1410_v7 = vpop.permute.xlu0 %1409 }
 0x257   :  { %v1449_v9 = vmul.f32 %v9986_v6, %v1410_v7 }
 0x258   :  { %v1412_v13 = vpop.permute.xlu1 %1411  ;;  %v10022_v46 = vpop.eup %8924 }
 0x259   :  { %1489 = vrot.lane.b32.xlu0 %v1449_v9, %s9375_s7  ;;  %v1450_v52 = vmul.f32 %v9989_v10, %v1412_v13 }
 0x25b   :  { %1491 = vrot.lane.b32.xlu1 %v1450_v52, %s9375_s7 }
 0x25c   :  { %v1414_v36 = vpop.permute.xlu0 %1413 }
 0x25d   :  { %v1451_v18 = vmul.f32 %v9993_v17, %v1414_v36  ;;  %1333 = vrot.lane.b32.xlu0 %v1291_v33, %s9375_s7 }
 0x25e   :  { %v1416_v21 = vpop.permute.xlu1 %1415 }
 0x25f   :  { %1493 = vrot.lane.b32.xlu1 %v1451_v18, %s9375_s7  ;;  %v1452_v60 = vmul.f32 %v9999_v22, %v1416_v21 }
 0x261   :  { %1335 = vrot.lane.b32.xlu0 %v1292_v38, %s9375_s7 }
 0x263   :  { %1495 = vrot.lane.b32.xlu1 %v1452_v60, %s9375_s7 }
 0x265   :  { %1337 = vrot.lane.b32.xlu0 %v1293_v63, %s9375_s7 }
 0x269   :  { %1339 = vrot.lane.b32.xlu0 %v1294_v54, %s9375_s7 }
 0x26d   :  { %1341 = vrot.lane.b32.xlu0 %v1295_v29, %s9375_s7 }
 0x26e   :  { %v1418_v31 = vpop.permute.xlu0 %1417 }
 0x26f   :  { %v1453_v55 = vmul.f32 %v10009_v48, %v1418_v31 }
 0x270   :  { %v1420_v50 = vpop.permute.xlu1 %1419 }
 0x271   :  { %1497 = vrot.lane.b32.xlu1 %v1453_v55, %s9375_s7  ;;  %1343 = vrot.lane.b32.xlu0 %v1296_v32, %s9375_s7  ;;  %v1454_v39 = vmul.f32 %v10014_v37, %v1420_v50 }
 0x274   :  { %v1316_v43 = vpop.permute.xlu1 %1315 }
 0x275   :  { %1499 = vrot.lane.b32.xlu1 %v1454_v39, %s9375_s7  ;;  %v1362_v16 = vmul.f32 %v9941_v14, %v1316_v43 }
 0x27e   :  { %v1422_v44 = vpop.permute.xlu0 %1421 }
 0x27f   :  { %v1455_v45 = vmul.f32 %v10018_v42, %v1422_v44 }
 0x280   :  { %v1424_v47 = vpop.permute.xlu1 %1423 }
 0x281   :  { %1501 = vrot.lane.b32.xlu1 %v1455_v45, %s9375_s7  ;;  %v1456_v51 = vmul.f32 %v10022_v46, %v1424_v47 }
 0x282   :  { %v1314_v15 = vpop.permute.xlu0 %1313 }
 0x283   :  { %v1361_v19 = vmul.f32 %v9938_v12, %v1314_v15 }
 0x285   :  { %1503 = vrot.lane.b32.xlu1 %v1456_v51, %s9375_s7 }
 0x28b   :  { %v1474_v8 = vpop.permute.xlu0 %1473 }
 0x28c   :  { %v10027_v62 = vadd.f32 %v1474_v8, %v1361_v19 }
 0x28d   :  { %v1476_v56 = vpop.permute.xlu1 %1475 }
 0x28e   :  { %8926 = vtanh.f32 %v10027_v62  ;;  %v10031_v58 = vadd.f32 %v1476_v56, %v1362_v16 }
 0x28f   :  { %v1318_v61 = vpop.permute.xlu0 %1317 }
 0x290   :  { %v1363_v1 = vmul.f32 %v9945_v53, %v1318_v61  ;;  %8928 = vtanh.f32 %v10031_v58 }
 0x291   :  { %v1478_v11 = vpop.permute.xlu1 %1477 }
 0x292   :  { %v10035_v20 = vadd.f32 %v1478_v11, %v1363_v1 }
 0x293   :  { %v1320_v3 = vpop.permute.xlu0 %1319 }
 0x294   :  { %v1364_v24 = vmul.f32 %v9951_v26, %v1320_v3  ;;  %8930 = vtanh.f32 %v10035_v20 }
 0x295   :  { %v1480_v4 = vpop.permute.xlu1 %1479 }
 0x296   :  { %v10039_v5 = vadd.f32 %v1480_v4, %v1364_v24 }
 0x297   :  { %v1322_v13 = vpop.permute.xlu0 %1321 }
 0x298   :  { %v8927_v7 = vpop.eup %8926  ;;  %8932 = vtanh.f32 %v10039_v5  ;;  %v1365_v33 = vmul.f32 %v9961_v0, %v1322_v13 }
 0x299   :  { %1569 = vrot.lane.b32.xlu0 %v8927_v7, %s9375_s7 }
 0x29a   :  { %v8929_v9 = vpop.eup %8928 }
 0x29b   :  { %1571 = vrot.lane.b32.xlu1 %v8929_v9, %s9375_s7  ;;  %v1324_v34 = vpop.permute.xlu0 %1323 }
 0x29c   :  { %v1366_v59 = vmul.f32 %v9966_v41, %v1324_v34 }
 0x29e   :  { %v8931_v52 = vpop.eup %8930 }
 0x29f   :  { %1573 = vrot.lane.b32.xlu0 %v8931_v52, %s9375_s7  ;;  %v1326_v25 = vpop.permute.xlu0 %1325 }
 0x2a0   :  { %v1367_v63 = vmul.f32 %v9974_v49, %v1326_v25 }
 0x2a2   :  { %v8933_v36 = vpop.eup %8932 }
 0x2a3   :  { %v1482_v18 = vpop.permute.xlu1 %1481  ;;  %1575 = vrot.lane.b32.xlu1 %v8933_v36, %s9375_s7  ;;  %v1328_v27 = vpop.permute.xlu0 %1327 }
 0x2a4   :  { %v10046_v38 = vadd.f32 %v1482_v18, %v1365_v33  ;;  %v1368_v30 = vmul.f32 %v9979_v57, %v1328_v27 }
 0x2a6   :  { %8934 = vtanh.f32 %v10046_v38 }
 0x2a7   :  { %v1484_v21 = vpop.permute.xlu1 %1483  ;;  %v1330_v35 = vpop.permute.xlu0 %1329 }
 0x2a8   :  { %v10051_v23 = vadd.f32 %v1484_v21, %v1366_v59  ;;  %v1369_v50 = vmul.f32 %v9986_v6, %v1330_v35 }
 0x2aa   :  { %8936 = vtanh.f32 %v10051_v23 }
 0x2b0   :  { %v8935_v60 = vpop.eup %8934 }
 0x2b1   :  { %1577 = vrot.lane.b32.xlu0 %v8935_v60, %s9375_s7 }
 0x2b3   :  { %v1486_v28 = vpop.permute.xlu1 %1485 }
 0x2b4   :  { %v8937_v54 = vpop.eup %8936  ;;  %v10056_v29 = vadd.f32 %v1486_v28, %v1367_v63 }
 0x2b5   :  { %1579 = vrot.lane.b32.xlu1 %v8937_v54, %s9375_s7 }
 0x2b6   :  { %8938 = vtanh.f32 %v10056_v29 }
 0x2b7   :  { %v1488_v31 = vpop.permute.xlu1 %1487 }
 0x2b8   :  { %v10061_v32 = vadd.f32 %v1488_v31, %v1368_v30 }
 0x2ba   :  { %8940 = vtanh.f32 %v10061_v32 }
 0x2bb   :  { %v1332_v39 = vpop.permute.xlu1 %1331 }
 0x2bc   :  { %v1370_v44 = vmul.f32 %v9989_v10, %v1332_v39 }
 0x2c0   :  { %v8939_v55 = vpop.eup %8938 }
 0x2c1   :  { %1581 = vrot.lane.b32.xlu0 %v8939_v55, %s9375_s7 }
 0x2c4   :  { %v8941_v2 = vpop.eup %8940 }
 0x2c5   :  { %1583 = vrot.lane.b32.xlu1 %v8941_v2, %s9375_s7 }
 0x2cb   :  { %v1490_v40 = vpop.permute.xlu0 %1489 }
 0x2cc   :  { %v10067_v43 = vadd.f32 %v1490_v40, %v1369_v50 }
 0x2cd   :  { %v1492_v45 = vpop.permute.xlu1 %1491 }
 0x2ce   :  { %8942 = vtanh.f32 %v10067_v43  ;;  %v10071_v47 = vadd.f32 %v1492_v45, %v1370_v44 }
 0x2cf   :  { %v1334_v51 = vpop.permute.xlu0 %1333 }
 0x2d0   :  { %v1371_v15 = vmul.f32 %v9993_v17, %v1334_v51  ;;  %8944 = vtanh.f32 %v10071_v47 }
 0x2d1   :  { %v1494_v19 = vpop.permute.xlu1 %1493 }
 0x2d2   :  { %v10075_v8 = vadd.f32 %v1494_v19, %v1371_v15 }
 0x2d3   :  { %v1336_v16 = vpop.permute.xlu0 %1335 }
 0x2d4   :  { %v1372_v56 = vmul.f32 %v9999_v22, %v1336_v16  ;;  %8946 = vtanh.f32 %v10075_v8 }
 0x2d5   :  { %v1496_v61 = vpop.permute.xlu1 %1495 }
 0x2d6   :  { %v10079_v1 = vadd.f32 %v1496_v61, %v1372_v56 }
 0x2d7   :  { %v1338_v24 = vpop.permute.xlu0 %1337 }
 0x2d8   :  { %v8943_v11 = vpop.eup %8942  ;;  %8948 = vtanh.f32 %v10079_v1  ;;  %v1373_v7 = vmul.f32 %v10009_v48, %v1338_v24 }
 0x2d9   :  { %1585 = vrot.lane.b32.xlu0 %v8943_v11, %s9375_s7 }
 0x2da   :  { %v8945_v3 = vpop.eup %8944 }
 0x2db   :  { %1587 = vrot.lane.b32.xlu1 %v8945_v3, %s9375_s7  ;;  %v1340_v13 = vpop.permute.xlu0 %1339 }
 0x2dc   :  { %v1374_v36 = vmul.f32 %v10014_v37, %v1340_v13 }
 0x2de   :  { %v8947_v4 = vpop.eup %8946 }
 0x2df   :  { %1589 = vrot.lane.b32.xlu0 %v8947_v4, %s9375_s7  ;;  %v1342_v59 = vpop.permute.xlu0 %1341 }
 0x2e0   :  { %v1375_v25 = vmul.f32 %v10018_v42, %v1342_v59 }
 0x2e2   :  { %v8949_v9 = vpop.eup %8948 }
 0x2e3   :  { %v1498_v52 = vpop.permute.xlu1 %1497  ;;  %1591 = vrot.lane.b32.xlu1 %v8949_v9, %s9375_s7  ;;  %v1344_v60 = vpop.permute.xlu0 %1343 }
 0x2e4   :  { %v10086_v33 = vadd.f32 %v1498_v52, %v1373_v7  ;;  %v1376_v54 = vmul.f32 %v10022_v46, %v1344_v60 }
 0x2e6   :  { %8950 = vtanh.f32 %v10086_v33 }
 0x2e7   :  { %v1500_v34 = vpop.permute.xlu1 %1499 }
 0x2e8   :  { %v10091_v18 = vadd.f32 %v1500_v34, %v1374_v36 }
 0x2ea   :  { %8952 = vtanh.f32 %v10091_v18 }
 0x2f0   :  { %v8951_v21 = vpop.eup %8950 }
 0x2f1   :  { %1593 = vrot.lane.b32.xlu0 %v8951_v21, %s9375_s7 }
 0x2f3   :  { %v1502_v63 = vpop.permute.xlu1 %1501 }
 0x2f4   :  { %v8953_v27 = vpop.eup %8952  ;;  %v10096_v28 = vadd.f32 %v1502_v63, %v1375_v25 }
 0x2f5   :  { %1595 = vrot.lane.b32.xlu1 %v8953_v27, %s9375_s7 }
 0x2f6   :  { %8954 = vtanh.f32 %v10096_v28 }
 0x2f7   :  { %v1504_v30 = vpop.permute.xlu1 %1503 }
 0x2f8   :  { %v10101_v31 = vadd.f32 %v1504_v30, %v1376_v54 }
 0x2fa   :  { %8956 = vtanh.f32 %v10101_v31 }
 0x300   :  { %v8955_v55 = vpop.eup %8954 }
 0x301   :  { %1597 = vrot.lane.b32.xlu0 %v8955_v55, %s9375_s7 }
 0x304   :  { %v8957_v2 = vpop.eup %8956 }
 0x305   :  { %1599 = vrot.lane.b32.xlu1 %v8957_v2, %s9375_s7 }
 0x30b   :  { %v1570_v35 = vpop.permute.xlu0 %1569 }
 0x30c   :  { %v1617_v50 = vmul.f32 %v9938_v12, %v1570_v35 }
 0x30d   :  { %v1572_v39 = vpop.permute.xlu1 %1571 }
 0x30e   :  { %1729 = vrot.lane.b32.xlu0 %v1617_v50, %s9376_s20  ;;  %v1835_v40 = vrot.slane %v1617_v50, 1  ;;  %v1618_v44 = vmul.f32 %v9941_v14, %v1572_v39  ;;  %v1899_v45 = vrot.slane %v1617_v50, 3  ;;  %v1933_v51 = vrot.slane %v1617_v50, 4 }
 0x30f   :  { %v1967_v15 = vrot.slane %v1617_v50, 5  ;;  %v2031_v19 = vrot.slane %v1617_v50, 7  ;;  %v1869_v16 = vrot.slane %v1617_v50, 2  ;;  %v2001_v25 = vrot.slane %v1617_v50, 6 }
 0x310   :  { %1731 = vrot.lane.b32.xlu1 %v1618_v44, %s9376_s20  ;;  %v1794_v56 = vrot.slane %v1618_v44, 7  ;;  %v1836_v12 = vsel %vm1795_vm13, %v1618_v44, %v1835_v40  ;;  %v1900_v61 = vrot.slane %v1618_v44, 2  ;;  %v1934_v11 = vrot.slane %v1618_v44, 3 }
 0x311   :  { %v1574_v3 = vpop.permute.xlu0 %1573  ;;  %v1968_v24 = vrot.slane %v1618_v44, 4  ;;  %v2032_v4 = vrot.slane %v1618_v44, 6  ;;  %v1870_v7 = vrot.slane %v1618_v44, 1  ;;  %v2002_v9 = vrot.slane %v1618_v44, 5 }
 0x312   :  { %v1619_v14 = vmul.f32 %v9945_v53, %v1574_v3  ;;  %v1796_v13 = vsel %vm1795_vm13, %v1794_v56, %v1617_v50  ;;  %v1901_v52 = vsel %vm1795_vm13, %v1900_v61, %v1899_v45  ;;  %v1935_v36 = vsel %vm1795_vm13, %v1934_v11, %v1933_v51 }
 0x313   :  { %v1969_v34 = vsel %vm1795_vm13, %v1968_v24, %v1967_v15  ;;  %v2033_v59 = vsel %vm1795_vm13, %v2032_v4, %v2031_v19  ;;  %v1871_v21 = vsel %vm1795_vm13, %v1870_v7, %v1869_v16  ;;  %v2003_v35 = vsel %vm1795_vm13, %v2002_v9, %v2001_v25 }
 0x314   :  { %1733 = vrot.lane.b32.xlu0 %v1619_v14, %s9376_s20  ;;  %v1797_v60 = vrot.slane %v1619_v14, 6  ;;  %v1837_v63 = vrot.slane %v1619_v14, 7  ;;  %v1902_v27 = vrot.slane %v1619_v14, 1  ;;  %v1936_v54 = vrot.slane %v1619_v14, 2 }
 0x315   :  { %v1576_v53 = vpop.permute.xlu1 %1575  ;;  %v1970_v30 = vrot.slane %v1619_v14, 3  ;;  %v2034_v55 = vrot.slane %v1619_v14, 5  ;;  %v1872_v2 = vsel %vm1798_vm14, %v1619_v14, %v1871_v21  ;;  %v2004_v19 = vrot.slane %v1619_v14, 4 }
 0x316   :  { %v1620_v39 = vmul.f32 %v9951_v26, %v1576_v53  ;;  %v1799_v40 = vsel %vm1798_vm14, %v1797_v60, %v1796_v13  ;;  %v1838_v44 = vsel %vm1798_vm14, %v1837_v63, %v1836_v12  ;;  %v1903_v50 = vsel %vm1798_vm14, %v1902_v27, %v1901_v52 }
 0x317   :  { %v1937_v45 = vsel %vm1798_vm14, %v1936_v54, %v1935_v36  ;;  %v1971_v51 = vsel %vm1798_vm14, %v1970_v30, %v1969_v34  ;;  %v2035_v15 = vsel %vm1798_vm14, %v2034_v55, %v2033_v59  ;;  %v2005_v12 = vsel %vm1798_vm14, %v2004_v19, %v2003_v35 }
 0x318   :  { %1735 = vrot.lane.b32.xlu1 %v1620_v39, %s9376_s20  ;;  %v1800_v16 = vrot.slane %v1620_v39, 5  ;;  %v1839_v56 = vrot.slane %v1620_v39, 6  ;;  %v1904_v61 = vsel %vm1801_vm15, %v1620_v39, %v1903_v50  ;;  %v1938_v26 = vrot.slane %v1620_v39, 1 }
 0x319   :  { %v1972_v11 = vrot.slane %v1620_v39, 2  ;;  %v2036_v3 = vrot.slane %v1620_v39, 4  ;;  %v1873_v24 = vrot.slane %v1620_v39, 7  ;;  %v2006_v13 = vrot.slane %v1620_v39, 3 }
 0x31a   :  { %v1802_v4 = vsel %vm1801_vm15, %v1800_v16, %v1799_v40  ;;  %v1840_v7 = vsel %vm1801_vm15, %v1839_v56, %v1838_v44  ;;  %v1939_v9 = vsel %vm1801_vm15, %v1938_v26, %v1937_v45 }
 0x31b   :  { %v1973_v14 = vsel %vm1801_vm15, %v1972_v11, %v1971_v51  ;;  %v2037_v52 = vsel %vm1801_vm15, %v2036_v3, %v2035_v15  ;;  %v1874_v36 = vsel %vm1801_vm15, %v1873_v24, %v1872_v2  ;;  %v2007_v34 = vsel %vm1801_vm15, %v2006_v13, %v2005_v12 }
 0x323   :  { %v1578_v59 = vpop.permute.xlu0 %1577 }
 0x324   :  { %v1621_v21 = vmul.f32 %v9961_v0, %v1578_v59 }
 0x326   :  { %1737 = vrot.lane.b32.xlu0 %v1621_v21, %s9376_s20  ;;  %v1803_v25 = vrot.slane %v1621_v21, 4  ;;  %v1841_v60 = vrot.slane %v1621_v21, 5  ;;  %v1905_v63 = vrot.slane %v1621_v21, 7  ;;  %v1940_v54 = vsel %vm1804_vm1, %v1621_v21, %v1939_v9 }
 0x327   :  { %v1580_v27 = vpop.permute.xlu1 %1579  ;;  %v1974_v53 = vrot.slane %v1621_v21, 1  ;;  %v2038_v30 = vrot.slane %v1621_v21, 3  ;;  %v1875_v55 = vrot.slane %v1621_v21, 6  ;;  %v2008_v45 = vrot.slane %v1621_v21, 2 }
 0x328   :  { %v1622_v2 = vmul.f32 %v9966_v41, %v1580_v27  ;;  %v1805_v35 = vsel %vm1804_vm1, %v1803_v25, %v1802_v4  ;;  %v1842_v39 = vsel %vm1804_vm1, %v1841_v60, %v1840_v7  ;;  %v1906_v0 = vsel %vm1804_vm1, %v1905_v63, %v1904_v61 }
 0x329   :  { %v1975_v40 = vsel %vm1804_vm1, %v1974_v53, %v1973_v14  ;;  %v2039_v44 = vsel %vm1804_vm1, %v2038_v30, %v2037_v52  ;;  %v1876_v50 = vsel %vm1804_vm1, %v1875_v55, %v1874_v36  ;;  %v2009_v3 = vsel %vm1804_vm1, %v2008_v45, %v2007_v34 }
 0x32a   :  { %1739 = vrot.lane.b32.xlu1 %v1622_v2, %s9376_s20  ;;  %v1806_v51 = vrot.slane %v1622_v2, 3  ;;  %v1843_v15 = vrot.slane %v1622_v2, 4  ;;  %v1907_v19 = vrot.slane %v1622_v2, 6  ;;  %v1941_v16 = vrot.slane %v1622_v2, 7 }
 0x32b   :  { %v1976_v41 = vsel %vm12951_vm12, %v1622_v2, %v1975_v40  ;;  %v2040_v56 = vrot.slane %v1622_v2, 2  ;;  %v1877_v11 = vrot.slane %v1622_v2, 5  ;;  %v2010_v7 = vrot.slane %v1622_v2, 1 }
 0x32c   :  { %v1808_v26 = vsel %vm12951_vm12, %v1806_v51, %v1805_v35  ;;  %v1844_v61 = vsel %vm12951_vm12, %v1843_v15, %v1842_v39  ;;  %v1908_v24 = vsel %vm12951_vm12, %v1907_v19, %v1906_v0  ;;  %v1942_v12 = vsel %vm12951_vm12, %v1941_v16, %v1940_v54 }
 0x32d   :  { %v2041_v4 = vsel %vm12951_vm12, %v2040_v56, %v2039_v44  ;;  %v1878_v9 = vsel %vm12951_vm12, %v1877_v11, %v1876_v50  ;;  %v2011_v13 = vsel %vm12951_vm12, %v2010_v7, %v2009_v3 }
 0x333   :  { %v1582_v14 = vpop.permute.xlu0 %1581 }
 0x334   :  { %v1623_v52 = vmul.f32 %v9974_v49, %v1582_v14 }
 0x336   :  { %1741 = vrot.lane.b32.xlu0 %v1623_v52, %s9376_s20  ;;  %v1809_v36 = vrot.slane %v1623_v52, 2  ;;  %v1845_v34 = vrot.slane %v1623_v52, 3  ;;  %v1909_v59 = vrot.slane %v1623_v52, 5  ;;  %v1943_v21 = vrot.slane %v1623_v52, 6 }
 0x337   :  { %v1584_v25 = vpop.permute.xlu1 %1583  ;;  %v1977_v60 = vrot.slane %v1623_v52, 7  ;;  %v2042_v63 = vrot.slane %v1623_v52, 1  ;;  %v1879_v27 = vrot.slane %v1623_v52, 4  ;;  %v2012_v54 = vsel %vm12943_vm3, %v1623_v52, %v2011_v13 }
 0x338   :  { %v1624_v53 = vmul.f32 %v9979_v57, %v1584_v25  ;;  %v1811_v30 = vsel %vm12943_vm3, %v1809_v36, %v1808_v26  ;;  %v1846_v49 = vsel %vm12943_vm3, %v1845_v34, %v1844_v61  ;;  %v1910_v55 = vsel %vm12943_vm3, %v1909_v59, %v1908_v24 }
 0x339   :  { %v1944_v2 = vsel %vm12943_vm3, %v1943_v21, %v1942_v12  ;;  %v1978_v35 = vsel %vm12943_vm3, %v1977_v60, %v1976_v41  ;;  %v2043_v39 = vsel %vm12943_vm3, %v2042_v63, %v2041_v4  ;;  %v1880_v0 = vsel %vm12943_vm3, %v1879_v27, %v1878_v9 }
 0x33a   :  { %1743 = vrot.lane.b32.xlu1 %v1624_v53, %s9376_s20  ;;  %v1812_v40 = vrot.slane %v1624_v53, 1  ;;  %v1847_v44 = vrot.slane %v1624_v53, 2  ;;  %v1911_v50 = vrot.slane %v1624_v53, 4  ;;  %v1945_v57 = vrot.slane %v1624_v53, 5 }
 0x33b   :  { %v1979_v45 = vrot.slane %v1624_v53, 6  ;;  %v10171_v51 = vsel %vm12947_vm11, %v1624_v53, %v2043_v39  ;;  %v1881_v15 = vrot.slane %v1624_v53, 3  ;;  %v2013_v19 = vrot.slane %v1624_v53, 7 }
 0x33c   :  { %12964 = vst [vmem:[#allocation8_spill] sm:$0xff] %v10171_v51  ;;  %v10174_v16 = vsel %vm12947_vm11, %v1812_v40, %v1811_v30  ;;  %v10177_v41 = vsel %vm12947_vm11, %v1847_v44, %v1846_v49  ;;  %v10180_v56 = vsel %vm12947_vm11, %v1911_v50, %v1910_v55  ;;  %v10183_v26 = vsel %vm12947_vm11, %v1945_v57, %v1944_v2 }
 0x33d   :  { %v10186_v61 = vsel %vm12947_vm11, %v1979_v45, %v1978_v35  ;;  %v10189_v11 = vsel %vm12947_vm11, %v1881_v15, %v1880_v0  ;;  %v10192_v3 = vsel %vm12947_vm11, %v2013_v19, %v2012_v54 }
 0x33e   :  { %12965 = vst [vmem:[#allocation9_spill] sm:$0xff] %v10186_v61  ;;  %12966 = vst [vmem:[#allocation10_spill] sm:$0xff] %v10189_v11 }
 0x33f   :  { %12967 = vst [vmem:[#allocation11_spill] sm:$0xff] %v10192_v3 }
 0x34b   :  { %v1586_v24 = vpop.permute.xlu0 %1585 }
 0x34c   :  { %v1625_v12 = vmul.f32 %v9986_v6, %v1586_v24 }
 0x34d   :  { %v1588_v4 = vpop.permute.xlu1 %1587 }
 0x34e   :  { %1745 = vrot.lane.b32.xlu0 %v1625_v12, %s9376_s20  ;;  %v1849_v7 = vrot.slane %v1625_v12, 1  ;;  %v1626_v9 = vmul.f32 %v9989_v10, %v1588_v4  ;;  %v1913_v13 = vrot.slane %v1625_v12, 3  ;;  %v1947_v14 = vrot.slane %v1625_v12, 4 }
 0x34f   :  { %v1981_v52 = vrot.slane %v1625_v12, 5  ;;  %v2045_v36 = vrot.slane %v1625_v12, 7  ;;  %v1883_v34 = vrot.slane %v1625_v12, 2  ;;  %v2015_v0 = vrot.slane %v1625_v12, 6 }
 0x350   :  { %1747 = vrot.lane.b32.xlu1 %v1626_v9, %s9376_s20  ;;  %v1815_v59 = vrot.slane %v1626_v9, 7  ;;  %v1850_v21 = vsel %vm1795_vm13, %v1626_v9, %v1849_v7  ;;  %v1914_v25 = vrot.slane %v1626_v9, 2  ;;  %v1948_v60 = vrot.slane %v1626_v9, 3 }
 0x351   :  { %v1590_v63 = vpop.permute.xlu0 %1589  ;;  %v1982_v6 = vrot.slane %v1626_v9, 4  ;;  %v2046_v27 = vrot.slane %v1626_v9, 6  ;;  %v1884_v54 = vrot.slane %v1626_v9, 1  ;;  %v2016_v53 = vrot.slane %v1626_v9, 5 }
 0x352   :  { %v1627_v30 = vmul.f32 %v9993_v17, %v1590_v63  ;;  %v1816_v10 = vsel %vm1795_vm13, %v1815_v59, %v1625_v12  ;;  %v1915_v49 = vsel %vm1795_vm13, %v1914_v25, %v1913_v13  ;;  %v1949_v55 = vsel %vm1795_vm13, %v1948_v60, %v1947_v14 }
 0x353   :  { %v1983_v2 = vsel %vm1795_vm13, %v1982_v6, %v1981_v52  ;;  %v2047_v35 = vsel %vm1795_vm13, %v2046_v27, %v2045_v36  ;;  %v1885_v39 = vsel %vm1795_vm13, %v1884_v54, %v1883_v34  ;;  %v2017_v24 = vsel %vm1795_vm13, %v2016_v53, %v2015_v0 }
 0x354   :  { %1749 = vrot.lane.b32.xlu0 %v1627_v30, %s9376_s20  ;;  %v1817_v40 = vrot.slane %v1627_v30, 6  ;;  %v1851_v44 = vrot.slane %v1627_v30, 7  ;;  %v1916_v50 = vrot.slane %v1627_v30, 1  ;;  %v1950_v57 = vrot.slane %v1627_v30, 2 }
 0x355   :  { %v1592_v17 = vpop.permute.xlu1 %1591  ;;  %v1984_v45 = vrot.slane %v1627_v30, 3  ;;  %v2048_v15 = vrot.slane %v1627_v30, 5  ;;  %v1886_v19 = vsel %vm1798_vm14, %v1627_v30, %v1885_v39  ;;  %v2018_v36 = vrot.slane %v1627_v30, 4 }
 0x356   :  { %v1628_v4 = vmul.f32 %v9999_v22, %v1592_v17  ;;  %v1818_v7 = vsel %vm1798_vm14, %v1817_v40, %v1816_v10  ;;  %v1852_v9 = vsel %vm1798_vm14, %v1851_v44, %v1850_v21  ;;  %v1917_v12 = vsel %vm1798_vm14, %v1916_v50, %v1915_v49 }
 0x357   :  { %v1951_v13 = vsel %vm1798_vm14, %v1950_v57, %v1949_v55  ;;  %v1985_v14 = vsel %vm1798_vm14, %v1984_v45, %v1983_v2  ;;  %v2049_v52 = vsel %vm1798_vm14, %v2048_v15, %v2047_v35  ;;  %v2019_v21 = vsel %vm1798_vm14, %v2018_v36, %v2017_v24 }
 0x358   :  { %1751 = vrot.lane.b32.xlu1 %v1628_v4, %s9376_s20  ;;  %v1819_v34 = vrot.slane %v1628_v4, 5  ;;  %v1853_v59 = vrot.slane %v1628_v4, 6  ;;  %v1918_v25 = vsel %vm1801_vm15, %v1628_v4, %v1917_v12  ;;  %v1952_v22 = vrot.slane %v1628_v4, 1 }
 0x359   :  { %v1986_v60 = vrot.slane %v1628_v4, 2  ;;  %v2050_v63 = vrot.slane %v1628_v4, 4  ;;  %v1887_v6 = vrot.slane %v1628_v4, 7  ;;  %v2020_v10 = vrot.slane %v1628_v4, 3 }
 0x35a   :  { %v1820_v27 = vsel %vm1801_vm15, %v1819_v34, %v1818_v7  ;;  %v1854_v54 = vsel %vm1801_vm15, %v1853_v59, %v1852_v9  ;;  %v1953_v53 = vsel %vm1801_vm15, %v1952_v22, %v1951_v13 }
 0x35b   :  { %v1987_v30 = vsel %vm1801_vm15, %v1986_v60, %v1985_v14  ;;  %v2051_v49 = vsel %vm1801_vm15, %v2050_v63, %v2049_v52  ;;  %v1888_v55 = vsel %vm1801_vm15, %v1887_v6, %v1886_v19  ;;  %v2021_v2 = vsel %vm1801_vm15, %v2020_v10, %v2019_v21 }
 0x363   :  { %v1594_v35 = vpop.permute.xlu0 %1593 }
 0x364   :  { %v1629_v39 = vmul.f32 %v10009_v48, %v1594_v35  ;;  %v8758_v48 = vld [vmem:[%s12937_s1 + $0x80] sm:$0xff]  }
 0x365   :  { %8623 = vmatprep.subr.bf16.mxu0 %v8758_v48  ;;  %v8760_v35 = vld [vmem:[%s12937_s1 + $0x40] sm:$0xff]  }
 0x366   :  { %1753 = vrot.lane.b32.xlu0 %v1629_v39, %s9376_s20  ;;  %v1821_v0 = vrot.slane %v1629_v39, 4  ;;  %v1855_v40 = vrot.slane %v1629_v39, 5  ;;  %v1919_v44 = vrot.slane %v1629_v39, 7  ;;  %v1954_v57 = vsel %vm1804_vm1, %v1629_v39, %v1953_v53  ;;  %8624 = vmatpush3.bf16.msra.mxu0 %v8758_v48 }
 0x367   :  { %v1596_v50 = vpop.permute.xlu1 %1595  ;;  %v1988_v17 = vrot.slane %v1629_v39, 1  ;;  %v2052_v45 = vrot.slane %v1629_v39, 3  ;;  %v1889_v15 = vrot.slane %v1629_v39, 6  ;;  %v2022_v14 = vrot.slane %v1629_v39, 2  ;;  %8351 = vmatprep.subr.bf16.mxu1 %v8760_v35  ;;  %v8766_v35 = vld [vmem:[%s12937_s1 + $0x10] sm:$0xff]  }
 0x368   :  { %v1630_v24 = vmul.f32 %v10014_v37, %v1596_v50  ;;  %v1822_v19 = vsel %vm1804_vm1, %v1821_v0, %v1820_v27  ;;  %v1856_v4 = vsel %vm1804_vm1, %v1855_v40, %v1854_v54  ;;  %v1920_v7 = vsel %vm1804_vm1, %v1919_v44, %v1918_v25 }
 0x369   :  { %v1989_v9 = vsel %vm1804_vm1, %v1988_v17, %v1987_v30  ;;  %v2053_v12 = vsel %vm1804_vm1, %v2052_v45, %v2051_v49  ;;  %v1890_v13 = vsel %vm1804_vm1, %v1889_v15, %v1888_v55  ;;  %v2023_v6 = vsel %vm1804_vm1, %v2022_v14, %v2021_v2  ;;  %v8759_v49 = vld [vmem:[%s12937_s1 + $0x88] sm:$0xff]  }
 0x36a   :  { %1755 = vrot.lane.b32.xlu1 %v1630_v24, %s9376_s20  ;;  %v1823_v37 = vrot.slane %v1630_v24, 3  ;;  %v1857_v52 = vrot.slane %v1630_v24, 4  ;;  %v1921_v36 = vrot.slane %v1630_v24, 6  ;;  %v1955_v34 = vrot.slane %v1630_v24, 7  ;;  %8625 = vmatprep.subr.bf16.mxu0 %v8759_v49 }
 0x36b   :  { %v1990_v59 = vsel %vm12951_vm12, %v1630_v24, %v1989_v9  ;;  %v2054_v25 = vrot.slane %v1630_v24, 2  ;;  %v1891_v63 = vrot.slane %v1630_v24, 5  ;;  %v2024_v53 = vrot.slane %v1630_v24, 1  ;;  %8626 = vmatpush3.bf16.msra.mxu0 %v8759_v49 }
 0x36c   :  { %v1824_v22 = vsel %vm12951_vm12, %v1823_v37, %v1822_v19  ;;  %v1858_v60 = vsel %vm12951_vm12, %v1857_v52, %v1856_v4  ;;  %v1922_v21 = vsel %vm12951_vm12, %v1921_v36, %v1920_v7  ;;  %v1956_v27 = vsel %vm12951_vm12, %v1955_v34, %v1954_v57  ;;  %v8761_v57 = vld [vmem:[%s12937_s1] sm:$0xff]   ;;  %v8762_v19 = vld [vmem:[%s12937_s1 + $0x48] sm:$0xff]   ;;  %v8763_v4 = vld [vmem:[%s12937_s1 + $0x90] sm:$0xff]  }
 0x36d   :  { %v2055_v54 = vsel %vm12951_vm12, %v2054_v25, %v2053_v12  ;;  %v1892_v10 = vsel %vm12951_vm12, %v1891_v63, %v1890_v13  ;;  %v2025_v30 = vsel %vm12951_vm12, %v2024_v53, %v2023_v6  ;;  %8352 = vmatpush3.bf16.msra.mxu1 %v8761_v57  ;;  %v8247_v25 = vld [vmem:[%s12936_s0 + $0x40] sm:$0xff]   ;;  %8627 = vmatprep.subr.bf16.mxu0 %v8763_v4 }
 0x36e   :  { %8353 = vmatprep.subr.bf16.mxu1 %v8762_v19  ;;  %v2132_v19 = vld [vmem:[#allocation2] sm:$0xff] }
 0x36f   :  { %8628 = vmatpush3.bf16.msra.mxu0 %v8763_v4  ;;  %v2228_v4 = vld [vmem:[#allocation2 + $0x2] sm:$0xff] }
 0x373   :  { %v1598_v55 = vpop.permute.xlu0 %1597 }
 0x374   :  { %v1631_v2 = vmul.f32 %v10018_v42, %v1598_v55 }
 0x376   :  { %1757 = vrot.lane.b32.xlu0 %v1631_v2, %s9376_s20  ;;  %v1825_v39 = vrot.slane %v1631_v2, 2  ;;  %v1859_v0 = vrot.slane %v1631_v2, 3  ;;  %v1923_v40 = vrot.slane %v1631_v2, 5  ;;  %v1957_v44 = vrot.slane %v1631_v2, 6 }
 0x377   :  { %v1600_v50 = vpop.permute.xlu1 %1599  ;;  %v1991_v17 = vrot.slane %v1631_v2, 7  ;;  %v2056_v45 = vrot.slane %v1631_v2, 1  ;;  %v1893_v15 = vrot.slane %v1631_v2, 4  ;;  %v2026_v42 = vsel %vm12943_vm3, %v1631_v2, %v2025_v30 }
 0x378   :  { %v1632_v24 = vmul.f32 %v10022_v46, %v1600_v50  ;;  %v1826_v7 = vsel %vm12943_vm3, %v1825_v39, %v1824_v22  ;;  %v1860_v48 = vsel %vm12943_vm3, %v1859_v0, %v1858_v60  ;;  %v1924_v9 = vsel %vm12943_vm3, %v1923_v40, %v1922_v21  ;;  %v8765_v21 = vld [vmem:[%s12937_s1 + $0x50] sm:$0xff]   ;;  %v8248_v40 = vld [vmem:[%s12936_s0 + $0x48] sm:$0xff]   ;;  %v8768_v50 = vld [vmem:[%s12937_s1 + $0x98] sm:$0xff]  }
 0x379   :  { %v1958_v12 = vsel %vm12943_vm3, %v1957_v44, %v1956_v27  ;;  %v1992_v13 = vsel %vm12943_vm3, %v1991_v17, %v1990_v59  ;;  %v2057_v46 = vsel %vm12943_vm3, %v2056_v45, %v2055_v54  ;;  %v1894_v14 = vsel %vm12943_vm3, %v1893_v15, %v1892_v10  ;;  %v8764_v59 = vld [vmem:[%s12937_s1 + $0x8] sm:$0xff]   ;;  %v8767_v44 = vld [vmem:[%s12937_s1 + $0x58] sm:$0xff]   ;;  %8629 = vmatprep.subr.bf16.mxu0 %v8768_v50  ;;  %v8770_v15 = vld [vmem:[%s12937_s1 + $0x60] sm:$0xff]  }
 0x37a   :  { %1759 = vrot.lane.b32.xlu1 %v1632_v24, %s9376_s20  ;;  %v1827_v37 = vrot.slane %v1632_v24, 1  ;;  %v1861_v52 = vrot.slane %v1632_v24, 2  ;;  %v1925_v36 = vrot.slane %v1632_v24, 4  ;;  %v1959_v34 = vrot.slane %v1632_v24, 5  ;;  %8354 = vmatpush3.bf16.msra.mxu1 %v8764_v59  ;;  %v8769_v17 = vld [vmem:[%s12937_s1 + $0x18] sm:$0xff]  }
 0x37b   :  { %v1993_v22 = vrot.slane %v1632_v24, 6  ;;  %v10283_v60 = vsel %vm12947_vm11, %v1632_v24, %v2057_v46  ;;  %v1895_v63 = vrot.slane %v1632_v24, 3  ;;  %v2027_v6 = vrot.slane %v1632_v24, 7  ;;  %8355 = vmatprep.subr.bf16.mxu1 %v8765_v21  ;;  %8630 = vmatpush3.bf16.msra.mxu0 %v8768_v50  ;;  %v2164_v24 = vld [vmem:[#allocation2 + $0x1] sm:$0xff]  ;;  %v8777_v50 = vld [vmem:[%s12937_s1 + $0x78] sm:$0xff]  }
 0x37c   :  { %12968 = vst [vmem:[#allocation12_spill] sm:$0xff] %v10283_v60  ;;  %v10289_v27 = vsel %vm12947_vm11, %v1827_v37, %v1826_v7  ;;  %v10292_v54 = vsel %vm12947_vm11, %v1861_v52, %v1860_v48  ;;  %v10295_v53 = vsel %vm12947_vm11, %v1925_v36, %v1924_v9  ;;  %v10298_v10 = vsel %vm12947_vm11, %v1959_v34, %v1958_v12  ;;  %v8771_v7 = vld [vmem:[%s12937_s1 + $0x20] sm:$0xff]   ;;  %v8772_v37 = vld [vmem:[%s12937_s1 + $0x68] sm:$0xff]  }
 0x37d   :  { %12969 = vst [vmem:[#allocation13_spill] sm:$0xff] %v10298_v10  ;;  %v10301_v30 = vsel %vm12947_vm11, %v1993_v22, %v1992_v13  ;;  %v10304_v49 = vsel %vm12947_vm11, %v1895_v63, %v1894_v14  ;;  %v10307_v55 = vsel %vm12947_vm11, %v2027_v6, %v2026_v42  ;;  %vm12946_vm3 = vcmask 293920   ;;  %v8773_v52 = vld [vmem:[%s12937_s1 + $0xa0] sm:$0xff]   ;;  %v8774_v34 = vld [vmem:[%s12937_s1 + $0x28] sm:$0xff]  }
 0x37e   :  { %12970 = vst [vmem:[#allocation14_spill] sm:$0xff] %v10301_v30  ;;  %12971 = vst [vmem:[#allocation15_spill] sm:$0xff] %v10304_v49  ;;  %v8146_v2 = vunpack.c.l.bf16 %v8247_v25  ;;  %v8147_v0 = vunpack.c.h.bf16 %v8247_v25  ;;  %8356 = vmatpush3.bf16.msra.mxu1 %v8766_v35  ;;  %v8150_v45 = vunpack.c.l.bf16 %v8248_v40  ;;  %v8151_v13 = vunpack.c.h.bf16 %v8248_v40  ;;  %8631 = vmatprep.subr.bf16.mxu0 %v8773_v52  ;;  %v8776_v35 = vld [vmem:[%s12937_s1 + $0x30] sm:$0xff]  }
 0x37f   :  { %12972 = vst [vmem:[#allocation16_spill] sm:$0xff] %v10307_v55  ;;  %8357 = vmatprep.subr.bf16.mxu1 %v8767_v44  ;;  %8632 = vmatpush3.bf16.msra.mxu0 %v8773_v52 }
 0x380   :  { %v1730_v39 = vpop.permute.xlu0 %1729 }
 0x381   :  { %1778 = vst.msk [vmem:[#allocation2 + $0x11] sm:$0xff] %vm12946_vm3, %v1730_v39 }
 0x382   :  { %2116 = vst.msk [vmem:[#allocation2 + $0x11] sm:$0xff] %vm12945_vm2, %v8146_v2  ;;  %v1732_v57 = vpop.permute.xlu1 %1731  ;;  %8358 = vmatpush3.bf16.msra.mxu1 %v8769_v17  ;;  %v8775_v2 = vld [vmem:[%s12937_s1 + $0x70] sm:$0xff]  }
 0x383   :  { %1779 = vst.msk [vmem:[#allocation2 + $0x21] sm:$0xff] %vm12946_vm3, %v1732_v57  ;;  %8359 = vmatprep.subr.bf16.mxu1 %v8770_v15  ;;  %v8778_v57 = vld [vmem:[%s12937_s1 + $0xa8] sm:$0xff]   ;;  %v8249_v17 = vld [vmem:[%s12936_s0 + $0x50] sm:$0xff]  }
 0x384   :  { %2117 = vst.msk [vmem:[#allocation2 + $0x21] sm:$0xff] %vm12945_vm2, %v8147_v0  ;;  %8633 = vmatprep.subr.bf16.mxu0 %v8778_v57 }
 0x385   :  { %8634 = vmatpush3.bf16.msra.mxu0 %v8778_v57 }
 0x386   :  { %v1734_v42 = vpop.permute.xlu0 %1733  ;;  %8360 = vmatpush3.bf16.msra.mxu1 %v8771_v7 }
 0x387   :  { %1780 = vst.msk [vmem:[#allocation2 + $0x31] sm:$0xff] %vm12946_vm3, %v1734_v42  ;;  %8361 = vmatprep.subr.bf16.mxu1 %v8772_v37 }
 0x388   :  { %2118 = vst.msk [vmem:[#allocation2 + $0x31] sm:$0xff] %vm12945_vm2, %v8150_v45  ;;  %v8779_v45 = vld [vmem:[%s12937_s1 + $0x38] sm:$0xff]  }
 0x389   :  { %v2165_v48 = vld [vmem:[#allocation2 + $0x11] sm:$0xff] }
 0x38a   :  { %v2292_v9 = vld [vmem:[#allocation2 + $0x10] sm:$0xff]  ;;  %v2180_v46 = vpack.c.bf16 %v2165_v48, %v2164_v24  ;;  %v1736_v36 = vpop.permute.xlu1 %1735  ;;  %8362 = vmatpush3.bf16.msra.mxu1 %v8774_v34 }
 0x38b   :  { %v2229_v12 = vld [vmem:[#allocation2 + $0x12] sm:$0xff]  ;;  %v2148_v14 = vpack.c.bf16 %v2292_v9, %v2132_v19  ;;  %1781 = vst.msk [vmem:[#allocation2 + $0x41] sm:$0xff] %vm12946_vm3, %v1736_v36  ;;  %v2293_v25 = vld [vmem:[#allocation2 + $0x20] sm:$0xff]  ;;  %8363 = vmatprep.subr.bf16.mxu1 %v8775_v2  ;;  %v8154_v19 = vunpack.c.l.bf16 %v8249_v17 }
 0x38c   :  { %2196 = vrot.lane.b32.xlu1 %v2180_v46, %s9370_s11  ;;  %v2244_v59 = vpack.c.bf16 %v2229_v12, %v2228_v4  ;;  %v2429_v22 = vld [vmem:[#allocation2 + $0x22] sm:$0xff]  ;;  %v2308_v63 = vpack.c.bf16 %v2293_v25, %v2292_v9  ;;  %2119 = vst.msk [vmem:[#allocation2 + $0x41] sm:$0xff] %vm12945_vm2, %v8151_v13 }
 0x38d   :  { %2156 = vst.msk [vmem:[#allocation3] sm:$0xff] %vm12944_vm0, %v2148_v14  ;;  %v2365_v6 = vld [vmem:[#allocation2 + $0x21] sm:$0xff]  ;;  %v2444_v21 = vpack.c.bf16 %v2429_v22, %v2229_v12  ;;  %v8155_v12 = vunpack.c.h.bf16 %v8249_v17  ;;  %v8780_v14 = vld [vmem:[%s12937_s1 + $0xb0] sm:$0xff]  }
 0x38e   :  { %2324 = vrot.lane.b32.xlu0 %v2308_v63, %s9369_s10  ;;  %v2380_v39 = vpack.c.bf16 %v2365_v6, %v2165_v48  ;;  %8364 = vmatpush3.bf16.msra.mxu1 %v8776_v35 }
 0x38f   :  { %v2493_v0 = vld [vmem:[#allocation2 + $0x30] sm:$0xff]  ;;  %8365 = vmatprep.subr.bf16.mxu1 %v8777_v50  ;;  %8635 = vmatprep.subr.bf16.mxu0 %v8780_v14 }
 0x390   :  { %2260 = vrot.lane.b32.xlu1 %v2244_v59, %s9372_s13  ;;  %v2508_v40 = vpack.c.bf16 %v2493_v0, %v2293_v25  ;;  %v2629_v44 = vld [vmem:[#allocation2 + $0x32] sm:$0xff]  ;;  %8636 = vmatpush3.bf16.msra.mxu0 %v8780_v14 }
 0x391   :  { %v2644_v15 = vpack.c.bf16 %v2629_v44, %v2429_v22  ;;  %v2557_v42 = vld [vmem:[#allocation2 + $0x31] sm:$0xff] }
 0x392   :  { %2460 = vrot.lane.b32.xlu0 %v2444_v21, %s9368_s9  ;;  %2157 = vst.msk [vmem:[#allocation3 + $0x18] sm:$0xff] %vm12944_vm0, %v2508_v40  ;;  %8366 = vmatpush3.bf16.msra.mxu1 %v8779_v45  ;;  %v2572_v4 = vpack.c.bf16 %v2557_v42, %v2365_v6  ;;  %v8781_v25 = vld [vmem:[%s12937_s1 + $0xb8] sm:$0xff]  }
 0x393   :  { %v2295_v24 = vld [vmem:[#allocation2 + $0x40] sm:$0xff]  ;;  %v8250_v22 = vld [vmem:[%s12936_s0 + $0x58] sm:$0xff]   ;;  %8637 = vmatprep.subr.bf16.mxu0 %v8781_v25 }
 0x394   :  { %2396 = vrot.lane.b32.xlu1 %v2380_v39, %s9371_s12  ;;  %v2309_v48 = vpack.c.bf16 %v2295_v24, %v2493_v0  ;;  %v2431_v9 = vld [vmem:[#allocation2 + $0x42] sm:$0xff]  ;;  %8638 = vmatpush3.bf16.msra.mxu0 %v8781_v25  ;;  %v8158_v21 = vunpack.c.l.bf16 %v8250_v22  ;;  %v8159_v0 = vunpack.c.h.bf16 %v8250_v22 }
 0x395   :  { %v2445_v46 = vpack.c.bf16 %v2431_v9, %v2629_v44  ;;  %v2367_v37 = vld [vmem:[#allocation2 + $0x41] sm:$0xff] }
 0x396   :  { %2524 = vrot.lane.b32.xlu0 %v2508_v40, %s9373_s14  ;;  %v2381_v59 = vpack.c.bf16 %v2367_v37, %v2557_v42  ;;  %v8252_v22 = vld [vmem:[%s12936_s0 + $0x68] sm:$0xff]  }
 0x398   :  { %2660 = vrot.lane.b32.xlu1 %v2644_v15, %s9375_s7  ;;  %v1738_v7 = vpop.permute.xlu0 %1737 }
 0x399   :  { %1782 = vst.msk [vmem:[#allocation2 + $0x51] sm:$0xff] %vm12946_vm3, %v1738_v7 }
 0x39a   :  { %2120 = vst.msk [vmem:[#allocation2 + $0x51] sm:$0xff] %vm12945_vm2, %v8154_v19  ;;  %2588 = vrot.lane.b32.xlu0 %v2572_v4, %s9374_s17 }
 0x39c   :  { %v1740_v13 = vpop.permute.xlu1 %1739  ;;  %2326 = vrot.lane.b32.xlu1 %v2309_v48, %s9369_s10 }
 0x39d   :  { %1783 = vst.msk [vmem:[#allocation2 + $0x61] sm:$0xff] %vm12946_vm3, %v1740_v13  ;;  %v8251_v13 = vld [vmem:[%s12936_s0 + $0x60] sm:$0xff]  }
 0x39e   :  { %2121 = vst.msk [vmem:[#allocation2 + $0x61] sm:$0xff] %vm12945_vm2, %v8155_v12  ;;  %2198 = vrot.lane.b32.xlu0 %v2572_v4, %s9370_s11  ;;  %v8162_v14 = vunpack.c.l.bf16 %v8251_v13  ;;  %v8163_v25 = vunpack.c.h.bf16 %v8251_v13 }
 0x3a0   :  { %2462 = vrot.lane.b32.xlu1 %v2445_v46, %s9368_s9 }
 0x3a1   :  { %v2495_v52 = vld [vmem:[#allocation2 + $0x50] sm:$0xff] }
 0x3a2   :  { %v2631_v36 = vld [vmem:[#allocation2 + $0x52] sm:$0xff]  ;;  %v2509_v34 = vpack.c.bf16 %v2495_v52, %v2295_v24  ;;  %2262 = vrot.lane.b32.xlu0 %v2644_v15, %s9372_s13 }
 0x3a3   :  { %v2645_v63 = vpack.c.bf16 %v2631_v36, %v2431_v9  ;;  %v2559_v6 = vld [vmem:[#allocation2 + $0x51] sm:$0xff] }
 0x3a4   :  { %2526 = vrot.lane.b32.xlu1 %v2509_v34, %s9373_s14  ;;  %2158 = vst.msk [vmem:[#allocation3 + $0x30] sm:$0xff] %vm12944_vm0, %v2509_v34  ;;  %v2573_v2 = vpack.c.bf16 %v2559_v6, %v2367_v37  ;;  %v2563_v9 = vld [vmem:[#allocation2 + $0x91] sm:$0xff] }
 0x3a5   :  { %v2297_v39 = vld [vmem:[#allocation2 + $0x60] sm:$0xff] }
 0x3a6   :  { %2398 = vrot.lane.b32.xlu0 %v2381_v59, %s9371_s12  ;;  %v2310_v40 = vpack.c.bf16 %v2297_v39, %v2495_v52  ;;  %v2433_v50 = vld [vmem:[#allocation2 + $0x62] sm:$0xff]  ;;  %v2635_v59 = vld [vmem:[#allocation2 + $0x92] sm:$0xff] }
 0x3a7   :  { %v2369_v57 = vld [vmem:[#allocation2 + $0x61] sm:$0xff]  ;;  %v2446_v17 = vpack.c.bf16 %v2433_v50, %v2631_v36 }
 0x3a8   :  { %v1742_v35 = vpop.permute.xlu0 %1741  ;;  %2662 = vrot.lane.b32.xlu1 %v2645_v63, %s9375_s7  ;;  %v2382_v45 = vpack.c.bf16 %v2369_v57, %v2559_v6 }
 0x3a9   :  { %1784 = vst.msk [vmem:[#allocation2 + $0x71] sm:$0xff] %vm12946_vm3, %v1742_v35  ;;  %v8166_v35 = vunpack.c.l.bf16 %v8252_v22 }
 0x3aa   :  { %2122 = vst.msk [vmem:[#allocation2 + $0x71] sm:$0xff] %vm12945_vm2, %v8158_v21  ;;  %2590 = vrot.lane.b32.xlu0 %v2573_v2, %s9374_s17 }
 0x3ac   :  { %v1744_v44 = vpop.permute.xlu1 %1743  ;;  %2200 = vrot.lane.b32.xlu1 %v2573_v2, %s9370_s11  ;;  %v2499_v2 = vld [vmem:[#allocation2 + $0x90] sm:$0xff] }
 0x3ad   :  { %1785 = vst.msk [vmem:[#allocation2 + $0x81] sm:$0xff] %vm12946_vm3, %v1744_v44  ;;  %v2140_v44 = vld [vmem:[#allocation2 + $0xa0] sm:$0xff] }
 0x3ae   :  { %2123 = vst.msk [vmem:[#allocation2 + $0x81] sm:$0xff] %vm12945_vm2, %v8159_v0  ;;  %2328 = vrot.lane.b32.xlu0 %v2310_v40, %s9369_s10  ;;  %v2172_v40 = vld [vmem:[#allocation2 + $0xa1] sm:$0xff] }
 0x3b0   :  { %2264 = vrot.lane.b32.xlu1 %v2645_v63, %s9372_s13 }
 0x3b1   :  { %v2497_v15 = vld [vmem:[#allocation2 + $0x70] sm:$0xff] }
 0x3b2   :  { %v2633_v42 = vld [vmem:[#allocation2 + $0x72] sm:$0xff]  ;;  %v2510_v24 = vpack.c.bf16 %v2497_v15, %v2297_v39  ;;  %2464 = vrot.lane.b32.xlu0 %v2446_v17, %s9368_s9 }
 0x3b3   :  { %v2646_v19 = vpack.c.bf16 %v2633_v42, %v2433_v50  ;;  %v2561_v4 = vld [vmem:[#allocation2 + $0x71] sm:$0xff]  ;;  %v2236_v50 = vld [vmem:[#allocation2 + $0xa2] sm:$0xff] }
 0x3b4   :  { %2400 = vrot.lane.b32.xlu1 %v2382_v45, %s9371_s12  ;;  %2159 = vst.msk [vmem:[#allocation3 + $0x48] sm:$0xff] %vm12944_vm0, %v2510_v24  ;;  %v2574_v7 = vpack.c.bf16 %v2561_v4, %v2369_v57 }
 0x3b5   :  { %v2562_v48 = vld [vmem:[#allocation2 + $0x81] sm:$0xff] }
 0x3b6   :  { %2528 = vrot.lane.b32.xlu0 %v2510_v24, %s9373_s14  ;;  %v2575_v12 = vpack.c.bf16 %v2563_v9, %v2562_v48  ;;  %v2299_v46 = vld [vmem:[#allocation2 + $0x80] sm:$0xff]  ;;  %v2383_v37 = vpack.c.bf16 %v2562_v48, %v2561_v4 }
 0x3b7   :  { %v2311_v36 = vpack.c.bf16 %v2299_v46, %v2497_v15  ;;  %v2435_v34 = vld [vmem:[#allocation2 + $0x82] sm:$0xff]  ;;  %v2511_v0 = vpack.c.bf16 %v2499_v2, %v2299_v46  ;;  %v8167_v15 = vunpack.c.h.bf16 %v8252_v22 }
 0x3b8   :  { %2664 = vrot.lane.b32.xlu1 %v2646_v19, %s9375_s7  ;;  %v2447_v6 = vpack.c.bf16 %v2435_v34, %v2633_v42  ;;  %v2647_v21 = vpack.c.bf16 %v2635_v59, %v2435_v34 }
 0x3ba   :  { %2592 = vrot.lane.b32.xlu0 %v2574_v7, %s9374_s17 }
 0x3bc   :  { %2202 = vrot.lane.b32.xlu1 %v2574_v7, %s9370_s11 }
 0x3be   :  { %2594 = vrot.lane.b32.xlu0 %v2575_v12, %s9374_s17 }
 0x3c0   :  { %2266 = vrot.lane.b32.xlu1 %v2646_v19, %s9372_s13  ;;  %v1746_v52 = vpop.permute.xlu0 %1745 }
 0x3c1   :  { %1786 = vst.msk [vmem:[#allocation2 + $0xb1] sm:$0xff] %vm12946_vm3, %v1746_v52 }
 0x3c2   :  { %2124 = vst.msk [vmem:[#allocation2 + $0xb1] sm:$0xff] %vm12945_vm2, %v8162_v14  ;;  %v1748_v63 = vpop.permute.xlu1 %1747  ;;  %2402 = vrot.lane.b32.xlu0 %v2383_v37, %s9371_s12 }
 0x3c3   :  { %1787 = vst.msk [vmem:[#allocation2 + $0xc1] sm:$0xff] %vm12946_vm3, %v1748_v63 }
 0x3c4   :  { %2330 = vrot.lane.b32.xlu1 %v2311_v36, %s9369_s10  ;;  %2125 = vst.msk [vmem:[#allocation2 + $0xc1] sm:$0xff] %vm12945_vm2, %v8163_v25  ;;  %v8253_v36 = vld [vmem:[%s12936_s0 + $0x70] sm:$0xff]  }
 0x3c5   :  { %v8170_v22 = vunpack.c.l.bf16 %v8253_v36 }
 0x3c6   :  { %2466 = vrot.lane.b32.xlu0 %v2447_v6, %s9368_s9  ;;  %v1750_v39 = vpop.permute.xlu0 %1749 }
 0x3c7   :  { %1788 = vst.msk [vmem:[#allocation2 + $0xd1] sm:$0xff] %vm12946_vm3, %v1750_v39 }
 0x3c8   :  { %2666 = vrot.lane.b32.xlu1 %v2647_v21, %s9375_s7  ;;  %2126 = vst.msk [vmem:[#allocation2 + $0xd1] sm:$0xff] %vm12945_vm2, %v8166_v35  ;;  %v8171_v35 = vunpack.c.h.bf16 %v8253_v36 }
 0x3c9   :  { %v2173_v57 = vld [vmem:[#allocation2 + $0xb1] sm:$0xff] }
 0x3ca   :  { %v2300_v17 = vld [vmem:[#allocation2 + $0xb0] sm:$0xff]  ;;  %v2184_v42 = vpack.c.bf16 %v2173_v57, %v2172_v40  ;;  %v1752_v19 = vpop.permute.xlu1 %1751  ;;  %2530 = vrot.lane.b32.xlu0 %v2511_v0, %s9373_s14 }
 0x3cb   :  { %v2237_v45 = vld [vmem:[#allocation2 + $0xb2] sm:$0xff]  ;;  %v2152_v24 = vpack.c.bf16 %v2300_v17, %v2140_v44  ;;  %1789 = vst.msk [vmem:[#allocation2 + $0xe1] sm:$0xff] %vm12946_vm3, %v1752_v19  ;;  %v2301_v4 = vld [vmem:[#allocation2 + $0xc0] sm:$0xff] }
 0x3cc   :  { %2204 = vrot.lane.b32.xlu1 %v2184_v42, %s9370_s11  ;;  %v2248_v7 = vpack.c.bf16 %v2237_v45, %v2236_v50  ;;  %v2437_v48 = vld [vmem:[#allocation2 + $0xc2] sm:$0xff]  ;;  %v2312_v9 = vpack.c.bf16 %v2301_v4, %v2300_v17  ;;  %2127 = vst.msk [vmem:[#allocation2 + $0xe1] sm:$0xff] %vm12945_vm2, %v8167_v15 }
 0x3cd   :  { %2160 = vst.msk [vmem:[#allocation3 + $0x60] sm:$0xff] %vm12944_vm0, %v2152_v24  ;;  %v2373_v12 = vld [vmem:[#allocation2 + $0xc1] sm:$0xff]  ;;  %v2448_v13 = vpack.c.bf16 %v2437_v48, %v2237_v45  ;;  %v8254_v45 = vld [vmem:[%s12936_s0 + $0x78] sm:$0xff]  }
 0x3ce   :  { %2332 = vrot.lane.b32.xlu0 %v2312_v9, %s9369_s10  ;;  %v2384_v46 = vpack.c.bf16 %v2373_v12, %v2173_v57  ;;  %v8174_v24 = vunpack.c.l.bf16 %v8254_v45 }
 0x3cf   :  { %v2501_v14 = vld [vmem:[#allocation2 + $0xd0] sm:$0xff] }
 0x3d0   :  { %2268 = vrot.lane.b32.xlu1 %v2248_v7, %s9372_s13  ;;  %v2512_v37 = vpack.c.bf16 %v2501_v14, %v2301_v4  ;;  %v2637_v52 = vld [vmem:[#allocation2 + $0xd2] sm:$0xff] }
 0x3d1   :  { %v2648_v34 = vpack.c.bf16 %v2637_v52, %v2437_v48  ;;  %v2565_v25 = vld [vmem:[#allocation2 + $0xd1] sm:$0xff]  ;;  %v8175_v48 = vunpack.c.h.bf16 %v8254_v45 }
 0x3d2   :  { %2468 = vrot.lane.b32.xlu0 %v2448_v13, %s9368_s9  ;;  %2161 = vst.msk [vmem:[#allocation3 + $0x78] sm:$0xff] %vm12944_vm0, %v2512_v37  ;;  %v2576_v63 = vpack.c.bf16 %v2565_v25, %v2373_v12 }
 0x3d3   :  { %v2303_v59 = vld [vmem:[#allocation2 + $0xe0] sm:$0xff] }
 0x3d4   :  { %2404 = vrot.lane.b32.xlu1 %v2384_v46, %s9371_s12  ;;  %v2313_v21 = vpack.c.bf16 %v2303_v59, %v2501_v14  ;;  %v2439_v2 = vld [vmem:[#allocation2 + $0xe2] sm:$0xff] }
 0x3d5   :  { %v2449_v0 = vpack.c.bf16 %v2439_v2, %v2637_v52  ;;  %v2375_v40 = vld [vmem:[#allocation2 + $0xe1] sm:$0xff] }
 0x3d6   :  { %2532 = vrot.lane.b32.xlu0 %v2512_v37, %s9373_s14  ;;  %v2385_v17 = vpack.c.bf16 %v2375_v40, %v2565_v25 }
 0x3d8   :  { %2668 = vrot.lane.b32.xlu1 %v2648_v34, %s9375_s7  ;;  %v1754_v6 = vpop.permute.xlu0 %1753 }
 0x3d9   :  { %1790 = vst.msk [vmem:[#allocation2 + $0xf1] sm:$0xff] %vm12946_vm3, %v1754_v6  ;;  %v2571_v6 = vld [vmem:[#allocation2 + $0x131] sm:$0xff] }
 0x3da   :  { %2128 = vst.msk [vmem:[#allocation2 + $0xf1] sm:$0xff] %vm12945_vm2, %v8170_v22  ;;  %2596 = vrot.lane.b32.xlu0 %v2576_v63, %s9374_s17 }
 0x3dc   :  { %v1756_v39 = vpop.permute.xlu1 %1755  ;;  %2334 = vrot.lane.b32.xlu1 %v2313_v21, %s9369_s10 }
 0x3dd   :  { %1791 = vst.msk [vmem:[#allocation2 + $0x101] sm:$0xff] %vm12946_vm3, %v1756_v39 }
 0x3de   :  { %2129 = vst.msk [vmem:[#allocation2 + $0x101] sm:$0xff] %vm12945_vm2, %v8171_v35  ;;  %2206 = vrot.lane.b32.xlu0 %v2576_v63, %s9370_s11 }
 0x3e0   :  { %2470 = vrot.lane.b32.xlu1 %v2449_v0, %s9368_s9  ;;  %v2643_v0 = vld [vmem:[#allocation2 + $0x132] sm:$0xff] }
 0x3e1   :  { %v2503_v44 = vld [vmem:[#allocation2 + $0xf0] sm:$0xff] }
 0x3e2   :  { %v2639_v50 = vld [vmem:[#allocation2 + $0xf2] sm:$0xff]  ;;  %v2513_v57 = vpack.c.bf16 %v2503_v44, %v2303_v59  ;;  %2270 = vrot.lane.b32.xlu0 %v2648_v34, %s9372_s13 }
 0x3e3   :  { %v2649_v15 = vpack.c.bf16 %v2639_v50, %v2439_v2  ;;  %v2567_v42 = vld [vmem:[#allocation2 + $0xf1] sm:$0xff] }
 0x3e4   :  { %2534 = vrot.lane.b32.xlu1 %v2513_v57, %s9373_s14  ;;  %2162 = vst.msk [vmem:[#allocation3 + $0x90] sm:$0xff] %vm12944_vm0, %v2513_v57  ;;  %v2577_v19 = vpack.c.bf16 %v2567_v42, %v2375_v40 }
 0x3e5   :  { %v2305_v7 = vld [vmem:[#allocation2 + $0x100] sm:$0xff] }
 0x3e6   :  { %2406 = vrot.lane.b32.xlu0 %v2385_v17, %s9371_s12  ;;  %v2314_v9 = vpack.c.bf16 %v2305_v7, %v2503_v44  ;;  %v2441_v13 = vld [vmem:[#allocation2 + $0x102] sm:$0xff] }
 0x3e7   :  { %v2377_v46 = vld [vmem:[#allocation2 + $0x101] sm:$0xff]  ;;  %v2450_v14 = vpack.c.bf16 %v2441_v13, %v2639_v50 }
 0x3e8   :  { %v1758_v4 = vpop.permute.xlu0 %1757  ;;  %2670 = vrot.lane.b32.xlu1 %v2649_v15, %s9375_s7  ;;  %v2386_v37 = vpack.c.bf16 %v2377_v46, %v2567_v42 }
 0x3e9   :  { %1792 = vst.msk [vmem:[#allocation2 + $0x111] sm:$0xff] %vm12946_vm3, %v1758_v4 }
 0x3ea   :  { %2130 = vst.msk [vmem:[#allocation2 + $0x111] sm:$0xff] %vm12945_vm2, %v8174_v24  ;;  %2598 = vrot.lane.b32.xlu0 %v2577_v19, %s9374_s17 }
 0x3ec   :  { %v1760_v12 = vpop.permute.xlu1 %1759  ;;  %2208 = vrot.lane.b32.xlu1 %v2577_v19, %s9370_s11 }
 0x3ed   :  { %1793 = vst.msk [vmem:[#allocation2 + $0x121] sm:$0xff] %vm12946_vm3, %v1760_v12  ;;  %vm12975_vm3 = vcmask 556288  }
 0x3ee   :  { %2131 = vst.msk [vmem:[#allocation2 + $0x121] sm:$0xff] %vm12945_vm2, %v8175_v48  ;;  %2336 = vrot.lane.b32.xlu0 %v2314_v9, %s9369_s10  ;;  %vm12974_vm2 = vcmask 261120  }
 0x3ef   :  { %vm12976_vm11 = vmmov %vm12974_vm2 }
 0x3f0   :  { %2272 = vrot.lane.b32.xlu1 %v2649_v15, %s9372_s13  ;;  %v2507_v15 = vld [vmem:[#allocation2 + $0x130] sm:$0xff] }
 0x3f1   :  { %v2505_v52 = vld [vmem:[#allocation2 + $0x110] sm:$0xff] }
 0x3f2   :  { %v2641_v36 = vld [vmem:[#allocation2 + $0x112] sm:$0xff]  ;;  %v2514_v34 = vpack.c.bf16 %v2505_v52, %v2305_v7  ;;  %2472 = vrot.lane.b32.xlu0 %v2450_v14, %s9368_s9 }
 0x3f3   :  { %v2650_v25 = vpack.c.bf16 %v2641_v36, %v2441_v13  ;;  %v2569_v59 = vld [vmem:[#allocation2 + $0x111] sm:$0xff] }
 0x3f4   :  { %2408 = vrot.lane.b32.xlu1 %v2386_v37, %s9371_s12  ;;  %2163 = vst.msk [vmem:[#allocation3 + $0xa8] sm:$0xff] %vm12944_vm0, %v2514_v34  ;;  %v2578_v22 = vpack.c.bf16 %v2569_v59, %v2377_v46  ;;  %vm12973_vm0 = vcmask 1048544  }
 0x3f5   :  { %v2570_v63 = vld [vmem:[#allocation2 + $0x121] sm:$0xff] }
 0x3f6   :  { %2536 = vrot.lane.b32.xlu0 %v2514_v34, %s9373_s14  ;;  %v2307_v21 = vld [vmem:[#allocation2 + $0x120] sm:$0xff]  ;;  %v2579_v2 = vpack.c.bf16 %v2571_v6, %v2570_v63  ;;  %v2387_v44 = vpack.c.bf16 %v2570_v63, %v2569_v59 }
 0x3f7   :  { %v2315_v35 = vpack.c.bf16 %v2307_v21, %v2505_v52  ;;  %v2642_v39 = vld [vmem:[#allocation2 + $0x122] sm:$0xff]  ;;  %v2515_v19 = vpack.c.bf16 %v2507_v15, %v2307_v21 }
 0x3f8   :  { %2672 = vrot.lane.b32.xlu1 %v2650_v25, %s9375_s7  ;;  %v2651_v50 = vpack.c.bf16 %v2643_v0, %v2642_v39  ;;  %v2451_v45 = vpack.c.bf16 %v2642_v39, %v2641_v36 }
 0x3fa   :  { %2600 = vrot.lane.b32.xlu0 %v2578_v22, %s9374_s17 }
 0x3fc   :  { %2210 = vrot.lane.b32.xlu1 %v2578_v22, %s9370_s11 }
 0x3fe   :  { %v2197_v40 = vpop.permute.xlu1 %2196  ;;  %2602 = vrot.lane.b32.xlu0 %v2579_v2, %s9374_s17 }
 0x3ff   :  { %2220 = vst.msk [vmem:[#allocation3] sm:$0xff] %vm269_vm5, %v2197_v40 }
 0x400   :  { %2338 = vrot.lane.b32.xlu1 %v2315_v35, %s9369_s10  ;;  %v2325_v57 = vpop.permute.xlu0 %2324 }
 0x401   :  { %2349 = vst.msk [vmem:[#allocation3 + $0x8] sm:$0xff] %vm401_vm4, %v2325_v57 }
 0x402   :  { %v2261_v17 = vpop.permute.xlu1 %2260  ;;  %2410 = vrot.lane.b32.xlu0 %v2387_v44, %s9371_s12 }
 0x403   :  { %2284 = vst.msk [vmem:[#allocation3] sm:$0xff] %vm334_vm8, %v2261_v17 }
 0x404   :  { %2348 = vst.msk [vmem:[#allocation3] sm:$0xff] %vm399_vm10, %v2325_v57  ;;  %2674 = vrot.lane.b32.xlu1 %v2651_v50, %s9375_s7  ;;  %v2461_v42 = vpop.permute.xlu0 %2460 }
 0x406   :  { %v2397_v24 = vpop.permute.xlu1 %2396  ;;  %2474 = vrot.lane.b32.xlu0 %v2451_v45, %s9368_s9 }
 0x407   :  { %2420 = vst.msk [vmem:[#allocation3 + $0x8] sm:$0xff] %vm12950_vm6, %v2397_v24 }
 0x408   :  { %2484 = vst.msk [vmem:[#allocation3 + $0x8] sm:$0xff] %vm12948_vm7, %v2461_v42  ;;  %2274 = vrot.lane.b32.xlu1 %v2650_v25, %s9372_s13  ;;  %v2525_v4 = vpop.permute.xlu0 %2524 }
 0x409   :  { %2548 = vst.msk [vmem:[#allocation3 + $0x8] sm:$0xff] %vm12949_vm9, %v2525_v4 }
 0x40a   :  { %v2661_v7 = vpop.permute.xlu1 %2660  ;;  %2538 = vrot.lane.b32.xlu0 %v2515_v19, %s9373_s14 }
 0x40b   :  { %v2692_v37 = vld [vmem:[#allocation3] sm:$0xff] }
 0x40c   :  { %1651 = vrot.lane.b32.xlu1 %v10031_v58, %s9377_s4  ;;  %v2589_v48 = vpop.permute.xlu0 %2588 }
 0x40d   :  { %2612 = vst.msk [vmem:[#allocation3 + $0x8] sm:$0xff] %vm12973_vm0, %v2589_v48 }
 0x40e   :  { %2613 = vst.msk [vmem:[#allocation3 + $0x10] sm:$0xff] %vm12974_vm2, %v2589_v48  ;;  %v2327_v9 = vpop.permute.xlu1 %2326  ;;  %1649 = vrot.lane.b32.xlu0 %v10027_v62, %s9377_s4 }
 0x40f   :  { %2684 = vst.msk [vmem:[#allocation3 + $0x10] sm:$0xff] %vm12975_vm3, %v2661_v7 }
 0x410   :  { %2351 = vst.msk [vmem:[#allocation3 + $0x20] sm:$0xff] %vm401_vm4, %v2327_v9  ;;  %1655 = vrot.lane.b32.xlu1 %v10039_v5, %s9377_s4  ;;  %v2199_v12 = vpop.permute.xlu0 %2198 }
 0x411   :  { %2221 = vst.msk [vmem:[#allocation3 + $0x18] sm:$0xff] %vm269_vm5, %v2199_v12 }
 0x412   :  { %v2463_v58 = vpop.permute.xlu1 %2462  ;;  %1653 = vrot.lane.b32.xlu0 %v10035_v20, %s9377_s4 }
 0x414   :  { %v2263_v13 = vpop.permute.xlu0 %2262  ;;  %v2693_v46 = vld [vmem:[#allocation3 + $0x8] sm:$0xff] }
 0x415   :  { %2285 = vst.msk [vmem:[#allocation3 + $0x18] sm:$0xff] %vm334_vm8, %v2263_v13  ;;  %2947 = vmatprep.mubr.bf16.mxu1 %v2693_v46 }
 0x416   :  { %v2527_v14 = vpop.permute.xlu1 %2526  ;;  %v2694_v52 = vld [vmem:[#allocation3 + $0x10] sm:$0xff]  ;;  %2350 = vst.msk [vmem:[#allocation3 + $0x18] sm:$0xff] %vm399_vm10, %v2327_v9  ;;  %2948 = vmatmul.mubr.bf16.vlgmr.msra.gmra.mrb[16].mxu1 %v2692_v37 }
 0x417   :  { %8639 = vmatprep.mubr.bf16.mxu0 %v2694_v52 }
 0x418   :  { %v2399_v62 = vpop.permute.xlu0 %2398 }
 0x419   :  { %2421 = vst.msk [vmem:[#allocation3 + $0x20] sm:$0xff] %vm12950_vm6, %v2399_v62 }
 0x41a   :  { %v2663_v5 = vpop.permute.xlu1 %2662  ;;  %2485 = vst.msk [vmem:[#allocation3 + $0x20] sm:$0xff] %vm12948_vm7, %v2463_v58 }
 0x41b   :  { %2549 = vst.msk [vmem:[#allocation3 + $0x20] sm:$0xff] %vm12949_vm9, %v2527_v14 }
 0x41c   :  { %v2591_v20 = vpop.permute.xlu0 %2590 }
 0x41d   :  { %2614 = vst.msk [vmem:[#allocation3 + $0x20] sm:$0xff] %vm12973_vm0, %v2591_v20  ;;  %v2695_v6 = vld [vmem:[#allocation3 + $0x18] sm:$0xff] }
 0x41e   :  { %2615 = vst.msk [vmem:[#allocation3 + $0x28] sm:$0xff] %vm12974_vm2, %v2591_v20  ;;  %v2201_v36 = vpop.permute.xlu1 %2200 }
 0x41f   :  { %2685 = vst.msk [vmem:[#allocation3 + $0x28] sm:$0xff] %vm12975_vm3, %v2663_v5 }
 0x420   :  { %2222 = vst.msk [vmem:[#allocation3 + $0x30] sm:$0xff] %vm269_vm5, %v2201_v36  ;;  %v2329_v34 = vpop.permute.xlu0 %2328 }
 0x421   :  { %2353 = vst.msk [vmem:[#allocation3 + $0x38] sm:$0xff] %vm401_vm4, %v2329_v34 }
 0x422   :  { %v2265_v25 = vpop.permute.xlu1 %2264 }
 0x423   :  { %2286 = vst.msk [vmem:[#allocation3 + $0x30] sm:$0xff] %vm334_vm8, %v2265_v25 }
 0x424   :  { %2352 = vst.msk [vmem:[#allocation3 + $0x30] sm:$0xff] %vm399_vm10, %v2329_v34  ;;  %v2465_v59 = vpop.permute.xlu0 %2464  ;;  %v2696_v22 = vld [vmem:[#allocation3 + $0x20] sm:$0xff] }
 0x425   :  { %2955 = vmatprep.mubr.bf16.mxu1 %v2696_v22 }
 0x426   :  { %v2401_v63 = vpop.permute.xlu1 %2400  ;;  %v2697_v21 = vld [vmem:[#allocation3 + $0x28] sm:$0xff]  ;;  %2956 = vmatmul.mubr.bf16.gmra.mrb[20].mxu1 %v2695_v6 }
 0x427   :  { %2422 = vst.msk [vmem:[#allocation3 + $0x38] sm:$0xff] %vm12950_vm6, %v2401_v63  ;;  %8640 = vmatmul.mubr.bf16.vlgmr.msra.gmra.mrb[32].mxu0 %v2697_v21 }
 0x428   :  { %2486 = vst.msk [vmem:[#allocation3 + $0x38] sm:$0xff] %vm12948_vm7, %v2465_v59  ;;  %v2529_v2 = vpop.permute.xlu0 %2528 }
 0x429   :  { %2550 = vst.msk [vmem:[#allocation3 + $0x38] sm:$0xff] %vm12949_vm9, %v2529_v2 }
 0x42a   :  { %v2665_v35 = vpop.permute.xlu1 %2664 }
 0x42b   :  { %v2698_v45 = vld [vmem:[#allocation3 + $0x30] sm:$0xff] }
 0x42c   :  { %v2593_v39 = vpop.permute.xlu0 %2592 }
 0x42d   :  { %2616 = vst.msk [vmem:[#allocation3 + $0x38] sm:$0xff] %vm12973_vm0, %v2593_v39 }
 0x42e   :  { %2617 = vst.msk [vmem:[#allocation3 + $0x40] sm:$0xff] %vm12974_vm2, %v2593_v39  ;;  %v2203_v0 = vpop.permute.xlu1 %2202  ;;  %vm12978_vm2 = vmmov %vm12973_vm0 }
 0x42f   :  { %2686 = vst.msk [vmem:[#allocation3 + $0x40] sm:$0xff] %vm12975_vm3, %v2665_v35 }
 0x430   :  { %2223 = vst.msk [vmem:[#allocation3 + $0x48] sm:$0xff] %vm269_vm5, %v2203_v0  ;;  %v2595_v40 = vpop.permute.xlu0 %2594 }
 0x431   :  { %2619 = vst.msk [vmem:[#allocation3 + $0x58] sm:$0xff] %vm12976_vm11, %v2595_v40  ;;  %vm12977_vm11 = vmmov %vm12975_vm3  ;;  %vm12979_vm3 = vcmask 261120  }
 0x432   :  { %v2267_v44 = vpop.permute.xlu1 %2266 }
 0x433   :  { %2287 = vst.msk [vmem:[#allocation3 + $0x48] sm:$0xff] %vm334_vm8, %v2267_v44 }
 0x434   :  { %v2403_v50 = vpop.permute.xlu0 %2402  ;;  %v2699_v57 = vld [vmem:[#allocation3 + $0x38] sm:$0xff] }
 0x435   :  { %2963 = vmatprep.mubr.bf16.mxu1 %v2699_v57 }
 0x436   :  { %v2331_v17 = vpop.permute.xlu1 %2330  ;;  %v2700_v15 = vld [vmem:[#allocation3 + $0x40] sm:$0xff]  ;;  %2964 = vmatmul.mubr.bf16.gmra.mrb[24].mxu1 %v2698_v45 }
 0x437   :  { %2354 = vst.msk [vmem:[#allocation3 + $0x48] sm:$0xff] %vm399_vm10, %v2331_v17  ;;  %8643 = vmatprep.mubr.bf16.mxu0 %v2700_v15 }
 0x438   :  { %2355 = vst.msk [vmem:[#allocation3 + $0x50] sm:$0xff] %vm401_vm4, %v2331_v17  ;;  %v2467_v42 = vpop.permute.xlu0 %2466 }
 0x439   :  { %2423 = vst.msk [vmem:[#allocation3 + $0x50] sm:$0xff] %vm12950_vm6, %v2403_v50 }
 0x43a   :  { %2487 = vst.msk [vmem:[#allocation3 + $0x50] sm:$0xff] %vm12948_vm7, %v2467_v42  ;;  %v2667_v24 = vpop.permute.xlu1 %2666 }
 0x43b   :  { %2687 = vst.msk [vmem:[#allocation3 + $0x58] sm:$0xff] %vm12977_vm11, %v2667_v24 }
 0x43c   :  { %v2531_v19 = vpop.permute.xlu0 %2530 }
 0x43d   :  { %2551 = vst.msk [vmem:[#allocation3 + $0x50] sm:$0xff] %vm12949_vm9, %v2531_v19 }
 0x43e   :  { %v2205_v4 = vpop.permute.xlu1 %2204  ;;  %2618 = vst.msk [vmem:[#allocation3 + $0x50] sm:$0xff] %vm12973_vm0, %v2595_v40  ;;  %v2701_v46 = vld [vmem:[#allocation3 + $0x48] sm:$0xff] }
 0x43f   :  { %2224 = vst.msk [vmem:[#allocation3 + $0x60] sm:$0xff] %vm269_vm5, %v2205_v4 }
 0x440   :  { %v2333_v7 = vpop.permute.xlu0 %2332 }
 0x441   :  { %2357 = vst.msk [vmem:[#allocation3 + $0x68] sm:$0xff] %vm401_vm4, %v2333_v7 }
 0x442   :  { %v2269_v48 = vpop.permute.xlu1 %2268  ;;  %v2703_v9 = vld [vmem:[#allocation3 + $0x58] sm:$0xff] }
 0x443   :  { %2288 = vst.msk [vmem:[#allocation3 + $0x60] sm:$0xff] %vm334_vm8, %v2269_v48  ;;  %8644 = vmatmul.mubr.bf16.gmra.mrb[36].mxu0 %v2703_v9 }
 0x444   :  { %2356 = vst.msk [vmem:[#allocation3 + $0x60] sm:$0xff] %vm399_vm10, %v2333_v7  ;;  %v2469_v12 = vpop.permute.xlu0 %2468 }
 0x445   :  { %v2702_v13 = vld [vmem:[#allocation3 + $0x50] sm:$0xff] }
 0x446   :  { %v2405_v58 = vpop.permute.xlu1 %2404  ;;  %2971 = vmatprep.mubr.bf16.mxu1 %v2702_v13 }
 0x447   :  { %2424 = vst.msk [vmem:[#allocation3 + $0x68] sm:$0xff] %vm12950_vm6, %v2405_v58  ;;  %2972 = vmatmul.mubr.bf16.gmra.mrb[28].mxu1 %v2701_v46 }
 0x448   :  { %2488 = vst.msk [vmem:[#allocation3 + $0x68] sm:$0xff] %vm12948_vm7, %v2469_v12  ;;  %v2533_v14 = vpop.permute.xlu0 %2532 }
 0x449   :  { %2552 = vst.msk [vmem:[#allocation3 + $0x68] sm:$0xff] %vm12949_vm9, %v2533_v14 }
 0x44a   :  { %v2669_v37 = vpop.permute.xlu1 %2668 }
 0x44b   :  { %v2704_v59 = vld [vmem:[#allocation3 + $0x60] sm:$0xff] }
 0x44c   :  { %v2597_v52 = vpop.permute.xlu0 %2596 }
 0x44d   :  { %2620 = vst.msk [vmem:[#allocation3 + $0x68] sm:$0xff] %vm12978_vm2, %v2597_v52  ;;  %vm12980_vm2 = vmmov %vm12979_vm3 }
 0x44e   :  { %2621 = vst.msk [vmem:[#allocation3 + $0x70] sm:$0xff] %vm12979_vm3, %v2597_v52  ;;  %v2335_v62 = vpop.permute.xlu1 %2334  ;;  %vm12981_vm3 = vmmov %vm12977_vm11 }
 0x44f   :  { %2688 = vst.msk [vmem:[#allocation3 + $0x70] sm:$0xff] %vm12977_vm11, %v2669_v37  ;;  %vm12982_vm11 = vmmov %vm12973_vm0 }
 0x450   :  { %2359 = vst.msk [vmem:[#allocation3 + $0x80] sm:$0xff] %vm401_vm4, %v2335_v62  ;;  %v2207_v5 = vpop.permute.xlu0 %2206 }
 0x451   :  { %2225 = vst.msk [vmem:[#allocation3 + $0x78] sm:$0xff] %vm269_vm5, %v2207_v5 }
 0x452   :  { %v2471_v20 = vpop.permute.xlu1 %2470 }
 0x454   :  { %v2271_v36 = vpop.permute.xlu0 %2270  ;;  %v2705_v34 = vld [vmem:[#allocation3 + $0x68] sm:$0xff] }
 0x455   :  { %2289 = vst.msk [vmem:[#allocation3 + $0x78] sm:$0xff] %vm334_vm8, %v2271_v36  ;;  %2979 = vmatprep.mubr.bf16.mxu1 %v2705_v34 }
 0x456   :  { %v2535_v25 = vpop.permute.xlu1 %2534  ;;  %v2706_v22 = vld [vmem:[#allocation3 + $0x70] sm:$0xff]  ;;  %2358 = vst.msk [vmem:[#allocation3 + $0x78] sm:$0xff] %vm399_vm10, %v2335_v62  ;;  %2980 = vmatmul.mubr.bf16.gmra.mrb[32].mxu1 %v2704_v59 }
 0x457   :  { %8647 = vmatprep.mubr.bf16.mxu0 %v2706_v22 }
 0x458   :  { %v2407_v63 = vpop.permute.xlu0 %2406 }
 0x459   :  { %2425 = vst.msk [vmem:[#allocation3 + $0x80] sm:$0xff] %vm12950_vm6, %v2407_v63 }
 0x45a   :  { %v2671_v6 = vpop.permute.xlu1 %2670  ;;  %2489 = vst.msk [vmem:[#allocation3 + $0x80] sm:$0xff] %vm12948_vm7, %v2471_v20 }
 0x45b   :  { %2553 = vst.msk [vmem:[#allocation3 + $0x80] sm:$0xff] %vm12949_vm9, %v2535_v25 }
 0x45c   :  { %v2599_v21 = vpop.permute.xlu0 %2598 }
 0x45d   :  { %2622 = vst.msk [vmem:[#allocation3 + $0x80] sm:$0xff] %vm12973_vm0, %v2599_v21  ;;  %v2707_v50 = vld [vmem:[#allocation3 + $0x78] sm:$0xff]  ;;  %vm12983_vm0 = vmmov %vm12980_vm2 }
 0x45e   :  { %2623 = vst.msk [vmem:[#allocation3 + $0x88] sm:$0xff] %vm12980_vm2, %v2599_v21  ;;  %v2209_v2 = vpop.permute.xlu1 %2208  ;;  %vm12984_vm2 = vmmov %vm12981_vm3  ;;  %v10577_v21 = vld [vmem:[%s12938_s2] ss:$0 sm:$0xff] }
 0x45f   :  { %2689 = vst.msk [vmem:[#allocation3 + $0x88] sm:$0xff] %vm12981_vm3, %v2671_v6  ;;  %vm12985_vm3 = vmmov %vm12983_vm0 }
 0x460   :  { %2226 = vst.msk [vmem:[#allocation3 + $0x90] sm:$0xff] %vm269_vm5, %v2209_v2  ;;  %v2337_v35 = vpop.permute.xlu0 %2336 }
 0x461   :  { %2361 = vst.msk [vmem:[#allocation3 + $0x98] sm:$0xff] %vm401_vm4, %v2337_v35 }
 0x462   :  { %v2273_v39 = vpop.permute.xlu1 %2272 }
 0x463   :  { %2290 = vst.msk [vmem:[#allocation3 + $0x90] sm:$0xff] %vm334_vm8, %v2273_v39 }
 0x464   :  { %2360 = vst.msk [vmem:[#allocation3 + $0x90] sm:$0xff] %vm399_vm10, %v2337_v35  ;;  %v2473_v0 = vpop.permute.xlu0 %2472  ;;  %v2708_v40 = vld [vmem:[#allocation3 + $0x80] sm:$0xff] }
 0x465   :  { %2987 = vmatprep.mubr.bf16.mxu1 %v2708_v40 }
 0x466   :  { %v2409_v44 = vpop.permute.xlu1 %2408  ;;  %v2709_v57 = vld [vmem:[#allocation3 + $0x88] sm:$0xff]  ;;  %2988 = vmatmul.mubr.bf16.gmra.mrb[36].mxu1 %v2707_v50 }
 0x467   :  { %2426 = vst.msk [vmem:[#allocation3 + $0x98] sm:$0xff] %vm12950_vm6, %v2409_v44  ;;  %8648 = vmatmul.mubr.bf16.gmra.mrb[40].mxu0 %v2709_v57 }
 0x468   :  { %2490 = vst.msk [vmem:[#allocation3 + $0x98] sm:$0xff] %vm12948_vm7, %v2473_v0  ;;  %v2537_v17 = vpop.permute.xlu0 %2536 }
 0x469   :  { %2554 = vst.msk [vmem:[#allocation3 + $0x98] sm:$0xff] %vm12949_vm9, %v2537_v17 }
 0x46a   :  { %v2673_v45 = vpop.permute.xlu1 %2672 }
 0x46b   :  { %v2710_v4 = vld [vmem:[#allocation3 + $0x90] sm:$0xff] }
 0x46c   :  { %v2601_v15 = vpop.permute.xlu0 %2600 }
 0x46d   :  { %2624 = vst.msk [vmem:[#allocation3 + $0x98] sm:$0xff] %vm12982_vm11, %v2601_v15  ;;  %vm12986_vm11 = vmmov %vm12984_vm2 }
 0x46e   :  { %2625 = vst.msk [vmem:[#allocation3 + $0xa0] sm:$0xff] %vm12983_vm0, %v2601_v15  ;;  %v2211_v42 = vpop.permute.xlu1 %2210  ;;  %vm12987_vm0 = vcmask 1048544  }
 0x46f   :  { %2690 = vst.msk [vmem:[#allocation3 + $0xa0] sm:$0xff] %vm12984_vm2, %v2673_v45  ;;  %vm12988_vm2 = vmmov %vm12985_vm3 }
 0x470   :  { %2227 = vst.msk [vmem:[#allocation3 + $0xa8] sm:$0xff] %vm269_vm5, %v2211_v42  ;;  %v2603_v24 = vpop.permute.xlu0 %2602 }
 0x471   :  { %2627 = vst.msk [vmem:[#allocation3 + $0xb8] sm:$0xff] %vm12985_vm3, %v2603_v24  ;;  %vm12989_vm3 = vmmov %vm12988_vm2 }
 0x472   :  { %v2339_v19 = vpop.permute.xlu1 %2338 }
 0x473   :  { %2363 = vst.msk [vmem:[#allocation3 + $0xb0] sm:$0xff] %vm401_vm4, %v2339_v19 }
 0x474   :  { %v2411_v7 = vpop.permute.xlu0 %2410  ;;  %v2711_v48 = vld [vmem:[#allocation3 + $0x98] sm:$0xff] }
 0x475   :  { %2427 = vst.msk [vmem:[#allocation3 + $0xb0] sm:$0xff] %vm12950_vm6, %v2411_v7  ;;  %2995 = vmatprep.mubr.bf16.mxu1 %v2711_v48 }
 0x476   :  { %v2675_v9 = vpop.permute.xlu1 %2674  ;;  %v2712_v12 = vld [vmem:[#allocation3 + $0xa0] sm:$0xff]  ;;  %2996 = vmatmul.mubr.bf16.gmra.mrb[40].mxu1 %v2710_v4 }
 0x477   :  { %2691 = vst.msk [vmem:[#allocation3 + $0xb8] sm:$0xff] %vm12986_vm11, %v2675_v9  ;;  %8651 = vmatprep.mubr.bf16.mxu0 %v2712_v12  ;;  %vm12990_vm11 = vmmov %vm12988_vm2 }
 0x478   :  { %v2475_v58 = vpop.permute.xlu0 %2474 }
 0x479   :  { %2491 = vst.msk [vmem:[#allocation3 + $0xb0] sm:$0xff] %vm12948_vm7, %v2475_v58  ;;  %vm12991_vm7 = vmmov %vm12988_vm2 }
 0x47a   :  { %v2275_v13 = vpop.permute.xlu1 %2274 }
 0x47b   :  { %2291 = vst.msk [vmem:[#allocation3 + $0xa8] sm:$0xff] %vm334_vm8, %v2275_v13 }
 0x47c   :  { %2362 = vst.msk [vmem:[#allocation3 + $0xa8] sm:$0xff] %vm399_vm10, %v2339_v19  ;;  %v2539_v46 = vpop.permute.xlu0 %2538 }
 0x47d   :  { %2555 = vst.msk [vmem:[#allocation3 + $0xb0] sm:$0xff] %vm12949_vm9, %v2539_v46 }
 0x47e   :  { %v1652_v14 = vpop.permute.xlu1 %1651  ;;  %v2715_v37 = vld [vmem:[#allocation3 + $0xb8] sm:$0xff]  ;;  %2626 = vst.msk [vmem:[#allocation3 + $0xb0] sm:$0xff] %vm12987_vm0, %v2603_v24  ;;  %vm12993_vm0 = vmmov %vm12988_vm2 }
 0x47f   :  { %1698 = vst.msk [vmem:[#allocation4 + $0x8] sm:$0xff] %vm12988_vm2, %v1652_v14  ;;  %8652 = vmatmul.mubr.bf16.gmra.mrb[44].mxu0 %v2715_v37 }
 0x480   :  { %v1650_v52 = vpop.permute.xlu0 %1649 }
 0x481   :  { %1697 = vst.msk [vmem:[#allocation4] sm:$0xff] %vm12989_vm3, %v1650_v52  ;;  %vm12995_vm3 = vmmov %vm12993_vm0 }
 0x482   :  { %v1656_v62 = vpop.permute.xlu1 %1655 }
 0x483   :  { %1700 = vst.msk [vmem:[#allocation4 + $0x18] sm:$0xff] %vm12990_vm11, %v1656_v62  ;;  %v2713_v36 = vld [vmem:[#allocation3 + $0xa8] sm:$0xff]  ;;  %vm12996_vm11 = vmmov %vm12993_vm0 }
 0x484   :  { %v1654_v5 = vpop.permute.xlu0 %1653 }
 0x485   :  { %1699 = vst.msk [vmem:[#allocation4 + $0x10] sm:$0xff] %vm12991_vm7, %v1654_v5  ;;  %v2714_v20 = vld [vmem:[#allocation3 + $0xb0] sm:$0xff]  ;;  %vm12992_vm7 = vmmov %vm12988_vm2 }
 0x486   :  { %3003 = vmatprep.mubr.bf16.mxu1 %v2714_v20  ;;  %vm12994_vm2 = vmmov %vm12993_vm0 }
 0x487   :  { %3004 = vmatmul.mubr.bf16.gmra.mrb[44].mxu1 %v2713_v36 }
 0x4e9   :  { %v8367_v34 = vpop.f32.mrb[16].mxu1 }
 0x4ea   :  { %v8368_v25 = vpop.f32.mrb[17].mxu1 }
 0x4eb   :  { %v8369_v59 = vadd.f32 %v8368_v25, %v8367_v34  ;;  %v8370_v22 = vpop.f32.mrb[18].mxu1 }
 0x4ec   :  { %v8371_v63 = vpop.f32.mrb[19].mxu1 }
 0x4ed   :  { %v8372_v6 = vadd.f32 %v8371_v63, %v8370_v22  ;;  %v2950_v39 = vadd.f32 %v8369_v59, %v10577_v21 }
 0x4ef   :  { %v2953_v15 = vadd.f32 %v8372_v6, %v10577_v21 }
 0x4f9   :  { %v8373_v2 = vpop.f32.mrb[20].mxu1 }
 0x4fa   :  { %v8641_v35 = vpop.f32.mrb[32].mxu0  ;;  %v8374_v0 = vpop.f32.mrb[21].mxu1 }
 0x4fb   :  { %v3046_v40 = vpop.f32.mrb[33].mxu0  ;;  %v8375_v44 = vadd.f32 %v8374_v0, %v8373_v2  ;;  %v8376_v57 = vpop.f32.mrb[22].mxu1 }
 0x4fc   :  { %v10580_v50 = vadd.f32 %v3046_v40, %v2950_v39  ;;  %v8642_v17 = vpop.f32.mrb[34].mxu0  ;;  %v8377_v45 = vpop.f32.mrb[23].mxu1 }
 0x4fd   :  { %v3049_v42 = vpop.f32.mrb[35].mxu0  ;;  %v2958_v24 = vadd.f32 %v8375_v44, %v10577_v21  ;;  %v8378_v19 = vadd.f32 %v8377_v45, %v8376_v57 }
 0x4fe   :  { %8958 = vtanh.f32 %v10580_v50  ;;  %v10585_v4 = vadd.f32 %v3049_v42, %v2953_v15 }
 0x4ff   :  { %v10587_v7 = vadd.f32 %v8641_v35, %v2958_v24  ;;  %v2961_v48 = vadd.f32 %v8378_v19, %v10577_v21 }
 0x500   :  { %8960 = vtanh.f32 %v10585_v4 }
 0x501   :  { %v10591_v9 = vadd.f32 %v8642_v17, %v2961_v48  ;;  %8962 = vtanh.f32 %v10587_v7 }
 0x503   :  { %8964 = vtanh.f32 %v10591_v9 }
 0x508   :  { %v8959_v12 = vpop.eup %8958 }
 0x509   :  { %3333 = vrot.lane.b32.xlu0 %v8959_v12, %s9375_s7  ;;  %v8379_v58 = vpop.f32.mrb[24].mxu1 }
 0x50a   :  { %v8961_v13 = vpop.eup %8960  ;;  %v8380_v46 = vpop.f32.mrb[25].mxu1 }
 0x50b   :  { %3335 = vrot.lane.b32.xlu1 %v8961_v13, %s9375_s7  ;;  %v8381_v14 = vadd.f32 %v8380_v46, %v8379_v58  ;;  %v8382_v37 = vpop.f32.mrb[26].mxu1  ;;  %v8963_v5 = vpop.eup %8962 }
 0x50c   :  { %v8383_v52 = vpop.f32.mrb[27].mxu1 }
 0x50d   :  { %1657 = vrot.lane.b32.xlu0 %v10046_v38, %s9377_s4  ;;  %v8384_v62 = vadd.f32 %v8383_v52, %v8382_v37  ;;  %v8965_v20 = vpop.eup %8964  ;;  %v2966_v34 = vadd.f32 %v8381_v14, %v10577_v21 }
 0x50f   :  { %3337 = vrot.lane.b32.xlu1 %v8963_v5, %s9375_s7  ;;  %v2969_v22 = vadd.f32 %v8384_v62, %v10577_v21 }
 0x511   :  { %1659 = vrot.lane.b32.xlu0 %v10051_v23, %s9377_s4 }
 0x513   :  { %3339 = vrot.lane.b32.xlu1 %v8965_v20, %s9375_s7 }
 0x515   :  { %1661 = vrot.lane.b32.xlu0 %v10056_v29, %s9377_s4 }
 0x516   :  { %v8645_v36 = vpop.f32.mrb[36].mxu0 }
 0x517   :  { %v3062_v25 = vpop.f32.mrb[37].mxu0 }
 0x518   :  { %v10606_v59 = vadd.f32 %v3062_v25, %v2966_v34  ;;  %v8646_v38 = vpop.f32.mrb[38].mxu0 }
 0x519   :  { %1663 = vrot.lane.b32.xlu0 %v10061_v32, %s9377_s4  ;;  %v3065_v63 = vpop.f32.mrb[39].mxu0 }
 0x51a   :  { %8966 = vtanh.f32 %v10606_v59  ;;  %v10612_v23 = vadd.f32 %v3065_v63, %v2969_v22  ;;  %v8385_v6 = vpop.f32.mrb[28].mxu1 }
 0x51b   :  { %v8386_v2 = vpop.f32.mrb[29].mxu1 }
 0x51c   :  { %v8387_v29 = vadd.f32 %v8386_v2, %v8385_v6  ;;  %v8388_v35 = vpop.f32.mrb[30].mxu1  ;;  %8968 = vtanh.f32 %v10612_v23 }
 0x51d   :  { %v8389_v39 = vpop.f32.mrb[31].mxu1 }
 0x51e   :  { %v2974_v0 = vadd.f32 %v8387_v29, %v10577_v21  ;;  %v8390_v40 = vadd.f32 %v8389_v39, %v8388_v35 }
 0x520   :  { %v10616_v44 = vadd.f32 %v8645_v36, %v2974_v0  ;;  %v2977_v57 = vadd.f32 %v8390_v40, %v10577_v21 }
 0x522   :  { %8970 = vtanh.f32 %v10616_v44  ;;  %v10620_v32 = vadd.f32 %v8646_v38, %v2977_v57 }
 0x524   :  { %v8967_v17 = vpop.eup %8966  ;;  %8972 = vtanh.f32 %v10620_v32 }
 0x525   :  { %3341 = vrot.lane.b32.xlu1 %v8967_v17, %s9375_s7 }
 0x526   :  { %v8969_v45 = vpop.eup %8968 }
 0x529   :  { %3343 = vrot.lane.b32.xlu1 %v8969_v45, %s9375_s7  ;;  %v8391_v15 = vpop.f32.mrb[32].mxu1 }
 0x52a   :  { %v8392_v42 = vpop.f32.mrb[33].mxu1 }
 0x52b   :  { %v8393_v24 = vadd.f32 %v8392_v42, %v8391_v15  ;;  %v8394_v19 = vpop.f32.mrb[34].mxu1 }
 0x52c   :  { %v8971_v48 = vpop.eup %8970  ;;  %v8395_v12 = vpop.f32.mrb[35].mxu1 }
 0x52d   :  { %1665 = vrot.lane.b32.xlu1 %v10067_v43, %s9377_s4  ;;  %v8396_v58 = vadd.f32 %v8395_v12, %v8394_v19  ;;  %3345 = vrot.lane.b32.xlu0 %v8971_v48, %s9375_s7  ;;  %v2982_v37 = vadd.f32 %v8393_v24, %v10577_v21 }
 0x52e   :  { %v8973_v13 = vpop.eup %8972 }
 0x531   :  { %3347 = vrot.lane.b32.xlu1 %v8973_v13, %s9375_s7  ;;  %1667 = vrot.lane.b32.xlu0 %v10071_v47, %s9377_s4  ;;  %v2985_v47 = vadd.f32 %v8396_v58, %v10577_v21 }
 0x535   :  { %1671 = vrot.lane.b32.xlu1 %v10079_v1, %s9377_s4  ;;  %1669 = vrot.lane.b32.xlu0 %v10075_v8, %s9377_s4 }
 0x539   :  { %v8397_v46 = vpop.f32.mrb[36].mxu1 }
 0x53a   :  { %v8649_v14 = vpop.f32.mrb[40].mxu0  ;;  %v8398_v43 = vpop.f32.mrb[37].mxu1 }
 0x53b   :  { %v3078_v52 = vpop.f32.mrb[41].mxu0  ;;  %v8399_v62 = vadd.f32 %v8398_v43, %v8397_v46  ;;  %v8400_v20 = vpop.f32.mrb[38].mxu1  ;;  %v7982_v46 = vmul.f32 -1.442695, %v10580_v50  ;;  %v7984_v50 = vmul.f32 -1.442695, %v10587_v7 }
 0x53c   :  { %v10636_v5 = vadd.f32 %v3078_v52, %v2982_v37  ;;  %v8650_v36 = vpop.f32.mrb[42].mxu0  ;;  %v8401_v34 = vpop.f32.mrb[39].mxu1  ;;  %v7983_v52 = vmul.f32 -1.442695, %v10585_v4 }
 0x53d   :  { %v3081_v25 = vpop.f32.mrb[43].mxu0  ;;  %v2990_v1 = vadd.f32 %v8399_v62, %v10577_v21  ;;  %v8402_v8 = vadd.f32 %v8401_v34, %v8400_v20 }
 0x53e   :  { %8974 = vtanh.f32 %v10636_v5  ;;  %v10641_v38 = vadd.f32 %v3081_v25, %v2985_v47  ;;  %v7985_v25 = vmul.f32 -1.442695, %v10591_v9 }
 0x53f   :  { %v10643_v22 = vadd.f32 %v8649_v14, %v2990_v1  ;;  %v2993_v63 = vadd.f32 %v8402_v8, %v10577_v21  ;;  %v3222_v1 = vld [vmem:[#allocation4 + $0x8] sm:$0xff] }
 0x540   :  { %8976 = vtanh.f32 %v10641_v38 }
 0x541   :  { %v10647_v6 = vadd.f32 %v8650_v36, %v2993_v63  ;;  %8978 = vtanh.f32 %v10643_v22 }
 0x543   :  { %8980 = vtanh.f32 %v10647_v6 }
 0x548   :  { %v8975_v2 = vpop.eup %8974 }
 0x549   :  { %3349 = vrot.lane.b32.xlu0 %v8975_v2, %s9375_s7  ;;  %v8403_v29 = vpop.f32.mrb[40].mxu1 }
 0x54a   :  { %v8977_v35 = vpop.eup %8976  ;;  %v8404_v39 = vpop.f32.mrb[41].mxu1 }
 0x54b   :  { %3351 = vrot.lane.b32.xlu1 %v8977_v35, %s9375_s7  ;;  %v8405_v0 = vadd.f32 %v8404_v39, %v8403_v29  ;;  %v8406_v40 = vpop.f32.mrb[42].mxu1  ;;  %v8979_v45 = vpop.eup %8978  ;;  %v3221_v35 = vld [vmem:[#allocation4] sm:$0xff] }
 0x54c   :  { %v8407_v57 = vpop.f32.mrb[43].mxu1 }
 0x54d   :  { %1673 = vrot.lane.b32.xlu0 %v10086_v33, %s9377_s4  ;;  %v8408_v17 = vadd.f32 %v8407_v57, %v8406_v40  ;;  %v2998_v42 = vadd.f32 %v8405_v0, %v10577_v21  ;;  %v8981_v24 = vpop.eup %8980  ;;  %v7986_v57 = vmul.f32 -1.442695, %v10606_v59  ;;  %v7988_v59 = vmul.f32 -1.442695, %v10616_v44  ;;  %v3224_v44 = vld [vmem:[#allocation4 + $0x18] sm:$0xff] }
 0x54f   :  { %3353 = vrot.lane.b32.xlu1 %v8979_v45, %s9375_s7  ;;  %v3001_v33 = vadd.f32 %v8408_v17, %v10577_v21 }
 0x551   :  { %1675 = vrot.lane.b32.xlu0 %v10091_v18, %s9377_s4 }
 0x552   :  { %v8653_v15 = vpop.f32.mrb[44].mxu0 }
 0x553   :  { %v3094_v19 = vpop.f32.mrb[45].mxu0  ;;  %3355 = vrot.lane.b32.xlu1 %v8981_v24, %s9375_s7 }
 0x554   :  { %v10660_v48 = vadd.f32 %v3094_v19, %v2998_v42  ;;  %v8654_v12 = vpop.f32.mrb[46].mxu0 }
 0x555   :  { %1677 = vrot.lane.b32.xlu0 %v10096_v28, %s9377_s4  ;;  %v3097_v58 = vpop.f32.mrb[47].mxu0 }
 0x556   :  { %8982 = vtanh.f32 %v10660_v48  ;;  %v10666_v13 = vadd.f32 %v3097_v58, %v3001_v33  ;;  %v3223_v58 = vld [vmem:[#allocation4 + $0x10] sm:$0xff] }
 0x558   :  { %8984 = vtanh.f32 %v10666_v13 }
 0x559   :  { %1679 = vrot.lane.b32.xlu0 %v10101_v31, %s9377_s4  ;;  %8986 = vpow2.f32 %v7982_v46 }
 0x55a   :  { %v8409_v18 = vpop.f32.mrb[44].mxu1  ;;  %8988 = vpow2.f32 %v7983_v52 }
 0x55b   :  { %v8410_v14 = vpop.f32.mrb[45].mxu1 }
 0x55c   :  { %v8411_v37 = vadd.f32 %v8410_v14, %v8409_v18  ;;  %v8412_v43 = vpop.f32.mrb[46].mxu1 }
 0x55d   :  { %v8413_v62 = vpop.f32.mrb[47].mxu1 }
 0x55e   :  { %v3006_v28 = vadd.f32 %v8411_v37, %v10577_v21  ;;  %v8414_v20 = vadd.f32 %v8413_v62, %v8412_v43  ;;  %v7989_v37 = vmul.f32 -1.442695, %v10620_v32 }
 0x560   :  { %v8983_v36 = vpop.eup %8982  ;;  %v10674_v34 = vadd.f32 %v8653_v15, %v3006_v28  ;;  %v3009_v31 = vadd.f32 %v8414_v20, %v10577_v21  ;;  %v7987_v15 = vmul.f32 -1.442695, %v10612_v23 }
 0x561   :  { %3357 = vrot.lane.b32.xlu1 %v8983_v36, %s9375_s7 }
 0x562   :  { %8990 = vtanh.f32 %v10674_v34  ;;  %v10680_v47 = vadd.f32 %v8654_v12, %v3009_v31  ;;  %v8985_v4 = vpop.eup %8984 }
 0x563   :  { %8992 = vpow2.f32 %v7984_v50  ;;  %v8987_v21 = vpop.eup %8986 }
 0x564   :  { %8994 = vtanh.f32 %v10680_v47  ;;  %v8989_v8 = vpop.eup %8988  ;;  %v3157_v7 = vadd.f32 1.0, %v8987_v21 }
 0x565   :  { %3359 = vrot.lane.b32.xlu1 %v8985_v4, %s9375_s7  ;;  %8996 = vpow2.f32 %v7985_v25  ;;  %v3158_v2 = vadd.f32 1.0, %v8989_v8 }
 0x566   :  { %8998 = vrcp.f32 %v3157_v7 }
 0x567   :  { %9000 = vrcp.f32 %v3158_v2 }
 0x569   :  { %3255 = vrot.lane.b32.xlu1 %v3222_v1, %s9375_s7 }
 0x56c   :  { %v8991_v63 = vpop.eup %8990 }
 0x56d   :  { %3361 = vrot.lane.b32.xlu0 %v8991_v63, %s9375_s7  ;;  %v8993_v29 = vpop.eup %8992 }
 0x56e   :  { %v8995_v9 = vpop.eup %8994  ;;  %v3159_v0 = vadd.f32 1.0, %v8993_v29 }
 0x56f   :  { %v8997_v39 = vpop.eup %8996  ;;  %3363 = vrot.lane.b32.xlu1 %v8995_v9, %s9375_s7 }
 0x570   :  { %v3160_v40 = vadd.f32 1.0, %v8997_v39  ;;  %9002 = vrcp.f32 %v3159_v0  ;;  %v10690_v17 = vpop.eup %8998 }
 0x571   :  { %3253 = vrot.lane.b32.xlu0 %v3221_v35, %s9375_s7  ;;  %v10694_v24 = vpop.eup %9000 }
 0x572   :  { %9004 = vrcp.f32 %v3160_v40  ;;  %v7990_v40 = vmul.f32 -1.442695, %v10636_v5 }
 0x573   :  { %9006 = vpow2.f32 %v7986_v57 }
 0x574   :  { %9008 = vpow2.f32 %v7987_v15 }
 0x575   :  { %9010 = vpow2.f32 %v7988_v59 }
 0x576   :  { %9012 = vpow2.f32 %v7989_v37 }
 0x57a   :  { %v10701_v18 = vpop.eup %9002 }
 0x57b   :  { %v3334_v45 = vpop.permute.xlu0 %3333 }
 0x57c   :  { %v3381_v42 = vmul.f32 %v10690_v17, %v3334_v45  ;;  %v10707_v43 = vpop.eup %9004  ;;  %v7991_v45 = vmul.f32 -1.442695, %v10641_v38 }
 0x57d   :  { %v3336_v19 = vpop.permute.xlu1 %3335  ;;  %v9007_v52 = vpop.eup %9006 }
 0x57e   :  { %3413 = vrot.lane.b32.xlu0 %v3381_v42, %s9375_s7  ;;  %v3382_v12 = vmul.f32 %v10694_v24, %v3336_v19  ;;  %v3161_v36 = vadd.f32 1.0, %v9007_v52  ;;  %v9009_v31 = vpop.eup %9008 }
 0x57f   :  { %v1658_v33 = vpop.permute.xlu0 %1657  ;;  %v3162_v4 = vadd.f32 1.0, %v9009_v31  ;;  %v9011_v1 = vpop.eup %9010 }
 0x580   :  { %1701 = vst.msk [vmem:[#allocation4 + $0x20] sm:$0xff] %vm12992_vm7, %v1658_v33  ;;  %3415 = vrot.lane.b32.xlu1 %v3382_v12, %s9375_s7  ;;  %9014 = vrcp.f32 %v3161_v36  ;;  %v9013_v8 = vpop.eup %9012  ;;  %v3163_v63 = vadd.f32 1.0, %v9011_v1  ;;  %v7992_v33 = vmul.f32 -1.442695, %v10643_v22  ;;  %vm12997_vm7 = vmmov %vm12993_vm0 }
 0x581   :  { %v3338_v23 = vpop.permute.xlu1 %3337  ;;  %9016 = vrcp.f32 %v3162_v4  ;;  %v3164_v7 = vadd.f32 1.0, %v9013_v8 }
 0x582   :  { %3257 = vrot.lane.b32.xlu0 %v3223_v58, %s9375_s7  ;;  %v3383_v46 = vmul.f32 %v10701_v18, %v3338_v23  ;;  %9018 = vrcp.f32 %v3163_v63  ;;  %v7993_v23 = vmul.f32 -1.442695, %v10647_v6 }
 0x583   :  { %v1660_v14 = vpop.permute.xlu0 %1659  ;;  %9020 = vrcp.f32 %v3164_v7 }
 0x584   :  { %1702 = vst.msk [vmem:[#allocation4 + $0x28] sm:$0xff] %vm12993_vm0, %v1660_v14  ;;  %3417 = vrot.lane.b32.xlu1 %v3383_v46, %s9375_s7  ;;  %9022 = vpow2.f32 %v7990_v40 }
 0x585   :  { %v3340_v62 = vpop.permute.xlu1 %3339  ;;  %9024 = vpow2.f32 %v7991_v45 }
 0x586   :  { %3259 = vrot.lane.b32.xlu0 %v3224_v44, %s9375_s7  ;;  %v3384_v28 = vmul.f32 %v10707_v43, %v3340_v62  ;;  %9026 = vpow2.f32 %v7992_v33 }
 0x587   :  { %v1662_v20 = vpop.permute.xlu0 %1661  ;;  %v3225_v32 = vld [vmem:[#allocation4 + $0x20] sm:$0xff]  ;;  %9028 = vpow2.f32 %v7993_v23 }
 0x588   :  { %1703 = vst.msk [vmem:[#allocation4 + $0x30] sm:$0xff] %vm12994_vm2, %v1662_v20  ;;  %3419 = vrot.lane.b32.xlu1 %v3384_v28, %s9375_s7  ;;  %vm12998_vm2 = vmmov %vm12993_vm0 }
 0x58a   :  { %3261 = vrot.lane.b32.xlu0 %v3225_v32, %s9375_s7  ;;  %v10719_v29 = vpop.eup %9014  ;;  %v7994_v32 = vmul.f32 -1.442695, %v10660_v48 }
 0x58b   :  { %v1664_v50 = vpop.permute.xlu0 %1663  ;;  %v3226_v25 = vld [vmem:[#allocation4 + $0x28] sm:$0xff]  ;;  %v10723_v39 = vpop.eup %9016 }
 0x58c   :  { %1704 = vst.msk [vmem:[#allocation4 + $0x38] sm:$0xff] %vm12995_vm3, %v1664_v50  ;;  %v10729_v42 = vpop.eup %9018  ;;  %v7995_v50 = vmul.f32 -1.442695, %v10666_v13  ;;  %vm12999_vm3 = vmmov %vm12993_vm0  ;;  %v7996_v13 = vmul.f32 -1.442695, %v10674_v34 }
 0x58d   :  { %v10734_v59 = vpop.eup %9020 }
 0x58e   :  { %3263 = vrot.lane.b32.xlu0 %v3226_v25, %s9375_s7  ;;  %v9023_v37 = vpop.eup %9022 }
 0x58f   :  { %v3227_v21 = vld [vmem:[#allocation4 + $0x30] sm:$0xff]  ;;  %v9025_v52 = vpop.eup %9024  ;;  %v3165_v62 = vadd.f32 1.0, %v9023_v37 }
 0x590   :  { %v9027_v28 = vpop.eup %9026  ;;  %v3166_v6 = vadd.f32 1.0, %v9025_v52 }
 0x591   :  { %9030 = vrcp.f32 %v3165_v62  ;;  %v3167_v20 = vadd.f32 1.0, %v9027_v28  ;;  %v9029_v36 = vpop.eup %9028 }
 0x592   :  { %3265 = vrot.lane.b32.xlu0 %v3227_v21, %s9375_s7  ;;  %9032 = vrcp.f32 %v3166_v6  ;;  %v3168_v31 = vadd.f32 1.0, %v9029_v36 }
 0x593   :  { %v3228_v2 = vld [vmem:[#allocation4 + $0x38] sm:$0xff]  ;;  %9034 = vrcp.f32 %v3167_v20 }
 0x594   :  { %9036 = vpow2.f32 %v7994_v32 }
 0x595   :  { %9038 = vrcp.f32 %v3168_v31 }
 0x596   :  { %3267 = vrot.lane.b32.xlu0 %v3228_v2, %s9375_s7  ;;  %9040 = vpow2.f32 %v7995_v50 }
 0x597   :  { %v3342_v35 = vpop.permute.xlu1 %3341  ;;  %9042 = vpow2.f32 %v7996_v13 }
 0x598   :  { %v3385_v9 = vmul.f32 %v10719_v29, %v3342_v35 }
 0x59a   :  { %3421 = vrot.lane.b32.xlu1 %v3385_v9, %s9375_s7 }
 0x59b   :  { %v3344_v0 = vpop.permute.xlu1 %3343  ;;  %v10747_v4 = vpop.eup %9030 }
 0x59c   :  { %v3386_v57 = vmul.f32 %v10723_v39, %v3344_v0  ;;  %v10750_v21 = vpop.eup %9032 }
 0x59d   :  { %v10755_v7 = vpop.eup %9034 }
 0x59e   :  { %3423 = vrot.lane.b32.xlu1 %v3386_v57, %s9375_s7  ;;  %v9037_v35 = vpop.eup %9036 }
 0x59f   :  { %v1666_v15 = vpop.permute.xlu1 %1665  ;;  %v3346_v19 = vpop.permute.xlu0 %3345  ;;  %v3169_v45 = vadd.f32 1.0, %v9037_v35 }
 0x5a0   :  { %1705 = vst.msk [vmem:[#allocation4 + $0x40] sm:$0xff] %vm12996_vm11, %v1666_v15  ;;  %v3387_v12 = vmul.f32 %v10729_v42, %v3346_v19  ;;  %vm13000_vm11 = vmmov %vm12993_vm0  ;;  %v10762_v57 = vpop.eup %9038 }
 0x5a1   :  { %v9041_v34 = vpop.eup %9040  ;;  %9044 = vrcp.f32 %v3169_v45 }
 0x5a2   :  { %3425 = vrot.lane.b32.xlu1 %v3387_v12, %s9375_s7  ;;  %v7997_v12 = vmul.f32 -1.442695, %v10680_v47  ;;  %v9043_v47 = vpop.eup %9042 }
 0x5a3   :  { %v3348_v5 = vpop.permute.xlu1 %3347  ;;  %v1668_v38 = vpop.permute.xlu0 %1667 }
 0x5a4   :  { %v3388_v58 = vmul.f32 %v10734_v59, %v3348_v5  ;;  %1706 = vst.msk [vmem:[#allocation4 + $0x48] sm:$0xff] %vm12997_vm7, %v1668_v38  ;;  %vm13001_vm7 = vmmov %vm12993_vm0  ;;  %9046 = vpow2.f32 %v7997_v12 }
 0x5a6   :  { %3427 = vrot.lane.b32.xlu1 %v3388_v58, %s9375_s7  ;;  %v3170_v58 = vadd.f32 1.0, %v9041_v34 }
 0x5a7   :  { %v1672_v46 = vpop.permute.xlu1 %1671  ;;  %v3229_v14 = vld [vmem:[#allocation4 + $0x40] sm:$0xff]  ;;  %v1670_v22 = vpop.permute.xlu0 %1669 }
 0x5a8   :  { %1708 = vst.msk [vmem:[#allocation4 + $0x58] sm:$0xff] %vm12993_vm0, %v1672_v46  ;;  %3269 = vrot.lane.b32.xlu0 %v3229_v14, %s9375_s7  ;;  %9048 = vrcp.f32 %v3170_v58 }
 0x5a9   :  { %1707 = vst.msk [vmem:[#allocation4 + $0x50] sm:$0xff] %vm12998_vm2, %v1670_v22  ;;  %v3171_v22 = vadd.f32 1.0, %v9043_v47  ;;  %vm13002_vm2 = vcmask 1046534  }
 0x5ab   :  { %v3230_v44 = vld [vmem:[#allocation4 + $0x48] sm:$0xff]  ;;  %v10774_v37 = vpop.eup %9044  ;;  %9050 = vrcp.f32 %v3171_v22 }
 0x5ac   :  { %3271 = vrot.lane.b32.xlu1 %v3230_v44, %s9375_s7 }
 0x5ae   :  { %v9047_v62 = vpop.eup %9046 }
 0x5af   :  { %v3232_v15 = vld [vmem:[#allocation4 + $0x58] sm:$0xff]  ;;  %v3172_v36 = vadd.f32 1.0, %v9047_v62 }
 0x5b0   :  { %v3231_v2 = vld [vmem:[#allocation4 + $0x50] sm:$0xff] }
 0x5b1   :  { %9052 = vrcp.f32 %v3172_v36 }
 0x5b2   :  { %v10779_v6 = vpop.eup %9048 }
 0x5b5   :  { %v10783_v31 = vpop.eup %9050 }
 0x5bb   :  { %v3350_v25 = vpop.permute.xlu0 %3349 }
 0x5bc   :  { %v3389_v1 = vmul.f32 %v10747_v4, %v3350_v25 }
 0x5bd   :  { %v3352_v8 = vpop.permute.xlu1 %3351 }
 0x5be   :  { %3429 = vrot.lane.b32.xlu0 %v3389_v1, %s9375_s7  ;;  %v3390_v63 = vmul.f32 %v10750_v21, %v3352_v8  ;;  %v10787_v8 = vpop.eup %9052 }
 0x5bf   :  { %v1674_v48 = vpop.permute.xlu0 %1673 }
 0x5c0   :  { %1709 = vst.msk [vmem:[#allocation4 + $0x60] sm:$0xff] %vm12999_vm3, %v1674_v48  ;;  %3431 = vrot.lane.b32.xlu1 %v3390_v63, %s9375_s7  ;;  %vm13003_vm3 = vmmov %vm13002_vm2 }
 0x5c1   :  { %v3354_v9 = vpop.permute.xlu1 %3353 }
 0x5c2   :  { %3273 = vrot.lane.b32.xlu0 %v3231_v2, %s9375_s7  ;;  %v3391_v0 = vmul.f32 %v10755_v7, %v3354_v9 }
 0x5c3   :  { %v1676_v40 = vpop.permute.xlu0 %1675 }
 0x5c4   :  { %1710 = vst.msk [vmem:[#allocation4 + $0x68] sm:$0xff] %vm13000_vm11, %v1676_v40  ;;  %3433 = vrot.lane.b32.xlu1 %v3391_v0, %s9375_s7  ;;  %vm13004_vm11 = vmmov %vm13002_vm2 }
 0x5c5   :  { %v3356_v19 = vpop.permute.xlu1 %3355 }
 0x5c6   :  { %3275 = vrot.lane.b32.xlu0 %v3232_v15, %s9375_s7  ;;  %v3392_v33 = vmul.f32 %v10762_v57, %v3356_v19 }
 0x5c7   :  { %v1678_v5 = vpop.permute.xlu0 %1677  ;;  %v3233_v38 = vld [vmem:[#allocation4 + $0x60] sm:$0xff] }
 0x5c8   :  { %1711 = vst.msk [vmem:[#allocation4 + $0x70] sm:$0xff] %vm13001_vm7, %v1678_v5  ;;  %3435 = vrot.lane.b32.xlu1 %v3392_v33, %s9375_s7  ;;  %vm13005_vm7 = vmmov %vm13002_vm2 }
 0x5ca   :  { %3277 = vrot.lane.b32.xlu0 %v3233_v38, %s9375_s7 }
 0x5cb   :  { %v1680_v23 = vpop.permute.xlu0 %1679  ;;  %v3234_v46 = vld [vmem:[#allocation4 + $0x68] sm:$0xff] }
 0x5cc   :  { %1712 = vst.msk [vmem:[#allocation4 + $0x78] sm:$0xff] %vm12993_vm0, %v1680_v23  ;;  %vm13006_vm0 = vmmov %vm13002_vm2 }
 0x5cd   :  { %vm13007_vm9 = vmmov %vm13006_vm0 }
 0x5ce   :  { %3279 = vrot.lane.b32.xlu0 %v3234_v46, %s9375_s7  ;;  %vm13008_vm6 = vmmov %vm13006_vm0 }
 0x5cf   :  { %v3235_v14 = vld [vmem:[#allocation4 + $0x70] sm:$0xff] }
 0x5d2   :  { %3281 = vrot.lane.b32.xlu0 %v3235_v14, %s9375_s7 }
 0x5d3   :  { %v3358_v44 = vpop.permute.xlu1 %3357  ;;  %v3236_v28 = vld [vmem:[#allocation4 + $0x78] sm:$0xff] }
 0x5d4   :  { %v3393_v52 = vmul.f32 %v10774_v37, %v3358_v44 }
 0x5d6   :  { %3283 = vrot.lane.b32.xlu0 %v3236_v28, %s9375_s7  ;;  %3437 = vrot.lane.b32.xlu1 %v3393_v52, %s9375_s7 }
 0x5d7   :  { %v3360_v20 = vpop.permute.xlu1 %3359 }
 0x5d8   :  { %v3394_v32 = vmul.f32 %v10779_v6, %v3360_v20 }
 0x5da   :  { %3439 = vrot.lane.b32.xlu1 %v3394_v32, %s9375_s7 }
 0x5db   :  { %v3256_v1 = vpop.permute.xlu1 %3255 }
 0x5dc   :  { %v3302_v0 = vmul.f32 %v10694_v24, %v3256_v1 }
 0x5df   :  { %v3362_v50 = vpop.permute.xlu0 %3361 }
 0x5e0   :  { %v3395_v25 = vmul.f32 %v10783_v31, %v3362_v50 }
 0x5e1   :  { %v3364_v63 = vpop.permute.xlu1 %3363 }
 0x5e2   :  { %3441 = vrot.lane.b32.xlu1 %v3395_v25, %s9375_s7  ;;  %v3396_v48 = vmul.f32 %v10787_v8, %v3364_v63 }
 0x5e3   :  { %v3254_v13 = vpop.permute.xlu0 %3253 }
 0x5e4   :  { %v3301_v2 = vmul.f32 %v10690_v17, %v3254_v13 }
 0x5e6   :  { %3443 = vrot.lane.b32.xlu1 %v3396_v48, %s9375_s7 }
 0x5f0   :  { %v3414_v35 = vpop.permute.xlu0 %3413 }
 0x5f1   :  { %v10792_v9 = vadd.f32 %v3414_v35, %v3301_v2 }
 0x5f2   :  { %v3416_v40 = vpop.permute.xlu1 %3415 }
 0x5f3   :  { %9054 = vtanh.f32 %v10792_v9  ;;  %v10796_v45 = vadd.f32 %v3416_v40, %v3302_v0 }
 0x5f4   :  { %v3258_v15 = vpop.permute.xlu0 %3257 }
 0x5f5   :  { %v3303_v34 = vmul.f32 %v10701_v18, %v3258_v15  ;;  %9056 = vtanh.f32 %v10796_v45 }
 0x5f6   :  { %v3418_v19 = vpop.permute.xlu1 %3417 }
 0x5f7   :  { %v10800_v12 = vadd.f32 %v3418_v19, %v3303_v34 }
 0x5f8   :  { %v3260_v33 = vpop.permute.xlu0 %3259 }
 0x5f9   :  { %v3304_v5 = vmul.f32 %v10707_v43, %v3260_v33  ;;  %9058 = vtanh.f32 %v10800_v12 }
 0x5fa   :  { %v3420_v58 = vpop.permute.xlu1 %3419 }
 0x5fb   :  { %v10804_v38 = vadd.f32 %v3420_v58, %v3304_v5 }
 0x5fc   :  { %v3262_v47 = vpop.permute.xlu0 %3261 }
 0x5fd   :  { %v9055_v23 = vpop.eup %9054  ;;  %9060 = vtanh.f32 %v10804_v38  ;;  %v3305_v52 = vmul.f32 %v10719_v29, %v3262_v47 }
 0x5fe   :  { %3509 = vrot.lane.b32.xlu0 %v9055_v23, %s9375_s7 }
 0x5ff   :  { %v9057_v46 = vpop.eup %9056 }
 0x600   :  { %3511 = vrot.lane.b32.xlu1 %v9057_v46, %s9375_s7  ;;  %v3264_v44 = vpop.permute.xlu0 %3263 }
 0x601   :  { %v3306_v20 = vmul.f32 %v10723_v39, %v3264_v44 }
 0x603   :  { %v9059_v14 = vpop.eup %9058 }
 0x604   :  { %3513 = vrot.lane.b32.xlu0 %v9059_v14, %s9375_s7  ;;  %v3266_v36 = vpop.permute.xlu0 %3265 }
 0x605   :  { %v3307_v25 = vmul.f32 %v10729_v42, %v3266_v36 }
 0x607   :  { %v9061_v22 = vpop.eup %9060 }
 0x608   :  { %3515 = vrot.lane.b32.xlu1 %v9061_v22, %s9375_s7  ;;  %v3268_v1 = vpop.permute.xlu0 %3267 }
 0x609   :  { %v3308_v13 = vmul.f32 %v10734_v59, %v3268_v1 }
 0x60c   :  { %v3422_v62 = vpop.permute.xlu1 %3421 }
 0x60d   :  { %v10812_v28 = vadd.f32 %v3422_v62, %v3305_v52 }
 0x60f   :  { %9062 = vtanh.f32 %v10812_v28 }
 0x610   :  { %v3424_v32 = vpop.permute.xlu1 %3423 }
 0x611   :  { %v10816_v50 = vadd.f32 %v3424_v32, %v3306_v20 }
 0x613   :  { %9064 = vtanh.f32 %v10816_v50 }
 0x614   :  { %v3426_v63 = vpop.permute.xlu1 %3425 }
 0x615   :  { %v10820_v48 = vadd.f32 %v3426_v63, %v3307_v25 }
 0x617   :  { %9066 = vtanh.f32 %v10820_v48 }
 0x618   :  { %v3428_v35 = vpop.permute.xlu1 %3427 }
 0x619   :  { %v9063_v2 = vpop.eup %9062  ;;  %v10824_v0 = vadd.f32 %v3428_v35, %v3308_v13 }
 0x61a   :  { %3517 = vrot.lane.b32.xlu0 %v9063_v2, %s9375_s7  ;;  %v3270_v19 = vpop.permute.xlu0 %3269 }
 0x61b   :  { %9068 = vtanh.f32 %v10824_v0  ;;  %v3309_v33 = vmul.f32 %v10747_v4, %v3270_v19 }
 0x61d   :  { %v9065_v40 = vpop.eup %9064 }
 0x61e   :  { %3519 = vrot.lane.b32.xlu1 %v9065_v40, %s9375_s7  ;;  %v3272_v5 = vpop.permute.xlu1 %3271 }
 0x61f   :  { %v3310_v46 = vmul.f32 %v10750_v21, %v3272_v5 }
 0x621   :  { %v9067_v15 = vpop.eup %9066 }
 0x622   :  { %3521 = vrot.lane.b32.xlu0 %v9067_v15, %s9375_s7 }
 0x625   :  { %v9069_v34 = vpop.eup %9068 }
 0x626   :  { %3523 = vrot.lane.b32.xlu1 %v9069_v34, %s9375_s7 }
 0x630   :  { %v3430_v58 = vpop.permute.xlu0 %3429 }
 0x631   :  { %v10832_v23 = vadd.f32 %v3430_v58, %v3309_v33 }
 0x632   :  { %v3432_v47 = vpop.permute.xlu1 %3431 }
 0x633   :  { %9070 = vtanh.f32 %v10832_v23  ;;  %v10836_v14 = vadd.f32 %v3432_v47, %v3310_v46 }
 0x634   :  { %v3274_v22 = vpop.permute.xlu0 %3273 }
 0x635   :  { %v3311_v44 = vmul.f32 %v10755_v7, %v3274_v22  ;;  %9072 = vtanh.f32 %v10836_v14 }
 0x636   :  { %v3434_v52 = vpop.permute.xlu1 %3433 }
 0x637   :  { %v10840_v62 = vadd.f32 %v3434_v52, %v3311_v44 }
 0x638   :  { %v3276_v20 = vpop.permute.xlu0 %3275 }
 0x639   :  { %v3312_v36 = vmul.f32 %v10762_v57, %v3276_v20  ;;  %9074 = vtanh.f32 %v10840_v62 }
 0x63a   :  { %v3436_v32 = vpop.permute.xlu1 %3435 }
 0x63b   :  { %v10844_v25 = vadd.f32 %v3436_v32, %v3312_v36 }
 0x63c   :  { %v3278_v13 = vpop.permute.xlu0 %3277 }
 0x63d   :  { %v9071_v1 = vpop.eup %9070  ;;  %9076 = vtanh.f32 %v10844_v25  ;;  %v3313_v35 = vmul.f32 %v10774_v37, %v3278_v13 }
 0x63e   :  { %3525 = vrot.lane.b32.xlu0 %v9071_v1, %s9375_s7 }
 0x63f   :  { %v9073_v63 = vpop.eup %9072 }
 0x640   :  { %3527 = vrot.lane.b32.xlu1 %v9073_v63, %s9375_s7  ;;  %v3280_v15 = vpop.permute.xlu0 %3279 }
 0x641   :  { %v3314_v33 = vmul.f32 %v10779_v6, %v3280_v15 }
 0x643   :  { %v9075_v2 = vpop.eup %9074 }
 0x644   :  { %3529 = vrot.lane.b32.xlu0 %v9075_v2, %s9375_s7  ;;  %v3282_v46 = vpop.permute.xlu0 %3281 }
 0x645   :  { %v3315_v47 = vmul.f32 %v10783_v31, %v3282_v46 }
 0x647   :  { %v9077_v40 = vpop.eup %9076 }
 0x648   :  { %v3438_v34 = vpop.permute.xlu1 %3437  ;;  %3531 = vrot.lane.b32.xlu1 %v9077_v40, %s9375_s7  ;;  %v3284_v20 = vpop.permute.xlu0 %3283 }
 0x649   :  { %v10852_v19 = vadd.f32 %v3438_v34, %v3313_v35  ;;  %v3316_v32 = vmul.f32 %v10787_v8, %v3284_v20 }
 0x64b   :  { %9078 = vtanh.f32 %v10852_v19 }
 0x64c   :  { %v3440_v5 = vpop.permute.xlu1 %3439 }
 0x64d   :  { %v10856_v58 = vadd.f32 %v3440_v5, %v3314_v33 }
 0x64f   :  { %9080 = vtanh.f32 %v10856_v58 }
 0x654   :  { %v3442_v44 = vpop.permute.xlu1 %3441 }
 0x655   :  { %v9079_v22 = vpop.eup %9078  ;;  %v10860_v52 = vadd.f32 %v3442_v44, %v3315_v47 }
 0x656   :  { %3533 = vrot.lane.b32.xlu0 %v9079_v22, %s9375_s7 }
 0x657   :  { %9082 = vtanh.f32 %v10860_v52 }
 0x658   :  { %v3444_v1 = vpop.permute.xlu1 %3443 }
 0x659   :  { %v9081_v36 = vpop.eup %9080  ;;  %v10866_v63 = vadd.f32 %v3444_v1, %v3316_v32 }
 0x65a   :  { %3535 = vrot.lane.b32.xlu1 %v9081_v36, %s9375_s7 }
 0x65b   :  { %9084 = vtanh.f32 %v10866_v63 }
 0x661   :  { %v9083_v13 = vpop.eup %9082 }
 0x662   :  { %3537 = vrot.lane.b32.xlu0 %v9083_v13, %s9375_s7 }
 0x665   :  { %v9085_v2 = vpop.eup %9084 }
 0x666   :  { %3539 = vrot.lane.b32.xlu1 %v9085_v2, %s9375_s7 }
 0x670   :  { %v3510_v35 = vpop.permute.xlu0 %3509 }
 0x671   :  { %v3557_v40 = vmul.f32 %v10690_v17, %v3510_v35 }
 0x672   :  { %v3512_v15 = vpop.permute.xlu1 %3511 }
 0x673   :  { %3669 = vrot.lane.b32.xlu0 %v3557_v40, %s9376_s20  ;;  %v3767_v34 = vrot.slane %v3557_v40, 1  ;;  %v3558_v33 = vmul.f32 %v10694_v24, %v3512_v15  ;;  %v3831_v5 = vrot.slane %v3557_v40, 3  ;;  %v3865_v46 = vrot.slane %v3557_v40, 4 }
 0x674   :  { %v3899_v47 = vrot.slane %v3557_v40, 5  ;;  %v3963_v22 = vrot.slane %v3557_v40, 7  ;;  %v3801_v44 = vrot.slane %v3557_v40, 2  ;;  %v3933_v20 = vrot.slane %v3557_v40, 6 }
 0x675   :  { %3671 = vrot.lane.b32.xlu1 %v3558_v33, %s9376_s20  ;;  %v3733_v36 = vrot.slane %v3558_v33, 7  ;;  %v3768_v32 = vsel %vm1795_vm13, %v3558_v33, %v3767_v34  ;;  %v3832_v1 = vrot.slane %v3558_v33, 2  ;;  %v3866_v13 = vrot.slane %v3558_v33, 3 }
 0x676   :  { %v3514_v17 = vpop.permute.xlu0 %3513  ;;  %v3900_v2 = vrot.slane %v3558_v33, 4  ;;  %v3964_v35 = vrot.slane %v3558_v33, 6  ;;  %v3802_v55 = vrot.slane %v3558_v33, 1  ;;  %v3934_v3 = vrot.slane %v3558_v33, 5 }
 0x677   :  { %v3559_v24 = vmul.f32 %v10701_v18, %v3514_v17  ;;  %v3734_v15 = vsel %vm1795_vm13, %v3733_v36, %v3557_v40  ;;  %v3833_v49 = vsel %vm1795_vm13, %v3832_v1, %v3831_v5  ;;  %v3867_v11 = vsel %vm1795_vm13, %v3866_v13, %v3865_v46 }
 0x678   :  { %v3901_v60 = vsel %vm1795_vm13, %v3900_v2, %v3899_v47  ;;  %v3965_v51 = vsel %vm1795_vm13, %v3964_v35, %v3963_v22  ;;  %v3803_v34 = vsel %vm1795_vm13, %v3802_v55, %v3801_v44  ;;  %v3935_v30 = vsel %vm1795_vm13, %v3934_v3, %v3933_v20 }
 0x679   :  { %3673 = vrot.lane.b32.xlu0 %v3559_v24, %s9376_s20  ;;  %v3735_v61 = vrot.slane %v3559_v24, 6  ;;  %v3769_v33 = vrot.slane %v3559_v24, 7  ;;  %v3834_v10 = vrot.slane %v3559_v24, 1  ;;  %v3868_v18 = vrot.slane %v3559_v24, 2 }
 0x67a   :  { %v3516_v17 = vpop.permute.xlu1 %3515  ;;  %v3902_v40 = vrot.slane %v3559_v24, 3  ;;  %v3966_v36 = vrot.slane %v3559_v24, 5  ;;  %v3804_v5 = vsel %vm1798_vm14, %v3559_v24, %v3803_v34  ;;  %v3936_v46 = vrot.slane %v3559_v24, 4 }
 0x67b   :  { %v3560_v47 = vmul.f32 %v10707_v43, %v3516_v17  ;;  %v3736_v22 = vsel %vm1798_vm14, %v3735_v61, %v3734_v15  ;;  %v3770_v55 = vsel %vm1798_vm14, %v3769_v33, %v3768_v32  ;;  %v3835_v3 = vsel %vm1798_vm14, %v3834_v10, %v3833_v49 }
 0x67c   :  { %v3869_v44 = vsel %vm1798_vm14, %v3868_v18, %v3867_v11  ;;  %v3903_v20 = vsel %vm1798_vm14, %v3902_v40, %v3901_v60  ;;  %v3967_v1 = vsel %vm1798_vm14, %v3966_v36, %v3965_v51  ;;  %v3937_v13 = vsel %vm1798_vm14, %v3936_v46, %v3935_v30 }
 0x67d   :  { %3675 = vrot.lane.b32.xlu1 %v3560_v47, %s9376_s20  ;;  %v3737_v2 = vrot.slane %v3560_v47, 5  ;;  %v3771_v35 = vrot.slane %v3560_v47, 6  ;;  %v3836_v43 = vsel %vm1801_vm15, %v3560_v47, %v3835_v3  ;;  %v3870_v24 = vrot.slane %v3560_v47, 1 }
 0x67e   :  { %v3904_v61 = vrot.slane %v3560_v47, 2  ;;  %v3968_v15 = vrot.slane %v3560_v47, 4  ;;  %v3805_v32 = vrot.slane %v3560_v47, 7  ;;  %v3938_v49 = vrot.slane %v3560_v47, 3 }
 0x67f   :  { %v3738_v10 = vsel %vm1801_vm15, %v3737_v2, %v3736_v22  ;;  %v3772_v11 = vsel %vm1801_vm15, %v3771_v35, %v3770_v55  ;;  %v3871_v60 = vsel %vm1801_vm15, %v3870_v24, %v3869_v44 }
 0x680   :  { %v3905_v51 = vsel %vm1801_vm15, %v3904_v61, %v3903_v20  ;;  %v3969_v30 = vsel %vm1801_vm15, %v3968_v15, %v3967_v1  ;;  %v3806_v34 = vsel %vm1801_vm15, %v3805_v32, %v3804_v5  ;;  %v3939_v33 = vsel %vm1801_vm15, %v3938_v49, %v3937_v13 }
 0x68c   :  { %v3518_v18 = vpop.permute.xlu0 %3517 }
 0x68d   :  { %v3561_v17 = vmul.f32 %v10719_v29, %v3518_v18 }
 0x68f   :  { %3677 = vrot.lane.b32.xlu0 %v3561_v17, %s9376_s20  ;;  %v3739_v40 = vrot.slane %v3561_v17, 4  ;;  %v3773_v36 = vrot.slane %v3561_v17, 5  ;;  %v3837_v46 = vrot.slane %v3561_v17, 7  ;;  %v3872_v47 = vsel %vm1804_vm1, %v3561_v17, %v3871_v60 }
 0x690   :  { %v3520_v22 = vpop.permute.xlu1 %3519  ;;  %v3906_v55 = vrot.slane %v3561_v17, 1  ;;  %v3970_v3 = vrot.slane %v3561_v17, 3  ;;  %v3807_v44 = vrot.slane %v3561_v17, 6  ;;  %v3940_v20 = vrot.slane %v3561_v17, 2 }
 0x691   :  { %v3562_v1 = vmul.f32 %v10723_v39, %v3520_v22  ;;  %v3740_v5 = vsel %vm1804_vm1, %v3739_v40, %v3738_v10  ;;  %v3774_v13 = vsel %vm1804_vm1, %v3773_v36, %v3772_v11  ;;  %v3838_v29 = vsel %vm1804_vm1, %v3837_v46, %v3836_v43 }
 0x692   :  { %v3907_v2 = vsel %vm1804_vm1, %v3906_v55, %v3905_v51  ;;  %v3971_v35 = vsel %vm1804_vm1, %v3970_v3, %v3969_v30  ;;  %v3808_v24 = vsel %vm1804_vm1, %v3807_v44, %v3806_v34  ;;  %v3941_v61 = vsel %vm1804_vm1, %v3940_v20, %v3939_v33 }
 0x693   :  { %3679 = vrot.lane.b32.xlu1 %v3562_v1, %s9376_s20  ;;  %v3741_v15 = vrot.slane %v3562_v1, 3  ;;  %v3775_v32 = vrot.slane %v3562_v1, 4  ;;  %v3839_v49 = vrot.slane %v3562_v1, 6  ;;  %v3873_v39 = vrot.slane %v3562_v1, 7 }
 0x694   :  { %v3908_v10 = vsel %vm12951_vm12, %v3562_v1, %v3907_v2  ;;  %v3972_v60 = vrot.slane %v3562_v1, 2  ;;  %v3809_v11 = vrot.slane %v3562_v1, 5  ;;  %v3522_v18 = vpop.permute.xlu0 %3521  ;;  %v3942_v34 = vrot.slane %v3562_v1, 1 }
 0x695   :  { %v3742_v43 = vsel %vm12951_vm12, %v3741_v15, %v3740_v5  ;;  %v3776_v51 = vsel %vm12951_vm12, %v3775_v32, %v3774_v13  ;;  %v3840_v30 = vsel %vm12951_vm12, %v3839_v49, %v3838_v29  ;;  %v3563_v33 = vmul.f32 %v10729_v42, %v3522_v18 }
 0x696   :  { %v3874_v17 = vsel %vm12951_vm12, %v3873_v39, %v3872_v47  ;;  %v3973_v40 = vsel %vm12951_vm12, %v3972_v60, %v3971_v35  ;;  %v3810_v36 = vsel %vm12951_vm12, %v3809_v11, %v3808_v24  ;;  %v3943_v46 = vsel %vm12951_vm12, %v3942_v34, %v3941_v61 }
 0x697   :  { %3681 = vrot.lane.b32.xlu0 %v3563_v33, %s9376_s20  ;;  %v3743_v22 = vrot.slane %v3563_v33, 2  ;;  %v3777_v55 = vrot.slane %v3563_v33, 3  ;;  %v3841_v3 = vrot.slane %v3563_v33, 5  ;;  %v3875_v44 = vrot.slane %v3563_v33, 6 }
 0x698   :  { %v3524_v20 = vpop.permute.xlu1 %3523  ;;  %v3909_v5 = vrot.slane %v3563_v33, 7  ;;  %v3974_v13 = vrot.slane %v3563_v33, 1  ;;  %v3811_v1 = vrot.slane %v3563_v33, 4  ;;  %v3944_v42 = vsel %vm13002_vm2, %v3563_v33, %v3943_v46 }
 0x699   :  { %v3564_v47 = vmul.f32 %v10734_v59, %v3524_v20  ;;  %v3744_v29 = vsel %vm13003_vm3, %v3743_v22, %v3742_v43  ;;  %v3778_v2 = vsel %vm13004_vm11, %v3777_v55, %v3776_v51  ;;  %v3842_v35 = vsel %vm13005_vm7, %v3841_v3, %v3840_v30  ;;  %vm13010_vm3 = vmmov %vm13006_vm0 }
 0x69a   :  { %v3876_v24 = vsel %vm13006_vm0, %v3875_v44, %v3874_v17  ;;  %v3910_v61 = vsel %vm13007_vm9, %v3909_v5, %v3908_v10  ;;  %v3975_v15 = vsel %vm13008_vm6, %v3974_v13, %v3973_v40  ;;  %vm13009_vm2 = vcmask 1047559  }
 0x69b   :  { %3683 = vrot.lane.b32.xlu1 %v3564_v47, %s9376_s20  ;;  %v3745_v32 = vrot.slane %v3564_v47, 1  ;;  %v3779_v49 = vrot.slane %v3564_v47, 2  ;;  %v3843_v39 = vrot.slane %v3564_v47, 4  ;;  %v3877_v60 = vrot.slane %v3564_v47, 5  ;;  %vm13011_vm11 = vmmov %vm13009_vm2 }
 0x69c   :  { %v3911_v11 = vrot.slane %v3564_v47, 6  ;;  %v10935_v59 = vsel %vm13009_vm2, %v3564_v47, %v3975_v15  ;;  %v3812_v18 = vsel %vm13010_vm3, %v3811_v1, %v3810_v36  ;;  %v3813_v43 = vrot.slane %v3564_v47, 3  ;;  %vm13012_vm7 = vmmov %vm13009_vm2 }
 0x69d   :  { %v10939_v51 = vsel %vm13011_vm11, %v3745_v32, %v3744_v29  ;;  %v10942_v10 = vsel %vm13012_vm7, %v3779_v49, %v3778_v2  ;;  %vm13013_vm6 = vmmov %vm13009_vm2  ;;  %v3945_v40 = vrot.slane %v3564_v47, 7  ;;  %vm13020_vm11 = vcmask 1046534  }
 0x69e   :  { %v10945_v30 = vsel %vm13013_vm6, %v3843_v39, %v3842_v35  ;;  %vm13014_vm9 = vmmov %vm13009_vm2 }
 0x69f   :  { %v10948_v34 = vsel %vm13014_vm9, %v3877_v60, %v3876_v24  ;;  %vm13015_vm0 = vmmov %vm13009_vm2 }
 0x6a0   :  { %v10951_v33 = vsel %vm13015_vm0, %v3911_v11, %v3910_v61  ;;  %vm13016_vm2 = vmmov %vm13015_vm0 }
 0x6a1   :  { %v10954_v17 = vsel %vm13016_vm2, %v3813_v43, %v3812_v18  ;;  %vm13018_vm3 = vmmov %vm13015_vm0 }
 0x6a2   :  { %13017 = vst [vmem:[#allocation17_spill] sm:$0xff] %v10954_v17  ;;  %v10957_v36 = vsel %vm13018_vm3, %v3945_v40, %v3944_v42  ;;  %vm13021_vm7 = vmmov %vm13020_vm11 }
 0x6a3   :  { %13019 = vst [vmem:[#allocation18_spill] sm:$0xff] %v10957_v36  ;;  %vm13022_vm6 = vmmov %vm13021_vm7 }
 0x6a4   :  { %vm13023_vm9 = vmmov %vm13022_vm6 }
 0x6a5   :  { %vm13024_vm0 = vmmov %vm13022_vm6 }
 0x6a6   :  { %vm13025_vm2 = vmmov %vm13024_vm0 }
 0x6a7   :  { %vm13026_vm3 = vmmov %vm13024_vm0 }
 0x6b0   :  { %v3526_v46 = vpop.permute.xlu0 %3525 }
 0x6b1   :  { %v3565_v22 = vmul.f32 %v10747_v4, %v3526_v46 }
 0x6b2   :  { %v3528_v55 = vpop.permute.xlu1 %3527 }
 0x6b3   :  { %3685 = vrot.lane.b32.xlu0 %v3565_v22, %s9376_s20  ;;  %v3781_v3 = vrot.slane %v3565_v22, 1  ;;  %v3566_v44 = vmul.f32 %v10750_v21, %v3528_v55  ;;  %v3845_v20 = vrot.slane %v3565_v22, 3  ;;  %v3879_v5 = vrot.slane %v3565_v22, 4 }
 0x6b4   :  { %v3913_v13 = vrot.slane %v3565_v22, 5  ;;  %v3977_v1 = vrot.slane %v3565_v22, 7  ;;  %v3815_v29 = vrot.slane %v3565_v22, 2  ;;  %v3947_v2 = vrot.slane %v3565_v22, 6 }
 0x6b5   :  { %3687 = vrot.lane.b32.xlu1 %v3566_v44, %s9376_s20  ;;  %v3747_v47 = vrot.slane %v3566_v44, 7  ;;  %v3782_v42 = vsel %vm1795_vm13, %v3566_v44, %v3781_v3  ;;  %v3846_v35 = vrot.slane %v3566_v44, 2  ;;  %v3880_v24 = vrot.slane %v3566_v44, 3 }
 0x6b6   :  { %v3530_v4 = vpop.permute.xlu0 %3529  ;;  %v3914_v61 = vrot.slane %v3566_v44, 4  ;;  %v3978_v15 = vrot.slane %v3566_v44, 6  ;;  %v3816_v32 = vrot.slane %v3566_v44, 1  ;;  %v3948_v49 = vrot.slane %v3566_v44, 5 }
 0x6b7   :  { %v3567_v21 = vmul.f32 %v10755_v7, %v3530_v4  ;;  %v3748_v39 = vsel %vm1795_vm13, %v3747_v47, %v3565_v22  ;;  %v3847_v60 = vsel %vm1795_vm13, %v3846_v35, %v3845_v20  ;;  %v3881_v11 = vsel %vm1795_vm13, %v3880_v24, %v3879_v5 }
 0x6b8   :  { %v3915_v18 = vsel %vm1795_vm13, %v3914_v61, %v3913_v13  ;;  %v3979_v43 = vsel %vm1795_vm13, %v3978_v15, %v3977_v1  ;;  %v3817_v40 = vsel %vm1795_vm13, %v3816_v32, %v3815_v29  ;;  %v3949_v46 = vsel %vm1795_vm13, %v3948_v49, %v3947_v2 }
 0x6b9   :  { %3689 = vrot.lane.b32.xlu0 %v3567_v21, %s9376_s20  ;;  %v3749_v55 = vrot.slane %v3567_v21, 6  ;;  %v3783_v3 = vrot.slane %v3567_v21, 7  ;;  %v3848_v44 = vrot.slane %v3567_v21, 1  ;;  %v3882_v7 = vrot.slane %v3567_v21, 2 }
 0x6ba   :  { %v3532_v4 = vpop.permute.xlu1 %3531  ;;  %v3916_v22 = vrot.slane %v3567_v21, 3  ;;  %v3980_v47 = vrot.slane %v3567_v21, 5  ;;  %v3818_v20 = vsel %vm1798_vm14, %v3567_v21, %v3817_v40  ;;  %v3950_v5 = vrot.slane %v3567_v21, 4 }
 0x6bb   :  { %v3568_v13 = vmul.f32 %v10762_v57, %v3532_v4  ;;  %v3750_v1 = vsel %vm1798_vm14, %v3749_v55, %v3748_v39  ;;  %v3784_v29 = vsel %vm1798_vm14, %v3783_v3, %v3782_v42  ;;  %v3849_v2 = vsel %vm1798_vm14, %v3848_v44, %v3847_v60 }
 0x6bc   :  { %v3883_v35 = vsel %vm1798_vm14, %v3882_v7, %v3881_v11  ;;  %v3917_v24 = vsel %vm1798_vm14, %v3916_v22, %v3915_v18  ;;  %v3981_v61 = vsel %vm1798_vm14, %v3980_v47, %v3979_v43  ;;  %v3951_v15 = vsel %vm1798_vm14, %v3950_v5, %v3949_v46 }
 0x6bd   :  { %3691 = vrot.lane.b32.xlu1 %v3568_v13, %s9376_s20  ;;  %v3751_v32 = vrot.slane %v3568_v13, 5  ;;  %v3785_v49 = vrot.slane %v3568_v13, 6  ;;  %v3850_v57 = vsel %vm1801_vm15, %v3568_v13, %v3849_v2  ;;  %v3884_v21 = vrot.slane %v3568_v13, 1 }
 0x6be   :  { %v3918_v39 = vrot.slane %v3568_v13, 2  ;;  %v3982_v40 = vrot.slane %v3568_v13, 4  ;;  %v3819_v42 = vrot.slane %v3568_v13, 7  ;;  %v3952_v55 = vrot.slane %v3568_v13, 3 }
 0x6bf   :  { %v3752_v60 = vsel %vm1801_vm15, %v3751_v32, %v3750_v1  ;;  %v3786_v11 = vsel %vm1801_vm15, %v3785_v49, %v3784_v29  ;;  %v3885_v18 = vsel %vm1801_vm15, %v3884_v21, %v3883_v35 }
 0x6c0   :  { %v3919_v43 = vsel %vm1801_vm15, %v3918_v39, %v3917_v24  ;;  %v3983_v46 = vsel %vm1801_vm15, %v3982_v40, %v3981_v61  ;;  %v3820_v3 = vsel %vm1801_vm15, %v3819_v42, %v3818_v20  ;;  %v3953_v44 = vsel %vm1801_vm15, %v3952_v55, %v3951_v15 }
 0x6c8   :  { %v3534_v7 = vpop.permute.xlu0 %3533 }
 0x6c9   :  { %v3569_v4 = vmul.f32 %v10774_v37, %v3534_v7 }
 0x6cb   :  { %3693 = vrot.lane.b32.xlu0 %v3569_v4, %s9376_s20  ;;  %v3753_v22 = vrot.slane %v3569_v4, 4  ;;  %v3787_v47 = vrot.slane %v3569_v4, 5  ;;  %v3851_v5 = vrot.slane %v3569_v4, 7  ;;  %v3886_v13 = vsel %vm1804_vm1, %v3569_v4, %v3885_v18 }
 0x6cc   :  { %v3536_v1 = vpop.permute.xlu1 %3535  ;;  %v3920_v29 = vrot.slane %v3569_v4, 1  ;;  %v3984_v2 = vrot.slane %v3569_v4, 3  ;;  %v3821_v35 = vrot.slane %v3569_v4, 6  ;;  %v3954_v21 = vrot.slane %v3569_v4, 2 }
 0x6cd   :  { %v3570_v24 = vmul.f32 %v10779_v6, %v3536_v1  ;;  %v3754_v20 = vsel %vm1804_vm1, %v3753_v22, %v3752_v60  ;;  %v3788_v61 = vsel %vm1804_vm1, %v3787_v47, %v3786_v11  ;;  %v3852_v15 = vsel %vm1804_vm1, %v3851_v5, %v3850_v57  ;;  %v8782_v57 = vld [vmem:[%s12937_s1 + $0x80] sm:$0xff]  }
 0x6ce   :  { %v3921_v37 = vsel %vm1804_vm1, %v3920_v29, %v3919_v43  ;;  %v3985_v32 = vsel %vm1804_vm1, %v3984_v2, %v3983_v46  ;;  %v3822_v49 = vsel %vm1804_vm1, %v3821_v35, %v3820_v3  ;;  %v3955_v11 = vsel %vm1804_vm1, %v3954_v21, %v3953_v44  ;;  %8655 = vmatprep.subr.bf16.mxu1 %v8782_v57  ;;  %v8783_v29 = vld [vmem:[%s12937_s1 + $0x88] sm:$0xff]  }
 0x6cf   :  { %3695 = vrot.lane.b32.xlu1 %v3570_v24, %s9376_s20  ;;  %v3755_v39 = vrot.slane %v3570_v24, 3  ;;  %v3789_v40 = vrot.slane %v3570_v24, 4  ;;  %v3853_v42 = vrot.slane %v3570_v24, 6  ;;  %v3887_v55 = vrot.slane %v3570_v24, 7  ;;  %8656 = vmatpush3.bf16.msra.mxu1 %v8782_v57  ;;  %v8786_v57 = vld [vmem:[%s12937_s1 + $0x48] sm:$0xff]  }
 0x6d0   :  { %v3922_v6 = vsel %vm12951_vm12, %v3570_v24, %v3921_v37  ;;  %v3986_v60 = vrot.slane %v3570_v24, 2  ;;  %v3823_v18 = vrot.slane %v3570_v24, 5  ;;  %v3956_v47 = vrot.slane %v3570_v24, 1  ;;  %v8784_v24 = vld [vmem:[%s12937_s1 + $0x40] sm:$0xff]   ;;  %8657 = vmatprep.subr.bf16.mxu1 %v8783_v29 }
 0x6d1   :  { %v3756_v43 = vsel %vm12951_vm12, %v3755_v39, %v3754_v20  ;;  %v3790_v46 = vsel %vm12951_vm12, %v3789_v40, %v3788_v61  ;;  %v3854_v3 = vsel %vm12951_vm12, %v3853_v42, %v3852_v15  ;;  %v3888_v7 = vsel %vm12951_vm12, %v3887_v55, %v3886_v13  ;;  %8431 = vmatprep.subr.bf16.mxu0 %v8784_v24 }
 0x6d2   :  { %v3987_v4 = vsel %vm12951_vm12, %v3986_v60, %v3985_v32  ;;  %v3824_v22 = vsel %vm12951_vm12, %v3823_v18, %v3822_v49  ;;  %v3957_v44 = vsel %vm12951_vm12, %v3956_v47, %v3955_v11  ;;  %vm13027_vm12 = vmmov %vm13024_vm0  ;;  %v8785_v11 = vld [vmem:[%s12937_s1] sm:$0xff]  }
 0x6d3   :  { %8658 = vmatpush3.bf16.msra.mxu1 %v8783_v29  ;;  %8432 = vmatpush3.bf16.msra.mxu0 %v8785_v11  ;;  %v8255_v47 = vld [vmem:[%s12936_s0 + $0x80] sm:$0xff]  }
 0x6d4   :  { %v3538_v5 = vpop.permute.xlu0 %3537  ;;  %8433 = vmatprep.subr.bf16.mxu0 %v8786_v57  ;;  %v4094_v11 = vld [vmem:[#allocation2 + $0x1] sm:$0xff] }
 0x6d5   :  { %v3571_v1 = vmul.f32 %v10783_v31, %v3538_v5  ;;  %v8788_v5 = vld [vmem:[%s12937_s1 + $0x90] sm:$0xff]   ;;  %v4062_v57 = vld [vmem:[#allocation2] sm:$0xff] }
 0x6d6   :  { %8659 = vmatprep.subr.bf16.mxu1 %v8788_v5 }
 0x6d7   :  { %3697 = vrot.lane.b32.xlu0 %v3571_v1, %s9376_s20  ;;  %v3757_v2 = vrot.slane %v3571_v1, 2  ;;  %v3791_v13 = vrot.slane %v3571_v1, 3  ;;  %v3855_v35 = vrot.slane %v3571_v1, 5  ;;  %v3889_v20 = vrot.slane %v3571_v1, 6  ;;  %8660 = vmatpush3.bf16.msra.mxu1 %v8788_v5 }
 0x6d8   :  { %v3923_v61 = vrot.slane %v3571_v1, 7  ;;  %v3988_v15 = vrot.slane %v3571_v1, 1  ;;  %v3825_v37 = vrot.slane %v3571_v1, 4  ;;  %v3958_v32 = vsel %vm13020_vm11, %v3571_v1, %v3957_v44  ;;  %v3540_v40 = vpop.permute.xlu1 %3539  ;;  %v8787_v44 = vld [vmem:[%s12937_s1 + $0x8] sm:$0xff]  }
 0x6d9   :  { %v3758_v31 = vsel %vm13021_vm7, %v3757_v2, %v3756_v43  ;;  %v3792_v49 = vsel %vm13022_vm6, %v3791_v13, %v3790_v46  ;;  %v3856_v21 = vsel %vm13023_vm9, %v3855_v35, %v3854_v3  ;;  %v3890_v39 = vsel %vm13024_vm0, %v3889_v20, %v3888_v7  ;;  %v8789_v35 = vld [vmem:[%s12937_s1 + $0x50] sm:$0xff]   ;;  %8434 = vmatpush3.bf16.msra.mxu0 %v8787_v44  ;;  %v8796_v44 = vld [vmem:[%s12937_s1 + $0x68] sm:$0xff]  }
 0x6da   :  { %v3924_v42 = vsel %vm13025_vm2, %v3923_v61, %v3922_v6  ;;  %v3989_v55 = vsel %vm13026_vm3, %v3988_v15, %v3987_v4  ;;  %v3826_v60 = vsel %vm13027_vm12, %v3825_v37, %v3824_v22  ;;  %v3572_v18 = vmul.f32 %v10787_v8, %v3540_v40  ;;  %8435 = vmatprep.subr.bf16.mxu0 %v8789_v35  ;;  %v8790_v37 = vld [vmem:[%s12937_s1 + $0x10] sm:$0xff]   ;;  %v8792_v40 = vld [vmem:[%s12937_s1 + $0x18] sm:$0xff]   ;;  %v8797_v35 = vld [vmem:[%s12937_s1 + $0x28] sm:$0xff]  }
 0x6db   :  { %vm13028_vm12 = vcmask 1047559   ;;  %v8178_v15 = vunpack.c.l.bf16 %v8255_v47 }
 0x6dc   :  { %3699 = vrot.lane.b32.xlu1 %v3572_v18, %s9376_s20  ;;  %v3759_v43 = vrot.slane %v3572_v18, 1  ;;  %v3793_v46 = vrot.slane %v3572_v18, 2  ;;  %v3857_v6 = vrot.slane %v3572_v18, 4  ;;  %v3891_v3 = vrot.slane %v3572_v18, 5  ;;  %vm13029_vm11 = vmmov %vm13028_vm12 }
 0x6dd   :  { %v3925_v7 = vrot.slane %v3572_v18, 6  ;;  %v11039_v4 = vsel %vm13028_vm12, %v3572_v18, %v3989_v55  ;;  %v3827_v8 = vrot.slane %v3572_v18, 3  ;;  %v3959_v22 = vrot.slane %v3572_v18, 7  ;;  %vm13030_vm7 = vmmov %vm13029_vm11  ;;  %8436 = vmatpush3.bf16.msra.mxu0 %v8790_v37 }
 0x6de   :  { %v11051_v1 = vsel %vm13029_vm11, %v3759_v43, %v3758_v31  ;;  %v11054_v29 = vsel %vm13030_vm7, %v3793_v46, %v3792_v49  ;;  %vm13031_vm6 = vmmov %vm13030_vm7  ;;  %vm13038_vm12 = vcmask 293920   ;;  %v8179_v49 = vunpack.c.h.bf16 %v8255_v47  ;;  %v8795_v43 = vld [vmem:[%s12937_s1 + $0x20] sm:$0xff]  }
 0x6df   :  { %v11057_v2 = vsel %vm13031_vm6, %v3857_v6, %v3856_v21  ;;  %vm13032_vm9 = vmmov %vm13031_vm6  ;;  %vm13039_vm11 = vcmask 31744   ;;  %v8791_v21 = vld [vmem:[%s12937_s1 + $0x58] sm:$0xff]   ;;  %v4158_v46 = vld [vmem:[#allocation2 + $0x2] sm:$0xff] }
 0x6e0   :  { %v11060_v13 = vsel %vm13032_vm9, %v3891_v3, %v3890_v39  ;;  %vm13033_vm0 = vmmov %vm13031_vm6  ;;  %8437 = vmatprep.subr.bf16.mxu0 %v8791_v21 }
 0x6e1   :  { %v11066_v20 = vsel %vm13033_vm0, %v3925_v7, %v3924_v42  ;;  %vm13034_vm2 = vmmov %vm13033_vm0  ;;  %v8793_v42 = vld [vmem:[%s12937_s1 + $0x98] sm:$0xff]   ;;  %8438 = vmatpush3.bf16.msra.mxu0 %v8792_v40 }
 0x6e2   :  { %v11069_v24 = vsel %vm13034_vm2, %v3827_v8, %v3826_v60  ;;  %vm13036_vm3 = vmmov %vm13033_vm0  ;;  %8661 = vmatprep.subr.bf16.mxu1 %v8793_v42  ;;  %v8794_v60 = vld [vmem:[%s12937_s1 + $0x60] sm:$0xff]  }
 0x6e3   :  { %13035 = vst [vmem:[#allocation19_spill] sm:$0xff] %v11069_v24  ;;  %v11072_v61 = vsel %vm13036_vm3, %v3959_v22, %v3958_v32  ;;  %v8256_v32 = vld [vmem:[%s12936_s0 + $0x88] sm:$0xff]   ;;  %vm13040_vm7 = vmmov %vm13038_vm12  ;;  %8662 = vmatpush3.bf16.msra.mxu1 %v8793_v42  ;;  %8439 = vmatprep.subr.bf16.mxu0 %v8794_v60  ;;  %vm13045_vm3 = vcmask 293888   ;;  %v8800_v42 = vld [vmem:[%s12937_s1 + $0x30] sm:$0xff]  }
 0x6e4   :  { %13037 = vst [vmem:[#allocation20_spill] sm:$0xff] %v11072_v61  ;;  %vm13041_vm6 = vmmov %vm13039_vm11  ;;  %v8182_v55 = vunpack.c.l.bf16 %v8256_v32  ;;  %v8183_v8 = vunpack.c.h.bf16 %v8256_v32 }
 0x6e5   :  { %v3670_v31 = vpop.permute.xlu0 %3669  ;;  %vm13042_vm9 = vmmov %vm13040_vm7  ;;  %8440 = vmatpush3.bf16.msra.mxu0 %v8795_v43  ;;  %v8802_v43 = vld [vmem:[%s12937_s1 + $0x38] sm:$0xff]  }
 0x6e6   :  { %3717 = vst.msk [vmem:[#allocation2 + $0x11] sm:$0xff] %vm13038_vm12, %v3670_v31  ;;  %vm13043_vm0 = vmmov %vm13041_vm6  ;;  %8441 = vmatprep.subr.bf16.mxu0 %v8796_v44 }
 0x6e7   :  { %4046 = vst.msk [vmem:[#allocation2 + $0x11] sm:$0xff] %vm13039_vm11, %v8178_v15  ;;  %v3672_v39 = vpop.permute.xlu1 %3671  ;;  %v8798_v15 = vld [vmem:[%s12937_s1 + $0xa0] sm:$0xff]   ;;  %vm13044_vm2 = vmmov %vm13040_vm7 }
 0x6e8   :  { %3718 = vst.msk [vmem:[#allocation2 + $0x21] sm:$0xff] %vm13040_vm7, %v3672_v39  ;;  %vm13046_vm12 = vmmov %vm13043_vm0  ;;  %8663 = vmatprep.subr.bf16.mxu1 %v8798_v15  ;;  %v8799_v39 = vld [vmem:[%s12937_s1 + $0x70] sm:$0xff]  }
 0x6e9   :  { %4047 = vst.msk [vmem:[#allocation2 + $0x21] sm:$0xff] %vm13041_vm6, %v8179_v49  ;;  %8442 = vmatpush3.bf16.msra.mxu0 %v8797_v35  ;;  %8664 = vmatpush3.bf16.msra.mxu1 %v8798_v15  ;;  %vm13047_vm11 = vmmov %vm13045_vm3 }
 0x6ea   :  { %8443 = vmatprep.subr.bf16.mxu0 %v8799_v39  ;;  %vm13048_vm7 = vmmov %vm13044_vm2 }
 0x6eb   :  { %v3674_v18 = vpop.permute.xlu0 %3673  ;;  %vm13049_vm6 = vmmov %vm13043_vm0 }
 0x6ec   :  { %3719 = vst.msk [vmem:[#allocation2 + $0x31] sm:$0xff] %vm13042_vm9, %v3674_v18  ;;  %vm13050_vm9 = vmmov %vm13044_vm2 }
 0x6ed   :  { %4048 = vst.msk [vmem:[#allocation2 + $0x31] sm:$0xff] %vm13043_vm0, %v8182_v55  ;;  %8444 = vmatpush3.bf16.msra.mxu0 %v8800_v42  ;;  %v8805_v42 = vld [vmem:[%s12937_s1 + $0xb8] sm:$0xff]  }
 0x6ee   :  { %v4222_v6 = vld [vmem:[#allocation2 + $0x10] sm:$0xff] }
 0x6ef   :  { %v4095_v3 = vld [vmem:[#allocation2 + $0x11] sm:$0xff]  ;;  %v4078_v47 = vpack.c.bf16 %v4222_v6, %v4062_v57  ;;  %v3676_v5 = vpop.permute.xlu1 %3675 }
 0x6f0   :  { %v4358_v7 = vld [vmem:[#allocation2 + $0x12] sm:$0xff]  ;;  %v4110_v22 = vpack.c.bf16 %v4095_v3, %v4094_v11  ;;  %3720 = vst.msk [vmem:[#allocation2 + $0x41] sm:$0xff] %vm13044_vm2, %v3676_v5  ;;  %v4223_v37 = vld [vmem:[#allocation2 + $0x20] sm:$0xff] }
 0x6f1   :  { %v4359_v31 = vld [vmem:[#allocation2 + $0x22] sm:$0xff]  ;;  %v4174_v49 = vpack.c.bf16 %v4358_v7, %v4158_v46  ;;  %4086 = vst.msk [vmem:[#allocation3] sm:$0xff] %vm13045_vm3, %v4078_v47  ;;  %v4238_v32 = vpack.c.bf16 %v4223_v37, %v4222_v6  ;;  %v8801_v57 = vld [vmem:[%s12937_s1 + $0x78] sm:$0xff]   ;;  %vm13051_vm3 = vmmov %vm13043_vm0 }
 0x6f2   :  { %4126 = vrot.lane.b32.xlu1 %v4110_v22, %s9370_s11  ;;  %v4295_v21 = vld [vmem:[#allocation2 + $0x21] sm:$0xff]  ;;  %4049 = vst.msk [vmem:[#allocation2 + $0x41] sm:$0xff] %vm13046_vm12, %v8183_v8  ;;  %v4374_v40 = vpack.c.bf16 %v4359_v31, %v4358_v7  ;;  %8445 = vmatprep.subr.bf16.mxu0 %v8801_v57  ;;  %v8257_v22 = vld [vmem:[%s12936_s0 + $0x90] sm:$0xff]   ;;  %vm13052_vm12 = vmmov %vm13047_vm11 }
 0x6f3   :  { %4254 = vrot.lane.b32.xlu0 %v4238_v32, %s9369_s10  ;;  %v4310_v60 = vpack.c.bf16 %v4295_v21, %v4095_v3  ;;  %v8803_v46 = vld [vmem:[%s12937_s1 + $0xa8] sm:$0xff]   ;;  %8446 = vmatpush3.bf16.msra.mxu0 %v8802_v43  ;;  %v8186_v5 = vunpack.c.l.bf16 %v8257_v22 }
 0x6f4   :  { %v4423_v55 = vld [vmem:[#allocation2 + $0x30] sm:$0xff]  ;;  %8665 = vmatprep.subr.bf16.mxu1 %v8803_v46 }
 0x6f5   :  { %v4438_v18 = vpack.c.bf16 %v4423_v55, %v4223_v37  ;;  %v4559_v11 = vld [vmem:[#allocation2 + $0x32] sm:$0xff]  ;;  %8666 = vmatpush3.bf16.msra.mxu1 %v8803_v46 }
 0x6f6   :  { %4190 = vrot.lane.b32.xlu1 %v4174_v49, %s9372_s13  ;;  %v4487_v6 = vld [vmem:[#allocation2 + $0x31] sm:$0xff]  ;;  %v4574_v3 = vpack.c.bf16 %v4559_v11, %v4359_v31  ;;  %v8187_v31 = vunpack.c.h.bf16 %v8257_v22 }
 0x6f7   :  { %4390 = vrot.lane.b32.xlu0 %v4374_v40, %s9368_s9  ;;  %4087 = vst.msk [vmem:[#allocation3 + $0x18] sm:$0xff] %vm13047_vm11, %v4438_v18  ;;  %v4502_v8 = vpack.c.bf16 %v4487_v6, %v4295_v21  ;;  %v8804_v37 = vld [vmem:[%s12937_s1 + $0xb0] sm:$0xff]   ;;  %v8258_v21 = vld [vmem:[%s12936_s0 + $0x98] sm:$0xff]   ;;  %vm13053_vm11 = vmmov %vm13044_vm2 }
 0x6f8   :  { %8667 = vmatprep.subr.bf16.mxu1 %v8804_v37  ;;  %v8190_v40 = vunpack.c.l.bf16 %v8258_v21  ;;  %v8191_v46 = vunpack.c.h.bf16 %v8258_v21 }
 0x6f9   :  { %v4225_v7 = vld [vmem:[#allocation2 + $0x40] sm:$0xff]  ;;  %8668 = vmatpush3.bf16.msra.mxu1 %v8804_v37 }
 0x6fa   :  { %4326 = vrot.lane.b32.xlu1 %v4310_v60, %s9371_s12  ;;  %v4239_v47 = vpack.c.bf16 %v4225_v7, %v4423_v55  ;;  %v4361_v44 = vld [vmem:[#allocation2 + $0x42] sm:$0xff]  ;;  %8669 = vmatprep.subr.bf16.mxu1 %v8805_v42 }
 0x6fb   :  { %4454 = vrot.lane.b32.xlu0 %v4438_v18, %s9373_s14  ;;  %v4375_v15 = vpack.c.bf16 %v4361_v44, %v4559_v11  ;;  %v4297_v32 = vld [vmem:[#allocation2 + $0x41] sm:$0xff] }
 0x6fc   :  { %v4311_v39 = vpack.c.bf16 %v4297_v32, %v4487_v6 }
 0x6fd   :  { %8670 = vmatpush3.bf16.msra.mxu1 %v8805_v42  ;;  %v8259_v42 = vld [vmem:[%s12936_s0 + $0xa0] sm:$0xff]  }
 0x6fe   :  { %4590 = vrot.lane.b32.xlu1 %v4574_v3, %s9375_s7 }
 0x6ff   :  { %4518 = vrot.lane.b32.xlu0 %v4502_v8, %s9374_s17 }
 0x701   :  { %v3678_v35 = vpop.permute.xlu0 %3677 }
 0x702   :  { %4256 = vrot.lane.b32.xlu1 %v4239_v47, %s9369_s10  ;;  %3721 = vst.msk [vmem:[#allocation2 + $0x51] sm:$0xff] %vm13048_vm7, %v3678_v35  ;;  %vm13054_vm7 = vmmov %vm13043_vm0 }
 0x703   :  { %4050 = vst.msk [vmem:[#allocation2 + $0x51] sm:$0xff] %vm13049_vm6, %v8186_v5  ;;  %4128 = vrot.lane.b32.xlu0 %v4502_v8, %s9370_s11  ;;  %vm13055_vm6 = vmmov %vm13052_vm12 }
 0x705   :  { %v3680_v49 = vpop.permute.xlu1 %3679 }
 0x706   :  { %4392 = vrot.lane.b32.xlu1 %v4375_v15, %s9368_s9  ;;  %3722 = vst.msk [vmem:[#allocation2 + $0x61] sm:$0xff] %vm13050_vm9, %v3680_v49  ;;  %vm13056_vm9 = vmmov %vm13044_vm2 }
 0x707   :  { %4051 = vst.msk [vmem:[#allocation2 + $0x61] sm:$0xff] %vm13043_vm0, %v8187_v31  ;;  %4192 = vrot.lane.b32.xlu0 %v4574_v3, %s9372_s13 }
 0x709   :  { %v3682_v55 = vpop.permute.xlu0 %3681 }
 0x70a   :  { %v4425_v60 = vld [vmem:[#allocation2 + $0x50] sm:$0xff]  ;;  %3723 = vst.msk [vmem:[#allocation2 + $0x71] sm:$0xff] %vm13044_vm2, %v3682_v55  ;;  %v8194_v55 = vunpack.c.l.bf16 %v8259_v42 }
 0x70b   :  { %v4489_v18 = vld [vmem:[#allocation2 + $0x51] sm:$0xff]  ;;  %v4439_v57 = vpack.c.bf16 %v4425_v60, %v4225_v7  ;;  %4328 = vrot.lane.b32.xlu0 %v4311_v39, %s9371_s12  ;;  %4052 = vst.msk [vmem:[#allocation2 + $0x71] sm:$0xff] %vm13051_vm3, %v8190_v40  ;;  %vm13057_vm3 = vmmov %vm13043_vm0 }
 0x70c   :  { %v4561_v11 = vld [vmem:[#allocation2 + $0x52] sm:$0xff]  ;;  %v4503_v43 = vpack.c.bf16 %v4489_v18, %v4297_v32 }
 0x70d   :  { %4456 = vrot.lane.b32.xlu1 %v4439_v57, %s9373_s14  ;;  %v4575_v6 = vpack.c.bf16 %v4561_v11, %v4361_v44  ;;  %4088 = vst.msk [vmem:[#allocation3 + $0x30] sm:$0xff] %vm13052_vm12, %v4439_v57  ;;  %v3684_v3 = vpop.permute.xlu1 %3683  ;;  %v4493_v39 = vld [vmem:[#allocation2 + $0x91] sm:$0xff]  ;;  %vm13058_vm12 = vmmov %vm13044_vm2 }
 0x70e   :  { %v4227_v8 = vld [vmem:[#allocation2 + $0x60] sm:$0xff]  ;;  %3724 = vst.msk [vmem:[#allocation2 + $0x81] sm:$0xff] %vm13053_vm11, %v3684_v3  ;;  %vm13059_vm11 = vmmov %vm13043_vm0 }
 0x70f   :  { %4520 = vrot.lane.b32.xlu0 %v4503_v43, %s9374_s17  ;;  %v4240_v22 = vpack.c.bf16 %v4227_v8, %v4425_v60  ;;  %4053 = vst.msk [vmem:[#allocation2 + $0x81] sm:$0xff] %vm13054_vm7, %v8191_v46  ;;  %v4363_v7 = vld [vmem:[#allocation2 + $0x62] sm:$0xff]  ;;  %vm13060_vm7 = vmmov %vm13044_vm2 }
 0x710   :  { %v4376_v5 = vpack.c.bf16 %v4363_v7, %v4561_v11  ;;  %v4299_v44 = vld [vmem:[#allocation2 + $0x61] sm:$0xff] }
 0x711   :  { %4592 = vrot.lane.b32.xlu1 %v4575_v6, %s9375_s7  ;;  %v4312_v15 = vpack.c.bf16 %v4299_v44, %v4489_v18  ;;  %v8260_v46 = vld [vmem:[%s12936_s0 + $0xa8] sm:$0xff]  }
 0x712   :  { %v4427_v47 = vld [vmem:[#allocation2 + $0x70] sm:$0xff] }
 0x713   :  { %4258 = vrot.lane.b32.xlu0 %v4240_v22, %s9369_s10  ;;  %v4440_v35 = vpack.c.bf16 %v4427_v47, %v4227_v8  ;;  %v4491_v37 = vld [vmem:[#allocation2 + $0x71] sm:$0xff] }
 0x714   :  { %v4563_v31 = vld [vmem:[#allocation2 + $0x72] sm:$0xff]  ;;  %v4504_v49 = vpack.c.bf16 %v4491_v37, %v4299_v44 }
 0x715   :  { %4130 = vrot.lane.b32.xlu1 %v4503_v43, %s9370_s11  ;;  %4089 = vst.msk [vmem:[#allocation3 + $0x48] sm:$0xff] %vm13055_vm6, %v4440_v35  ;;  %v4576_v32 = vpack.c.bf16 %v4563_v31, %v4363_v7  ;;  %v8195_v43 = vunpack.c.h.bf16 %v8259_v42  ;;  %v4429_v22 = vld [vmem:[#allocation2 + $0x90] sm:$0xff] }
 0x716   :  { %v4492_v21 = vld [vmem:[#allocation2 + $0x81] sm:$0xff]  ;;  %v4565_v7 = vld [vmem:[#allocation2 + $0x92] sm:$0xff] }
 0x717   :  { %4394 = vrot.lane.b32.xlu0 %v4376_v5, %s9368_s9  ;;  %v4505_v40 = vpack.c.bf16 %v4493_v39, %v4492_v21  ;;  %v4313_v60 = vpack.c.bf16 %v4492_v21, %v4491_v37  ;;  %v4365_v11 = vld [vmem:[#allocation2 + $0x82] sm:$0xff]  ;;  %v8198_v5 = vunpack.c.l.bf16 %v8260_v46 }
 0x718   :  { %v4229_v57 = vld [vmem:[#allocation2 + $0x80] sm:$0xff]  ;;  %v4377_v3 = vpack.c.bf16 %v4365_v11, %v4563_v31  ;;  %v4577_v37 = vpack.c.bf16 %v4565_v7, %v4365_v11 }
 0x719   :  { %4194 = vrot.lane.b32.xlu1 %v4575_v6, %s9372_s13  ;;  %v4241_v8 = vpack.c.bf16 %v4229_v57, %v4427_v47  ;;  %v4441_v44 = vpack.c.bf16 %v4429_v22, %v4229_v57  ;;  %v8199_v47 = vunpack.c.h.bf16 %v8260_v46  ;;  %v4166_v11 = vld [vmem:[#allocation2 + $0xa2] sm:$0xff] }
 0x71b   :  { %4458 = vrot.lane.b32.xlu0 %v4440_v35, %s9373_s14 }
 0x71d   :  { %4330 = vrot.lane.b32.xlu1 %v4312_v15, %s9371_s12  ;;  %v4070_v15 = vld [vmem:[#allocation2 + $0xa0] sm:$0xff] }
 0x71f   :  { %4522 = vrot.lane.b32.xlu0 %v4504_v49, %s9374_s17 }
 0x721   :  { %4594 = vrot.lane.b32.xlu1 %v4576_v32, %s9375_s7 }
 0x723   :  { %4524 = vrot.lane.b32.xlu0 %v4505_v40, %s9374_s17 }
 0x725   :  { %v3686_v18 = vpop.permute.xlu0 %3685  ;;  %4132 = vrot.lane.b32.xlu1 %v4504_v49, %s9370_s11  ;;  %v4102_v49 = vld [vmem:[#allocation2 + $0xa1] sm:$0xff] }
 0x726   :  { %3725 = vst.msk [vmem:[#allocation2 + $0xb1] sm:$0xff] %vm13056_vm9, %v3686_v18  ;;  %vm13061_vm9 = vmmov %vm13043_vm0 }
 0x727   :  { %4054 = vst.msk [vmem:[#allocation2 + $0xb1] sm:$0xff] %vm13043_vm0, %v8194_v55  ;;  %v3688_v6 = vpop.permute.xlu1 %3687  ;;  %4332 = vrot.lane.b32.xlu0 %v4313_v60, %s9371_s12  ;;  %vm13062_vm0 = vmmov %vm13055_vm6 }
 0x728   :  { %3726 = vst.msk [vmem:[#allocation2 + $0xc1] sm:$0xff] %vm13044_vm2, %v3688_v6 }
 0x729   :  { %4196 = vrot.lane.b32.xlu1 %v4576_v32, %s9372_s13  ;;  %4055 = vst.msk [vmem:[#allocation2 + $0xc1] sm:$0xff] %vm13057_vm3, %v8195_v43 }
 0x72b   :  { %4396 = vrot.lane.b32.xlu0 %v4377_v3, %s9368_s9  ;;  %v3690_v35 = vpop.permute.xlu0 %3689 }
 0x72c   :  { %3727 = vst.msk [vmem:[#allocation2 + $0xd1] sm:$0xff] %vm13058_vm12, %v3690_v35  ;;  %vm13063_vm12 = vmmov %vm13044_vm2 }
 0x72d   :  { %4260 = vrot.lane.b32.xlu1 %v4241_v8, %s9369_s10  ;;  %4056 = vst.msk [vmem:[#allocation2 + $0xd1] sm:$0xff] %vm13059_vm11, %v8198_v5  ;;  %v8261_v8 = vld [vmem:[%s12936_s0 + $0xb0] sm:$0xff]   ;;  %vm13064_vm11 = vmmov %vm13057_vm3 }
 0x72e   :  { %v4230_v31 = vld [vmem:[#allocation2 + $0xb0] sm:$0xff]  ;;  %v8202_v35 = vunpack.c.l.bf16 %v8261_v8 }
 0x72f   :  { %v4103_v21 = vld [vmem:[#allocation2 + $0xb1] sm:$0xff]  ;;  %v4082_v32 = vpack.c.bf16 %v4230_v31, %v4070_v15  ;;  %v3692_v39 = vpop.permute.xlu1 %3691  ;;  %4460 = vrot.lane.b32.xlu0 %v4441_v44, %s9373_s14 }
 0x730   :  { %3728 = vst.msk [vmem:[#allocation2 + $0xe1] sm:$0xff] %vm13060_vm7, %v3692_v39  ;;  %v4231_v40 = vld [vmem:[#allocation2 + $0xc0] sm:$0xff]  ;;  %v4114_v42 = vpack.c.bf16 %v4103_v21, %v4102_v49  ;;  %v4366_v55 = vld [vmem:[#allocation2 + $0xb2] sm:$0xff]  ;;  %v8203_v49 = vunpack.c.h.bf16 %v8261_v8  ;;  %vm13065_vm7 = vmmov %vm13062_vm0 }
 0x731   :  { %4596 = vrot.lane.b32.xlu1 %v4577_v37, %s9375_s7  ;;  %v4367_v60 = vld [vmem:[#allocation2 + $0xc2] sm:$0xff]  ;;  %4090 = vst.msk [vmem:[#allocation3 + $0x60] sm:$0xff] %vm13055_vm6, %v4082_v32  ;;  %v4242_v18 = vpack.c.bf16 %v4231_v40, %v4230_v31  ;;  %v4178_v43 = vpack.c.bf16 %v4366_v55, %v4166_v11  ;;  %vm13066_vm6 = vmmov %vm13044_vm2 }
 0x732   :  { %4057 = vst.msk [vmem:[#allocation2 + $0xe1] sm:$0xff] %vm13061_vm9, %v8199_v47  ;;  %v4378_v57 = vpack.c.bf16 %v4367_v60, %v4366_v55  ;;  %v4303_v3 = vld [vmem:[#allocation2 + $0xc1] sm:$0xff]  ;;  %vm13067_vm9 = vmmov %vm13057_vm3 }
 0x733   :  { %4262 = vrot.lane.b32.xlu0 %v4242_v18, %s9369_s10  ;;  %v4314_v22 = vpack.c.bf16 %v4303_v3, %v4103_v21 }
 0x734   :  { %v4431_v46 = vld [vmem:[#allocation2 + $0xd0] sm:$0xff] }
 0x735   :  { %4134 = vrot.lane.b32.xlu1 %v4114_v42, %s9370_s11  ;;  %v4442_v6 = vpack.c.bf16 %v4431_v46, %v4231_v40  ;;  %v4495_v7 = vld [vmem:[#allocation2 + $0xd1] sm:$0xff] }
 0x736   :  { %v4567_v5 = vld [vmem:[#allocation2 + $0xd2] sm:$0xff]  ;;  %v4506_v44 = vpack.c.bf16 %v4495_v7, %v4303_v3 }
 0x737   :  { %4398 = vrot.lane.b32.xlu0 %v4378_v57, %s9368_s9  ;;  %4091 = vst.msk [vmem:[#allocation3 + $0x78] sm:$0xff] %vm13062_vm0, %v4442_v6  ;;  %v4578_v37 = vpack.c.bf16 %v4567_v5, %v4367_v60  ;;  %v8262_v42 = vld [vmem:[%s12936_s0 + $0xb8] sm:$0xff]   ;;  %vm13068_vm0 = vmmov %vm13044_vm2 }
 0x738   :  { %v8206_v11 = vunpack.c.l.bf16 %v8262_v42 }
 0x739   :  { %4198 = vrot.lane.b32.xlu1 %v4178_v43, %s9372_s13  ;;  %v4233_v31 = vld [vmem:[#allocation2 + $0xe0] sm:$0xff] }
 0x73a   :  { %v4243_v21 = vpack.c.bf16 %v4233_v31, %v4431_v46  ;;  %v4369_v32 = vld [vmem:[#allocation2 + $0xe2] sm:$0xff] }
 0x73b   :  { %4462 = vrot.lane.b32.xlu0 %v4442_v6, %s9373_s14  ;;  %v4379_v39 = vpack.c.bf16 %v4369_v32, %v4567_v5  ;;  %v4305_v40 = vld [vmem:[#allocation2 + $0xe1] sm:$0xff] }
 0x73c   :  { %v4315_v18 = vpack.c.bf16 %v4305_v40, %v4495_v7 }
 0x73d   :  { %4334 = vrot.lane.b32.xlu1 %v4314_v22, %s9371_s12  ;;  %v3694_v15 = vpop.permute.xlu0 %3693  ;;  %v8207_v22 = vunpack.c.h.bf16 %v8262_v42  ;;  %v4501_v42 = vld [vmem:[#allocation2 + $0x131] sm:$0xff] }
 0x73e   :  { %3729 = vst.msk [vmem:[#allocation2 + $0xf1] sm:$0xff] %vm13044_vm2, %v3694_v15  ;;  %vm13069_vm2 = vmmov %vm13057_vm3 }
 0x73f   :  { %4058 = vst.msk [vmem:[#allocation2 + $0xf1] sm:$0xff] %vm13057_vm3, %v8202_v35  ;;  %4526 = vrot.lane.b32.xlu0 %v4506_v44, %s9374_s17  ;;  %vm13070_vm3 = vmmov %vm13065_vm7 }
 0x741   :  { %v3696_v47 = vpop.permute.xlu1 %3695  ;;  %4598 = vrot.lane.b32.xlu1 %v4578_v37, %s9375_s7 }
 0x742   :  { %3730 = vst.msk [vmem:[#allocation2 + $0x101] sm:$0xff] %vm13063_vm12, %v3696_v47  ;;  %vm13071_vm12 = vcmask 425088  }
 0x743   :  { %4059 = vst.msk [vmem:[#allocation2 + $0x101] sm:$0xff] %vm13064_vm11, %v8203_v49  ;;  %4136 = vrot.lane.b32.xlu0 %v4506_v44, %s9370_s11  ;;  %vm13072_vm11 = vcmask 720288  }
 0x745   :  { %4264 = vrot.lane.b32.xlu1 %v4243_v21, %s9369_s10 }
 0x746   :  { %v4433_v55 = vld [vmem:[#allocation2 + $0xf0] sm:$0xff] }
 0x747   :  { %v4443_v60 = vpack.c.bf16 %v4433_v55, %v4233_v31  ;;  %4200 = vrot.lane.b32.xlu0 %v4578_v37, %s9372_s13  ;;  %v4497_v57 = vld [vmem:[#allocation2 + $0xf1] sm:$0xff] }
 0x748   :  { %v4569_v46 = vld [vmem:[#allocation2 + $0xf2] sm:$0xff]  ;;  %v4507_v6 = vpack.c.bf16 %v4497_v57, %v4305_v40 }
 0x749   :  { %4400 = vrot.lane.b32.xlu1 %v4379_v39, %s9368_s9  ;;  %4092 = vst.msk [vmem:[#allocation3 + $0x90] sm:$0xff] %vm13065_vm7, %v4443_v60  ;;  %v3698_v43 = vpop.permute.xlu0 %3697  ;;  %v4579_v3 = vpack.c.bf16 %v4569_v46, %v4369_v32  ;;  %vm13073_vm7 = vcmask 1015488  }
 0x74a   :  { %3731 = vst.msk [vmem:[#allocation2 + $0x111] sm:$0xff] %vm13066_vm6, %v3698_v43  ;;  %v4235_v8 = vld [vmem:[#allocation2 + $0x100] sm:$0xff]  ;;  %vm13074_vm6 = vcmask 1048544  }
 0x74b   :  { %4336 = vrot.lane.b32.xlu0 %v4315_v18, %s9371_s12  ;;  %4060 = vst.msk [vmem:[#allocation2 + $0x111] sm:$0xff] %vm13067_vm9, %v8206_v11  ;;  %v4244_v5 = vpack.c.bf16 %v4235_v8, %v4433_v55  ;;  %v4371_v35 = vld [vmem:[#allocation2 + $0x102] sm:$0xff]  ;;  %vm13075_vm9 = vcmask 261120  }
 0x74c   :  { %v4380_v15 = vpack.c.bf16 %v4371_v35, %v4569_v46  ;;  %v4307_v31 = vld [vmem:[#allocation2 + $0x101] sm:$0xff] }
 0x74d   :  { %4464 = vrot.lane.b32.xlu1 %v4443_v60, %s9373_s14  ;;  %v4316_v49 = vpack.c.bf16 %v4307_v31, %v4497_v57 }
 0x74e   :  { %v3700_v7 = vpop.permute.xlu1 %3699 }
 0x74f   :  { %4528 = vrot.lane.b32.xlu0 %v4507_v6, %s9374_s17  ;;  %3732 = vst.msk [vmem:[#allocation2 + $0x121] sm:$0xff] %vm13068_vm0, %v3700_v7  ;;  %v4437_v7 = vld [vmem:[#allocation2 + $0x130] sm:$0xff]  ;;  %vm13076_vm0 = vcmask 556288  }
 0x750   :  { %4061 = vst.msk [vmem:[#allocation2 + $0x121] sm:$0xff] %vm13069_vm2, %v8207_v22  ;;  %vm13077_vm2 = vmmov %vm13071_vm12 }
 0x751   :  { %4600 = vrot.lane.b32.xlu1 %v4579_v3, %s9375_s7 }
 0x752   :  { %v4435_v44 = vld [vmem:[#allocation2 + $0x110] sm:$0xff] }
 0x753   :  { %4266 = vrot.lane.b32.xlu0 %v4244_v5, %s9369_s10  ;;  %v4444_v37 = vpack.c.bf16 %v4435_v44, %v4235_v8  ;;  %v4499_v47 = vld [vmem:[#allocation2 + $0x111] sm:$0xff] }
 0x754   :  { %v4571_v21 = vld [vmem:[#allocation2 + $0x112] sm:$0xff]  ;;  %v4508_v32 = vpack.c.bf16 %v4499_v47, %v4307_v31 }
 0x755   :  { %4138 = vrot.lane.b32.xlu1 %v4507_v6, %s9370_s11  ;;  %4093 = vst.msk [vmem:[#allocation3 + $0xa8] sm:$0xff] %vm13070_vm3, %v4444_v37  ;;  %v4580_v39 = vpack.c.bf16 %v4571_v21, %v4371_v35  ;;  %v4573_v6 = vld [vmem:[#allocation2 + $0x132] sm:$0xff]  ;;  %vm13078_vm3 = vmmov %vm13072_vm11 }
 0x757   :  { %4402 = vrot.lane.b32.xlu0 %v4380_v15, %s9368_s9  ;;  %v4500_v40 = vld [vmem:[#allocation2 + $0x121] sm:$0xff] }
 0x758   :  { %v4509_v55 = vpack.c.bf16 %v4501_v42, %v4500_v40  ;;  %v4237_v60 = vld [vmem:[#allocation2 + $0x120] sm:$0xff]  ;;  %v4317_v11 = vpack.c.bf16 %v4500_v40, %v4499_v47 }
 0x759   :  { %4202 = vrot.lane.b32.xlu1 %v4579_v3, %s9372_s13  ;;  %v4245_v57 = vpack.c.bf16 %v4237_v60, %v4435_v44  ;;  %v4373_v43 = vld [vmem:[#allocation2 + $0x122] sm:$0xff]  ;;  %v4445_v44 = vpack.c.bf16 %v4437_v7, %v4237_v60 }
 0x75a   :  { %v4381_v8 = vpack.c.bf16 %v4373_v43, %v4571_v21  ;;  %v4581_v22 = vpack.c.bf16 %v4573_v6, %v4373_v43 }
 0x75b   :  { %4466 = vrot.lane.b32.xlu0 %v4444_v37, %s9373_s14 }
 0x75d   :  { %4338 = vrot.lane.b32.xlu1 %v4316_v49, %s9371_s12 }
 0x75f   :  { %4530 = vrot.lane.b32.xlu0 %v4508_v32, %s9374_s17 }
 0x761   :  { %4602 = vrot.lane.b32.xlu1 %v4580_v39, %s9375_s7 }
 0x763   :  { %4532 = vrot.lane.b32.xlu0 %v4509_v55, %s9374_s17 }
 0x764   :  { %v4127_v18 = vpop.permute.xlu1 %4126 }
 0x765   :  { %4150 = vst.msk [vmem:[#allocation3] sm:$0xff] %vm269_vm5, %v4127_v18  ;;  %4140 = vrot.lane.b32.xlu1 %v4508_v32, %s9370_s11  ;;  %v4255_v46 = vpop.permute.xlu0 %4254 }
 0x766   :  { %4279 = vst.msk [vmem:[#allocation3 + $0x8] sm:$0xff] %vm401_vm4, %v4255_v46 }
 0x767   :  { %4340 = vrot.lane.b32.xlu0 %v4317_v11, %s9371_s12 }
 0x768   :  { %v4191_v3 = vpop.permute.xlu1 %4190 }
 0x769   :  { %4214 = vst.msk [vmem:[#allocation3] sm:$0xff] %vm334_vm8, %v4191_v3  ;;  %4268 = vrot.lane.b32.xlu1 %v4245_v57, %s9369_s10  ;;  %v4391_v5 = vpop.permute.xlu0 %4390 }
 0x76a   :  { %4278 = vst.msk [vmem:[#allocation3] sm:$0xff] %vm399_vm10, %v4255_v46 }
 0x76b   :  { %4404 = vrot.lane.b32.xlu0 %v4381_v8, %s9368_s9 }
 0x76c   :  { %v4327_v35 = vpop.permute.xlu1 %4326 }
 0x76d   :  { %4350 = vst.msk [vmem:[#allocation3 + $0x8] sm:$0xff] %vm13071_vm12, %v4327_v35  ;;  %4604 = vrot.lane.b32.xlu1 %v4581_v22, %s9375_s7  ;;  %v4455_v15 = vpop.permute.xlu0 %4454  ;;  %vm13079_vm12 = vmmov %vm13073_vm7 }
 0x76e   :  { %4414 = vst.msk [vmem:[#allocation3 + $0x8] sm:$0xff] %vm13072_vm11, %v4391_v5  ;;  %vm13080_vm11 = vmmov %vm13074_vm6 }
 0x76f   :  { %4478 = vst.msk [vmem:[#allocation3 + $0x8] sm:$0xff] %vm13073_vm7, %v4455_v15  ;;  %4468 = vrot.lane.b32.xlu0 %v4445_v44, %s9373_s14  ;;  %vm13081_vm7 = vmmov %vm13075_vm9 }
 0x770   :  { %v4591_v37 = vpop.permute.xlu1 %4590 }
 0x771   :  { %4204 = vrot.lane.b32.xlu1 %v4580_v39, %s9372_s13  ;;  %v4519_v31 = vpop.permute.xlu0 %4518 }
 0x772   :  { %4542 = vst.msk [vmem:[#allocation3 + $0x8] sm:$0xff] %vm13074_vm6, %v4519_v31  ;;  %vm13082_vm6 = vmmov %vm13076_vm0 }
 0x773   :  { %4543 = vst.msk [vmem:[#allocation3 + $0x10] sm:$0xff] %vm13075_vm9, %v4519_v31  ;;  %3589 = vrot.lane.b32.xlu0 %v10792_v9, %s9377_s4  ;;  %v4622_v9 = vld [vmem:[#allocation3] sm:$0xff]  ;;  %vm13083_vm9 = vmmov %vm13077_vm2 }
 0x774   :  { %v4257_v49 = vpop.permute.xlu1 %4256  ;;  %4614 = vst.msk [vmem:[#allocation3 + $0x10] sm:$0xff] %vm13076_vm0, %v4591_v37  ;;  %vm13084_vm0 = vmmov %vm13078_vm3 }
 0x775   :  { %4281 = vst.msk [vmem:[#allocation3 + $0x20] sm:$0xff] %vm401_vm4, %v4257_v49  ;;  %3591 = vrot.lane.b32.xlu1 %v10796_v45, %s9377_s4  ;;  %v4129_v47 = vpop.permute.xlu0 %4128 }
 0x776   :  { %4151 = vst.msk [vmem:[#allocation3 + $0x18] sm:$0xff] %vm269_vm5, %v4129_v47 }
 0x777   :  { %3593 = vrot.lane.b32.xlu0 %v10800_v12, %s9377_s4 }
 0x778   :  { %v4393_v21 = vpop.permute.xlu1 %4392 }
 0x779   :  { %3595 = vrot.lane.b32.xlu1 %v10804_v38, %s9377_s4  ;;  %v4193_v32 = vpop.permute.xlu0 %4192  ;;  %v4623_v39 = vld [vmem:[#allocation3 + $0x8] sm:$0xff] }
 0x77a   :  { %4215 = vst.msk [vmem:[#allocation3 + $0x18] sm:$0xff] %vm334_vm8, %v4193_v32  ;;  %4877 = vmatprep.mubr.bf16.mxu0 %v4623_v39 }
 0x77b   :  { %v4624_v40 = vld [vmem:[#allocation3 + $0x10] sm:$0xff]  ;;  %4280 = vst.msk [vmem:[#allocation3 + $0x18] sm:$0xff] %vm399_vm10, %v4257_v49  ;;  %4878 = vmatmul.mubr.bf16.vlgmr.msra.gmra.mrb[48].mxu0 %v4622_v9 }
 0x77c   :  { %8671 = vmatprep.mubr.bf16.mxu1 %v4624_v40 }
 0x77d   :  { %v4329_v45 = vpop.permute.xlu0 %4328 }
 0x77e   :  { %4351 = vst.msk [vmem:[#allocation3 + $0x20] sm:$0xff] %vm13077_vm2, %v4329_v45  ;;  %vm13085_vm2 = vmmov %vm13079_vm12 }
 0x77f   :  { %v4457_v42 = vpop.permute.xlu1 %4456  ;;  %4415 = vst.msk [vmem:[#allocation3 + $0x20] sm:$0xff] %vm13078_vm3, %v4393_v21  ;;  %vm13086_vm3 = vmmov %vm13080_vm11 }
 0x780   :  { %4479 = vst.msk [vmem:[#allocation3 + $0x20] sm:$0xff] %vm13079_vm12, %v4457_v42  ;;  %vm13087_vm12 = vmmov %vm13081_vm7 }
 0x781   :  { %v4521_v12 = vpop.permute.xlu0 %4520 }
 0x782   :  { %4544 = vst.msk [vmem:[#allocation3 + $0x20] sm:$0xff] %vm13080_vm11, %v4521_v12  ;;  %v4625_v57 = vld [vmem:[#allocation3 + $0x18] sm:$0xff]  ;;  %vm13088_vm11 = vmmov %vm13082_vm6 }
 0x783   :  { %4545 = vst.msk [vmem:[#allocation3 + $0x28] sm:$0xff] %vm13081_vm7, %v4521_v12  ;;  %v4593_v38 = vpop.permute.xlu1 %4592 }
 0x784   :  { %4615 = vst.msk [vmem:[#allocation3 + $0x28] sm:$0xff] %vm13082_vm6, %v4593_v38  ;;  %vm13089_vm6 = vmmov %vm13083_vm9 }
 0x785   :  { %v4259_v55 = vpop.permute.xlu0 %4258 }
 0x786   :  { %4283 = vst.msk [vmem:[#allocation3 + $0x38] sm:$0xff] %vm401_vm4, %v4259_v55 }
 0x787   :  { %v4131_v60 = vpop.permute.xlu1 %4130 }
 0x788   :  { %4152 = vst.msk [vmem:[#allocation3 + $0x30] sm:$0xff] %vm269_vm5, %v4131_v60 }
 0x789   :  { %v4395_v18 = vpop.permute.xlu0 %4394  ;;  %v4626_v11 = vld [vmem:[#allocation3 + $0x20] sm:$0xff] }
 0x78a   :  { %4885 = vmatprep.mubr.bf16.mxu0 %v4626_v11 }
 0x78b   :  { %v4195_v43 = vpop.permute.xlu1 %4194  ;;  %v4627_v46 = vld [vmem:[#allocation3 + $0x28] sm:$0xff]  ;;  %4886 = vmatmul.mubr.bf16.gmra.mrb[52].mxu0 %v4625_v57 }
 0x78c   :  { %4216 = vst.msk [vmem:[#allocation3 + $0x30] sm:$0xff] %vm334_vm8, %v4195_v43  ;;  %8672 = vmatmul.mubr.bf16.vlgmr.msra.gmra.mrb[48].mxu1 %v4627_v46 }
 0x78d   :  { %4282 = vst.msk [vmem:[#allocation3 + $0x30] sm:$0xff] %vm399_vm10, %v4259_v55  ;;  %v4459_v6 = vpop.permute.xlu0 %4458 }
 0x78f   :  { %v4331_v3 = vpop.permute.xlu1 %4330 }
 0x790   :  { %4352 = vst.msk [vmem:[#allocation3 + $0x38] sm:$0xff] %vm13083_vm9, %v4331_v3  ;;  %vm13090_vm9 = vmmov %vm13084_vm0 }
 0x791   :  { %4416 = vst.msk [vmem:[#allocation3 + $0x38] sm:$0xff] %vm13084_vm0, %v4395_v18  ;;  %v4523_v8 = vpop.permute.xlu0 %4522  ;;  %vm13091_vm0 = vmmov %vm13085_vm2 }
 0x792   :  { %4480 = vst.msk [vmem:[#allocation3 + $0x38] sm:$0xff] %vm13085_vm2, %v4459_v6  ;;  %vm13092_vm2 = vmmov %vm13086_vm3 }
 0x793   :  { %4546 = vst.msk [vmem:[#allocation3 + $0x38] sm:$0xff] %vm13086_vm3, %v4523_v8  ;;  %v4595_v22 = vpop.permute.xlu1 %4594  ;;  %vm13093_vm3 = vmmov %vm13088_vm11 }
 0x794   :  { %4547 = vst.msk [vmem:[#allocation3 + $0x40] sm:$0xff] %vm13087_vm12, %v4523_v8  ;;  %v4628_v37 = vld [vmem:[#allocation3 + $0x30] sm:$0xff]  ;;  %vm13094_vm12 = vmmov %vm13089_vm6 }
 0x795   :  { %4616 = vst.msk [vmem:[#allocation3 + $0x40] sm:$0xff] %vm13088_vm11, %v4595_v22  ;;  %v4525_v7 = vpop.permute.xlu0 %4524  ;;  %vm13095_vm11 = vmmov %vm13090_vm9 }
 0x796   :  { %4549 = vst.msk [vmem:[#allocation3 + $0x58] sm:$0xff] %vm13081_vm7, %v4525_v7  ;;  %vm13096_vm7 = vmmov %vm13091_vm0 }
 0x797   :  { %v4133_v5 = vpop.permute.xlu1 %4132 }
 0x798   :  { %4153 = vst.msk [vmem:[#allocation3 + $0x48] sm:$0xff] %vm269_vm5, %v4133_v5 }
 0x799   :  { %v4333_v35 = vpop.permute.xlu0 %4332 }
 0x79a   :  { %v4629_v44 = vld [vmem:[#allocation3 + $0x38] sm:$0xff] }
 0x79b   :  { %v4197_v15 = vpop.permute.xlu1 %4196  ;;  %4893 = vmatprep.mubr.bf16.mxu0 %v4629_v44 }
 0x79c   :  { %v4630_v31 = vld [vmem:[#allocation3 + $0x40] sm:$0xff]  ;;  %4217 = vst.msk [vmem:[#allocation3 + $0x48] sm:$0xff] %vm334_vm8, %v4197_v15  ;;  %4894 = vmatmul.mubr.bf16.gmra.mrb[56].mxu0 %v4628_v37 }
 0x79d   :  { %8675 = vmatprep.mubr.bf16.mxu1 %v4630_v31  ;;  %v4397_v49 = vpop.permute.xlu0 %4396 }
 0x79f   :  { %v4261_v47 = vpop.permute.xlu1 %4260 }
 0x7a0   :  { %4284 = vst.msk [vmem:[#allocation3 + $0x48] sm:$0xff] %vm399_vm10, %v4261_v47 }
 0x7a1   :  { %4285 = vst.msk [vmem:[#allocation3 + $0x50] sm:$0xff] %vm401_vm4, %v4261_v47  ;;  %v4461_v21 = vpop.permute.xlu0 %4460 }
 0x7a2   :  { %4353 = vst.msk [vmem:[#allocation3 + $0x50] sm:$0xff] %vm13089_vm6, %v4333_v35  ;;  %vm13097_vm6 = vmmov %vm13092_vm2 }
 0x7a3   :  { %4417 = vst.msk [vmem:[#allocation3 + $0x50] sm:$0xff] %vm13090_vm9, %v4397_v49  ;;  %v4597_v32 = vpop.permute.xlu1 %4596  ;;  %vm13098_vm9 = vcmask 261120  }
 0x7a4   :  { %4481 = vst.msk [vmem:[#allocation3 + $0x50] sm:$0xff] %vm13091_vm0, %v4461_v21  ;;  %vm13099_vm0 = vmmov %vm13093_vm3 }
 0x7a5   :  { %4548 = vst.msk [vmem:[#allocation3 + $0x50] sm:$0xff] %vm13092_vm2, %v4525_v7  ;;  %v4263_v39 = vpop.permute.xlu0 %4262  ;;  %vm13100_vm2 = vmmov %vm13094_vm12 }
 0x7a6   :  { %4617 = vst.msk [vmem:[#allocation3 + $0x58] sm:$0xff] %vm13093_vm3, %v4597_v32  ;;  %vm13101_vm3 = vmmov %vm13095_vm11 }
 0x7a7   :  { %4287 = vst.msk [vmem:[#allocation3 + $0x68] sm:$0xff] %vm401_vm4, %v4263_v39  ;;  %v4135_v9 = vpop.permute.xlu1 %4134  ;;  %v4631_v38 = vld [vmem:[#allocation3 + $0x48] sm:$0xff] }
 0x7a8   :  { %4154 = vst.msk [vmem:[#allocation3 + $0x60] sm:$0xff] %vm269_vm5, %v4135_v9 }
 0x7a9   :  { %v4399_v40 = vpop.permute.xlu0 %4398 }
 0x7ab   :  { %v4199_v45 = vpop.permute.xlu1 %4198 }
 0x7ac   :  { %v4632_v42 = vld [vmem:[#allocation3 + $0x50] sm:$0xff]  ;;  %4218 = vst.msk [vmem:[#allocation3 + $0x60] sm:$0xff] %vm334_vm8, %v4199_v45 }
 0x7ad   :  { %v4633_v12 = vld [vmem:[#allocation3 + $0x58] sm:$0xff]  ;;  %4901 = vmatprep.mubr.bf16.mxu0 %v4632_v42  ;;  %4286 = vst.msk [vmem:[#allocation3 + $0x60] sm:$0xff] %vm399_vm10, %v4263_v39  ;;  %v4463_v55 = vpop.permute.xlu0 %4462 }
 0x7ae   :  { %8676 = vmatmul.mubr.bf16.gmra.mrb[52].mxu1 %v4633_v12  ;;  %4902 = vmatmul.mubr.bf16.gmra.mrb[60].mxu0 %v4631_v38 }
 0x7af   :  { %v4335_v60 = vpop.permute.xlu1 %4334 }
 0x7b0   :  { %4354 = vst.msk [vmem:[#allocation3 + $0x68] sm:$0xff] %vm13094_vm12, %v4335_v60  ;;  %vm13102_vm12 = vmmov %vm13096_vm7 }
 0x7b1   :  { %4418 = vst.msk [vmem:[#allocation3 + $0x68] sm:$0xff] %vm13095_vm11, %v4399_v40  ;;  %v4527_v18 = vpop.permute.xlu0 %4526  ;;  %vm13103_vm11 = vmmov %vm13097_vm6 }
 0x7b2   :  { %4482 = vst.msk [vmem:[#allocation3 + $0x68] sm:$0xff] %vm13096_vm7, %v4463_v55  ;;  %vm13104_vm7 = vmmov %vm13098_vm9 }
 0x7b3   :  { %4550 = vst.msk [vmem:[#allocation3 + $0x68] sm:$0xff] %vm13097_vm6, %v4527_v18  ;;  %v4599_v11 = vpop.permute.xlu1 %4598  ;;  %vm13105_vm6 = vmmov %vm13099_vm0 }
 0x7b4   :  { %4551 = vst.msk [vmem:[#allocation3 + $0x70] sm:$0xff] %vm13098_vm9, %v4527_v18  ;;  %v4634_v8 = vld [vmem:[#allocation3 + $0x60] sm:$0xff]  ;;  %vm13106_vm9 = vmmov %vm13100_vm2 }
 0x7b5   :  { %4618 = vst.msk [vmem:[#allocation3 + $0x70] sm:$0xff] %vm13099_vm0, %v4599_v11  ;;  %v4137_v57 = vpop.permute.xlu0 %4136  ;;  %vm13107_vm0 = vmmov %vm13101_vm3 }
 0x7b6   :  { %4155 = vst.msk [vmem:[#allocation3 + $0x78] sm:$0xff] %vm269_vm5, %v4137_v57 }
 0x7b7   :  { %v4265_v43 = vpop.permute.xlu1 %4264 }
 0x7b8   :  { %4289 = vst.msk [vmem:[#allocation3 + $0x80] sm:$0xff] %vm401_vm4, %v4265_v43 }
 0x7b9   :  { %v4201_v46 = vpop.permute.xlu0 %4200 }
 0x7ba   :  { %v4635_v6 = vld [vmem:[#allocation3 + $0x68] sm:$0xff]  ;;  %4219 = vst.msk [vmem:[#allocation3 + $0x78] sm:$0xff] %vm334_vm8, %v4201_v46 }
 0x7bb   :  { %v4401_v3 = vpop.permute.xlu1 %4400  ;;  %4909 = vmatprep.mubr.bf16.mxu0 %v4635_v6  ;;  %4288 = vst.msk [vmem:[#allocation3 + $0x78] sm:$0xff] %vm399_vm10, %v4265_v43 }
 0x7bc   :  { %v4636_v22 = vld [vmem:[#allocation3 + $0x70] sm:$0xff]  ;;  %4910 = vmatmul.mubr.bf16.gmra.mrb[64].mxu0 %v4634_v8 }
 0x7bd   :  { %8679 = vmatprep.mubr.bf16.mxu1 %v4636_v22  ;;  %v4337_v7 = vpop.permute.xlu0 %4336 }
 0x7be   :  { %4355 = vst.msk [vmem:[#allocation3 + $0x80] sm:$0xff] %vm13100_vm2, %v4337_v7  ;;  %vm13108_vm2 = vmmov %vm13102_vm12 }
 0x7bf   :  { %v4465_v5 = vpop.permute.xlu1 %4464  ;;  %4419 = vst.msk [vmem:[#allocation3 + $0x80] sm:$0xff] %vm13101_vm3, %v4401_v3  ;;  %vm13109_vm3 = vmmov %vm13103_vm11 }
 0x7c0   :  { %4483 = vst.msk [vmem:[#allocation3 + $0x80] sm:$0xff] %vm13102_vm12, %v4465_v5  ;;  %vm13110_vm12 = vmmov %vm13104_vm7 }
 0x7c1   :  { %v4529_v35 = vpop.permute.xlu0 %4528 }
 0x7c2   :  { %4552 = vst.msk [vmem:[#allocation3 + $0x80] sm:$0xff] %vm13103_vm11, %v4529_v35  ;;  %v4637_v47 = vld [vmem:[#allocation3 + $0x78] sm:$0xff]  ;;  %vm13111_vm11 = vmmov %vm13105_vm6 }
 0x7c3   :  { %4553 = vst.msk [vmem:[#allocation3 + $0x88] sm:$0xff] %vm13104_vm7, %v4529_v35  ;;  %v4601_v44 = vpop.permute.xlu1 %4600 }
 0x7c4   :  { %4619 = vst.msk [vmem:[#allocation3 + $0x88] sm:$0xff] %vm13105_vm6, %v4601_v44  ;;  %vm13112_vm6 = vmmov %vm13106_vm9 }
 0x7c5   :  { %v4267_v15 = vpop.permute.xlu0 %4266 }
 0x7c6   :  { %4291 = vst.msk [vmem:[#allocation3 + $0x98] sm:$0xff] %vm401_vm4, %v4267_v15 }
 0x7c7   :  { %v4139_v37 = vpop.permute.xlu1 %4138 }
 0x7c8   :  { %4156 = vst.msk [vmem:[#allocation3 + $0x90] sm:$0xff] %vm269_vm5, %v4139_v37 }
 0x7c9   :  { %v4403_v31 = vpop.permute.xlu0 %4402  ;;  %v4638_v49 = vld [vmem:[#allocation3 + $0x80] sm:$0xff] }
 0x7ca   :  { %4917 = vmatprep.mubr.bf16.mxu0 %v4638_v49 }
 0x7cb   :  { %v4203_v21 = vpop.permute.xlu1 %4202  ;;  %v4639_v32 = vld [vmem:[#allocation3 + $0x88] sm:$0xff]  ;;  %4918 = vmatmul.mubr.bf16.gmra.mrb[68].mxu0 %v4637_v47 }
 0x7cc   :  { %4220 = vst.msk [vmem:[#allocation3 + $0x90] sm:$0xff] %vm334_vm8, %v4203_v21  ;;  %8680 = vmatmul.mubr.bf16.gmra.mrb[56].mxu1 %v4639_v32  ;;  %v11342_v32 = vld [vmem:[%s12938_s2] ss:$0 sm:$0xff] }
 0x7cd   :  { %4290 = vst.msk [vmem:[#allocation3 + $0x90] sm:$0xff] %vm399_vm10, %v4267_v15  ;;  %v4467_v39 = vpop.permute.xlu0 %4466 }
 0x7cf   :  { %v4339_v9 = vpop.permute.xlu1 %4338 }
 0x7d0   :  { %4356 = vst.msk [vmem:[#allocation3 + $0x98] sm:$0xff] %vm13106_vm9, %v4339_v9  ;;  %vm13113_vm9 = vmmov %vm13107_vm0 }
 0x7d1   :  { %4420 = vst.msk [vmem:[#allocation3 + $0x98] sm:$0xff] %vm13107_vm0, %v4403_v31  ;;  %v4531_v40 = vpop.permute.xlu0 %4530  ;;  %vm13114_vm0 = vmmov %vm13111_vm11 }
 0x7d2   :  { %4484 = vst.msk [vmem:[#allocation3 + $0x98] sm:$0xff] %vm13108_vm2, %v4467_v39 }
 0x7d3   :  { %4554 = vst.msk [vmem:[#allocation3 + $0x98] sm:$0xff] %vm13109_vm3, %v4531_v40  ;;  %v4603_v45 = vpop.permute.xlu1 %4602 }
 0x7d4   :  { %4555 = vst.msk [vmem:[#allocation3 + $0xa0] sm:$0xff] %vm13110_vm12, %v4531_v40  ;;  %v4640_v18 = vld [vmem:[#allocation3 + $0x90] sm:$0xff]  ;;  %vm13115_vm12 = vmmov %vm13104_vm7 }
 0x7d5   :  { %4620 = vst.msk [vmem:[#allocation3 + $0xa0] sm:$0xff] %vm13111_vm11, %v4603_v45  ;;  %v4533_v42 = vpop.permute.xlu0 %4532  ;;  %vm13116_vm11 = vmmov %vm13104_vm7 }
 0x7d6   :  { %4557 = vst.msk [vmem:[#allocation3 + $0xb8] sm:$0xff] %vm13104_vm7, %v4533_v42 }
 0x7d7   :  { %v4141_v12 = vpop.permute.xlu1 %4140 }
 0x7d8   :  { %4157 = vst.msk [vmem:[#allocation3 + $0xa8] sm:$0xff] %vm269_vm5, %v4141_v12 }
 0x7d9   :  { %v4341_v38 = vpop.permute.xlu0 %4340 }
 0x7da   :  { %v4641_v55 = vld [vmem:[#allocation3 + $0x98] sm:$0xff] }
 0x7db   :  { %v4269_v60 = vpop.permute.xlu1 %4268  ;;  %4925 = vmatprep.mubr.bf16.mxu0 %v4641_v55 }
 0x7dc   :  { %v4642_v11 = vld [vmem:[#allocation3 + $0xa0] sm:$0xff]  ;;  %4293 = vst.msk [vmem:[#allocation3 + $0xb0] sm:$0xff] %vm401_vm4, %v4269_v60  ;;  %4926 = vmatmul.mubr.bf16.gmra.mrb[72].mxu0 %v4640_v18 }
 0x7dd   :  { %8683 = vmatprep.mubr.bf16.mxu1 %v4642_v11  ;;  %4357 = vst.msk [vmem:[#allocation3 + $0xb0] sm:$0xff] %vm13112_vm6, %v4341_v38  ;;  %v4405_v57 = vpop.permute.xlu0 %4404  ;;  %vm13117_vm6 = vmmov %vm13104_vm7 }
 0x7de   :  { %4421 = vst.msk [vmem:[#allocation3 + $0xb0] sm:$0xff] %vm13113_vm9, %v4405_v57  ;;  %vm13118_vm9 = vmmov %vm13117_vm6 }
 0x7df   :  { %v4605_v43 = vpop.permute.xlu1 %4604 }
 0x7e0   :  { %4621 = vst.msk [vmem:[#allocation3 + $0xb8] sm:$0xff] %vm13114_vm0, %v4605_v43  ;;  %vm13119_vm0 = vmmov %vm13117_vm6 }
 0x7e1   :  { %v4469_v46 = vpop.permute.xlu0 %4468 }
 0x7e2   :  { %4485 = vst.msk [vmem:[#allocation3 + $0xb0] sm:$0xff] %vm13108_vm2, %v4469_v46  ;;  %vm13120_vm2 = vmmov %vm13119_vm0 }
 0x7e3   :  { %v4205_v6 = vpop.permute.xlu1 %4204  ;;  %4556 = vst.msk [vmem:[#allocation3 + $0xb0] sm:$0xff] %vm13109_vm3, %v4533_v42  ;;  %vm13121_vm3 = vmmov %vm13119_vm0 }
 0x7e4   :  { %4221 = vst.msk [vmem:[#allocation3 + $0xa8] sm:$0xff] %vm334_vm8, %v4205_v6 }
 0x7e5   :  { %4292 = vst.msk [vmem:[#allocation3 + $0xa8] sm:$0xff] %vm399_vm10, %v4269_v60  ;;  %v3590_v3 = vpop.permute.xlu0 %3589 }
 0x7e6   :  { %3637 = vst.msk [vmem:[#allocation4] sm:$0xff] %vm13115_vm12, %v3590_v3  ;;  %vm13122_vm12 = vmmov %vm13119_vm0 }
 0x7e7   :  { %v3592_v8 = vpop.permute.xlu1 %3591  ;;  %v4645_v22 = vld [vmem:[#allocation3 + $0xb8] sm:$0xff] }
 0x7e8   :  { %3638 = vst.msk [vmem:[#allocation4 + $0x8] sm:$0xff] %vm13116_vm11, %v3592_v8  ;;  %8684 = vmatmul.mubr.bf16.gmra.mrb[60].mxu1 %v4645_v22  ;;  %vm13123_vm11 = vmmov %vm13119_vm0 }
 0x7e9   :  { %v3594_v7 = vpop.permute.xlu0 %3593 }
 0x7ea   :  { %3639 = vst.msk [vmem:[#allocation4 + $0x10] sm:$0xff] %vm13104_vm7, %v3594_v7  ;;  %v4644_v5 = vld [vmem:[#allocation3 + $0xb0] sm:$0xff]  ;;  %vm13124_vm7 = vmmov %vm13119_vm0 }
 0x7eb   :  { %v3596_v35 = vpop.permute.xlu1 %3595  ;;  %4933 = vmatprep.mubr.bf16.mxu0 %v4644_v5 }
 0x7ec   :  { %3640 = vst.msk [vmem:[#allocation4 + $0x18] sm:$0xff] %vm13117_vm6, %v3596_v35  ;;  %v4643_v44 = vld [vmem:[#allocation3 + $0xa8] sm:$0xff]  ;;  %vm13125_vm6 = vmmov %vm13119_vm0 }
 0x7ed   :  { %4934 = vmatmul.mubr.bf16.gmra.mrb[76].mxu0 %v4643_v44 }
 0x84e   :  { %v8447_v15 = vpop.f32.mrb[48].mxu0 }
 0x84f   :  { %v8448_v37 = vpop.f32.mrb[49].mxu0 }
 0x850   :  { %v8449_v31 = vadd.f32 %v8448_v37, %v8447_v15  ;;  %v8450_v49 = vpop.f32.mrb[50].mxu0 }
 0x851   :  { %v8451_v47 = vpop.f32.mrb[51].mxu0 }
 0x852   :  { %v8452_v21 = vadd.f32 %v8451_v47, %v8450_v49  ;;  %v4880_v40 = vadd.f32 %v8449_v31, %v11342_v32 }
 0x854   :  { %v4883_v11 = vadd.f32 %v8452_v21, %v11342_v32 }
 0x85e   :  { %v8453_v39 = vpop.f32.mrb[52].mxu0 }
 0x85f   :  { %v8673_v9 = vpop.f32.mrb[48].mxu1  ;;  %v8454_v45 = vpop.f32.mrb[53].mxu0 }
 0x860   :  { %v4976_v42 = vpop.f32.mrb[49].mxu1  ;;  %v8455_v12 = vadd.f32 %v8454_v45, %v8453_v39  ;;  %v8456_v38 = vpop.f32.mrb[54].mxu0 }
 0x861   :  { %v11345_v55 = vadd.f32 %v4976_v42, %v4880_v40  ;;  %v8674_v60 = vpop.f32.mrb[50].mxu1  ;;  %v8457_v18 = vpop.f32.mrb[55].mxu0 }
 0x862   :  { %v4979_v57 = vpop.f32.mrb[51].mxu1  ;;  %v4888_v43 = vadd.f32 %v8455_v12, %v11342_v32  ;;  %v8458_v46 = vadd.f32 %v8457_v18, %v8456_v38 }
 0x863   :  { %9086 = vtanh.f32 %v11345_v55  ;;  %v11350_v6 = vadd.f32 %v4979_v57, %v4883_v11 }
 0x864   :  { %v11352_v3 = vadd.f32 %v8673_v9, %v4888_v43  ;;  %v4891_v8 = vadd.f32 %v8458_v46, %v11342_v32 }
 0x865   :  { %9088 = vtanh.f32 %v11350_v6 }
 0x866   :  { %v11356_v22 = vadd.f32 %v8674_v60, %v4891_v8  ;;  %9090 = vtanh.f32 %v11352_v3 }
 0x868   :  { %9092 = vtanh.f32 %v11356_v22 }
 0x86d   :  { %v9087_v7 = vpop.eup %9086 }
 0x86e   :  { %5263 = vrot.lane.b32.xlu0 %v9087_v7, %s9375_s7 }
 0x86f   :  { %v8459_v5 = vpop.f32.mrb[56].mxu0  ;;  %v9089_v35 = vpop.eup %9088 }
 0x870   :  { %v8460_v44 = vpop.f32.mrb[57].mxu0  ;;  %5265 = vrot.lane.b32.xlu1 %v9089_v35, %s9375_s7  ;;  %v9091_v47 = vpop.eup %9090 }
 0x871   :  { %v8461_v15 = vadd.f32 %v8460_v44, %v8459_v5  ;;  %v8462_v37 = vpop.f32.mrb[58].mxu0 }
 0x872   :  { %3597 = vrot.lane.b32.xlu0 %v10812_v28, %s9377_s4  ;;  %v8463_v31 = vpop.f32.mrb[59].mxu0  ;;  %v9093_v21 = vpop.eup %9092 }
 0x873   :  { %v8464_v49 = vadd.f32 %v8463_v31, %v8462_v37  ;;  %v4896_v28 = vadd.f32 %v8461_v15, %v11342_v32 }
 0x874   :  { %5267 = vrot.lane.b32.xlu1 %v9091_v47, %s9375_s7 }
 0x876   :  { %3599 = vrot.lane.b32.xlu0 %v10816_v50, %s9377_s4  ;;  %v4899_v50 = vadd.f32 %v8464_v49, %v11342_v32 }
 0x878   :  { %5269 = vrot.lane.b32.xlu1 %v9093_v21, %s9375_s7 }
 0x87a   :  { %3601 = vrot.lane.b32.xlu0 %v10820_v48, %s9377_s4 }
 0x87e   :  { %3603 = vrot.lane.b32.xlu0 %v10824_v0, %s9377_s4 }
 0x881   :  { %v8677_v39 = vpop.f32.mrb[52].mxu1  ;;  %v8465_v9 = vpop.f32.mrb[60].mxu0 }
 0x882   :  { %v4992_v40 = vpop.f32.mrb[53].mxu1  ;;  %v8466_v42 = vpop.f32.mrb[61].mxu0 }
 0x883   :  { %v11373_v45 = vadd.f32 %v4992_v40, %v4896_v28  ;;  %v8678_v12 = vpop.f32.mrb[54].mxu1  ;;  %v8467_v38 = vadd.f32 %v8466_v42, %v8465_v9  ;;  %v8468_v60 = vpop.f32.mrb[62].mxu0 }
 0x884   :  { %v4995_v18 = vpop.f32.mrb[55].mxu1  ;;  %v8469_v11 = vpop.f32.mrb[63].mxu0 }
 0x885   :  { %9094 = vtanh.f32 %v11373_v45  ;;  %v11377_v48 = vadd.f32 %v4995_v18, %v4899_v50  ;;  %v4904_v0 = vadd.f32 %v8467_v38, %v11342_v32  ;;  %v8470_v57 = vadd.f32 %v8469_v11, %v8468_v60 }
 0x887   :  { %v11380_v43 = vadd.f32 %v8677_v39, %v4904_v0  ;;  %v4907_v46 = vadd.f32 %v8470_v57, %v11342_v32  ;;  %9096 = vtanh.f32 %v11377_v48 }
 0x889   :  { %9098 = vtanh.f32 %v11380_v43  ;;  %v11385_v8 = vadd.f32 %v8678_v12, %v4907_v46 }
 0x88b   :  { %9100 = vtanh.f32 %v11385_v8 }
 0x88f   :  { %v9095_v7 = vpop.eup %9094  ;;  %v8471_v5 = vpop.f32.mrb[64].mxu0 }
 0x890   :  { %5271 = vrot.lane.b32.xlu1 %v9095_v7, %s9375_s7  ;;  %v8472_v35 = vpop.f32.mrb[65].mxu0 }
 0x891   :  { %v9097_v44 = vpop.eup %9096  ;;  %v8473_v15 = vadd.f32 %v8472_v35, %v8471_v5  ;;  %v8474_v37 = vpop.f32.mrb[66].mxu0 }
 0x892   :  { %v8475_v49 = vpop.f32.mrb[67].mxu0 }
 0x893   :  { %v9099_v31 = vpop.eup %9098  ;;  %v8476_v47 = vadd.f32 %v8475_v49, %v8474_v37  ;;  %v4912_v9 = vadd.f32 %v8473_v15, %v11342_v32 }
 0x894   :  { %5273 = vrot.lane.b32.xlu1 %v9097_v44, %s9375_s7  ;;  %5275 = vrot.lane.b32.xlu0 %v9099_v31, %s9375_s7 }
 0x895   :  { %v9101_v21 = vpop.eup %9100  ;;  %v4915_v60 = vadd.f32 %v8476_v47, %v11342_v32 }
 0x898   :  { %3605 = vrot.lane.b32.xlu1 %v10832_v23, %s9377_s4  ;;  %3607 = vrot.lane.b32.xlu0 %v10836_v14, %s9377_s4 }
 0x89c   :  { %5277 = vrot.lane.b32.xlu1 %v9101_v21, %s9375_s7  ;;  %3609 = vrot.lane.b32.xlu0 %v10840_v62, %s9377_s4 }
 0x89e   :  { %v8477_v39 = vpop.f32.mrb[68].mxu0 }
 0x89f   :  { %v8681_v28 = vpop.f32.mrb[56].mxu1  ;;  %v8478_v40 = vpop.f32.mrb[69].mxu0 }
 0x8a0   :  { %3611 = vrot.lane.b32.xlu1 %v10844_v25, %s9377_s4  ;;  %v5008_v42 = vpop.f32.mrb[57].mxu1  ;;  %v8479_v12 = vadd.f32 %v8478_v40, %v8477_v39  ;;  %v8480_v23 = vpop.f32.mrb[70].mxu0 }
 0x8a1   :  { %v11401_v50 = vadd.f32 %v5008_v42, %v4912_v9  ;;  %v8682_v14 = vpop.f32.mrb[58].mxu1  ;;  %v8481_v38 = vpop.f32.mrb[71].mxu0 }
 0x8a2   :  { %v5011_v18 = vpop.f32.mrb[59].mxu1  ;;  %v4920_v62 = vadd.f32 %v8479_v12, %v11342_v32  ;;  %v8482_v11 = vadd.f32 %v8481_v38, %v8480_v23 }
 0x8a3   :  { %9102 = vtanh.f32 %v11401_v50  ;;  %v11406_v25 = vadd.f32 %v5011_v18, %v4915_v60  ;;  %v8040_v18 = vmul.f32 -1.442695, %v11350_v6  ;;  %v8042_v6 = vmul.f32 -1.442695, %v11356_v22  ;;  %v5151_v22 = vld [vmem:[#allocation4] sm:$0xff] }
 0x8a4   :  { %v11408_v0 = vadd.f32 %v8681_v28, %v4920_v62  ;;  %v4923_v57 = vadd.f32 %v8482_v11, %v11342_v32 }
 0x8a5   :  { %9104 = vtanh.f32 %v11406_v25 }
 0x8a6   :  { %v11412_v46 = vadd.f32 %v8682_v14, %v4923_v57  ;;  %9106 = vtanh.f32 %v11408_v0 }
 0x8a8   :  { %9108 = vtanh.f32 %v11412_v46 }
 0x8ad   :  { %v9103_v7 = vpop.eup %9102 }
 0x8ae   :  { %5279 = vrot.lane.b32.xlu0 %v9103_v7, %s9375_s7 }
 0x8af   :  { %v8483_v5 = vpop.f32.mrb[72].mxu0  ;;  %v9105_v35 = vpop.eup %9104 }
 0x8b0   :  { %v8484_v44 = vpop.f32.mrb[73].mxu0  ;;  %5281 = vrot.lane.b32.xlu1 %v9105_v35, %s9375_s7  ;;  %v9107_v47 = vpop.eup %9106 }
 0x8b1   :  { %v8485_v15 = vadd.f32 %v8484_v44, %v8483_v5  ;;  %v8486_v37 = vpop.f32.mrb[74].mxu0  ;;  %v8041_v5 = vmul.f32 -1.442695, %v11352_v3 }
 0x8b2   :  { %3613 = vrot.lane.b32.xlu0 %v10852_v19, %s9377_s4  ;;  %v8487_v31 = vpop.f32.mrb[75].mxu0  ;;  %v9109_v21 = vpop.eup %9108 }
 0x8b3   :  { %v8488_v49 = vadd.f32 %v8487_v31, %v8486_v37  ;;  %v4928_v28 = vadd.f32 %v8485_v15, %v11342_v32  ;;  %v5152_v37 = vld [vmem:[#allocation4 + $0x8] sm:$0xff] }
 0x8b4   :  { %5283 = vrot.lane.b32.xlu1 %v9107_v47, %s9375_s7 }
 0x8b5   :  { %v4931_v42 = vadd.f32 %v8488_v49, %v11342_v32 }
 0x8b6   :  { %3615 = vrot.lane.b32.xlu0 %v10856_v58, %s9377_s4 }
 0x8b8   :  { %5285 = vrot.lane.b32.xlu1 %v9109_v21, %s9375_s7 }
 0x8ba   :  { %3617 = vrot.lane.b32.xlu0 %v10860_v52, %s9377_s4  ;;  %v8039_v52 = vmul.f32 -1.442695, %v11345_v55 }
 0x8bb   :  { %v8685_v39 = vpop.f32.mrb[60].mxu1 }
 0x8bc   :  { %v5024_v9 = vpop.f32.mrb[61].mxu1 }
 0x8bd   :  { %v11427_v40 = vadd.f32 %v5024_v9, %v4928_v28  ;;  %v8686_v19 = vpop.f32.mrb[62].mxu1 }
 0x8be   :  { %3619 = vrot.lane.b32.xlu0 %v10866_v63, %s9377_s4  ;;  %v5027_v12 = vpop.f32.mrb[63].mxu1 }
 0x8bf   :  { %9110 = vtanh.f32 %v11427_v40  ;;  %v11433_v58 = vadd.f32 %v5027_v12, %v4931_v42  ;;  %v8043_v12 = vmul.f32 -1.442695, %v11373_v45 }
 0x8c0   :  { %v8489_v23 = vpop.f32.mrb[76].mxu0 }
 0x8c1   :  { %v8490_v14 = vpop.f32.mrb[77].mxu0  ;;  %9112 = vtanh.f32 %v11433_v58 }
 0x8c2   :  { %v8491_v38 = vadd.f32 %v8490_v14, %v8489_v23  ;;  %v8492_v60 = vpop.f32.mrb[78].mxu0  ;;  %9114 = vpow2.f32 %v8039_v52 }
 0x8c3   :  { %v8493_v62 = vpop.f32.mrb[79].mxu0  ;;  %9116 = vpow2.f32 %v8040_v18  ;;  %v8044_v18 = vmul.f32 -1.442695, %v11377_v48  ;;  %v5154_v48 = vld [vmem:[#allocation4 + $0x18] sm:$0xff] }
 0x8c4   :  { %v4936_v11 = vadd.f32 %v8491_v38, %v11342_v32  ;;  %v8494_v57 = vadd.f32 %v8493_v62, %v8492_v60  ;;  %v5153_v62 = vld [vmem:[#allocation4 + $0x10] sm:$0xff] }
 0x8c6   :  { %v11439_v63 = vadd.f32 %v8685_v39, %v4936_v11  ;;  %v4939_v7 = vadd.f32 %v8494_v57, %v11342_v32 }
 0x8c8   :  { %9118 = vtanh.f32 %v11439_v63  ;;  %v11444_v55 = vadd.f32 %v8686_v19, %v4939_v7 }
 0x8c9   :  { %v9111_v35 = vpop.eup %9110 }
 0x8ca   :  { %5287 = vrot.lane.b32.xlu1 %v9111_v35, %s9375_s7  ;;  %9120 = vtanh.f32 %v11444_v55 }
 0x8cb   :  { %9122 = vpow2.f32 %v8041_v5  ;;  %v9113_v44 = vpop.eup %9112  ;;  %v8045_v5 = vmul.f32 -1.442695, %v11380_v43 }
 0x8cc   :  { %v9115_v15 = vpop.eup %9114  ;;  %9124 = vpow2.f32 %v8042_v6 }
 0x8cd   :  { %v9117_v32 = vpop.eup %9116  ;;  %v5087_v31 = vadd.f32 1.0, %v9115_v15 }
 0x8ce   :  { %5289 = vrot.lane.b32.xlu1 %v9113_v44, %s9375_s7  ;;  %v5088_v47 = vadd.f32 1.0, %v9117_v32  ;;  %v8046_v32 = vmul.f32 -1.442695, %v11385_v8 }
 0x8cf   :  { %9126 = vrcp.f32 %v5087_v31 }
 0x8d0   :  { %9128 = vrcp.f32 %v5088_v47 }
 0x8d2   :  { %v9119_v3 = vpop.eup %9118  ;;  %5185 = vrot.lane.b32.xlu1 %v5152_v37, %s9375_s7 }
 0x8d3   :  { %5291 = vrot.lane.b32.xlu0 %v9119_v3, %s9375_s7 }
 0x8d4   :  { %v9121_v49 = vpop.eup %9120 }
 0x8d5   :  { %v9123_v21 = vpop.eup %9122 }
 0x8d6   :  { %5293 = vrot.lane.b32.xlu1 %v9121_v49, %s9375_s7  ;;  %v5089_v39 = vadd.f32 1.0, %v9123_v21  ;;  %v9125_v28 = vpop.eup %9124 }
 0x8d7   :  { %5183 = vrot.lane.b32.xlu0 %v5151_v22, %s9375_s7  ;;  %v5090_v9 = vadd.f32 1.0, %v9125_v28 }
 0x8d8   :  { %9130 = vrcp.f32 %v5089_v39 }
 0x8d9   :  { %v11454_v19 = vpop.eup %9126  ;;  %9132 = vrcp.f32 %v5090_v9 }
 0x8da   :  { %v11458_v52 = vpop.eup %9128  ;;  %9134 = vpow2.f32 %v8043_v12 }
 0x8db   :  { %9136 = vpow2.f32 %v8044_v18  ;;  %v8048_v18 = vmul.f32 -1.442695, %v11406_v25  ;;  %v8050_v25 = vmul.f32 -1.442695, %v11412_v46 }
 0x8dc   :  { %9138 = vpow2.f32 %v8045_v5 }
 0x8dd   :  { %9140 = vpow2.f32 %v8046_v32 }
 0x8e0   :  { %v5264_v42 = vpop.permute.xlu0 %5263 }
 0x8e1   :  { %v5311_v23 = vmul.f32 %v11454_v19, %v5264_v42 }
 0x8e2   :  { %v5266_v14 = vpop.permute.xlu1 %5265  ;;  %v11465_v11 = vpop.eup %9130 }
 0x8e3   :  { %5343 = vrot.lane.b32.xlu0 %v5311_v23, %s9375_s7  ;;  %v5312_v38 = vmul.f32 %v11458_v52, %v5266_v14  ;;  %v11472_v35 = vpop.eup %9132  ;;  %v8047_v14 = vmul.f32 -1.442695, %v11401_v50  ;;  %v8049_v50 = vmul.f32 -1.442695, %v11408_v0 }
 0x8e4   :  { %v3598_v60 = vpop.permute.xlu0 %3597  ;;  %v9135_v37 = vpop.eup %9134 }
 0x8e5   :  { %3641 = vst.msk [vmem:[#allocation4 + $0x20] sm:$0xff] %vm13118_vm9, %v3598_v60  ;;  %5345 = vrot.lane.b32.xlu1 %v5312_v38, %s9375_s7  ;;  %v5091_v31 = vadd.f32 1.0, %v9135_v37  ;;  %v9137_v47 = vpop.eup %9136  ;;  %vm13126_vm9 = vmmov %vm13119_vm0 }
 0x8e6   :  { %v5268_v45 = vpop.permute.xlu1 %5267  ;;  %v5092_v21 = vadd.f32 1.0, %v9137_v47  ;;  %v9139_v22 = vpop.eup %9138 }
 0x8e7   :  { %5187 = vrot.lane.b32.xlu0 %v5153_v62, %s9375_s7  ;;  %v5313_v57 = vmul.f32 %v11465_v11, %v5268_v45  ;;  %9142 = vrcp.f32 %v5091_v31  ;;  %v5093_v39 = vadd.f32 1.0, %v9139_v22  ;;  %v9141_v9 = vpop.eup %9140 }
 0x8e8   :  { %v3600_v7 = vpop.permute.xlu0 %3599  ;;  %9144 = vrcp.f32 %v5092_v21  ;;  %v5094_v42 = vadd.f32 1.0, %v9141_v9 }
 0x8e9   :  { %3642 = vst.msk [vmem:[#allocation4 + $0x28] sm:$0xff] %vm13119_vm0, %v3600_v7  ;;  %5347 = vrot.lane.b32.xlu1 %v5313_v57, %s9375_s7  ;;  %9146 = vrcp.f32 %v5093_v39 }
 0x8ea   :  { %v5270_v6 = vpop.permute.xlu1 %5269  ;;  %9148 = vrcp.f32 %v5094_v42 }
 0x8eb   :  { %5189 = vrot.lane.b32.xlu0 %v5154_v48, %s9375_s7  ;;  %v5314_v44 = vmul.f32 %v11472_v35, %v5270_v6  ;;  %9150 = vpow2.f32 %v8047_v14 }
 0x8ec   :  { %v3602_v15 = vpop.permute.xlu0 %3601  ;;  %v5155_v43 = vld [vmem:[#allocation4 + $0x20] sm:$0xff]  ;;  %9152 = vpow2.f32 %v8048_v18 }
 0x8ed   :  { %3643 = vst.msk [vmem:[#allocation4 + $0x30] sm:$0xff] %vm13120_vm2, %v3602_v15  ;;  %5349 = vrot.lane.b32.xlu1 %v5314_v44, %s9375_s7  ;;  %9154 = vpow2.f32 %v8049_v50  ;;  %vm13127_vm2 = vmmov %vm13119_vm0 }
 0x8ee   :  { %9156 = vpow2.f32 %v8050_v25 }
 0x8ef   :  { %5191 = vrot.lane.b32.xlu0 %v5155_v43, %s9375_s7 }
 0x8f0   :  { %v3604_v3 = vpop.permute.xlu0 %3603  ;;  %v5156_v49 = vld [vmem:[#allocation4 + $0x28] sm:$0xff] }
 0x8f1   :  { %3644 = vst.msk [vmem:[#allocation4 + $0x38] sm:$0xff] %vm13121_vm3, %v3604_v3  ;;  %v11484_v12 = vpop.eup %9142  ;;  %vm13128_vm3 = vmmov %vm13119_vm0 }
 0x8f2   :  { %v11489_v60 = vpop.eup %9144 }
 0x8f3   :  { %5193 = vrot.lane.b32.xlu0 %v5156_v49, %s9375_s7  ;;  %v11494_v7 = vpop.eup %9146 }
 0x8f4   :  { %v5157_v8 = vld [vmem:[#allocation4 + $0x30] sm:$0xff]  ;;  %v11502_v44 = vpop.eup %9148 }
 0x8f5   :  { %v9151_v43 = vpop.eup %9150 }
 0x8f6   :  { %v9153_v31 = vpop.eup %9152  ;;  %v5095_v49 = vadd.f32 1.0, %v9151_v43 }
 0x8f7   :  { %5195 = vrot.lane.b32.xlu0 %v5157_v8, %s9375_s7  ;;  %v5096_v47 = vadd.f32 1.0, %v9153_v31  ;;  %v9155_v21 = vpop.eup %9154 }
 0x8f8   :  { %v5158_v28 = vld [vmem:[#allocation4 + $0x38] sm:$0xff]  ;;  %9158 = vrcp.f32 %v5095_v49  ;;  %v9157_v8 = vpop.eup %9156  ;;  %v5097_v22 = vadd.f32 1.0, %v9155_v21 }
 0x8f9   :  { %9160 = vrcp.f32 %v5096_v47  ;;  %v5098_v39 = vadd.f32 1.0, %v9157_v8 }
 0x8fa   :  { %9162 = vrcp.f32 %v5097_v22 }
 0x8fb   :  { %5197 = vrot.lane.b32.xlu0 %v5158_v28, %s9375_s7  ;;  %v8051_v28 = vmul.f32 -1.442695, %v11427_v40  ;;  %9164 = vrcp.f32 %v5098_v39  ;;  %v8053_v40 = vmul.f32 -1.442695, %v11439_v63 }
 0x8fd   :  { %9166 = vpow2.f32 %v8051_v28 }
 0x902   :  { %v5272_v23 = vpop.permute.xlu1 %5271  ;;  %v11511_v9 = vpop.eup %9158 }
 0x903   :  { %v5315_v38 = vmul.f32 %v11484_v12, %v5272_v23  ;;  %v8052_v23 = vmul.f32 -1.442695, %v11433_v58 }
 0x905   :  { %5351 = vrot.lane.b32.xlu1 %v5315_v38, %s9375_s7  ;;  %v11515_v38 = vpop.eup %9160  ;;  %9168 = vpow2.f32 %v8052_v23 }
 0x906   :  { %v5274_v62 = vpop.permute.xlu1 %5273  ;;  %v5276_v57 = vpop.permute.xlu0 %5275  ;;  %9170 = vpow2.f32 %v8053_v40 }
 0x907   :  { %v5316_v45 = vmul.f32 %v11489_v60, %v5274_v62  ;;  %v5317_v48 = vmul.f32 %v11494_v7, %v5276_v57  ;;  %v11522_v50 = vpop.eup %9162 }
 0x908   :  { %v11528_v25 = vpop.eup %9164 }
 0x909   :  { %5353 = vrot.lane.b32.xlu1 %v5316_v45, %s9375_s7 }
 0x90a   :  { %v3606_v5 = vpop.permute.xlu1 %3605  ;;  %v3608_v6 = vpop.permute.xlu0 %3607 }
 0x90b   :  { %3645 = vst.msk [vmem:[#allocation4 + $0x40] sm:$0xff] %vm13122_vm12, %v3606_v5  ;;  %vm13141_vm12 = vcmask 1045509  }
 0x90c   :  { %3646 = vst.msk [vmem:[#allocation4 + $0x48] sm:$0xff] %vm13123_vm11, %v3608_v6  ;;  %v8054_v6 = vmul.f32 -1.442695, %v11444_v55  ;;  %vm13142_vm11 = vmmov %vm13141_vm12 }
 0x90d   :  { %5355 = vrot.lane.b32.xlu1 %v5317_v48, %s9375_s7 }
 0x90e   :  { %v5278_v15 = vpop.permute.xlu1 %5277  ;;  %v3610_v0 = vpop.permute.xlu0 %3609  ;;  %9172 = vpow2.f32 %v8054_v6 }
 0x90f   :  { %v5318_v32 = vmul.f32 %v11502_v44, %v5278_v15  ;;  %3647 = vst.msk [vmem:[#allocation4 + $0x50] sm:$0xff] %vm13124_vm7, %v3610_v0  ;;  %v9167_v15 = vpop.eup %9166  ;;  %vm13143_vm7 = vmmov %vm13142_vm11 }
 0x911   :  { %5357 = vrot.lane.b32.xlu1 %v5318_v32, %s9375_s7 }
 0x912   :  { %v3612_v37 = vpop.permute.xlu1 %3611  ;;  %v5159_v3 = vld [vmem:[#allocation4 + $0x40] sm:$0xff] }
 0x913   :  { %3648 = vst.msk [vmem:[#allocation4 + $0x58] sm:$0xff] %vm13125_vm6, %v3612_v37  ;;  %5199 = vrot.lane.b32.xlu0 %v5159_v3, %s9375_s7  ;;  %v5160_v46 = vld [vmem:[#allocation4 + $0x48] sm:$0xff]  ;;  %v5099_v37 = vadd.f32 1.0, %v9167_v15  ;;  %v9169_v3 = vpop.eup %9168  ;;  %vm13144_vm6 = vmmov %vm13143_vm7 }
 0x914   :  { %v5100_v31 = vadd.f32 1.0, %v9169_v3  ;;  %v9171_v47 = vpop.eup %9170 }
 0x915   :  { %5201 = vrot.lane.b32.xlu1 %v5160_v46, %s9375_s7  ;;  %9174 = vrcp.f32 %v5099_v37  ;;  %v5101_v22 = vadd.f32 1.0, %v9171_v47 }
 0x916   :  { %v5161_v57 = vld [vmem:[#allocation4 + $0x50] sm:$0xff]  ;;  %9176 = vrcp.f32 %v5100_v31 }
 0x917   :  { %9178 = vrcp.f32 %v5101_v22 }
 0x918   :  { %v9173_v8 = vpop.eup %9172 }
 0x919   :  { %v5102_v39 = vadd.f32 1.0, %v9173_v8 }
 0x91a   :  { %v5162_v63 = vld [vmem:[#allocation4 + $0x58] sm:$0xff] }
 0x91b   :  { %9180 = vrcp.f32 %v5102_v39 }
 0x920   :  { %v5280_v42 = vpop.permute.xlu0 %5279 }
 0x921   :  { %v5319_v14 = vmul.f32 %v11511_v9, %v5280_v42  ;;  %v11540_v42 = vpop.eup %9174 }
 0x922   :  { %v5282_v18 = vpop.permute.xlu1 %5281 }
 0x923   :  { %5359 = vrot.lane.b32.xlu0 %v5319_v14, %s9375_s7  ;;  %v5320_v62 = vmul.f32 %v11515_v38, %v5282_v18  ;;  %v11544_v18 = vpop.eup %9176 }
 0x924   :  { %v3614_v45 = vpop.permute.xlu0 %3613 }
 0x925   :  { %3649 = vst.msk [vmem:[#allocation4 + $0x60] sm:$0xff] %vm13126_vm9, %v3614_v45  ;;  %5361 = vrot.lane.b32.xlu1 %v5320_v62, %s9375_s7  ;;  %vm13145_vm9 = vmmov %vm13144_vm6 }
 0x926   :  { %v5284_v58 = vpop.permute.xlu1 %5283 }
 0x927   :  { %5203 = vrot.lane.b32.xlu0 %v5161_v57, %s9375_s7  ;;  %v5321_v5 = vmul.f32 %v11522_v50, %v5284_v58  ;;  %v11548_v57 = vpop.eup %9178 }
 0x928   :  { %v3616_v48 = vpop.permute.xlu0 %3615 }
 0x929   :  { %3650 = vst.msk [vmem:[#allocation4 + $0x68] sm:$0xff] %vm13119_vm0, %v3616_v48  ;;  %5363 = vrot.lane.b32.xlu1 %v5321_v5, %s9375_s7  ;;  %v11551_v48 = vpop.eup %9180  ;;  %vm13146_vm0 = vmmov %vm13144_vm6 }
 0x92a   :  { %v5286_v32 = vpop.permute.xlu1 %5285 }
 0x92b   :  { %5205 = vrot.lane.b32.xlu0 %v5162_v63, %s9375_s7  ;;  %v5322_v0 = vmul.f32 %v11528_v25, %v5286_v32 }
 0x92c   :  { %v3618_v43 = vpop.permute.xlu0 %3617  ;;  %v5163_v55 = vld [vmem:[#allocation4 + $0x60] sm:$0xff] }
 0x92d   :  { %3651 = vst.msk [vmem:[#allocation4 + $0x70] sm:$0xff] %vm13127_vm2, %v3618_v43  ;;  %5365 = vrot.lane.b32.xlu1 %v5322_v0, %s9375_s7  ;;  %vm13147_vm2 = vmmov %vm13146_vm0 }
 0x92f   :  { %5207 = vrot.lane.b32.xlu0 %v5163_v55, %s9375_s7 }
 0x930   :  { %v3620_v46 = vpop.permute.xlu0 %3619  ;;  %v5164_v49 = vld [vmem:[#allocation4 + $0x68] sm:$0xff] }
 0x931   :  { %3652 = vst.msk [vmem:[#allocation4 + $0x78] sm:$0xff] %vm13128_vm3, %v3620_v46  ;;  %vm13148_vm3 = vmmov %vm13146_vm0 }
 0x933   :  { %5209 = vrot.lane.b32.xlu0 %v5164_v49, %s9375_s7 }
 0x934   :  { %v5165_v21 = vld [vmem:[#allocation4 + $0x70] sm:$0xff] }
 0x937   :  { %5211 = vrot.lane.b32.xlu0 %v5165_v21, %s9375_s7 }
 0x938   :  { %v5166_v28 = vld [vmem:[#allocation4 + $0x78] sm:$0xff] }
 0x93b   :  { %5213 = vrot.lane.b32.xlu0 %v5166_v28, %s9375_s7 }
 0x93c   :  { %v5288_v23 = vpop.permute.xlu1 %5287 }
 0x93d   :  { %v5323_v14 = vmul.f32 %v11540_v42, %v5288_v23 }
 0x93f   :  { %5367 = vrot.lane.b32.xlu1 %v5323_v14, %s9375_s7 }
 0x940   :  { %v5290_v62 = vpop.permute.xlu1 %5289 }
 0x941   :  { %v5324_v45 = vmul.f32 %v11544_v18, %v5290_v62 }
 0x943   :  { %5369 = vrot.lane.b32.xlu1 %v5324_v45, %s9375_s7 }
 0x944   :  { %v5186_v40 = vpop.permute.xlu1 %5185 }
 0x945   :  { %v5292_v58 = vpop.permute.xlu0 %5291  ;;  %v5232_v37 = vmul.f32 %v11458_v52, %v5186_v40 }
 0x946   :  { %v5325_v5 = vmul.f32 %v11548_v57, %v5292_v58 }
 0x948   :  { %v5294_v6 = vpop.permute.xlu1 %5293  ;;  %5371 = vrot.lane.b32.xlu1 %v5325_v5, %s9375_s7 }
 0x949   :  { %v5326_v63 = vmul.f32 %v11551_v48, %v5294_v6  ;;  %v5184_v15 = vpop.permute.xlu0 %5183 }
 0x94a   :  { %v5231_v32 = vmul.f32 %v11454_v19, %v5184_v15 }
 0x94c   :  { %5373 = vrot.lane.b32.xlu1 %v5326_v63, %s9375_s7 }
 0x955   :  { %v5344_v0 = vpop.permute.xlu0 %5343 }
 0x956   :  { %v11557_v43 = vadd.f32 %v5344_v0, %v5231_v32 }
 0x957   :  { %v5346_v55 = vpop.permute.xlu1 %5345 }
 0x958   :  { %9182 = vtanh.f32 %v11557_v43  ;;  %v11561_v3 = vadd.f32 %v5346_v55, %v5232_v37 }
 0x959   :  { %v5188_v46 = vpop.permute.xlu0 %5187 }
 0x95a   :  { %v5233_v31 = vmul.f32 %v11465_v11, %v5188_v46  ;;  %9184 = vtanh.f32 %v11561_v3 }
 0x95b   :  { %v5348_v49 = vpop.permute.xlu1 %5347 }
 0x95c   :  { %v11565_v47 = vadd.f32 %v5348_v49, %v5233_v31 }
 0x95d   :  { %v5190_v21 = vpop.permute.xlu0 %5189 }
 0x95e   :  { %13129 = vst [vmem:[#allocation21_spill] sm:$0xff] %v11565_v47  ;;  %v5234_v8 = vmul.f32 %v11472_v35, %v5190_v21  ;;  %9186 = vtanh.f32 %v11565_v47 }
 0x95f   :  { %v5350_v22 = vpop.permute.xlu1 %5349 }
 0x960   :  { %v11569_v39 = vadd.f32 %v5350_v22, %v5234_v8 }
 0x961   :  { %v5192_v62 = vpop.permute.xlu0 %5191 }
 0x962   :  { %13130 = vst [vmem:[#allocation22_spill] sm:$0xff] %v11569_v39  ;;  %v9183_v28 = vpop.eup %9182  ;;  %9188 = vtanh.f32 %v11569_v39  ;;  %v5235_v58 = vmul.f32 %v11484_v12, %v5192_v62 }
 0x963   :  { %5439 = vrot.lane.b32.xlu0 %v9183_v28, %s9375_s7 }
 0x964   :  { %v9185_v23 = vpop.eup %9184 }
 0x965   :  { %5441 = vrot.lane.b32.xlu1 %v9185_v23, %s9375_s7  ;;  %v5194_v40 = vpop.permute.xlu0 %5193 }
 0x966   :  { %v5236_v15 = vmul.f32 %v11489_v60, %v5194_v40 }
 0x968   :  { %v9187_v14 = vpop.eup %9186 }
 0x969   :  { %5443 = vrot.lane.b32.xlu0 %v9187_v14, %s9375_s7  ;;  %v5196_v63 = vpop.permute.xlu0 %5195 }
 0x96a   :  { %v5237_v37 = vmul.f32 %v11494_v7, %v5196_v63 }
 0x96c   :  { %v9189_v45 = vpop.eup %9188 }
 0x96d   :  { %5445 = vrot.lane.b32.xlu1 %v9189_v45, %s9375_s7  ;;  %v5198_v55 = vpop.permute.xlu0 %5197 }
 0x96e   :  { %v5238_v49 = vmul.f32 %v11502_v44, %v5198_v55 }
 0x977   :  { %v5352_v5 = vpop.permute.xlu1 %5351 }
 0x978   :  { %v11577_v6 = vadd.f32 %v5352_v5, %v5235_v58 }
 0x97a   :  { %13131 = vst [vmem:[#allocation23_spill] sm:$0xff] %v11577_v6  ;;  %9190 = vtanh.f32 %v11577_v6 }
 0x97b   :  { %v5354_v32 = vpop.permute.xlu1 %5353 }
 0x97c   :  { %v11581_v0 = vadd.f32 %v5354_v32, %v5236_v15 }
 0x97e   :  { %13132 = vst [vmem:[#allocation24_spill] sm:$0xff] %v11581_v0  ;;  %9192 = vtanh.f32 %v11581_v0 }
 0x97f   :  { %v5356_v46 = vpop.permute.xlu1 %5355 }
 0x980   :  { %v11585_v31 = vadd.f32 %v5356_v46, %v5237_v37 }
 0x982   :  { %13133 = vst [vmem:[#allocation25_spill] sm:$0xff] %v11585_v31  ;;  %9194 = vtanh.f32 %v11585_v31 }
 0x983   :  { %v5358_v21 = vpop.permute.xlu1 %5357 }
 0x984   :  { %v9191_v8 = vpop.eup %9190  ;;  %v11589_v22 = vadd.f32 %v5358_v21, %v5238_v49 }
 0x985   :  { %5447 = vrot.lane.b32.xlu0 %v9191_v8, %s9375_s7  ;;  %v5200_v62 = vpop.permute.xlu0 %5199 }
 0x986   :  { %13134 = vst [vmem:[#allocation26_spill] sm:$0xff] %v11589_v22  ;;  %9196 = vtanh.f32 %v11589_v22  ;;  %v5239_v45 = vmul.f32 %v11511_v9, %v5200_v62 }
 0x987   :  { %v5202_v40 = vpop.permute.xlu1 %5201 }
 0x988   :  { %v9193_v28 = vpop.eup %9192  ;;  %v5240_v63 = vmul.f32 %v11515_v38, %v5202_v40 }
 0x989   :  { %5449 = vrot.lane.b32.xlu1 %v9193_v28, %s9375_s7 }
 0x98c   :  { %v9195_v23 = vpop.eup %9194 }
 0x98d   :  { %5451 = vrot.lane.b32.xlu0 %v9195_v23, %s9375_s7 }
 0x990   :  { %v9197_v14 = vpop.eup %9196 }
 0x991   :  { %5453 = vrot.lane.b32.xlu1 %v9197_v14, %s9375_s7 }
 0x995   :  { %v5360_v58 = vpop.permute.xlu0 %5359 }
 0x996   :  { %v11597_v5 = vadd.f32 %v5360_v58, %v5239_v45 }
 0x997   :  { %v5362_v15 = vpop.permute.xlu1 %5361 }
 0x998   :  { %9198 = vtanh.f32 %v11597_v5  ;;  %v11601_v32 = vadd.f32 %v5362_v15, %v5240_v63 }
 0x999   :  { %v5204_v37 = vpop.permute.xlu0 %5203 }
 0x99a   :  { %v5241_v55 = vmul.f32 %v11522_v50, %v5204_v37  ;;  %9200 = vtanh.f32 %v11601_v32 }
 0x99b   :  { %v5364_v46 = vpop.permute.xlu1 %5363 }
 0x99c   :  { %v11605_v49 = vadd.f32 %v5364_v46, %v5241_v55 }
 0x99d   :  { %v5206_v21 = vpop.permute.xlu0 %5205 }
 0x99e   :  { %13135 = vst [vmem:[#allocation27_spill] sm:$0xff] %v11605_v49  ;;  %v5242_v8 = vmul.f32 %v11528_v25, %v5206_v21  ;;  %9202 = vtanh.f32 %v11605_v49 }
 0x99f   :  { %v5366_v28 = vpop.permute.xlu1 %5365 }
 0x9a0   :  { %v11609_v23 = vadd.f32 %v5366_v28, %v5242_v8 }
 0x9a1   :  { %v5208_v45 = vpop.permute.xlu0 %5207 }
 0x9a2   :  { %13136 = vst [vmem:[#allocation28_spill] sm:$0xff] %v11609_v23  ;;  %v9199_v14 = vpop.eup %9198  ;;  %9204 = vtanh.f32 %v11609_v23  ;;  %v5243_v15 = vmul.f32 %v11540_v42, %v5208_v45 }
 0x9a3   :  { %5455 = vrot.lane.b32.xlu0 %v9199_v14, %s9375_s7 }
 0x9a4   :  { %v9201_v62 = vpop.eup %9200 }
 0x9a5   :  { %5457 = vrot.lane.b32.xlu1 %v9201_v62, %s9375_s7  ;;  %v5210_v63 = vpop.permute.xlu0 %5209 }
 0x9a6   :  { %v5244_v46 = vmul.f32 %v11544_v18, %v5210_v63 }
 0x9a8   :  { %v9203_v40 = vpop.eup %9202 }
 0x9a9   :  { %5459 = vrot.lane.b32.xlu0 %v9203_v40, %s9375_s7  ;;  %v5212_v21 = vpop.permute.xlu0 %5211 }
 0x9aa   :  { %v5245_v14 = vmul.f32 %v11548_v57, %v5212_v21 }
 0x9ac   :  { %v9205_v58 = vpop.eup %9204 }
 0x9ad   :  { %5461 = vrot.lane.b32.xlu1 %v9205_v58, %s9375_s7  ;;  %v5214_v62 = vpop.permute.xlu0 %5213 }
 0x9ae   :  { %v5246_v45 = vmul.f32 %v11551_v48, %v5214_v62 }
 0x9b1   :  { %v5368_v37 = vpop.permute.xlu1 %5367 }
 0x9b2   :  { %v11617_v55 = vadd.f32 %v5368_v37, %v5243_v15 }
 0x9b4   :  { %13137 = vst [vmem:[#allocation29_spill] sm:$0xff] %v11617_v55  ;;  %9206 = vtanh.f32 %v11617_v55 }
 0x9b5   :  { %v5370_v8 = vpop.permute.xlu1 %5369 }
 0x9b6   :  { %v11621_v28 = vadd.f32 %v5370_v8, %v5244_v46 }
 0x9b8   :  { %13138 = vst [vmem:[#allocation30_spill] sm:$0xff] %v11621_v28  ;;  %9208 = vtanh.f32 %v11621_v28 }
 0x9ba   :  { %v5372_v40 = vpop.permute.xlu1 %5371 }
 0x9bb   :  { %v11625_v58 = vadd.f32 %v5372_v40, %v5245_v14 }
 0x9bd   :  { %13139 = vst [vmem:[#allocation31_spill] sm:$0xff] %v11625_v58  ;;  %9210 = vtanh.f32 %v11625_v58 }
 0x9be   :  { %v9207_v15 = vpop.eup %9206  ;;  %v5374_v63 = vpop.permute.xlu1 %5373 }
 0x9bf   :  { %v11629_v37 = vadd.f32 %v5374_v63, %v5246_v45  ;;  %5463 = vrot.lane.b32.xlu0 %v9207_v15, %s9375_s7 }
 0x9c1   :  { %13140 = vst [vmem:[#allocation32_spill] sm:$0xff] %v11629_v37  ;;  %9212 = vtanh.f32 %v11629_v37 }
 0x9c2   :  { %v9209_v46 = vpop.eup %9208 }
 0x9c3   :  { %5465 = vrot.lane.b32.xlu1 %v9209_v46, %s9375_s7 }
 0x9c7   :  { %v9211_v21 = vpop.eup %9210 }
 0x9c8   :  { %5467 = vrot.lane.b32.xlu0 %v9211_v21, %s9375_s7 }
 0x9cb   :  { %v9213_v8 = vpop.eup %9212 }
 0x9cc   :  { %5469 = vrot.lane.b32.xlu1 %v9213_v8, %s9375_s7 }
 0x9d5   :  { %v5440_v14 = vpop.permute.xlu0 %5439 }
 0x9d6   :  { %v5487_v62 = vmul.f32 %v11454_v19, %v5440_v14 }
 0x9d7   :  { %v5442_v40 = vpop.permute.xlu1 %5441 }
 0x9d8   :  { %5599 = vrot.lane.b32.xlu0 %v5487_v62, %s9376_s20  ;;  %v5697_v45 = vrot.slane %v5487_v62, 1  ;;  %v5488_v15 = vmul.f32 %v11458_v52, %v5442_v40  ;;  %v5761_v63 = vrot.slane %v5487_v62, 3  ;;  %v5795_v61 = vrot.slane %v5487_v62, 4 }
 0x9d9   :  { %v5829_v36 = vrot.slane %v5487_v62, 5  ;;  %v5893_v24 = vrot.slane %v5487_v62, 7  ;;  %v5731_v46 = vrot.slane %v5487_v62, 2  ;;  %v5863_v17 = vrot.slane %v5487_v62, 6 }
 0x9da   :  { %5601 = vrot.lane.b32.xlu1 %v5488_v15, %s9376_s20  ;;  %v5663_v21 = vrot.slane %v5488_v15, 7  ;;  %v5698_v8 = vsel %vm1795_vm13, %v5488_v15, %v5697_v45  ;;  %v5762_v37 = vrot.slane %v5488_v15, 2  ;;  %v5796_v22 = vrot.slane %v5488_v15, 3 }
 0x9db   :  { %v5444_v19 = vpop.permute.xlu0 %5443  ;;  %v5830_v14 = vrot.slane %v5488_v15, 4  ;;  %v5894_v58 = vrot.slane %v5488_v15, 6  ;;  %v5732_v31 = vrot.slane %v5488_v15, 1  ;;  %v5864_v28 = vrot.slane %v5488_v15, 5 }
 0x9dc   :  { %v5489_v52 = vmul.f32 %v11465_v11, %v5444_v19  ;;  %v5664_v40 = vsel %vm1795_vm13, %v5663_v21, %v5487_v62  ;;  %v5763_v0 = vsel %vm1795_vm13, %v5762_v37, %v5761_v63  ;;  %v5797_v55 = vsel %vm1795_vm13, %v5796_v22, %v5795_v61 }
 0x9dd   :  { %v5831_v6 = vsel %vm1795_vm13, %v5830_v14, %v5829_v36  ;;  %v5895_v23 = vsel %vm1795_vm13, %v5894_v58, %v5893_v24  ;;  %v5733_v45 = vsel %vm1795_vm13, %v5732_v31, %v5731_v46  ;;  %v5865_v39 = vsel %vm1795_vm13, %v5864_v28, %v5863_v17 }
 0x9de   :  { %5603 = vrot.lane.b32.xlu0 %v5489_v52, %s9376_s20  ;;  %v5665_v49 = vrot.slane %v5489_v52, 6  ;;  %v5699_v15 = vrot.slane %v5489_v52, 7  ;;  %v5764_v47 = vrot.slane %v5489_v52, 1  ;;  %v5798_v11 = vrot.slane %v5489_v52, 2 }
 0x9df   :  { %v5446_v19 = vpop.permute.xlu1 %5445  ;;  %v5832_v62 = vrot.slane %v5489_v52, 3  ;;  %v5896_v21 = vrot.slane %v5489_v52, 5  ;;  %v5734_v37 = vsel %vm1798_vm14, %v5489_v52, %v5733_v45  ;;  %v5866_v61 = vrot.slane %v5489_v52, 4 }
 0x9e0   :  { %v5490_v36 = vmul.f32 %v11472_v35, %v5446_v19  ;;  %v5666_v24 = vsel %vm1798_vm14, %v5665_v49, %v5664_v40  ;;  %v5700_v31 = vsel %vm1798_vm14, %v5699_v15, %v5698_v8  ;;  %v5765_v17 = vsel %vm1798_vm14, %v5764_v47, %v5763_v0 }
 0x9e1   :  { %v5799_v22 = vsel %vm1798_vm14, %v5798_v11, %v5797_v55  ;;  %v5833_v28 = vsel %vm1798_vm14, %v5832_v62, %v5831_v6  ;;  %v5897_v58 = vsel %vm1798_vm14, %v5896_v21, %v5895_v23  ;;  %v5867_v63 = vsel %vm1798_vm14, %v5866_v61, %v5865_v39 }
 0x9e2   :  { %5605 = vrot.lane.b32.xlu1 %v5490_v36, %s9376_s20  ;;  %v5667_v46 = vrot.slane %v5490_v36, 5  ;;  %v5701_v14 = vrot.slane %v5490_v36, 6  ;;  %v5766_v35 = vsel %vm1801_vm15, %v5490_v36, %v5765_v17  ;;  %v5800_v52 = vrot.slane %v5490_v36, 1 }
 0x9e3   :  { %v5834_v49 = vrot.slane %v5490_v36, 2  ;;  %v5898_v40 = vrot.slane %v5490_v36, 4  ;;  %v5735_v8 = vrot.slane %v5490_v36, 7  ;;  %v5868_v45 = vrot.slane %v5490_v36, 3 }
 0x9e4   :  { %v5668_v47 = vsel %vm1801_vm15, %v5667_v46, %v5666_v24  ;;  %v5702_v0 = vsel %vm1801_vm15, %v5701_v14, %v5700_v31  ;;  %v5801_v6 = vsel %vm1801_vm15, %v5800_v52, %v5799_v22 }
 0x9e5   :  { %v5835_v23 = vsel %vm1801_vm15, %v5834_v49, %v5833_v28  ;;  %v5899_v39 = vsel %vm1801_vm15, %v5898_v40, %v5897_v58  ;;  %v5736_v55 = vsel %vm1801_vm15, %v5735_v8, %v5734_v37  ;;  %v5869_v15 = vsel %vm1801_vm15, %v5868_v45, %v5867_v63 }
 0x9f7   :  { %v5448_v11 = vpop.permute.xlu0 %5447 }
 0x9f8   :  { %v5491_v19 = vmul.f32 %v11484_v12, %v5448_v11 }
 0x9fa   :  { %5607 = vrot.lane.b32.xlu0 %v5491_v19, %s9376_s20  ;;  %v5669_v62 = vrot.slane %v5491_v19, 4  ;;  %v5703_v21 = vrot.slane %v5491_v19, 5  ;;  %v5767_v61 = vrot.slane %v5491_v19, 7  ;;  %v5802_v36 = vsel %vm1804_vm1, %v5491_v19, %v5801_v6 }
 0x9fb   :  { %v5450_v24 = vpop.permute.xlu1 %5449  ;;  %v5836_v31 = vrot.slane %v5491_v19, 1  ;;  %v5900_v17 = vrot.slane %v5491_v19, 3  ;;  %v5737_v22 = vrot.slane %v5491_v19, 6  ;;  %v5870_v28 = vrot.slane %v5491_v19, 2 }
 0x9fc   :  { %v5492_v58 = vmul.f32 %v11489_v60, %v5450_v24  ;;  %v5670_v37 = vsel %vm1804_vm1, %v5669_v62, %v5668_v47  ;;  %v5704_v63 = vsel %vm1804_vm1, %v5703_v21, %v5702_v0  ;;  %v5768_v12 = vsel %vm1804_vm1, %v5767_v61, %v5766_v35 }
 0x9fd   :  { %v5837_v46 = vsel %vm1804_vm1, %v5836_v31, %v5835_v23  ;;  %v5901_v14 = vsel %vm1804_vm1, %v5900_v17, %v5899_v39  ;;  %v5738_v52 = vsel %vm1804_vm1, %v5737_v22, %v5736_v55  ;;  %v5871_v0 = vsel %vm1804_vm1, %v5870_v28, %v5869_v15 }
 0x9fe   :  { %5609 = vrot.lane.b32.xlu1 %v5492_v58, %s9376_s20  ;;  %v5671_v49 = vrot.slane %v5492_v58, 3  ;;  %v5705_v40 = vrot.slane %v5492_v58, 4  ;;  %v5769_v8 = vrot.slane %v5492_v58, 6  ;;  %v5803_v45 = vrot.slane %v5492_v58, 7 }
 0x9ff   :  { %v5452_v6 = vpop.permute.xlu0 %5451  ;;  %v5838_v60 = vsel %vm13141_vm12, %v5492_v58, %v5837_v46  ;;  %v5902_v47 = vrot.slane %v5492_v58, 2  ;;  %v5739_v11 = vrot.slane %v5492_v58, 5  ;;  %v5872_v61 = vrot.slane %v5492_v58, 1 }
 0xa00   :  { %v5493_v35 = vmul.f32 %v11494_v7, %v5452_v6  ;;  %v5672_v23 = vsel %vm13142_vm11, %v5671_v49, %v5670_v37  ;;  %v5706_v39 = vsel %vm13143_vm7, %v5705_v40, %v5704_v63  ;;  %v5770_v55 = vsel %vm13144_vm6, %v5769_v8, %v5768_v12 }
 0xa01   :  { %v5804_v19 = vsel %vm13145_vm9, %v5803_v45, %v5802_v36  ;;  %v5903_v62 = vsel %vm13146_vm0, %v5902_v47, %v5901_v14  ;;  %v5740_v21 = vsel %vm13147_vm2, %v5739_v11, %v5738_v52  ;;  %v5873_v63 = vsel %vm13148_vm3, %v5872_v61, %v5871_v0 }
 0xa02   :  { %5611 = vrot.lane.b32.xlu0 %v5493_v35, %s9376_s20  ;;  %v5673_v24 = vrot.slane %v5493_v35, 2  ;;  %v5707_v31 = vrot.slane %v5493_v35, 3  ;;  %v5771_v15 = vrot.slane %v5493_v35, 5  ;;  %v5805_v17 = vrot.slane %v5493_v35, 6 }
 0xa03   :  { %v5454_v7 = vpop.permute.xlu1 %5453  ;;  %v5839_v22 = vrot.slane %v5493_v35, 7  ;;  %v5904_v28 = vrot.slane %v5493_v35, 1  ;;  %v5741_v37 = vrot.slane %v5493_v35, 4  ;;  %vm13149_vm12 = vcmask 1046534  }
 0xa04   :  { %v5494_v12 = vmul.f32 %v11502_v44, %v5454_v7  ;;  %v5674_v36 = vsel %vm13149_vm12, %v5673_v24, %v5672_v23  ;;  %vm13150_vm11 = vmmov %vm13149_vm12  ;;  %vm13155_vm2 = vcmask 1047559  }
 0xa05   :  { %v5708_v46 = vsel %vm13150_vm11, %v5707_v31, %v5706_v39  ;;  %vm13151_vm7 = vmmov %vm13150_vm11 }
 0xa06   :  { %v5772_v58 = vsel %vm13151_vm7, %v5771_v15, %v5770_v55  ;;  %vm13152_vm6 = vmmov %vm13151_vm7  ;;  %5613 = vrot.lane.b32.xlu1 %v5494_v12, %s9376_s20  ;;  %v5675_v40 = vrot.slane %v5494_v12, 1  ;;  %v5709_v8 = vrot.slane %v5494_v12, 2  ;;  %v5773_v45 = vrot.slane %v5494_v12, 4 }
 0xa07   :  { %v5806_v14 = vsel %vm13152_vm6, %v5805_v17, %v5804_v19  ;;  %vm13153_vm9 = vmmov %vm13152_vm6  ;;  %v5807_v6 = vrot.slane %v5494_v12, 5  ;;  %v5841_v47 = vrot.slane %v5494_v12, 6  ;;  %v5743_v0 = vrot.slane %v5494_v12, 3 }
 0xa08   :  { %v5840_v52 = vsel %vm13153_vm9, %v5839_v22, %v5838_v60  ;;  %vm13154_vm0 = vmmov %vm13152_vm6  ;;  %v5875_v61 = vrot.slane %v5494_v12, 7 }
 0xa09   :  { %v5905_v49 = vsel %vm13154_vm0, %v5904_v28, %v5903_v62  ;;  %vm13156_vm3 = vmmov %vm13154_vm0 }
 0xa0a   :  { %v11699_v44 = vsel %vm13155_vm2, %v5494_v12, %v5905_v49  ;;  %v5742_v11 = vsel %vm13156_vm3, %v5741_v37, %v5740_v21  ;;  %vm13157_vm12 = vmmov %vm13155_vm2 }
 0xa0b   :  { %v11703_v23 = vsel %vm13157_vm12, %v5675_v40, %v5674_v36  ;;  %vm13158_vm11 = vmmov %vm13155_vm2  ;;  %vm13166_vm12 = vcmask 1045509  }
 0xa0c   :  { %v11706_v60 = vsel %vm13158_vm11, %v5709_v8, %v5708_v46  ;;  %vm13159_vm7 = vmmov %vm13155_vm2 }
 0xa0d   :  { %v11709_v39 = vsel %vm13159_vm7, %v5773_v45, %v5772_v58  ;;  %vm13160_vm6 = vmmov %vm13155_vm2 }
 0xa0e   :  { %v11712_v55 = vsel %vm13160_vm6, %v5807_v6, %v5806_v14  ;;  %vm13161_vm9 = vmmov %vm13155_vm2 }
 0xa0f   :  { %v11715_v19 = vsel %vm13161_vm9, %v5841_v47, %v5840_v52  ;;  %vm13162_vm0 = vmmov %vm13155_vm2 }
 0xa10   :  { %v11718_v62 = vsel %vm13162_vm0, %v5743_v0, %v5742_v11  ;;  %vm13163_vm2 = vmmov %vm13156_vm3 }
 0xa11   :  { %v5874_v21 = vsel %vm13163_vm2, %v5493_v35, %v5873_v63  ;;  %vm13164_vm3 = vmmov %vm13162_vm0 }
 0xa12   :  { %v11722_v24 = vsel %vm13164_vm3, %v5875_v61, %v5874_v21  ;;  %vm13167_vm11 = vmmov %vm13166_vm12 }
 0xa13   :  { %13165 = vst [vmem:[#allocation33_spill] sm:$0xff] %v11722_v24  ;;  %vm13168_vm7 = vmmov %vm13167_vm11 }
 0xa14   :  { %vm13169_vm6 = vmmov %vm13168_vm7 }
 0xa15   :  { %v5456_v31 = vpop.permute.xlu0 %5455  ;;  %vm13170_vm9 = vmmov %vm13169_vm6 }
 0xa16   :  { %v5495_v15 = vmul.f32 %v11511_v9, %v5456_v31  ;;  %vm13171_vm0 = vmmov %vm13169_vm6 }
 0xa17   :  { %v5458_v17 = vpop.permute.xlu1 %5457  ;;  %vm13172_vm2 = vmmov %vm13171_vm0 }
 0xa18   :  { %5615 = vrot.lane.b32.xlu0 %v5495_v15, %s9376_s20  ;;  %v5711_v7 = vrot.slane %v5495_v15, 1  ;;  %v5496_v22 = vmul.f32 %v11515_v38, %v5458_v17  ;;  %v5775_v28 = vrot.slane %v5495_v15, 3  ;;  %v5809_v37 = vrot.slane %v5495_v15, 4  ;;  %vm13173_vm3 = vmmov %vm13171_vm0 }
 0xa19   :  { %v5843_v36 = vrot.slane %v5495_v15, 5  ;;  %v5907_v46 = vrot.slane %v5495_v15, 7  ;;  %v5745_v58 = vrot.slane %v5495_v15, 2  ;;  %v5877_v14 = vrot.slane %v5495_v15, 6 }
 0xa1a   :  { %5617 = vrot.lane.b32.xlu1 %v5496_v22, %s9376_s20  ;;  %v5677_v35 = vrot.slane %v5496_v22, 7  ;;  %v5712_v63 = vsel %vm1795_vm13, %v5496_v22, %v5711_v7  ;;  %v5776_v12 = vrot.slane %v5496_v22, 2  ;;  %v5810_v9 = vrot.slane %v5496_v22, 3 }
 0xa1b   :  { %v5460_v52 = vpop.permute.xlu0 %5459  ;;  %v5844_v49 = vrot.slane %v5496_v22, 4  ;;  %v5908_v40 = vrot.slane %v5496_v22, 6  ;;  %v5746_v8 = vrot.slane %v5496_v22, 1  ;;  %v5878_v47 = vrot.slane %v5496_v22, 5 }
 0xa1c   :  { %v5497_v45 = vmul.f32 %v11522_v50, %v5460_v52  ;;  %v5678_v38 = vsel %vm1795_vm13, %v5677_v35, %v5495_v15  ;;  %v5777_v6 = vsel %vm1795_vm13, %v5776_v12, %v5775_v28  ;;  %v5811_v11 = vsel %vm1795_vm13, %v5810_v9, %v5809_v37 }
 0xa1d   :  { %v5845_v0 = vsel %vm1795_vm13, %v5844_v49, %v5843_v36  ;;  %v5909_v21 = vsel %vm1795_vm13, %v5908_v40, %v5907_v46  ;;  %v5747_v61 = vsel %vm1795_vm13, %v5746_v8, %v5745_v58  ;;  %v5879_v22 = vsel %vm1795_vm13, %v5878_v47, %v5877_v14 }
 0xa1e   :  { %5619 = vrot.lane.b32.xlu0 %v5497_v45, %s9376_s20  ;;  %v5679_v31 = vrot.slane %v5497_v45, 6  ;;  %v5713_v17 = vrot.slane %v5497_v45, 7  ;;  %v5778_v7 = vrot.slane %v5497_v45, 1  ;;  %v5812_v24 = vrot.slane %v5497_v45, 2 }
 0xa1f   :  { %v5462_v50 = vpop.permute.xlu1 %5461  ;;  %v5846_v52 = vrot.slane %v5497_v45, 3  ;;  %v5910_v15 = vrot.slane %v5497_v45, 5  ;;  %v5748_v28 = vsel %vm1798_vm14, %v5497_v45, %v5747_v61  ;;  %v5880_v49 = vrot.slane %v5497_v45, 4 }
 0xa20   :  { %v5498_v37 = vmul.f32 %v11528_v25, %v5462_v50  ;;  %v5680_v36 = vsel %vm1798_vm14, %v5679_v31, %v5678_v38  ;;  %v5714_v46 = vsel %vm1798_vm14, %v5713_v17, %v5712_v63  ;;  %v5779_v58 = vsel %vm1798_vm14, %v5778_v7, %v5777_v6 }
 0xa21   :  { %v5813_v35 = vsel %vm1798_vm14, %v5812_v24, %v5811_v11  ;;  %v5847_v12 = vsel %vm1798_vm14, %v5846_v52, %v5845_v0  ;;  %v5911_v9 = vsel %vm1798_vm14, %v5910_v15, %v5909_v21  ;;  %v5881_v63 = vsel %vm1798_vm14, %v5880_v49, %v5879_v22 }
 0xa22   :  { %5621 = vrot.lane.b32.xlu1 %v5498_v37, %s9376_s20  ;;  %v5681_v40 = vrot.slane %v5498_v37, 5  ;;  %v5715_v8 = vrot.slane %v5498_v37, 6  ;;  %v5780_v14 = vsel %vm1801_vm15, %v5498_v37, %v5779_v58  ;;  %v5814_v25 = vrot.slane %v5498_v37, 1 }
 0xa23   :  { %v5848_v47 = vrot.slane %v5498_v37, 2  ;;  %v5912_v38 = vrot.slane %v5498_v37, 4  ;;  %v5749_v61 = vrot.slane %v5498_v37, 7  ;;  %v5882_v0 = vrot.slane %v5498_v37, 3 }
 0xa24   :  { %v5682_v6 = vsel %vm1801_vm15, %v5681_v40, %v5680_v36  ;;  %v5716_v24 = vsel %vm1801_vm15, %v5715_v8, %v5714_v46  ;;  %v5815_v11 = vsel %vm1801_vm15, %v5814_v25, %v5813_v35 }
 0xa25   :  { %v5849_v45 = vsel %vm1801_vm15, %v5848_v47, %v5847_v12  ;;  %v5913_v21 = vsel %vm1801_vm15, %v5912_v38, %v5911_v9  ;;  %v5750_v31 = vsel %vm1801_vm15, %v5749_v61, %v5748_v28  ;;  %v5883_v17 = vsel %vm1801_vm15, %v5882_v0, %v5881_v63 }
 0xa31   :  { %v5464_v7 = vpop.permute.xlu0 %5463 }
 0xa32   :  { %v5499_v50 = vmul.f32 %v11540_v42, %v5464_v7 }
 0xa34   :  { %5623 = vrot.lane.b32.xlu0 %v5499_v50, %s9376_s20  ;;  %v5683_v52 = vrot.slane %v5499_v50, 4  ;;  %v5717_v15 = vrot.slane %v5499_v50, 5  ;;  %v5781_v22 = vrot.slane %v5499_v50, 7  ;;  %v5816_v36 = vsel %vm1804_vm1, %v5499_v50, %v5815_v11 }
 0xa35   :  { %v5466_v46 = vpop.permute.xlu1 %5465  ;;  %v5850_v37 = vrot.slane %v5499_v50, 1  ;;  %v5914_v58 = vrot.slane %v5499_v50, 3  ;;  %v5751_v35 = vrot.slane %v5499_v50, 6  ;;  %v5884_v12 = vrot.slane %v5499_v50, 2 }
 0xa36   :  { %v5500_v9 = vmul.f32 %v11544_v18, %v5466_v46  ;;  %v5684_v28 = vsel %vm1804_vm1, %v5683_v52, %v5682_v6  ;;  %v5718_v49 = vsel %vm1804_vm1, %v5717_v15, %v5716_v24  ;;  %v5782_v42 = vsel %vm1804_vm1, %v5781_v22, %v5780_v14 }
 0xa37   :  { %v5851_v40 = vsel %vm1804_vm1, %v5850_v37, %v5849_v45  ;;  %v5915_v8 = vsel %vm1804_vm1, %v5914_v58, %v5913_v21  ;;  %v5752_v25 = vsel %vm1804_vm1, %v5751_v35, %v5750_v31  ;;  %v5885_v47 = vsel %vm1804_vm1, %v5884_v12, %v5883_v17  ;;  %v8806_v12 = vld [vmem:[%s12937_s1 + $0x40] sm:$0xff]  }
 0xa38   :  { %5625 = vrot.lane.b32.xlu1 %v5500_v9, %s9376_s20  ;;  %v5685_v38 = vrot.slane %v5500_v9, 3  ;;  %v5719_v61 = vrot.slane %v5500_v9, 4  ;;  %v5783_v63 = vrot.slane %v5500_v9, 6  ;;  %v5817_v18 = vrot.slane %v5500_v9, 7  ;;  %8511 = vmatprep.subr.bf16.mxu1 %v8806_v12 }
 0xa39   :  { %v5852_v6 = vsel %vm13166_vm12, %v5500_v9, %v5851_v40  ;;  %v5916_v11 = vrot.slane %v5500_v9, 2  ;;  %v5753_v24 = vrot.slane %v5500_v9, 5  ;;  %v5886_v0 = vrot.slane %v5500_v9, 1 }
 0xa3a   :  { %v5468_v14 = vpop.permute.xlu0 %5467  ;;  %v5686_v45 = vsel %vm13167_vm11, %v5685_v38, %v5684_v28  ;;  %v5720_v21 = vsel %vm13168_vm7, %v5719_v61, %v5718_v49  ;;  %v5784_v31 = vsel %vm13169_vm6, %v5783_v63, %v5782_v42  ;;  %v5818_v17 = vsel %vm13170_vm9, %v5817_v18, %v5816_v36 }
 0xa3b   :  { %v5501_v7 = vmul.f32 %v11548_v57, %v5468_v14  ;;  %v5917_v50 = vsel %vm13171_vm0, %v5916_v11, %v5915_v8  ;;  %v5754_v52 = vsel %vm13172_vm2, %v5753_v24, %v5752_v25  ;;  %v5887_v15 = vsel %vm13173_vm3, %v5886_v0, %v5885_v47  ;;  %v8807_v57 = vld [vmem:[%s12937_s1] sm:$0xff]   ;;  %v8808_v0 = vld [vmem:[%s12937_s1 + $0x48] sm:$0xff]  }
 0xa3c   :  { %vm13174_vm12 = vcmask 1046534   ;;  %8512 = vmatpush3.bf16.msra.mxu1 %v8807_v57  ;;  %v8809_v14 = vld [vmem:[%s12937_s1 + $0x8] sm:$0xff]  }
 0xa3d   :  { %5627 = vrot.lane.b32.xlu0 %v5501_v7, %s9376_s20  ;;  %v5687_v22 = vrot.slane %v5501_v7, 2  ;;  %v5721_v46 = vrot.slane %v5501_v7, 3  ;;  %v5785_v37 = vrot.slane %v5501_v7, 5  ;;  %v5819_v58 = vrot.slane %v5501_v7, 6  ;;  %vm13175_vm11 = vmmov %vm13174_vm12  ;;  %8513 = vmatprep.subr.bf16.mxu1 %v8808_v0 }
 0xa3e   :  { %v5470_v35 = vpop.permute.xlu1 %5469  ;;  %v5853_v36 = vrot.slane %v5501_v7, 7  ;;  %v5918_v9 = vrot.slane %v5501_v7, 1  ;;  %v5755_v28 = vrot.slane %v5501_v7, 4  ;;  %v5888_v49 = vsel %vm13174_vm12, %v5501_v7, %v5887_v15  ;;  %vm13176_vm7 = vmmov %vm13175_vm11 }
 0xa3f   :  { %v5502_v42 = vmul.f32 %v11551_v48, %v5470_v35  ;;  %v5688_v40 = vsel %vm13175_vm11, %v5687_v22, %v5686_v45  ;;  %v5722_v8 = vsel %vm13176_vm7, %v5721_v46, %v5720_v21  ;;  %vm13177_vm6 = vmmov %vm13176_vm7  ;;  %vm13182_vm12 = vcmask 1047559   ;;  %v8811_v35 = vld [vmem:[%s12937_s1 + $0x10] sm:$0xff]  }
 0xa40   :  { %v5786_v25 = vsel %vm13177_vm6, %v5785_v37, %v5784_v31  ;;  %vm13178_vm9 = vmmov %vm13177_vm6  ;;  %v8263_v37 = vld [vmem:[%s12936_s0 + $0xc0] sm:$0xff]   ;;  %8514 = vmatpush3.bf16.msra.mxu1 %v8809_v14 }
 0xa41   :  { %v5820_v47 = vsel %vm13178_vm9, %v5819_v58, %v5818_v17  ;;  %vm13179_vm0 = vmmov %vm13177_vm6  ;;  %5629 = vrot.lane.b32.xlu1 %v5502_v42, %s9376_s20  ;;  %v5689_v18 = vrot.slane %v5502_v42, 1  ;;  %v5723_v48 = vrot.slane %v5502_v42, 2  ;;  %v5787_v11 = vrot.slane %v5502_v42, 4  ;;  %v8810_v58 = vld [vmem:[%s12937_s1 + $0x50] sm:$0xff]  }
 0xa42   :  { %v5854_v38 = vsel %vm13179_vm0, %v5853_v36, %v5852_v6  ;;  %vm13180_vm2 = vmmov %vm13179_vm0  ;;  %v5821_v24 = vrot.slane %v5502_v42, 5  ;;  %v5855_v6 = vrot.slane %v5502_v42, 6  ;;  %v5757_v21 = vrot.slane %v5502_v42, 3  ;;  %8515 = vmatprep.subr.bf16.mxu1 %v8810_v58 }
 0xa43   :  { %v5919_v61 = vsel %vm13180_vm2, %v5918_v9, %v5917_v50  ;;  %vm13181_vm3 = vmmov %vm13179_vm0  ;;  %v5889_v31 = vrot.slane %v5502_v42, 7  ;;  %v8210_v12 = vunpack.c.l.bf16 %v8263_v37  ;;  %v8211_v36 = vunpack.c.h.bf16 %v8263_v37  ;;  %v8264_v9 = vld [vmem:[%s12936_s0 + $0xc8] sm:$0xff]  }
 0xa44   :  { %v5756_v63 = vsel %vm13181_vm3, %v5755_v28, %v5754_v52  ;;  %v11801_v45 = vsel %vm13182_vm12, %v5502_v42, %v5919_v61  ;;  %vm13183_vm11 = vmmov %vm13182_vm12  ;;  %8516 = vmatpush3.bf16.msra.mxu1 %v8811_v35  ;;  %vm13190_vm12 = vcmask 293920   ;;  %v8812_v28 = vld [vmem:[%s12937_s1 + $0x58] sm:$0xff]   ;;  %v5992_v61 = vld [vmem:[#allocation2] sm:$0xff] }
 0xa45   :  { %v11804_v17 = vsel %vm13183_vm11, %v5689_v18, %v5688_v40  ;;  %vm13184_vm7 = vmmov %vm13183_vm11  ;;  %vm13191_vm11 = vcmask 31744   ;;  %8517 = vmatprep.subr.bf16.mxu1 %v8812_v28  ;;  %v8214_v40 = vunpack.c.l.bf16 %v8264_v9  ;;  %v8820_v28 = vld [vmem:[%s12937_s1 + $0x30] sm:$0xff]  }
 0xa46   :  { %v11807_v7 = vsel %vm13184_vm7, %v5723_v48, %v5722_v8  ;;  %vm13185_vm6 = vmmov %vm13184_vm7  ;;  %v8814_v8 = vld [vmem:[%s12937_s1 + $0x60] sm:$0xff]  }
 0xa47   :  { %v11810_v50 = vsel %vm13185_vm6, %v5787_v11, %v5786_v25  ;;  %vm13186_vm9 = vmmov %vm13185_vm6  ;;  %v8815_v25 = vld [vmem:[%s12937_s1 + $0x20] sm:$0xff]  }
 0xa48   :  { %v11813_v52 = vsel %vm13186_vm9, %v5821_v24, %v5820_v47  ;;  %vm13187_vm0 = vmmov %vm13185_vm6  ;;  %v8215_v24 = vunpack.c.h.bf16 %v8264_v9  ;;  %v8819_v9 = vld [vmem:[%s12937_s1 + $0x70] sm:$0xff]  }
 0xa49   :  { %v11816_v15 = vsel %vm13187_vm0, %v5855_v6, %v5854_v38  ;;  %vm13188_vm2 = vmmov %vm13187_vm0  ;;  %v6024_v38 = vld [vmem:[#allocation2 + $0x1] sm:$0xff] }
 0xa4a   :  { %v11819_v22 = vsel %vm13188_vm2, %v5757_v21, %v5756_v63  ;;  %vm13189_vm3 = vmmov %vm13187_vm0  ;;  %v5600_v57 = vpop.permute.xlu0 %5599  ;;  %v6088_v63 = vld [vmem:[#allocation2 + $0x2] sm:$0xff] }
 0xa4b   :  { %v11822_v46 = vsel %vm13189_vm3, %v5889_v31, %v5888_v49  ;;  %5647 = vst.msk [vmem:[#allocation2 + $0x11] sm:$0xff] %vm13190_vm12, %v5600_v57  ;;  %v8813_v49 = vld [vmem:[%s12937_s1 + $0x18] sm:$0xff]   ;;  %vm13192_vm7 = vmmov %vm13190_vm12  ;;  %v8816_v6 = vld [vmem:[%s12937_s1 + $0x68] sm:$0xff]   ;;  %vm13197_vm3 = vcmask 293888  }
 0xa4c   :  { %5976 = vst.msk [vmem:[#allocation2 + $0x11] sm:$0xff] %vm13191_vm11, %v8210_v12  ;;  %v5602_v42 = vpop.permute.xlu1 %5601  ;;  %vm13193_vm6 = vmmov %vm13191_vm11  ;;  %8518 = vmatpush3.bf16.msra.mxu1 %v8813_v49  ;;  %v8817_v21 = vld [vmem:[%s12937_s1 + $0x28] sm:$0xff]   ;;  %v8818_v31 = vld [vmem:[%s12937_s1 + $0x80] sm:$0xff]  }
 0xa4d   :  { %5648 = vst.msk [vmem:[#allocation2 + $0x21] sm:$0xff] %vm13192_vm7, %v5602_v42  ;;  %8519 = vmatprep.subr.bf16.mxu1 %v8814_v8  ;;  %vm13194_vm9 = vmmov %vm13192_vm7  ;;  %8687 = vmatprep.subr.bf16.mxu0 %v8818_v31  ;;  %v8821_v49 = vld [vmem:[%s12937_s1 + $0x88] sm:$0xff]  }
 0xa4e   :  { %5977 = vst.msk [vmem:[#allocation2 + $0x21] sm:$0xff] %vm13193_vm6, %v8211_v36  ;;  %vm13195_vm0 = vmmov %vm13193_vm6  ;;  %8688 = vmatpush3.bf16.msra.mxu0 %v8818_v31  ;;  %v8826_v31 = vld [vmem:[%s12937_s1 + $0xa0] sm:$0xff]  }
 0xa4f   :  { %vm13196_vm2 = vmmov %vm13192_vm7  ;;  %8689 = vmatprep.subr.bf16.mxu0 %v8821_v49 }
 0xa50   :  { %v5604_v47 = vpop.permute.xlu0 %5603  ;;  %8520 = vmatpush3.bf16.msra.mxu1 %v8815_v25  ;;  %vm13198_vm12 = vmmov %vm13195_vm0 }
 0xa51   :  { %5649 = vst.msk [vmem:[#allocation2 + $0x31] sm:$0xff] %vm13194_vm9, %v5604_v47  ;;  %8521 = vmatprep.subr.bf16.mxu1 %v8816_v6  ;;  %vm13199_vm11 = vmmov %vm13197_vm3 }
 0xa52   :  { %5978 = vst.msk [vmem:[#allocation2 + $0x31] sm:$0xff] %vm13195_vm0, %v8214_v40  ;;  %8690 = vmatpush3.bf16.msra.mxu0 %v8821_v49  ;;  %vm13200_vm7 = vmmov %vm13196_vm2 }
 0xa53   :  { %v6152_v18 = vld [vmem:[#allocation2 + $0x10] sm:$0xff]  ;;  %vm13201_vm6 = vmmov %vm13195_vm0 }
 0xa54   :  { %v6025_v48 = vld [vmem:[#allocation2 + $0x11] sm:$0xff]  ;;  %v6008_v14 = vpack.c.bf16 %v6152_v18, %v5992_v61  ;;  %v5606_v37 = vpop.permute.xlu1 %5605  ;;  %8522 = vmatpush3.bf16.msra.mxu1 %v8817_v21  ;;  %vm13202_vm9 = vmmov %vm13196_vm2 }
 0xa55   :  { %v6288_v11 = vld [vmem:[#allocation2 + $0x12] sm:$0xff]  ;;  %v6040_v0 = vpack.c.bf16 %v6025_v48, %v6024_v38  ;;  %5650 = vst.msk [vmem:[#allocation2 + $0x41] sm:$0xff] %vm13196_vm2, %v5606_v37  ;;  %v6153_v58 = vld [vmem:[#allocation2 + $0x20] sm:$0xff]  ;;  %8523 = vmatprep.subr.bf16.mxu1 %v8819_v9 }
 0xa56   :  { %v6289_v35 = vld [vmem:[#allocation2 + $0x22] sm:$0xff]  ;;  %v6104_v12 = vpack.c.bf16 %v6288_v11, %v6088_v63  ;;  %6016 = vst.msk [vmem:[#allocation3] sm:$0xff] %vm13197_vm3, %v6008_v14  ;;  %v6168_v57 = vpack.c.bf16 %v6153_v58, %v6152_v18  ;;  %v8822_v38 = vld [vmem:[%s12937_s1 + $0x78] sm:$0xff]   ;;  %v8824_v63 = vld [vmem:[%s12937_s1 + $0x90] sm:$0xff]  }
 0xa57   :  { %6056 = vrot.lane.b32.xlu1 %v6040_v0, %s9370_s11  ;;  %v6225_v36 = vld [vmem:[#allocation2 + $0x21] sm:$0xff]  ;;  %5979 = vst.msk [vmem:[#allocation2 + $0x41] sm:$0xff] %vm13198_vm12, %v8215_v24  ;;  %v6304_v42 = vpack.c.bf16 %v6289_v35, %v6288_v11  ;;  %v8823_v61 = vld [vmem:[%s12937_s1 + $0x38] sm:$0xff]   ;;  %8691 = vmatprep.subr.bf16.mxu0 %v8824_v63  ;;  %v8265_v21 = vld [vmem:[%s12936_s0 + $0xd0] sm:$0xff]  }
 0xa58   :  { %6184 = vrot.lane.b32.xlu0 %v6168_v57, %s9369_s10  ;;  %v6240_v40 = vpack.c.bf16 %v6225_v36, %v6025_v48  ;;  %8524 = vmatpush3.bf16.msra.mxu1 %v8820_v28  ;;  %v8825_v0 = vld [vmem:[%s12937_s1 + $0x98] sm:$0xff]   ;;  %vm13203_vm3 = vmmov %vm13195_vm0 }
 0xa59   :  { %v6353_v8 = vld [vmem:[#allocation2 + $0x30] sm:$0xff]  ;;  %8525 = vmatprep.subr.bf16.mxu1 %v8822_v38  ;;  %8692 = vmatpush3.bf16.msra.mxu0 %v8824_v63  ;;  %v8266_v28 = vld [vmem:[%s12936_s0 + $0xd8] sm:$0xff]   ;;  %vm13204_vm12 = vmmov %vm13196_vm2 }
 0xa5a   :  { %v6368_v25 = vpack.c.bf16 %v6353_v8, %v6153_v58  ;;  %v6489_v47 = vld [vmem:[#allocation2 + $0x32] sm:$0xff]  ;;  %8693 = vmatprep.subr.bf16.mxu0 %v8825_v0  ;;  %v8218_v58 = vunpack.c.l.bf16 %v8265_v21 }
 0xa5b   :  { %6120 = vrot.lane.b32.xlu1 %v6104_v12, %s9372_s13  ;;  %v6417_v18 = vld [vmem:[#allocation2 + $0x31] sm:$0xff]  ;;  %v6504_v48 = vpack.c.bf16 %v6489_v47, %v6289_v35  ;;  %v8827_v35 = vld [vmem:[%s12937_s1 + $0xa8] sm:$0xff]  }
 0xa5c   :  { %6320 = vrot.lane.b32.xlu0 %v6304_v42, %s9368_s9  ;;  %6017 = vst.msk [vmem:[#allocation3 + $0x18] sm:$0xff] %vm13199_vm11, %v6368_v25  ;;  %8526 = vmatpush3.bf16.msra.mxu1 %v8823_v61  ;;  %v6432_v24 = vpack.c.bf16 %v6417_v18, %v6225_v36  ;;  %v8219_v36 = vunpack.c.h.bf16 %v8265_v21  ;;  %v8828_v42 = vld [vmem:[%s12937_s1 + $0xb0] sm:$0xff]  }
 0xa5d   :  { %8694 = vmatpush3.bf16.msra.mxu0 %v8825_v0 }
 0xa5e   :  { %v6155_v11 = vld [vmem:[#allocation2 + $0x40] sm:$0xff]  ;;  %8695 = vmatprep.subr.bf16.mxu0 %v8826_v31 }
 0xa5f   :  { %6256 = vrot.lane.b32.xlu1 %v6240_v40, %s9371_s12  ;;  %v6169_v14 = vpack.c.bf16 %v6155_v11, %v6353_v8  ;;  %v6291_v6 = vld [vmem:[#allocation2 + $0x42] sm:$0xff]  ;;  %v8222_v40 = vunpack.c.l.bf16 %v8266_v28  ;;  %v8829_v8 = vld [vmem:[%s12937_s1 + $0xb8] sm:$0xff]  }
 0xa60   :  { %6384 = vrot.lane.b32.xlu0 %v6368_v25, %s9373_s14  ;;  %v6305_v37 = vpack.c.bf16 %v6291_v6, %v6489_v47  ;;  %v6227_v57 = vld [vmem:[#allocation2 + $0x41] sm:$0xff] }
 0xa61   :  { %8696 = vmatpush3.bf16.msra.mxu0 %v8826_v31  ;;  %v6241_v9 = vpack.c.bf16 %v6227_v57, %v6417_v18  ;;  %v5996_v47 = vld [vmem:[#allocation2 + $0x40] sm:$0xff] }
 0xa62   :  { %8697 = vmatprep.subr.bf16.mxu0 %v8827_v35 }
 0xa63   :  { %6520 = vrot.lane.b32.xlu1 %v6504_v48, %s9375_s7 }
 0xa64   :  { %6448 = vrot.lane.b32.xlu0 %v6432_v24, %s9374_s17 }
 0xa65   :  { %8698 = vmatpush3.bf16.msra.mxu0 %v8827_v35 }
 0xa66   :  { %8699 = vmatprep.subr.bf16.mxu0 %v8828_v42 }
 0xa67   :  { %6186 = vrot.lane.b32.xlu1 %v6169_v14, %s9369_s10 }
 0xa68   :  { %6058 = vrot.lane.b32.xlu0 %v6432_v24, %s9370_s11  ;;  %v8223_v24 = vunpack.c.h.bf16 %v8266_v28 }
 0xa69   :  { %8700 = vmatpush3.bf16.msra.mxu0 %v8828_v42 }
 0xa6a   :  { %8701 = vmatprep.subr.bf16.mxu0 %v8829_v8 }
 0xa6b   :  { %6322 = vrot.lane.b32.xlu1 %v6305_v37, %s9368_s9 }
 0xa6c   :  { %v5608_v12 = vpop.permute.xlu0 %5607  ;;  %6122 = vrot.lane.b32.xlu0 %v6504_v48, %s9372_s13 }
 0xa6d   :  { %5651 = vst.msk [vmem:[#allocation2 + $0x51] sm:$0xff] %vm13200_vm7, %v5608_v12  ;;  %8702 = vmatpush3.bf16.msra.mxu0 %v8829_v8  ;;  %vm13205_vm7 = vmmov %vm13195_vm0 }
 0xa6e   :  { %5980 = vst.msk [vmem:[#allocation2 + $0x51] sm:$0xff] %vm13201_vm6, %v8218_v58  ;;  %vm13206_vm6 = vmmov %vm13199_vm11 }
 0xa70   :  { %v5610_v49 = vpop.permute.xlu1 %5609  ;;  %6258 = vrot.lane.b32.xlu0 %v6241_v9, %s9371_s12 }
 0xa71   :  { %5652 = vst.msk [vmem:[#allocation2 + $0x61] sm:$0xff] %vm13202_vm9, %v5610_v49  ;;  %vm13207_vm9 = vmmov %vm13196_vm2 }
 0xa72   :  { %5981 = vst.msk [vmem:[#allocation2 + $0x61] sm:$0xff] %vm13195_vm0, %v8219_v36 }
 0xa74   :  { %v5612_v25 = vpop.permute.xlu0 %5611 }
 0xa75   :  { %5653 = vst.msk [vmem:[#allocation2 + $0x71] sm:$0xff] %vm13196_vm2, %v5612_v25  ;;  %v6491_v38 = vld [vmem:[#allocation2 + $0x52] sm:$0xff]  ;;  %v8267_v25 = vld [vmem:[%s12936_s0 + $0xe0] sm:$0xff]  }
 0xa76   :  { %v6355_v61 = vld [vmem:[#allocation2 + $0x50] sm:$0xff]  ;;  %v6505_v18 = vpack.c.bf16 %v6491_v38, %v6291_v6  ;;  %5982 = vst.msk [vmem:[#allocation2 + $0x71] sm:$0xff] %vm13203_vm3, %v8222_v40  ;;  %vm13208_vm3 = vmmov %vm13195_vm0 }
 0xa77   :  { %v6419_v63 = vld [vmem:[#allocation2 + $0x51] sm:$0xff]  ;;  %v6369_v48 = vpack.c.bf16 %v6355_v61, %v6155_v11 }
 0xa78   :  { %v5997_v0 = vld [vmem:[#allocation2 + $0x50] sm:$0xff]  ;;  %v5614_v21 = vpop.permute.xlu1 %5613  ;;  %6522 = vrot.lane.b32.xlu0 %v6505_v18, %s9375_s7  ;;  %v6433_v31 = vpack.c.bf16 %v6419_v63, %v6227_v57 }
 0xa79   :  { %v6010_v14 = vpack.c.bf16 %v5997_v0, %v5996_v47  ;;  %6386 = vrot.lane.b32.xlu1 %v6369_v48, %s9373_s14  ;;  %5654 = vst.msk [vmem:[#allocation2 + $0x81] sm:$0xff] %vm13204_vm12, %v5614_v21  ;;  %v6157_v37 = vld [vmem:[#allocation2 + $0x60] sm:$0xff]  ;;  %v8226_v48 = vunpack.c.l.bf16 %v8267_v25  ;;  %v6359_v0 = vld [vmem:[#allocation2 + $0x90] sm:$0xff]  ;;  %v8268_v21 = vld [vmem:[%s12936_s0 + $0xe8] sm:$0xff]  }
 0xa7a   :  { %v6293_v58 = vld [vmem:[#allocation2 + $0x62] sm:$0xff]  ;;  %v6170_v6 = vpack.c.bf16 %v6157_v37, %v6355_v61  ;;  %5983 = vst.msk [vmem:[#allocation2 + $0x81] sm:$0xff] %vm13205_vm7, %v8223_v24  ;;  %vm13209_vm12 = vmmov %vm13196_vm2 }
 0xa7b   :  { %6018 = vst.msk [vmem:[#allocation3 + $0x30] sm:$0xff] %vm13199_vm11, %v6010_v14  ;;  %v6306_v11 = vpack.c.bf16 %v6293_v58, %v6491_v38  ;;  %v5998_v12 = vld [vmem:[#allocation2 + $0x60] sm:$0xff]  ;;  %v8227_v14 = vunpack.c.h.bf16 %v8267_v25  ;;  %vm13210_vm11 = vmmov %vm13195_vm0 }
 0xa7c   :  { %6188 = vrot.lane.b32.xlu0 %v6170_v6, %s9369_s10  ;;  %v6229_v28 = vld [vmem:[#allocation2 + $0x61] sm:$0xff]  ;;  %vm13211_vm7 = vmmov %vm13196_vm2 }
 0xa7d   :  { %6450 = vrot.lane.b32.xlu1 %v6433_v31, %s9374_s17  ;;  %v6357_v35 = vld [vmem:[#allocation2 + $0x70] sm:$0xff]  ;;  %v6242_v42 = vpack.c.bf16 %v6229_v28, %v6419_v63 }
 0xa7e   :  { %v5999_v36 = vld [vmem:[#allocation2 + $0x70] sm:$0xff]  ;;  %v6370_v57 = vpack.c.bf16 %v6357_v35, %v6157_v37 }
 0xa7f   :  { %v6011_v9 = vpack.c.bf16 %v5999_v36, %v5998_v12  ;;  %v6421_v49 = vld [vmem:[#allocation2 + $0x71] sm:$0xff] }
 0xa80   :  { %6324 = vrot.lane.b32.xlu0 %v6306_v11, %s9368_s9  ;;  %v6434_v40 = vpack.c.bf16 %v6421_v49, %v6229_v28  ;;  %v6294_v38 = vld [vmem:[#allocation2 + $0x72] sm:$0xff]  ;;  %v8230_v11 = vunpack.c.l.bf16 %v8268_v21  ;;  %v8231_v28 = vunpack.c.h.bf16 %v8268_v21  ;;  %v6096_v21 = vld [vmem:[#allocation2 + $0xa2] sm:$0xff] }
 0xa81   :  { %6060 = vrot.lane.b32.xlu1 %v6433_v31, %s9370_s11  ;;  %6019 = vst.msk [vmem:[#allocation3 + $0x48] sm:$0xff] %vm13206_vm6, %v6011_v9  ;;  %v6159_v8 = vld [vmem:[#allocation2 + $0x80] sm:$0xff]  ;;  %v6107_v24 = vpack.c.bf16 %v6294_v38, %v6293_v58  ;;  %v6423_v58 = vld [vmem:[#allocation2 + $0x91] sm:$0xff]  ;;  %vm13212_vm6 = vmmov %vm13195_vm0 }
 0xa82   :  { %v6171_v47 = vpack.c.bf16 %v6159_v8, %v6357_v35  ;;  %v6295_v61 = vld [vmem:[#allocation2 + $0x82] sm:$0xff]  ;;  %v6371_v37 = vpack.c.bf16 %v6359_v0, %v6159_v8  ;;  %v6495_v9 = vld [vmem:[#allocation2 + $0x92] sm:$0xff] }
 0xa83   :  { %v6307_v63 = vpack.c.bf16 %v6295_v61, %v6294_v38  ;;  %v6422_v6 = vld [vmem:[#allocation2 + $0x81] sm:$0xff] }
 0xa84   :  { %6388 = vrot.lane.b32.xlu0 %v6370_v57, %s9373_s14  ;;  %v6435_v12 = vpack.c.bf16 %v6423_v58, %v6422_v6  ;;  %v6243_v36 = vpack.c.bf16 %v6422_v6, %v6421_v49  ;;  %v6000_v57 = vld [vmem:[#allocation2 + $0xa0] sm:$0xff] }
 0xa85   :  { %6124 = vrot.lane.b32.xlu1 %v6505_v18, %s9372_s13 }
 0xa88   :  { %6452 = vrot.lane.b32.xlu0 %v6434_v40, %s9374_s17 }
 0xa89   :  { %6260 = vrot.lane.b32.xlu1 %v6242_v42, %s9371_s12 }
 0xa8a   :  { %v5616_v18 = vpop.permute.xlu0 %5615 }
 0xa8b   :  { %5655 = vst.msk [vmem:[#allocation2 + $0xb1] sm:$0xff] %vm13207_vm9, %v5616_v18  ;;  %vm13213_vm9 = vcmask 293888  }
 0xa8c   :  { %6062 = vrot.lane.b32.xlu0 %v6434_v40, %s9370_s11  ;;  %5984 = vst.msk [vmem:[#allocation2 + $0xb1] sm:$0xff] %vm13195_vm0, %v8226_v48  ;;  %v5618_v31 = vpop.permute.xlu1 %5617  ;;  %v6032_v48 = vld [vmem:[#allocation2 + $0xa1] sm:$0xff]  ;;  %vm13214_vm0 = vmmov %vm13213_vm9 }
 0xa8d   :  { %6190 = vrot.lane.b32.xlu1 %v6171_v47, %s9369_s10  ;;  %5656 = vst.msk [vmem:[#allocation2 + $0xc1] sm:$0xff] %vm13196_vm2, %v5618_v31  ;;  %v6507_v47 = vpack.c.bf16 %v6495_v9, %v6295_v61 }
 0xa8e   :  { %5985 = vst.msk [vmem:[#allocation2 + $0xc1] sm:$0xff] %vm13208_vm3, %v8227_v14 }
 0xa90   :  { %6126 = vrot.lane.b32.xlu0 %v6107_v24, %s9372_s13  ;;  %v5620_v35 = vpop.permute.xlu0 %5619 }
 0xa91   :  { %6326 = vrot.lane.b32.xlu1 %v6307_v63, %s9368_s9  ;;  %5657 = vst.msk [vmem:[#allocation2 + $0xd1] sm:$0xff] %vm13209_vm12, %v5620_v35  ;;  %vm13215_vm12 = vmmov %vm13196_vm2 }
 0xa92   :  { %5986 = vst.msk [vmem:[#allocation2 + $0xd1] sm:$0xff] %vm13210_vm11, %v8230_v11  ;;  %vm13216_vm11 = vmmov %vm13208_vm3 }
 0xa93   :  { %v6160_v42 = vld [vmem:[#allocation2 + $0xb0] sm:$0xff] }
 0xa94   :  { %6524 = vrot.lane.b32.xlu0 %v6107_v24, %s9375_s7  ;;  %v6001_v40 = vld [vmem:[#allocation2 + $0xb0] sm:$0xff]  ;;  %v5622_v8 = vpop.permute.xlu1 %5621 }
 0xa95   :  { %6390 = vrot.lane.b32.xlu1 %v6371_v37, %s9373_s14  ;;  %v6012_v25 = vpack.c.bf16 %v6001_v40, %v6000_v57  ;;  %5658 = vst.msk [vmem:[#allocation2 + $0xe1] sm:$0xff] %vm13211_vm7, %v5622_v8  ;;  %v6161_v38 = vld [vmem:[#allocation2 + $0xc0] sm:$0xff]  ;;  %v6296_v49 = vld [vmem:[#allocation2 + $0xb2] sm:$0xff]  ;;  %vm13217_vm7 = vmmov %vm13196_vm2 }
 0xa96   :  { %v6172_v18 = vpack.c.bf16 %v6161_v38, %v6160_v42  ;;  %v6297_v63 = vld [vmem:[#allocation2 + $0xc2] sm:$0xff]  ;;  %v6033_v24 = vld [vmem:[#allocation2 + $0xb1] sm:$0xff]  ;;  %5987 = vst.msk [vmem:[#allocation2 + $0xe1] sm:$0xff] %vm13212_vm6, %v8231_v28  ;;  %v6108_v6 = vpack.c.bf16 %v6296_v49, %v6096_v21  ;;  %vm13218_vm6 = vmmov %vm13208_vm3 }
 0xa97   :  { %6020 = vst.msk [vmem:[#allocation3 + $0x60] sm:$0xff] %vm13213_vm9, %v6012_v25  ;;  %v6308_v0 = vpack.c.bf16 %v6297_v63, %v6296_v49  ;;  %v6044_v14 = vpack.c.bf16 %v6033_v24, %v6032_v48  ;;  %v6002_v37 = vld [vmem:[#allocation2 + $0xc0] sm:$0xff]  ;;  %vm13219_vm9 = vmmov %vm13214_vm0 }
 0xa98   :  { %6262 = vrot.lane.b32.xlu0 %v6243_v36, %s9371_s12  ;;  %v6233_v35 = vld [vmem:[#allocation2 + $0xc1] sm:$0xff]  ;;  %v8269_v36 = vld [vmem:[%s12936_s0 + $0xf0] sm:$0xff]  }
 0xa99   :  { %6454 = vrot.lane.b32.xlu1 %v6435_v12, %s9374_s17  ;;  %v6361_v31 = vld [vmem:[#allocation2 + $0xd0] sm:$0xff]  ;;  %v6244_v57 = vpack.c.bf16 %v6233_v35, %v6033_v24  ;;  %v8234_v42 = vunpack.c.l.bf16 %v8269_v36 }
 0xa9a   :  { %v6003_v61 = vld [vmem:[#allocation2 + $0xd0] sm:$0xff]  ;;  %v6372_v58 = vpack.c.bf16 %v6361_v31, %v6161_v38 }
 0xa9b   :  { %v6013_v11 = vpack.c.bf16 %v6003_v61, %v6002_v37  ;;  %v6425_v12 = vld [vmem:[#allocation2 + $0xd1] sm:$0xff] }
 0xa9c   :  { %6192 = vrot.lane.b32.xlu0 %v6172_v18, %s9369_s10  ;;  %v6436_v9 = vpack.c.bf16 %v6425_v12, %v6233_v35  ;;  %v6497_v28 = vld [vmem:[#allocation2 + $0xd2] sm:$0xff] }
 0xa9d   :  { %6526 = vrot.lane.b32.xlu1 %v6507_v47, %s9375_s7  ;;  %6021 = vst.msk [vmem:[#allocation3 + $0x78] sm:$0xff] %vm13214_vm0, %v6013_v11  ;;  %v6508_v8 = vpack.c.bf16 %v6497_v28, %v6297_v63  ;;  %v6163_v25 = vld [vmem:[#allocation2 + $0xe0] sm:$0xff]  ;;  %v8235_v47 = vunpack.c.h.bf16 %v8269_v36  ;;  %v8270_v18 = vld [vmem:[%s12936_s0 + $0xf8] sm:$0xff]   ;;  %vm13220_vm0 = vmmov %vm13196_vm2  ;;  %s9378_s0 = smov 64  }
 0xa9e   :  { %v6173_v48 = vpack.c.bf16 %v6163_v25, %v6361_v31  ;;  %v6299_v49 = vld [vmem:[#allocation2 + $0xe2] sm:$0xff]  ;;  %v8238_v24 = vunpack.c.l.bf16 %v8270_v18 }
 0xa9f   :  { %v6235_v63 = vld [vmem:[#allocation2 + $0xe1] sm:$0xff] }
 0xaa0   :  { %6328 = vrot.lane.b32.xlu0 %v6308_v0, %s9368_s9  ;;  %v6309_v0 = vpack.c.bf16 %v6299_v49, %v6497_v28  ;;  %v6004_v21 = vld [vmem:[#allocation2 + $0xe0] sm:$0xff] }
 0xaa1   :  { %6064 = vrot.lane.b32.xlu1 %v6044_v14, %s9370_s11  ;;  %v6245_v14 = vpack.c.bf16 %v6235_v63, %v6425_v12 }
 0xaa4   :  { %6392 = vrot.lane.b32.xlu0 %v6372_v58, %s9373_s14  ;;  %v8239_v58 = vunpack.c.h.bf16 %v8270_v18 }
 0xaa5   :  { %6128 = vrot.lane.b32.xlu1 %v6108_v6, %s9372_s13 }
 0xaa6   :  { %v5624_v40 = vpop.permute.xlu0 %5623 }
 0xaa7   :  { %5659 = vst.msk [vmem:[#allocation2 + $0xf1] sm:$0xff] %vm13196_vm2, %v5624_v40  ;;  %vm13221_vm2 = vmmov %vm13208_vm3 }
 0xaa8   :  { %6456 = vrot.lane.b32.xlu0 %v6436_v9, %s9374_s17  ;;  %5988 = vst.msk [vmem:[#allocation2 + $0xf1] sm:$0xff] %vm13208_vm3, %v8234_v42  ;;  %vm13222_vm3 = vmmov %vm13219_vm9 }
 0xaa9   :  { %6264 = vrot.lane.b32.xlu1 %v6244_v57, %s9371_s12 }
 0xaaa   :  { %v5626_v38 = vpop.permute.xlu1 %5625 }
 0xaab   :  { %5660 = vst.msk [vmem:[#allocation2 + $0x101] sm:$0xff] %vm13215_vm12, %v5626_v38  ;;  %vm13223_vm12 = vcmask 425088  }
 0xaac   :  { %6066 = vrot.lane.b32.xlu0 %v6436_v9, %s9370_s11  ;;  %5989 = vst.msk [vmem:[#allocation2 + $0x101] sm:$0xff] %vm13216_vm11, %v8235_v47  ;;  %vm13224_vm11 = vcmask 720288  }
 0xaad   :  { %6528 = vrot.lane.b32.xlu1 %v6508_v8, %s9375_s7 }
 0xaaf   :  { %v5628_v37 = vpop.permute.xlu0 %5627  ;;  %v6499_v31 = vld [vmem:[#allocation2 + $0xf2] sm:$0xff] }
 0xab0   :  { %6130 = vrot.lane.b32.xlu0 %v6508_v8, %s9372_s13  ;;  %v6363_v61 = vld [vmem:[#allocation2 + $0xf0] sm:$0xff]  ;;  %5661 = vst.msk [vmem:[#allocation2 + $0x111] sm:$0xff] %vm13217_vm7, %v5628_v37  ;;  %v6509_v35 = vpack.c.bf16 %v6499_v31, %v6299_v49  ;;  %vm13225_vm7 = vcmask 1015488  }
 0xab1   :  { %6194 = vrot.lane.b32.xlu1 %v6173_v48, %s9369_s10  ;;  %v6005_v6 = vld [vmem:[#allocation2 + $0xf0] sm:$0xff]  ;;  %5990 = vst.msk [vmem:[#allocation2 + $0x111] sm:$0xff] %vm13218_vm6, %v8238_v24  ;;  %v6373_v36 = vpack.c.bf16 %v6363_v61, %v6163_v25  ;;  %vm13226_vm6 = vcmask 1048544  }
 0xab2   :  { %v6014_v11 = vpack.c.bf16 %v6005_v6, %v6004_v21  ;;  %v6427_v9 = vld [vmem:[#allocation2 + $0xf1] sm:$0xff] }
 0xab3   :  { %v5630_v57 = vpop.permute.xlu1 %5629  ;;  %v6165_v12 = vld [vmem:[#allocation2 + $0x100] sm:$0xff]  ;;  %v6437_v28 = vpack.c.bf16 %v6427_v9, %v6235_v63 }
 0xab4   :  { %6266 = vrot.lane.b32.xlu0 %v6245_v14, %s9371_s12  ;;  %6022 = vst.msk [vmem:[#allocation3 + $0x90] sm:$0xff] %vm13219_vm9, %v6014_v11  ;;  %v6174_v42 = vpack.c.bf16 %v6165_v12, %v6363_v61  ;;  %v6301_v40 = vld [vmem:[#allocation2 + $0x102] sm:$0xff]  ;;  %vm13227_vm9 = vcmask 261120  }
 0xab5   :  { %6330 = vrot.lane.b32.xlu1 %v6309_v0, %s9368_s9  ;;  %5662 = vst.msk [vmem:[#allocation2 + $0x121] sm:$0xff] %vm13220_vm0, %v5630_v57  ;;  %v6310_v8 = vpack.c.bf16 %v6301_v40, %v6499_v31  ;;  %v6006_v47 = vld [vmem:[#allocation2 + $0x100] sm:$0xff]  ;;  %vm13228_vm0 = vcmask 556288  }
 0xab6   :  { %5991 = vst.msk [vmem:[#allocation2 + $0x121] sm:$0xff] %vm13221_vm2, %v8239_v58  ;;  %v6237_v49 = vld [vmem:[#allocation2 + $0x101] sm:$0xff]  ;;  %vm13229_vm2 = vmmov %vm13223_vm12 }
 0xab7   :  { %v6246_v63 = vpack.c.bf16 %v6237_v49, %v6427_v9 }
 0xab8   :  { %6530 = vrot.lane.b32.xlu0 %v6509_v35, %s9375_s7  ;;  %v6365_v25 = vld [vmem:[#allocation2 + $0x110] sm:$0xff] }
 0xab9   :  { %6394 = vrot.lane.b32.xlu1 %v6373_v36, %s9373_s14  ;;  %v6007_v38 = vld [vmem:[#allocation2 + $0x110] sm:$0xff]  ;;  %v6374_v48 = vpack.c.bf16 %v6365_v25, %v6165_v12 }
 0xaba   :  { %v6015_v18 = vpack.c.bf16 %v6007_v38, %v6006_v47  ;;  %v6429_v24 = vld [vmem:[#allocation2 + $0x111] sm:$0xff] }
 0xabb   :  { %v6438_v0 = vpack.c.bf16 %v6429_v24, %v6237_v49  ;;  %v6302_v37 = vld [vmem:[#allocation2 + $0x112] sm:$0xff] }
 0xabc   :  { %6196 = vrot.lane.b32.xlu0 %v6174_v42, %s9369_s10  ;;  %6023 = vst.msk [vmem:[#allocation3 + $0xa8] sm:$0xff] %vm13222_vm3, %v6015_v18  ;;  %v6367_v36 = vld [vmem:[#allocation2 + $0x130] sm:$0xff]  ;;  %v6111_v12 = vpack.c.bf16 %v6302_v37, %v6301_v40  ;;  %vm13230_vm3 = vmmov %vm13224_vm11 }
 0xabd   :  { %6458 = vrot.lane.b32.xlu1 %v6437_v28, %s9374_s17  ;;  %v6167_v14 = vld [vmem:[#allocation2 + $0x120] sm:$0xff]  ;;  %v6431_v42 = vld [vmem:[#allocation2 + $0x131] sm:$0xff] }
 0xabe   :  { %v6175_v21 = vpack.c.bf16 %v6167_v14, %v6365_v25  ;;  %v6303_v31 = vld [vmem:[#allocation2 + $0x122] sm:$0xff]  ;;  %v6375_v9 = vpack.c.bf16 %v6367_v36, %v6167_v14  ;;  %v6503_v38 = vld [vmem:[#allocation2 + $0x132] sm:$0xff] }
 0xabf   :  { %v6239_v61 = vld [vmem:[#allocation2 + $0x121] sm:$0xff]  ;;  %v6311_v58 = vpack.c.bf16 %v6303_v31, %v6302_v37  ;;  %v6511_v40 = vpack.c.bf16 %v6503_v38, %v6303_v31 }
 0xac0   :  { %6332 = vrot.lane.b32.xlu0 %v6310_v8, %s9368_s9  ;;  %v6247_v11 = vpack.c.bf16 %v6239_v61, %v6429_v24  ;;  %v6439_v25 = vpack.c.bf16 %v6431_v42, %v6239_v61 }
 0xac1   :  { %6068 = vrot.lane.b32.xlu1 %v6437_v28, %s9370_s11 }
 0xac4   :  { %6396 = vrot.lane.b32.xlu0 %v6374_v48, %s9373_s14 }
 0xac5   :  { %6132 = vrot.lane.b32.xlu1 %v6509_v35, %s9372_s13 }
 0xac8   :  { %6460 = vrot.lane.b32.xlu0 %v6438_v0, %s9374_s17 }
 0xac9   :  { %6268 = vrot.lane.b32.xlu1 %v6246_v63, %s9371_s12  ;;  %v6057_v6 = vpop.permute.xlu1 %6056 }
 0xaca   :  { %6080 = vst.msk [vmem:[#allocation3] sm:$0xff] %vm269_vm5, %v6057_v6  ;;  %v6185_v35 = vpop.permute.xlu0 %6184 }
 0xacb   :  { %6209 = vst.msk [vmem:[#allocation3 + $0x8] sm:$0xff] %vm401_vm4, %v6185_v35 }
 0xacc   :  { %6070 = vrot.lane.b32.xlu0 %v6438_v0, %s9370_s11 }
 0xacd   :  { %6198 = vrot.lane.b32.xlu1 %v6175_v21, %s9369_s10  ;;  %v6121_v57 = vpop.permute.xlu1 %6120 }
 0xace   :  { %6144 = vst.msk [vmem:[#allocation3] sm:$0xff] %vm334_vm8, %v6121_v57  ;;  %v6321_v28 = vpop.permute.xlu0 %6320 }
 0xacf   :  { %6208 = vst.msk [vmem:[#allocation3] sm:$0xff] %vm399_vm10, %v6185_v35 }
 0xad0   :  { %6270 = vrot.lane.b32.xlu0 %v6247_v11, %s9371_s12  ;;  %v13239_v11 = vld [vmem:[#allocation12_spill] sm:$0xff] }
 0xad1   :  { %6334 = vrot.lane.b32.xlu1 %v6311_v58, %s9368_s9  ;;  %v6257_v8 = vpop.permute.xlu1 %6256 }
 0xad2   :  { %6280 = vst.msk [vmem:[#allocation3 + $0x8] sm:$0xff] %vm13223_vm12, %v6257_v8  ;;  %v6385_v47 = vpop.permute.xlu0 %6384  ;;  %vm13231_vm12 = vmmov %vm13225_vm7 }
 0xad3   :  { %6344 = vst.msk [vmem:[#allocation3 + $0x8] sm:$0xff] %vm13224_vm11, %v6321_v28  ;;  %vm13234_vm11 = vmmov %vm13226_vm6 }
 0xad4   :  { %6134 = vrot.lane.b32.xlu0 %v6111_v12, %s9372_s13  ;;  %6408 = vst.msk [vmem:[#allocation3 + $0x8] sm:$0xff] %vm13225_vm7, %v6385_v47  ;;  %vm13235_vm7 = vmmov %vm13227_vm9 }
 0xad5   :  { %6398 = vrot.lane.b32.xlu1 %v6375_v9, %s9373_s14  ;;  %v6521_v48 = vpop.permute.xlu1 %6520 }
 0xad6   :  { %v6449_v18 = vpop.permute.xlu0 %6448  ;;  %v6552_v14 = vld [vmem:[#allocation3] sm:$0xff] }
 0xad7   :  { %6472 = vst.msk [vmem:[#allocation3 + $0x8] sm:$0xff] %vm13226_vm6, %v6449_v18  ;;  %vm13236_vm6 = vmmov %vm13228_vm0 }
 0xad8   :  { %6532 = vrot.lane.b32.xlu0 %v6111_v12, %s9375_s7  ;;  %6473 = vst.msk [vmem:[#allocation3 + $0x10] sm:$0xff] %vm13227_vm9, %v6449_v18  ;;  %vm13240_vm9 = vmmov %vm13229_vm2 }
 0xad9   :  { %6462 = vrot.lane.b32.xlu1 %v6439_v25, %s9374_s17  ;;  %v6187_v49 = vpop.permute.xlu1 %6186  ;;  %6544 = vst.msk [vmem:[#allocation3 + $0x10] sm:$0xff] %vm13228_vm0, %v6521_v48  ;;  %vm13241_vm0 = vmmov %vm13235_vm7 }
 0xada   :  { %6211 = vst.msk [vmem:[#allocation3 + $0x20] sm:$0xff] %vm401_vm4, %v6187_v49  ;;  %v6059_v24 = vpop.permute.xlu0 %6058 }
 0xadb   :  { %6081 = vst.msk [vmem:[#allocation3 + $0x18] sm:$0xff] %vm269_vm5, %v6059_v24 }
 0xadc   :  { %1829 = vrot.lane.b32.xlu0 %v10174_v16, %s9378_s0 }
 0xadd   :  { %6534 = vrot.lane.b32.xlu1 %v6511_v40, %s9375_s7  ;;  %v6323_v16 = vpop.permute.xlu1 %6322 }
 0xade   :  { %v6553_v63 = vld [vmem:[#allocation3 + $0x8] sm:$0xff]  ;;  %v6123_v0 = vpop.permute.xlu0 %6122 }
 0xadf   :  { %6807 = vmatprep.mubr.bf16.mxu1 %v6553_v63  ;;  %6145 = vst.msk [vmem:[#allocation3 + $0x18] sm:$0xff] %vm334_vm8, %v6123_v0  ;;  %v13258_v63 = vld [vmem:[#allocation28_spill] sm:$0xff]  ;;  %v13259_v0 = vld [vmem:[#allocation23_spill] sm:$0xff] }
 0xae0   :  { %1863 = vrot.lane.b32.xlu0 %v10177_v41, %s9377_s4  ;;  %v6554_v21 = vld [vmem:[#allocation3 + $0x10] sm:$0xff]  ;;  %6210 = vst.msk [vmem:[#allocation3 + $0x18] sm:$0xff] %vm399_vm10, %v6187_v49  ;;  %6808 = vmatmul.mubr.bf16.vlgmr.msra.gmra.mrb[64].mxu1 %v6552_v14 }
 0xae1   :  { %1831 = vrot.lane.b32.xlu1 %v10289_v27, %s9378_s0  ;;  %8703 = vmatprep.mubr.bf16.mxu0 %v6554_v21 }
 0xae2   :  { %v6259_v27 = vpop.permute.xlu0 %6258 }
 0xae3   :  { %6281 = vst.msk [vmem:[#allocation3 + $0x20] sm:$0xff] %vm13229_vm2, %v6259_v27  ;;  %vm13242_vm2 = vmmov %vm13230_vm3  ;;  %v13264_v27 = vld [vmem:[#allocation24_spill] sm:$0xff] }
 0xae4   :  { %1927 = vrot.lane.b32.xlu0 %v10180_v56, %s9375_s7  ;;  %6345 = vst.msk [vmem:[#allocation3 + $0x20] sm:$0xff] %vm13230_vm3, %v6323_v16  ;;  %v13233_v56 = vld [vmem:[#allocation9_spill] sm:$0xff]  ;;  %vm13243_vm3 = vmmov %vm13231_vm12 }
 0xae5   :  { %1865 = vrot.lane.b32.xlu1 %v10292_v54, %s9377_s4  ;;  %v13232_v54 = vld [vmem:[#allocation13_spill] sm:$0xff] }
 0xae6   :  { %v13263_v16 = vld [vmem:[#allocation29_spill] sm:$0xff] }
 0xae7   :  { %v6555_v12 = vld [vmem:[#allocation3 + $0x18] sm:$0xff] }
 0xae8   :  { %1961 = vrot.lane.b32.xlu0 %v10183_v26, %s9378_s0  ;;  %v13237_v26 = vld [vmem:[#allocation14_spill] sm:$0xff] }
 0xae9   :  { %1929 = vrot.lane.b32.xlu1 %v10295_v53, %s9375_s7  ;;  %v13238_v53 = vld [vmem:[#allocation8_spill] sm:$0xff] }
 0xaea   :  { %v6523_v37 = vpop.permute.xlu0 %6522 }
 0xaeb   :  { %v6387_v41 = vpop.permute.xlu1 %6386 }
 0xaec   :  { %6409 = vst.msk [vmem:[#allocation3 + $0x20] sm:$0xff] %vm13231_vm12, %v6387_v41  ;;  %1995 = vrot.lane.b32.xlu0 %v13233_v56, %s9377_s4  ;;  %vm13244_vm12 = vmmov %vm13234_vm11  ;;  %v13266_v56 = vld [vmem:[#allocation25_spill] sm:$0xff] }
 0xaed   :  { %1963 = vrot.lane.b32.xlu1 %v13232_v54, %s9378_s0  ;;  %v13265_v54 = vld [vmem:[#allocation30_spill] sm:$0xff] }
 0xaee   :  { %v6189_v61 = vpop.permute.xlu0 %6188 }
 0xaef   :  { %v6451_v31 = vpop.permute.xlu1 %6450  ;;  %6213 = vst.msk [vmem:[#allocation3 + $0x38] sm:$0xff] %vm401_vm4, %v6189_v61 }
 0xaf0   :  { %6474 = vst.msk [vmem:[#allocation3 + $0x20] sm:$0xff] %vm13234_vm11, %v6451_v31  ;;  %2059 = vrot.lane.b32.xlu0 %v13238_v53, %s9375_s7  ;;  %vm13245_vm11 = vmmov %vm13236_vm6 }
 0xaf1   :  { %6475 = vst.msk [vmem:[#allocation3 + $0x28] sm:$0xff] %vm13235_vm7, %v6451_v31  ;;  %1997 = vrot.lane.b32.xlu1 %v13237_v26, %s9377_s4  ;;  %vm13246_vm7 = vmmov %vm13241_vm0 }
 0xaf2   :  { %6545 = vst.msk [vmem:[#allocation3 + $0x28] sm:$0xff] %vm13236_vm6, %v6523_v37  ;;  %v6325_v58 = vpop.permute.xlu0 %6324  ;;  %vm13247_vm6 = vmmov %vm13240_vm9 }
 0xaf3   :  { %v6061_v6 = vpop.permute.xlu1 %6060 }
 0xaf4   :  { %6082 = vst.msk [vmem:[#allocation3 + $0x30] sm:$0xff] %vm269_vm5, %v6061_v6  ;;  %3761 = vrot.lane.b32.xlu0 %v10939_v51, %s9378_s0 }
 0xaf5   :  { %2061 = vrot.lane.b32.xlu1 %v13239_v11, %s9375_s7  ;;  %v13270_v11 = vld [vmem:[#allocation26_spill] sm:$0xff] }
 0xaf6   :  { %v6389_v36 = vpop.permute.xlu0 %6388 }
 0xaf7   :  { %v6125_v35 = vpop.permute.xlu1 %6124  ;;  %v6556_v57 = vld [vmem:[#allocation3 + $0x20] sm:$0xff] }
 0xaf8   :  { %6146 = vst.msk [vmem:[#allocation3 + $0x30] sm:$0xff] %vm334_vm8, %v6125_v35  ;;  %6815 = vmatprep.mubr.bf16.mxu1 %v6556_v57  ;;  %3795 = vrot.lane.b32.xlu0 %v10942_v10, %s9377_s4  ;;  %v13272_v57 = vld [vmem:[#allocation32_spill] sm:$0xff] }
 0xaf9   :  { %v6557_v9 = vld [vmem:[#allocation3 + $0x28] sm:$0xff]  ;;  %6212 = vst.msk [vmem:[#allocation3 + $0x30] sm:$0xff] %vm399_vm10, %v6189_v61  ;;  %3763 = vrot.lane.b32.xlu1 %v11051_v1, %s9378_s0  ;;  %6816 = vmatmul.mubr.bf16.gmra.mrb[68].mxu1 %v6555_v12 }
 0xafa   :  { %8704 = vmatmul.mubr.bf16.vlgmr.msra.gmra.mrb[80].mxu0 %v6557_v9  ;;  %v6453_v51 = vpop.permute.xlu0 %6452 }
 0xafb   :  { %v6261_v28 = vpop.permute.xlu1 %6260  ;;  %6477 = vst.msk [vmem:[#allocation3 + $0x40] sm:$0xff] %vm13241_vm0, %v6453_v51  ;;  %vm13249_vm0 = vmmov %vm13243_vm3 }
 0xafc   :  { %6282 = vst.msk [vmem:[#allocation3 + $0x38] sm:$0xff] %vm13240_vm9, %v6261_v28  ;;  %3859 = vrot.lane.b32.xlu0 %v10945_v30, %s9375_s7  ;;  %vm13248_vm9 = vmmov %vm13242_vm2 }
 0xafd   :  { %6346 = vst.msk [vmem:[#allocation3 + $0x38] sm:$0xff] %vm13242_vm2, %v6325_v58  ;;  %3797 = vrot.lane.b32.xlu1 %v11054_v29, %s9377_s4  ;;  %vm13250_vm2 = vmmov %vm13244_vm12  ;;  %v13269_v58 = vld [vmem:[#allocation31_spill] sm:$0xff] }
 0xafe   :  { %6410 = vst.msk [vmem:[#allocation3 + $0x38] sm:$0xff] %vm13243_vm3, %v6389_v36  ;;  %v6063_v1 = vpop.permute.xlu0 %6062  ;;  %vm13251_vm3 = vmmov %vm13245_vm11 }
 0xaff   :  { %6476 = vst.msk [vmem:[#allocation3 + $0x38] sm:$0xff] %vm13244_vm12, %v6453_v51  ;;  %v6191_v10 = vpop.permute.xlu1 %6190  ;;  %vm13255_vm12 = vmmov %vm13247_vm6 }
 0xb00   :  { %6215 = vst.msk [vmem:[#allocation3 + $0x50] sm:$0xff] %vm401_vm4, %v6191_v10  ;;  %3893 = vrot.lane.b32.xlu0 %v10948_v34, %s9378_s0 }
 0xb01   :  { %6083 = vst.msk [vmem:[#allocation3 + $0x48] sm:$0xff] %vm269_vm5, %v6063_v1  ;;  %3861 = vrot.lane.b32.xlu1 %v11057_v2, %s9375_s7  ;;  %v6558_v2 = vld [vmem:[#allocation3 + $0x30] sm:$0xff] }
 0xb02   :  { %v6127_v42 = vpop.permute.xlu0 %6126 }
 0xb03   :  { %v6327_v29 = vpop.permute.xlu1 %6326  ;;  %6147 = vst.msk [vmem:[#allocation3 + $0x48] sm:$0xff] %vm334_vm8, %v6127_v42 }
 0xb04   :  { %6214 = vst.msk [vmem:[#allocation3 + $0x48] sm:$0xff] %vm399_vm10, %v6191_v10  ;;  %3927 = vrot.lane.b32.xlu0 %v10951_v33, %s9377_s4 }
 0xb05   :  { %3895 = vrot.lane.b32.xlu1 %v11060_v13, %s9378_s0 }
 0xb06   :  { %v6559_v30 = vld [vmem:[#allocation3 + $0x38] sm:$0xff]  ;;  %v6525_v25 = vpop.permute.xlu0 %6524 }
 0xb07   :  { %v6391_v8 = vpop.permute.xlu1 %6390  ;;  %6823 = vmatprep.mubr.bf16.mxu1 %v6559_v30  ;;  %6546 = vst.msk [vmem:[#allocation3 + $0x40] sm:$0xff] %vm13245_vm11, %v6525_v25  ;;  %vm13256_vm11 = vmmov %vm13246_vm7 }
 0xb08   :  { %6824 = vmatmul.mubr.bf16.gmra.mrb[72].mxu1 %v6558_v2  ;;  %3991 = vrot.lane.b32.xlu0 %v10935_v59, %s9375_s7 }
 0xb09   :  { %3929 = vrot.lane.b32.xlu1 %v11066_v20, %s9377_s4 }
 0xb0a   :  { %v6263_v47 = vpop.permute.xlu0 %6262 }
 0xb0b   :  { %v6455_v34 = vpop.permute.xlu1 %6454  ;;  %6283 = vst.msk [vmem:[#allocation3 + $0x50] sm:$0xff] %vm13247_vm6, %v6263_v47  ;;  %v6561_v18 = vld [vmem:[#allocation3 + $0x48] sm:$0xff]  ;;  %vm13260_vm6 = vmmov %vm13249_vm0 }
 0xb0c   :  { %6479 = vst.msk [vmem:[#allocation3 + $0x58] sm:$0xff] %vm13246_vm7, %v6455_v34  ;;  %5519 = vrot.lane.b32.xlu0 %v11557_v43, %s9377_s4  ;;  %v13252_v43 = vld [vmem:[#allocation21_spill] sm:$0xff]  ;;  %vm13257_vm7 = vmmov %vm13248_vm9 }
 0xb0d   :  { %6347 = vst.msk [vmem:[#allocation3 + $0x50] sm:$0xff] %vm13248_vm9, %v6327_v29  ;;  %3993 = vrot.lane.b32.xlu1 %v11039_v4, %s9375_s7  ;;  %vm13261_vm9 = vmmov %vm13250_vm2 }
 0xb0e   :  { %6411 = vst.msk [vmem:[#allocation3 + $0x50] sm:$0xff] %vm13249_vm0, %v6391_v8  ;;  %v6193_v59 = vpop.permute.xlu0 %6192  ;;  %v6560_v13 = vld [vmem:[#allocation3 + $0x40] sm:$0xff]  ;;  %vm13262_vm0 = vmmov %vm13251_vm3 }
 0xb0f   :  { %6478 = vst.msk [vmem:[#allocation3 + $0x50] sm:$0xff] %vm13250_vm2, %v6455_v34  ;;  %v6527_v33 = vpop.permute.xlu1 %6526  ;;  %8707 = vmatprep.mubr.bf16.mxu0 %v6560_v13  ;;  %vm13267_vm2 = vmmov %vm13255_vm12 }
 0xb10   :  { %6547 = vst.msk [vmem:[#allocation3 + $0x58] sm:$0xff] %vm13251_vm3, %v6527_v33  ;;  %5535 = vrot.lane.b32.xlu0 %v11597_v5, %s9377_s4  ;;  %v13254_v5 = vld [vmem:[#allocation22_spill] sm:$0xff]  ;;  %vm13268_vm3 = vmmov %vm13257_vm7 }
 0xb11   :  { %6217 = vst.msk [vmem:[#allocation3 + $0x68] sm:$0xff] %vm401_vm4, %v6193_v59  ;;  %5521 = vrot.lane.b32.xlu1 %v11561_v3, %s9377_s4  ;;  %v13253_v3 = vld [vmem:[#allocation27_spill] sm:$0xff] }
 0xb12   :  { %v6329_v20 = vpop.permute.xlu0 %6328 }
 0xb13   :  { %v6065_v4 = vpop.permute.xlu1 %6064 }
 0xb14   :  { %6084 = vst.msk [vmem:[#allocation3 + $0x60] sm:$0xff] %vm269_vm5, %v6065_v4  ;;  %5523 = vrot.lane.b32.xlu0 %v13252_v43, %s9377_s4 }
 0xb15   :  { %5537 = vrot.lane.b32.xlu1 %v11601_v32, %s9377_s4 }
 0xb16   :  { %v6562_v38 = vld [vmem:[#allocation3 + $0x50] sm:$0xff]  ;;  %v6393_v40 = vpop.permute.xlu0 %6392 }
 0xb17   :  { %v6129_v48 = vpop.permute.xlu1 %6128  ;;  %6831 = vmatprep.mubr.bf16.mxu1 %v6562_v38  ;;  %v6563_v49 = vld [vmem:[#allocation3 + $0x58] sm:$0xff] }
 0xb18   :  { %6148 = vst.msk [vmem:[#allocation3 + $0x60] sm:$0xff] %vm334_vm8, %v6129_v48  ;;  %6832 = vmatmul.mubr.bf16.gmra.mrb[76].mxu1 %v6561_v18  ;;  %8708 = vmatmul.mubr.bf16.gmra.mrb[84].mxu0 %v6563_v49 }
 0xb19   :  { %6216 = vst.msk [vmem:[#allocation3 + $0x60] sm:$0xff] %vm399_vm10, %v6193_v59  ;;  %5539 = vrot.lane.b32.xlu1 %v13253_v3, %s9377_s4  ;;  %5525 = vrot.lane.b32.xlu0 %v13254_v5, %s9377_s4 }
 0xb1a   :  { %v6457_v24 = vpop.permute.xlu0 %6456 }
 0xb1b   :  { %v6265_v32 = vpop.permute.xlu1 %6264  ;;  %6481 = vst.msk [vmem:[#allocation3 + $0x70] sm:$0xff] %vm13256_vm11, %v6457_v24  ;;  %vm13273_vm11 = vmmov %vm13261_vm9 }
 0xb1c   :  { %6284 = vst.msk [vmem:[#allocation3 + $0x68] sm:$0xff] %vm13255_vm12, %v6265_v32  ;;  %vm13271_vm12 = vmmov %vm13260_vm6 }
 0xb1d   :  { %6348 = vst.msk [vmem:[#allocation3 + $0x68] sm:$0xff] %vm13257_vm7, %v6329_v20  ;;  %5541 = vrot.lane.b32.xlu1 %v13258_v63, %s9377_s4  ;;  %5527 = vrot.lane.b32.xlu0 %v13259_v0, %s9377_s4  ;;  %vm13274_vm7 = vcmask 261120  }
 0xb1e   :  { %6412 = vst.msk [vmem:[#allocation3 + $0x68] sm:$0xff] %vm13260_vm6, %v6393_v40  ;;  %v6067_v21 = vpop.permute.xlu0 %6066  ;;  %vm13275_vm6 = vmmov %vm13262_vm0 }
 0xb1f   :  { %6480 = vst.msk [vmem:[#allocation3 + $0x68] sm:$0xff] %vm13261_vm9, %v6457_v24  ;;  %v6529_v14 = vpop.permute.xlu1 %6528  ;;  %vm13276_vm9 = vmmov %vm13267_vm2  ;;  %v13289_v24 = vld [vmem:[#allocation10_spill] sm:$0xff] }
 0xb20   :  { %6548 = vst.msk [vmem:[#allocation3 + $0x70] sm:$0xff] %vm13262_vm0, %v6529_v14  ;;  %v6564_v53 = vld [vmem:[#allocation3 + $0x60] sm:$0xff]  ;;  %vm13277_vm0 = vmmov %vm13274_vm7 }
 0xb21   :  { %6085 = vst.msk [vmem:[#allocation3 + $0x78] sm:$0xff] %vm269_vm5, %v6067_v21  ;;  %5543 = vrot.lane.b32.xlu1 %v13263_v16, %s9377_s4  ;;  %5529 = vrot.lane.b32.xlu0 %v13264_v27, %s9377_s4  ;;  %v13291_v27 = vld [vmem:[#allocation15_spill] sm:$0xff] }
 0xb22   :  { %v6131_v37 = vpop.permute.xlu0 %6130 }
 0xb23   :  { %v6195_v41 = vpop.permute.xlu1 %6194  ;;  %6149 = vst.msk [vmem:[#allocation3 + $0x78] sm:$0xff] %vm334_vm8, %v6131_v37 }
 0xb24   :  { %6219 = vst.msk [vmem:[#allocation3 + $0x80] sm:$0xff] %vm401_vm4, %v6195_v41 }
 0xb25   :  { %6218 = vst.msk [vmem:[#allocation3 + $0x78] sm:$0xff] %vm399_vm10, %v6195_v41  ;;  %5545 = vrot.lane.b32.xlu1 %v13265_v54, %s9377_s4  ;;  %5531 = vrot.lane.b32.xlu0 %v13266_v56, %s9377_s4 }
 0xb26   :  { %v6565_v31 = vld [vmem:[#allocation3 + $0x68] sm:$0xff]  ;;  %v6267_v26 = vpop.permute.xlu0 %6266 }
 0xb27   :  { %v6331_v61 = vpop.permute.xlu1 %6330  ;;  %6839 = vmatprep.mubr.bf16.mxu1 %v6565_v31  ;;  %v6566_v6 = vld [vmem:[#allocation3 + $0x70] sm:$0xff]  ;;  %6285 = vst.msk [vmem:[#allocation3 + $0x80] sm:$0xff] %vm13267_vm2, %v6267_v26  ;;  %vm13278_vm2 = vmmov %vm13268_vm3 }
 0xb28   :  { %6840 = vmatmul.mubr.bf16.gmra.mrb[80].mxu1 %v6564_v53  ;;  %8711 = vmatprep.mubr.bf16.mxu0 %v6566_v6  ;;  %6349 = vst.msk [vmem:[#allocation3 + $0x80] sm:$0xff] %vm13268_vm3, %v6331_v61  ;;  %vm13279_vm3 = vmmov %vm13271_vm12  ;;  %v13293_v6 = vld [vmem:[#allocation11_spill] sm:$0xff] }
 0xb29   :  { %5547 = vrot.lane.b32.xlu1 %v13269_v58, %s9377_s4  ;;  %5533 = vrot.lane.b32.xlu0 %v13270_v11, %s9377_s4 }
 0xb2a   :  { %v6531_v36 = vpop.permute.xlu0 %6530 }
 0xb2b   :  { %v6395_v35 = vpop.permute.xlu1 %6394 }
 0xb2c   :  { %6413 = vst.msk [vmem:[#allocation3 + $0x80] sm:$0xff] %vm13271_vm12, %v6395_v35  ;;  %v6567_v29 = vld [vmem:[#allocation3 + $0x78] sm:$0xff]  ;;  %vm13280_vm12 = vmmov %vm13273_vm11 }
 0xb2d   :  { %5549 = vrot.lane.b32.xlu1 %v13272_v57, %s9377_s4  ;;  %5691 = vrot.lane.b32.xlu0 %v11703_v23, %s9378_s0  ;;  %v13295_v57 = vld [vmem:[#allocation16_spill] sm:$0xff] }
 0xb2e   :  { %v6197_v12 = vpop.permute.xlu0 %6196 }
 0xb2f   :  { %v6459_v9 = vpop.permute.xlu1 %6458  ;;  %6221 = vst.msk [vmem:[#allocation3 + $0x98] sm:$0xff] %vm401_vm4, %v6197_v12 }
 0xb30   :  { %6482 = vst.msk [vmem:[#allocation3 + $0x80] sm:$0xff] %vm13273_vm11, %v6459_v9  ;;  %vm13281_vm11 = vmmov %vm13276_vm9 }
 0xb31   :  { %6483 = vst.msk [vmem:[#allocation3 + $0x88] sm:$0xff] %vm13274_vm7, %v6459_v9  ;;  %5693 = vrot.lane.b32.xlu1 %v11804_v17, %s9378_s0  ;;  %vm13282_vm7 = vmmov %vm13278_vm2 }
 0xb32   :  { %6549 = vst.msk [vmem:[#allocation3 + $0x88] sm:$0xff] %vm13275_vm6, %v6531_v36  ;;  %v6333_v51 = vpop.permute.xlu0 %6332  ;;  %vm13283_vm6 = vmmov %vm13279_vm3 }
 0xb33   :  { %v6069_v28 = vpop.permute.xlu1 %6068 }
 0xb34   :  { %6086 = vst.msk [vmem:[#allocation3 + $0x90] sm:$0xff] %vm269_vm5, %v6069_v28 }
 0xb36   :  { %v6397_v1 = vpop.permute.xlu0 %6396 }
 0xb37   :  { %v6133_v10 = vpop.permute.xlu1 %6132  ;;  %v6568_v23 = vld [vmem:[#allocation3 + $0x80] sm:$0xff] }
 0xb38   :  { %6150 = vst.msk [vmem:[#allocation3 + $0x90] sm:$0xff] %vm334_vm8, %v6133_v10  ;;  %6847 = vmatprep.mubr.bf16.mxu1 %v6568_v23 }
 0xb39   :  { %v6569_v42 = vld [vmem:[#allocation3 + $0x88] sm:$0xff]  ;;  %6220 = vst.msk [vmem:[#allocation3 + $0x90] sm:$0xff] %vm399_vm10, %v6197_v12  ;;  %6848 = vmatmul.mubr.bf16.gmra.mrb[84].mxu1 %v6567_v29 }
 0xb3a   :  { %8712 = vmatmul.mubr.bf16.gmra.mrb[88].mxu0 %v6569_v42  ;;  %v6461_v8 = vpop.permute.xlu0 %6460  ;;  %v13297_v42 = vld [vmem:[#allocation17_spill] sm:$0xff] }
 0xb3b   :  { %v6269_v30 = vpop.permute.xlu1 %6268  ;;  %6485 = vst.msk [vmem:[#allocation3 + $0xa0] sm:$0xff] %vm13277_vm0, %v6461_v8 }
 0xb3c   :  { %6286 = vst.msk [vmem:[#allocation3 + $0x98] sm:$0xff] %vm13276_vm9, %v6269_v30  ;;  %vm13286_vm9 = vcmask 556288  }
 0xb3d   :  { %6350 = vst.msk [vmem:[#allocation3 + $0x98] sm:$0xff] %vm13278_vm2, %v6333_v51  ;;  %vm2070_vm2 = vcmask 785408  }
 0xb3e   :  { %6414 = vst.msk [vmem:[#allocation3 + $0x98] sm:$0xff] %vm13279_vm3, %v6397_v1  ;;  %v6071_v25 = vpop.permute.xlu0 %6070 }
 0xb3f   :  { %6484 = vst.msk [vmem:[#allocation3 + $0x98] sm:$0xff] %vm13280_vm12, %v6461_v8  ;;  %v6199_v17 = vpop.permute.xlu1 %6198 }
 0xb40   :  { %6223 = vst.msk [vmem:[#allocation3 + $0xb0] sm:$0xff] %vm401_vm4, %v6199_v17  ;;  %v6570_v13 = vld [vmem:[#allocation3 + $0x90] sm:$0xff]  ;;  %vm13284_vm4 = vmmov %vm13280_vm12 }
 0xb41   :  { %6087 = vst.msk [vmem:[#allocation3 + $0xa8] sm:$0xff] %vm269_vm5, %v6071_v25  ;;  %vm13285_vm5 = vmmov %vm13277_vm0 }
 0xb42   :  { %v6271_v34 = vpop.permute.xlu0 %6270  ;;  %vm13287_vm0 = vmmov %vm13286_vm9 }
 0xb43   :  { %v6335_v2 = vpop.permute.xlu1 %6334  ;;  %6287 = vst.msk [vmem:[#allocation3 + $0xb0] sm:$0xff] %vm13281_vm11, %v6271_v34  ;;  %vm13290_vm3 = vmmov %vm13285_vm5 }
 0xb44   :  { %6351 = vst.msk [vmem:[#allocation3 + $0xb0] sm:$0xff] %vm13282_vm7, %v6335_v2  ;;  %vm13292_vm12 = vmmov %vm13290_vm3  ;;  %v13299_v2 = vld [vmem:[#allocation19_spill] sm:$0xff] }
 0xb45   :  { %vm13294_vm11 = vmmov %vm13290_vm3 }
 0xb46   :  { %v6571_v47 = vld [vmem:[#allocation3 + $0x98] sm:$0xff]  ;;  %v6135_v59 = vpop.permute.xlu0 %6134  ;;  %vm13296_vm7 = vmmov %vm13290_vm3 }
 0xb47   :  { %v6399_v33 = vpop.permute.xlu1 %6398  ;;  %6855 = vmatprep.mubr.bf16.mxu1 %v6571_v47  ;;  %6151 = vst.msk [vmem:[#allocation3 + $0xa8] sm:$0xff] %vm334_vm8, %v6135_v59  ;;  %vm13288_vm8 = vmmov %vm13285_vm5 }
 0xb48   :  { %6415 = vst.msk [vmem:[#allocation3 + $0xb0] sm:$0xff] %vm13283_vm6, %v6399_v33  ;;  %6856 = vmatmul.mubr.bf16.gmra.mrb[88].mxu1 %v6570_v13  ;;  %vm13298_vm6 = vmmov %vm13290_vm3 }
 0xb49   :  { %6222 = vst.msk [vmem:[#allocation3 + $0xa8] sm:$0xff] %vm399_vm10, %v6199_v17  ;;  %vm2067_vm10 = vcmask 523264  }
 0xb4a   :  { %v6533_v20 = vpop.permute.xlu0 %6532 }
 0xb4b   :  { %v6463_v4 = vpop.permute.xlu1 %6462  ;;  %6550 = vst.msk [vmem:[#allocation3 + $0xa0] sm:$0xff] %vm13286_vm9, %v6533_v20  ;;  %vm13304_vm9 = vmmov %vm13290_vm3 }
 0xb4c   :  { %6486 = vst.msk [vmem:[#allocation3 + $0xb0] sm:$0xff] %vm13284_vm4, %v6463_v4  ;;  %vm13300_vm4 = vmmov %vm13290_vm3 }
 0xb4d   :  { %6487 = vst.msk [vmem:[#allocation3 + $0xb8] sm:$0xff] %vm13285_vm5, %v6463_v4  ;;  %vm13302_vm5 = vmmov %vm13290_vm3 }
 0xb4e   :  { %v1830_v38 = vpop.permute.xlu0 %1829 }
 0xb4f   :  { %v6535_v43 = vpop.permute.xlu1 %6534 }
 0xb50   :  { %6551 = vst.msk [vmem:[#allocation3 + $0xb8] sm:$0xff] %vm13287_vm0, %v6535_v43  ;;  %v6573_v5 = vld [vmem:[#allocation3 + $0xa8] sm:$0xff]  ;;  %vm13305_vm0 = vmmov %vm13290_vm3 }
 0xb52   :  { %v1864_v40 = vpop.permute.xlu0 %1863  ;;  %v6572_v49 = vld [vmem:[#allocation3 + $0xa0] sm:$0xff] }
 0xb53   :  { %v1832_v48 = vpop.permute.xlu1 %1831  ;;  %v6574_v18 = vld [vmem:[#allocation3 + $0xb0] sm:$0xff]  ;;  %v2065_v3 = vsel %vm13288_vm8, %v1830_v38, %v1864_v40  ;;  %8715 = vmatprep.mubr.bf16.mxu0 %v6572_v49  ;;  %vm13306_vm8 = vmmov %vm13305_vm0 }
 0xb54   :  { %6863 = vmatprep.mubr.bf16.mxu1 %v6574_v18  ;;  %v2068_v63 = vsel %vm2067_vm10, %v2065_v3, %v13289_v24  ;;  %v13301_v38 = vld [vmem:[#allocation18_spill] sm:$0xff]  ;;  %v13303_v3 = vld [vmem:[#allocation20_spill] sm:$0xff] }
 0xb55   :  { %6864 = vmatmul.mubr.bf16.gmra.mrb[92].mxu1 %v6573_v5 }
 0xb56   :  { %v1928_v0 = vpop.permute.xlu0 %1927 }
 0xb57   :  { %v1866_v32 = vpop.permute.xlu1 %1865  ;;  %v6575_v14 = vld [vmem:[#allocation3 + $0xb8] sm:$0xff]  ;;  %v2071_v16 = vsel %vm2070_vm2, %v2068_v63, %v1928_v0 }
 0xb58   :  { %v2066_v21 = vsel %vm13290_vm3, %v1832_v48, %v1866_v32  ;;  %8716 = vmatmul.mubr.bf16.gmra.mrb[92].mxu0 %v6575_v14  ;;  %2079 = vst [vmem:[#allocation5] sm:$0xff] %v2071_v16  ;;  %vm13307_vm3 = vmmov %vm13305_vm0 }
 0xb59   :  { %v2069_v41 = vsel %vm2067_vm10, %v2066_v21, %v13291_v27 }
 0xb5a   :  { %v1962_v54 = vpop.permute.xlu0 %1961 }
 0xb5b   :  { %v1930_v37 = vpop.permute.xlu1 %1929 }
 0xb5c   :  { %v2072_v56 = vsel %vm2070_vm2, %v2069_v41, %v1930_v37 }
 0xb5d   :  { %2081 = vst [vmem:[#allocation5 + $0x10] sm:$0xff] %v2072_v56 }
 0xb5e   :  { %v1996_v61 = vpop.permute.xlu0 %1995 }
 0xb5f   :  { %v1964_v31 = vpop.permute.xlu1 %1963  ;;  %v2073_v26 = vsel %vm13292_vm12, %v1962_v54, %v1996_v61  ;;  %vm13308_vm12 = vmmov %vm13305_vm0 }
 0xb60   :  { %v2075_v58 = vsel %vm2067_vm10, %v2073_v26, %v13293_v6 }
 0xb62   :  { %v2060_v11 = vpop.permute.xlu0 %2059 }
 0xb63   :  { %v1998_v53 = vpop.permute.xlu1 %1997  ;;  %v2077_v36 = vsel %vm2070_vm2, %v2075_v58, %v2060_v11 }
 0xb64   :  { %v2074_v35 = vsel %vm13294_vm11, %v1964_v31, %v1998_v53  ;;  %2080 = vst [vmem:[#allocation5 + $0x8] sm:$0xff] %v2077_v36  ;;  %vm13309_vm11 = vmmov %vm13305_vm0 }
 0xb65   :  { %v2076_v9 = vsel %vm2067_vm10, %v2074_v35, %v13295_v57 }
 0xb66   :  { %v3762_v28 = vpop.permute.xlu0 %3761 }
 0xb67   :  { %v2062_v12 = vpop.permute.xlu1 %2061 }
 0xb68   :  { %v2078_v51 = vsel %vm2070_vm2, %v2076_v9, %v2062_v12 }
 0xb69   :  { %2082 = vst [vmem:[#allocation5 + $0x18] sm:$0xff] %v2078_v51 }
 0xb6a   :  { %v3796_v1 = vpop.permute.xlu0 %3795 }
 0xb6b   :  { %v3764_v10 = vpop.permute.xlu1 %3763  ;;  %v3997_v23 = vsel %vm13296_vm7, %v3762_v28, %v3796_v1  ;;  %vm13310_vm7 = vmmov %vm13305_vm0  ;;  %v12227_v28 = vld [vmem:[%s12938_s2] ss:$0 sm:$0xff]  ;;  %s9379_s2 = smov [#allocation5]  }
 0xb6c   :  { %v3999_v30 = vsel %vm2067_vm10, %v3997_v23, %v13297_v42  ;;  %s7883_s11 = sshll.u32 %s9379_s2, 4  ;;  %s7884_s11 = int_to_ptr.vmem [resolvable:$true] %s7883_s11 }
 0xb6d   :  { %s9342_s13 = scalar_lea.vmem %s7884_s11, 2048  ;;  %p9347_p1 = scmp.lt.s32.totalorder %s7884_s11, %s7884_s11 }
 0xb6e   :  { %v3860_v8 = vpop.permute.xlu0 %3859  ;;  %p9343_p0 = scmp.ne.s32.totalorder %s7884_s11, %s9342_s13  ;;  %p9348_p2 = scmp.lt.s32.totalorder %s9342_s13, %s9342_s13 }
 0xb6f   :  { %v3798_v29 = vpop.permute.xlu1 %3797  ;;  %v4001_v25 = vsel %vm2070_vm2, %v3999_v30, %v3860_v8 }
 0xb70   :  { %v3998_v17 = vsel %vm13298_vm6, %v3764_v10, %v3798_v29  ;;  %4009 = vst [vmem:[#allocation5 + $0x20] sm:$0xff] %v4001_v25  ;;  %vm13311_vm6 = vmmov %vm13305_vm0  ;;  %p9349_p3 = por %p9348_p2, %p9347_p1 }
 0xb71   :  { %v4000_v34 = vsel %vm2067_vm10, %v3998_v17, %v13299_v2 }
 0xb72   :  { %v3894_v33 = vpop.permute.xlu0 %3893  ;;  %p9350_p4 = pnand %p9349_p3, %p9343_p0 }
 0xb73   :  { %v3862_v47 = vpop.permute.xlu1 %3861 }
 0xb74   :  { %v4002_v59 = vsel %vm2070_vm2, %v4000_v34, %v3862_v47 }
 0xb75   :  { %4011 = vst [vmem:[#allocation5 + $0x30] sm:$0xff] %v4002_v59 }
 0xb76   :  { %v3928_v4 = vpop.permute.xlu0 %3927 }
 0xb77   :  { %v3896_v13 = vpop.permute.xlu1 %3895  ;;  %v4003_v20 = vsel %vm13300_vm4, %v3894_v33, %v3928_v4  ;;  %vm13312_vm4 = vmmov %vm13305_vm0 }
 0xb78   :  { %v4005_v48 = vsel %vm2067_vm10, %v4003_v20, %v13301_v38 }
 0xb7a   :  { %v3992_v40 = vpop.permute.xlu0 %3991 }
 0xb7b   :  { %v3930_v43 = vpop.permute.xlu1 %3929  ;;  %v4007_v49 = vsel %vm2070_vm2, %v4005_v48, %v3992_v40 }
 0xb7c   :  { %v4004_v18 = vsel %vm13302_vm5, %v3896_v13, %v3930_v43  ;;  %4010 = vst [vmem:[#allocation5 + $0x28] sm:$0xff] %v4007_v49  ;;  %vm13313_vm5 = vmmov %vm13305_vm0 }
 0xb7d   :  { %v4006_v5 = vsel %vm2067_vm10, %v4004_v18, %v13303_v3 }
 0xb7e   :  { %v5520_v24 = vpop.permute.xlu0 %5519 }
 0xb7f   :  { %v3994_v32 = vpop.permute.xlu1 %3993  ;;  %5567 = vst.msk [vmem:[#allocation4] sm:$0xff] %vm13304_vm9, %v5520_v24  ;;  %vm13314_vm9 = vmmov %vm13305_vm0 }
 0xb80   :  { %v4008_v63 = vsel %vm2070_vm2, %v4006_v5, %v3994_v32 }
 0xb81   :  { %4012 = vst [vmem:[#allocation5 + $0x38] sm:$0xff] %v4008_v63 }
 0xb82   :  { %v5536_v14 = vpop.permute.xlu0 %5535 }
 0xb83   :  { %v5522_v0 = vpop.permute.xlu1 %5521  ;;  %5575 = vst.msk [vmem:[#allocation4 + $0x40] sm:$0xff] %vm13306_vm8, %v5536_v14  ;;  %vm13315_vm8 = vmmov %vm13305_vm0 }
 0xb84   :  { %5568 = vst.msk [vmem:[#allocation4 + $0x8] sm:$0xff] %vm13305_vm0, %v5522_v0 }
 0xb86   :  { %v5524_v16 = vpop.permute.xlu0 %5523 }
 0xb87   :  { %v5538_v21 = vpop.permute.xlu1 %5537  ;;  %5569 = vst.msk [vmem:[#allocation4 + $0x10] sm:$0xff] %vm13308_vm12, %v5524_v16  ;;  %vm13317_vm12 = vmmov %vm13305_vm0 }
 0xb88   :  { %5576 = vst.msk [vmem:[#allocation4 + $0x48] sm:$0xff] %vm13307_vm3, %v5538_v21  ;;  %vm13316_vm3 = vmmov %vm13305_vm0 }
 0xb8b   :  { %v5540_v27 = vpop.permute.xlu1 %5539  ;;  %v5526_v41 = vpop.permute.xlu0 %5525  ;;  %v7082_v24 = vld [vmem:[#allocation4 + $0x8] sm:$0xff] }
 0xb8c   :  { %5577 = vst.msk [vmem:[#allocation4 + $0x50] sm:$0xff] %vm13309_vm11, %v5540_v27  ;;  %vm13318_vm11 = vmmov %vm13305_vm0 }
 0xb8d   :  { %5570 = vst.msk [vmem:[#allocation4 + $0x18] sm:$0xff] %vm13310_vm7, %v5526_v41  ;;  %vm13319_vm7 = vmmov %vm13305_vm0 }
 0xb8f   :  { %v5542_v37 = vpop.permute.xlu1 %5541  ;;  %v5528_v54 = vpop.permute.xlu0 %5527 }
 0xb90   :  { %5578 = vst.msk [vmem:[#allocation4 + $0x58] sm:$0xff] %vm13311_vm6, %v5542_v37  ;;  %vm13320_vm6 = vmmov %vm13305_vm0 }
 0xb91   :  { %5571 = vst.msk [vmem:[#allocation4 + $0x20] sm:$0xff] %vm13312_vm4, %v5528_v54  ;;  %vm13322_vm4 = vmmov %vm13305_vm0 }
 0xb93   :  { %v5544_v56 = vpop.permute.xlu1 %5543  ;;  %v5530_v31 = vpop.permute.xlu0 %5529 }
 0xb94   :  { %5579 = vst.msk [vmem:[#allocation4 + $0x60] sm:$0xff] %vm13313_vm5, %v5544_v56  ;;  %vm13323_vm5 = vmmov %vm13305_vm0 }
 0xb95   :  { %5572 = vst.msk [vmem:[#allocation4 + $0x28] sm:$0xff] %vm13314_vm9, %v5530_v31  ;;  %vm13324_vm9 = vmmov %vm13305_vm0 }
 0xb97   :  { %v5546_v61 = vpop.permute.xlu1 %5545  ;;  %v5532_v26 = vpop.permute.xlu0 %5531 }
 0xb98   :  { %5580 = vst.msk [vmem:[#allocation4 + $0x68] sm:$0xff] %vm13305_vm0, %v5546_v61 }
 0xb99   :  { %5573 = vst.msk [vmem:[#allocation4 + $0x30] sm:$0xff] %vm13315_vm8, %v5532_v26  ;;  %vm13325_vm8 = vmmov %vm13305_vm0 }
 0xb9b   :  { %v5548_v53 = vpop.permute.xlu1 %5547  ;;  %v5534_v6 = vpop.permute.xlu0 %5533 }
 0xb9c   :  { %5581 = vst.msk [vmem:[#allocation4 + $0x70] sm:$0xff] %vm13316_vm3, %v5548_v53  ;;  %vm13326_vm3 = vmmov %vm13305_vm0 }
 0xb9d   :  { %5574 = vst.msk [vmem:[#allocation4 + $0x38] sm:$0xff] %vm13317_vm12, %v5534_v6  ;;  %vm13327_vm12 = vmmov %vm13305_vm0 }
 0xb9f   :  { %v5550_v58 = vpop.permute.xlu1 %5549 }
 0xba0   :  { %5582 = vst.msk [vmem:[#allocation4 + $0x78] sm:$0xff] %vm13318_vm11, %v5550_v58  ;;  %vm13328_vm11 = vmmov %vm13305_vm0 }
 0xbb3   :  { %v8527_v11 = vpop.f32.mrb[64].mxu1 }
 0xbb4   :  { %v8528_v35 = vpop.f32.mrb[65].mxu1 }
 0xbb5   :  { %v8529_v36 = vadd.f32 %v8528_v35, %v8527_v11  ;;  %v8530_v57 = vpop.f32.mrb[66].mxu1 }
 0xbb6   :  { %v8531_v9 = vpop.f32.mrb[67].mxu1 }
 0xbb7   :  { %v8532_v12 = vadd.f32 %v8531_v9, %v8530_v57  ;;  %v6810_v1 = vadd.f32 %v8529_v36, %v12227_v28 }
 0xbb9   :  { %v6813_v2 = vadd.f32 %v8532_v12, %v12227_v28 }
 0xbcc   :  { %v8533_v51 = vpop.f32.mrb[68].mxu1 }
 0xbcd   :  { %v8705_v10 = vpop.f32.mrb[80].mxu0  ;;  %v8534_v23 = vpop.f32.mrb[69].mxu1 }
 0xbce   :  { %v6906_v29 = vpop.f32.mrb[81].mxu0  ;;  %v8535_v42 = vadd.f32 %v8534_v23, %v8533_v51  ;;  %v8536_v8 = vpop.f32.mrb[70].mxu1 }
 0xbcf   :  { %v12230_v30 = vadd.f32 %v6906_v29, %v6810_v1  ;;  %v8706_v17 = vpop.f32.mrb[82].mxu0  ;;  %v8537_v25 = vpop.f32.mrb[71].mxu1 }
 0xbd0   :  { %v6909_v34 = vpop.f32.mrb[83].mxu0  ;;  %v6818_v47 = vadd.f32 %v8535_v42, %v12227_v28  ;;  %v8538_v33 = vadd.f32 %v8537_v25, %v8536_v8 }
 0xbd1   :  { %9214 = vtanh.f32 %v12230_v30  ;;  %v12235_v59 = vadd.f32 %v6909_v34, %v6813_v2 }
 0xbd2   :  { %v12237_v13 = vadd.f32 %v8705_v10, %v6818_v47  ;;  %v6821_v4 = vadd.f32 %v8538_v33, %v12227_v28 }
 0xbd3   :  { %9216 = vtanh.f32 %v12235_v59 }
 0xbd4   :  { %9218 = vtanh.f32 %v12237_v13  ;;  %v12242_v20 = vadd.f32 %v8706_v17, %v6821_v4 }
 0xbd6   :  { %9220 = vtanh.f32 %v12242_v20 }
 0xbdb   :  { %v9215_v43 = vpop.eup %9214  ;;  %v8539_v38 = vpop.f32.mrb[72].mxu1 }
 0xbdc   :  { %7193 = vrot.lane.b32.xlu0 %v9215_v43, %s9375_s7  ;;  %v8540_v48 = vpop.f32.mrb[73].mxu1 }
 0xbdd   :  { %v8541_v40 = vadd.f32 %v8540_v48, %v8539_v38  ;;  %v8542_v18 = vpop.f32.mrb[74].mxu1  ;;  %v9217_v49 = vpop.eup %9216 }
 0xbde   :  { %v8543_v3 = vpop.f32.mrb[75].mxu1  ;;  %v9219_v5 = vpop.eup %9218  ;;  %7195 = vrot.lane.b32.xlu1 %v9217_v49, %s9375_s7 }
 0xbdf   :  { %v8544_v32 = vadd.f32 %v8543_v3, %v8542_v18  ;;  %v6826_v21 = vadd.f32 %v8541_v40, %v12227_v28 }
 0xbe0   :  { %7197 = vrot.lane.b32.xlu0 %v9219_v5, %s9375_s7  ;;  %v9221_v63 = vpop.eup %9220 }
 0xbe1   :  { %v6829_v61 = vadd.f32 %v8544_v32, %v12227_v28 }
 0xbe2   :  { %7115 = vrot.lane.b32.xlu1 %v7082_v24, %s9375_s7 }
 0xbe4   :  { %7199 = vrot.lane.b32.xlu0 %v9221_v63, %s9375_s7 }
 0xbeb   :  { %v8545_v0 = vpop.f32.mrb[76].mxu1  ;;  %v8709_v14 = vpop.f32.mrb[84].mxu0 }
 0xbec   :  { %v8546_v16 = vpop.f32.mrb[77].mxu1  ;;  %v6922_v27 = vpop.f32.mrb[85].mxu0 }
 0xbed   :  { %v8547_v41 = vadd.f32 %v8546_v16, %v8545_v0  ;;  %v12251_v37 = vadd.f32 %v6922_v27, %v6826_v21  ;;  %v8548_v54 = vpop.f32.mrb[78].mxu1  ;;  %v8710_v56 = vpop.f32.mrb[86].mxu0 }
 0xbee   :  { %v8549_v31 = vpop.f32.mrb[79].mxu1  ;;  %v6925_v26 = vpop.f32.mrb[87].mxu0 }
 0xbef   :  { %v6834_v53 = vadd.f32 %v8547_v41, %v12227_v28  ;;  %9222 = vtanh.f32 %v12251_v37  ;;  %v8550_v6 = vadd.f32 %v8549_v31, %v8548_v54  ;;  %v12256_v58 = vadd.f32 %v6925_v26, %v6829_v61  ;;  %v7089_v26 = vld [vmem:[#allocation4 + $0x40] sm:$0xff] }
 0xbf1   :  { %v12258_v11 = vadd.f32 %v8709_v14, %v6834_v53  ;;  %v6837_v35 = vadd.f32 %v8550_v6, %v12227_v28  ;;  %9224 = vtanh.f32 %v12256_v58  ;;  %v7083_v6 = vld [vmem:[#allocation4 + $0x10] sm:$0xff] }
 0xbf3   :  { %v12261_v36 = vadd.f32 %v8710_v56, %v6837_v35  ;;  %9226 = vtanh.f32 %v12258_v11  ;;  %v7081_v56 = vld [vmem:[#allocation4] sm:$0xff] }
 0xbf5   :  { %9228 = vtanh.f32 %v12261_v36 }
 0xbf9   :  { %v9223_v57 = vpop.eup %9222 }
 0xbfa   :  { %7201 = vrot.lane.b32.xlu0 %v9223_v57, %s9375_s7 }
 0xbfb   :  { %v8551_v9 = vpop.f32.mrb[80].mxu1  ;;  %v9225_v51 = vpop.eup %9224 }
 0xbfc   :  { %v8552_v12 = vpop.f32.mrb[81].mxu1 }
 0xbfd   :  { %v8553_v10 = vadd.f32 %v8552_v12, %v8551_v9  ;;  %v8554_v1 = vpop.f32.mrb[82].mxu1  ;;  %v9227_v42 = vpop.eup %9226 }
 0xbfe   :  { %7203 = vrot.lane.b32.xlu0 %v9225_v51, %s9375_s7  ;;  %v8555_v23 = vpop.f32.mrb[83].mxu1  ;;  %v7084_v51 = vld [vmem:[#allocation4 + $0x18] sm:$0xff] }
 0xbff   :  { %v8556_v29 = vadd.f32 %v8555_v23, %v8554_v1  ;;  %v9229_v8 = vpop.eup %9228  ;;  %v6842_v2 = vadd.f32 %v8553_v10, %v12227_v28 }
 0xc01   :  { %v6845_v40 = vadd.f32 %v8556_v29, %v12227_v28 }
 0xc02   :  { %7205 = vrot.lane.b32.xlu0 %v9227_v42, %s9375_s7 }
 0xc06   :  { %7207 = vrot.lane.b32.xlu0 %v9229_v8, %s9375_s7 }
 0xc0c   :  { %v8557_v17 = vpop.f32.mrb[84].mxu1 }
 0xc0d   :  { %v8713_v25 = vpop.f32.mrb[88].mxu0  ;;  %v8558_v34 = vpop.f32.mrb[85].mxu1 }
 0xc0e   :  { %v6938_v47 = vpop.f32.mrb[89].mxu0  ;;  %v8559_v33 = vadd.f32 %v8558_v34, %v8557_v17  ;;  %v8560_v43 = vpop.f32.mrb[86].mxu1 }
 0xc0f   :  { %v12271_v4 = vadd.f32 %v6938_v47, %v6842_v2  ;;  %v8714_v38 = vpop.f32.mrb[90].mxu0  ;;  %v8561_v48 = vpop.f32.mrb[87].mxu1 }
 0xc10   :  { %v6941_v18 = vpop.f32.mrb[91].mxu0  ;;  %v6850_v49 = vadd.f32 %v8559_v33, %v12227_v28  ;;  %v8562_v3 = vadd.f32 %v8561_v48, %v8560_v43  ;;  %v7085_v43 = vld [vmem:[#allocation4 + $0x20] sm:$0xff] }
 0xc11   :  { %9230 = vtanh.f32 %v12271_v4  ;;  %v12276_v5 = vadd.f32 %v6941_v18, %v6845_v40  ;;  %v7086_v18 = vld [vmem:[#allocation4 + $0x28] sm:$0xff] }
 0xc12   :  { %v12278_v32 = vadd.f32 %v8713_v25, %v6850_v49  ;;  %v6853_v24 = vadd.f32 %v8562_v3, %v12227_v28  ;;  %v8098_v49 = vmul.f32 -1.442695, %v12237_v13 }
 0xc13   :  { %9232 = vtanh.f32 %v12276_v5 }
 0xc14   :  { %v12282_v63 = vadd.f32 %v8714_v38, %v6853_v24  ;;  %9234 = vtanh.f32 %v12278_v32  ;;  %v8096_v38 = vmul.f32 -1.442695, %v12230_v30  ;;  %v8099_v30 = vmul.f32 -1.442695, %v12242_v20  ;;  %v7088_v24 = vld [vmem:[#allocation4 + $0x38] sm:$0xff] }
 0xc16   :  { %9236 = vtanh.f32 %v12282_v63 }
 0xc1b   :  { %v9231_v0 = vpop.eup %9230  ;;  %v8563_v14 = vpop.f32.mrb[88].mxu1 }
 0xc1c   :  { %7209 = vrot.lane.b32.xlu0 %v9231_v0, %s9375_s7  ;;  %v8564_v21 = vpop.f32.mrb[89].mxu1 }
 0xc1d   :  { %v9233_v16 = vpop.eup %9232  ;;  %v8565_v27 = vadd.f32 %v8564_v21, %v8563_v14  ;;  %v8566_v41 = vpop.f32.mrb[90].mxu1 }
 0xc1e   :  { %7211 = vrot.lane.b32.xlu1 %v9233_v16, %s9375_s7  ;;  %v8567_v54 = vpop.f32.mrb[91].mxu1  ;;  %v9235_v61 = vpop.eup %9234 }
 0xc1f   :  { %v8568_v31 = vadd.f32 %v8567_v54, %v8566_v41  ;;  %v6858_v23 = vadd.f32 %v8565_v27, %v12227_v28  ;;  %v8097_v41 = vmul.f32 -1.442695, %v12235_v59  ;;  %v7091_v59 = vld [vmem:[#allocation4 + $0x50] sm:$0xff] }
 0xc20   :  { %7113 = vrot.lane.b32.xlu0 %v7081_v56, %s9375_s7  ;;  %v9237_v53 = vpop.eup %9236 }
 0xc21   :  { %v6861_v2 = vadd.f32 %v8568_v31, %v12227_v28  ;;  %v12322_v31 = vpop.permute.xlu0 %5691 }
 0xc22   :  { %7213 = vrot.lane.b32.xlu1 %v9235_v61, %s9375_s7  ;;  %v7090_v61 = vld [vmem:[#allocation4 + $0x48] sm:$0xff] }
 0xc24   :  { %7129 = vrot.lane.b32.xlu0 %v7089_v26, %s9375_s7  ;;  %v8100_v26 = vmul.f32 -1.442695, %v12251_v37 }
 0xc26   :  { %7215 = vrot.lane.b32.xlu1 %v9237_v53, %s9375_s7 }
 0xc28   :  { %7117 = vrot.lane.b32.xlu0 %v7083_v6, %s9375_s7  ;;  %v8569_v35 = vpop.f32.mrb[92].mxu1 }
 0xc29   :  { %v8570_v57 = vpop.f32.mrb[93].mxu1 }
 0xc2a   :  { %v8571_v9 = vadd.f32 %v8570_v57, %v8569_v35  ;;  %v8572_v12 = vpop.f32.mrb[94].mxu1  ;;  %v8101_v57 = vmul.f32 -1.442695, %v12256_v58 }
 0xc2b   :  { %v8573_v10 = vpop.f32.mrb[95].mxu1  ;;  %v8717_v1 = vpop.f32.mrb[92].mxu0 }
 0xc2c   :  { %7119 = vrot.lane.b32.xlu0 %v7084_v51, %s9375_s7  ;;  %v8574_v29 = vadd.f32 %v8573_v10, %v8572_v12  ;;  %v6866_v42 = vadd.f32 %v8571_v9, %v12227_v28  ;;  %v6954_v8 = vpop.f32.mrb[93].mxu0  ;;  %v7092_v51 = vld [vmem:[#allocation4 + $0x58] sm:$0xff] }
 0xc2d   :  { %v12296_v17 = vadd.f32 %v6954_v8, %v6858_v23  ;;  %v8718_v25 = vpop.f32.mrb[94].mxu0  ;;  %v7093_v8 = vld [vmem:[#allocation4 + $0x60] sm:$0xff] }
 0xc2e   :  { %v12299_v34 = vadd.f32 %v8717_v1, %v6866_v42  ;;  %v6869_v47 = vadd.f32 %v8574_v29, %v12227_v28  ;;  %v6957_v33 = vpop.f32.mrb[95].mxu0  ;;  %v7087_v28 = vld [vmem:[#allocation4 + $0x30] sm:$0xff]  ;;  %v8102_v1 = vmul.f32 -1.442695, %v12258_v11  ;;  %v7094_v11 = vld [vmem:[#allocation4 + $0x68] sm:$0xff] }
 0xc2f   :  { %9238 = vtanh.f32 %v12296_v17  ;;  %v12304_v48 = vadd.f32 %v6957_v33, %v6861_v2  ;;  %v12344_v33 = vpop.permute.xlu1 %5693 }
 0xc30   :  { %7121 = vrot.lane.b32.xlu0 %v7085_v43, %s9375_s7  ;;  %v12307_v40 = vadd.f32 %v8718_v25, %v6869_v47  ;;  %9240 = vpow2.f32 %v8096_v38  ;;  %v7095_v43 = vld [vmem:[#allocation4 + $0x70] sm:$0xff] }
 0xc31   :  { %9242 = vtanh.f32 %v12304_v48 }
 0xc32   :  { %9244 = vpow2.f32 %v8098_v49 }
 0xc33   :  { %9246 = vtanh.f32 %v12299_v34 }
 0xc34   :  { %7123 = vrot.lane.b32.xlu0 %v7086_v18, %s9375_s7  ;;  %9248 = vpow2.f32 %v8099_v30 }
 0xc35   :  { %9250 = vtanh.f32 %v12307_v40 }
 0xc38   :  { %7125 = vrot.lane.b32.xlu0 %v7087_v28, %s9375_s7  ;;  %v7096_v28 = vld [vmem:[#allocation4 + $0x78] sm:$0xff] }
 0xc39   :  { %v9239_v3 = vpop.eup %9238 }
 0xc3a   :  { %7217 = vrot.lane.b32.xlu1 %v9239_v3, %s9375_s7  ;;  %v9241_v13 = vpop.eup %9240 }
 0xc3b   :  { %v9243_v0 = vpop.eup %9242  ;;  %v7017_v14 = vadd.f32 1.0, %v9241_v13 }
 0xc3c   :  { %7127 = vrot.lane.b32.xlu0 %v7088_v24, %s9375_s7  ;;  %v9245_v21 = vpop.eup %9244 }
 0xc3d   :  { %v9247_v20 = vpop.eup %9246  ;;  %v7019_v16 = vadd.f32 1.0, %v9245_v21  ;;  %9252 = vrcp.f32 %v7017_v14  ;;  %v8104_v21 = vmul.f32 -1.442695, %v12271_v4 }
 0xc3e   :  { %7219 = vrot.lane.b32.xlu1 %v9243_v0, %s9375_s7  ;;  %v9249_v27 = vpop.eup %9248 }
 0xc3f   :  { %v9251_v54 = vpop.eup %9250  ;;  %9254 = vrcp.f32 %v7019_v16  ;;  %v7020_v56 = vadd.f32 1.0, %v9249_v27  ;;  %v8105_v27 = vmul.f32 -1.442695, %v12276_v5  ;;  %v8107_v5 = vmul.f32 -1.442695, %v12282_v63 }
 0xc40   :  { %9256 = vpow2.f32 %v8097_v41  ;;  %v8108_v63 = vmul.f32 -1.442695, %v12296_v17  ;;  %v8109_v17 = vmul.f32 -1.442695, %v12304_v48 }
 0xc41   :  { %9258 = vrcp.f32 %v7020_v56 }
 0xc42   :  { %7221 = vrot.lane.b32.xlu1 %v9247_v20, %s9375_s7  ;;  %9260 = vpow2.f32 %v8100_v26  ;;  %v8106_v26 = vmul.f32 -1.442695, %v12278_v32 }
 0xc43   :  { %9262 = vpow2.f32 %v8101_v57 }
 0xc44   :  { %9264 = vpow2.f32 %v8102_v1 }
 0xc46   :  { %7223 = vrot.lane.b32.xlu1 %v9251_v54, %s9375_s7  ;;  %v8103_v54 = vmul.f32 -1.442695, %v12261_v36 }
 0xc47   :  { %v12326_v53 = vpop.eup %9252 }
 0xc49   :  { %v12332_v9 = vpop.eup %9254 }
 0xc4a   :  { %7131 = vrot.lane.b32.xlu1 %v7090_v61, %s9375_s7  ;;  %v9257_v10 = vpop.eup %9256 }
 0xc4b   :  { %v12338_v23 = vpop.eup %9258  ;;  %v7018_v42 = vadd.f32 1.0, %v9257_v10 }
 0xc4c   :  { %v9261_v25 = vpop.eup %9260 }
 0xc4d   :  { %9266 = vrcp.f32 %v7018_v42  ;;  %v7021_v2 = vadd.f32 1.0, %v9261_v25  ;;  %v9263_v47 = vpop.eup %9262 }
 0xc4e   :  { %v7194_v6 = vpop.permute.xlu0 %7193  ;;  %7133 = vrot.lane.b32.xlu1 %v7091_v59, %s9375_s7  ;;  %v7022_v38 = vadd.f32 1.0, %v9263_v47  ;;  %v9265_v18 = vpop.eup %9264 }
 0xc4f   :  { %v7241_v35 = vmul.f32 %v12326_v53, %v7194_v6  ;;  %9268 = vrcp.f32 %v7021_v2  ;;  %v7023_v3 = vadd.f32 1.0, %v9265_v18 }
 0xc50   :  { %v7196_v49 = vpop.permute.xlu1 %7195  ;;  %9270 = vrcp.f32 %v7022_v38 }
 0xc51   :  { %7273 = vrot.lane.b32.xlu0 %v7241_v35, %s9375_s7  ;;  %9272 = vrcp.f32 %v7023_v3 }
 0xc52   :  { %v7198_v12 = vpop.permute.xlu0 %7197  ;;  %7135 = vrot.lane.b32.xlu1 %v7092_v51, %s9375_s7  ;;  %9274 = vpow2.f32 %v8104_v21 }
 0xc53   :  { %v7243_v37 = vmul.f32 %v12332_v9, %v7198_v12  ;;  %9276 = vpow2.f32 %v8105_v27 }
 0xc54   :  { %9278 = vpow2.f32 %v8103_v54 }
 0xc55   :  { %7277 = vrot.lane.b32.xlu0 %v7243_v37, %s9375_s7  ;;  %9280 = vpow2.f32 %v8106_v26 }
 0xc56   :  { %v7200_v58 = vpop.permute.xlu0 %7199  ;;  %7137 = vrot.lane.b32.xlu1 %v7093_v8, %s9375_s7  ;;  %9282 = vpow2.f32 %v8107_v5 }
 0xc57   :  { %v7244_v29 = vmul.f32 %v12338_v23, %v7200_v58  ;;  %v12348_v30 = vpop.eup %9266  ;;  %v12369_v58 = vpop.permute.xlu1 %7115 }
 0xc58   :  { %v7242_v24 = vmul.f32 %v12348_v30, %v7196_v49 }
 0xc59   :  { %7279 = vrot.lane.b32.xlu0 %v7244_v29, %s9375_s7  ;;  %v12352_v13 = vpop.eup %9268 }
 0xc5a   :  { %7139 = vrot.lane.b32.xlu1 %v7094_v11, %s9375_s7  ;;  %v12357_v20 = vpop.eup %9270 }
 0xc5b   :  { %v12363_v56 = vpop.eup %9272 }
 0xc5c   :  { %v9275_v6 = vpop.eup %9274 }
 0xc5d   :  { %v9277_v36 = vpop.eup %9276  ;;  %v7025_v35 = vadd.f32 1.0, %v9275_v6 }
 0xc5e   :  { %7141 = vrot.lane.b32.xlu1 %v7095_v43, %s9375_s7  ;;  %v9279_v59 = vpop.eup %9278  ;;  %v7026_v57 = vadd.f32 1.0, %v9277_v36 }
 0xc5f   :  { %v9281_v12 = vpop.eup %9280  ;;  %v7024_v37 = vadd.f32 1.0, %v9279_v59  ;;  %9284 = vrcp.f32 %v7025_v35 }
 0xc60   :  { %v7027_v51 = vadd.f32 1.0, %v9281_v12  ;;  %9286 = vrcp.f32 %v7026_v57  ;;  %v9283_v32 = vpop.eup %9282 }
 0xc61   :  { %9288 = vrcp.f32 %v7024_v37  ;;  %v7028_v1 = vadd.f32 1.0, %v9283_v32 }
 0xc62   :  { %7143 = vrot.lane.b32.xlu1 %v7096_v28, %s9375_s7  ;;  %9290 = vrcp.f32 %v7027_v51 }
 0xc63   :  { %9292 = vrcp.f32 %v7028_v1 }
 0xc64   :  { %9294 = vpow2.f32 %v8108_v63 }
 0xc65   :  { %9296 = vpow2.f32 %v8109_v17 }
 0xc66   :  { %7275 = vrot.lane.b32.xlu1 %v7242_v24, %s9375_s7  ;;  %v8110_v24 = vmul.f32 -1.442695, %v12299_v34 }
 0xc68   :  { %9298 = vpow2.f32 %v8110_v24 }
 0xc69   :  { %v12371_v29 = vpop.eup %9284 }
 0xc6a   :  { %v12375_v25 = vpop.eup %9286 }
 0xc6b   :  { %v12378_v2 = vpop.eup %9288 }
 0xc6c   :  { %v7202_v0 = vpop.permute.xlu0 %7201  ;;  %v12383_v38 = vpop.eup %9290 }
 0xc6d   :  { %v7245_v14 = vmul.f32 %v12352_v13, %v7202_v0  ;;  %v12389_v3 = vpop.eup %9292 }
 0xc6e   :  { %v9295_v48 = vpop.eup %9294 }
 0xc6f   :  { %7281 = vrot.lane.b32.xlu0 %v7245_v14, %s9375_s7  ;;  %v7029_v27 = vadd.f32 1.0, %v9295_v48 }
 0xc70   :  { %v7204_v16 = vpop.permute.xlu0 %7203 }
 0xc71   :  { %v7246_v41 = vmul.f32 %v12357_v20, %v7204_v16  ;;  %v8111_v16 = vmul.f32 -1.442695, %v12307_v40 }
 0xc73   :  { %7283 = vrot.lane.b32.xlu0 %v7246_v41, %s9375_s7  ;;  %9300 = vpow2.f32 %v8111_v16 }
 0xc74   :  { %v7206_v61 = vpop.permute.xlu0 %7205  ;;  %9302 = vrcp.f32 %v7029_v27 }
 0xc75   :  { %v7247_v4 = vmul.f32 %v12363_v56, %v7206_v61 }
 0xc77   :  { %7285 = vrot.lane.b32.xlu0 %v7247_v4, %s9375_s7 }
 0xc78   :  { %v7208_v10 = vpop.permute.xlu0 %7207 }
 0xc79   :  { %v7248_v43 = vmul.f32 %v12378_v2, %v7208_v10 }
 0xc8e   :  { %v7210_v42 = vpop.permute.xlu0 %7209 }
 0xc8f   :  { %v7249_v8 = vmul.f32 %v12371_v29, %v7210_v42 }
 0xc90   :  { %v7212_v11 = vpop.permute.xlu1 %7211 }
 0xc91   :  { %7289 = vrot.lane.b32.xlu0 %v7249_v8, %s9375_s7  ;;  %v7250_v47 = vmul.f32 %v12375_v25, %v7212_v11 }
 0xc92   :  { %v7114_v49 = vpop.permute.xlu0 %7113 }
 0xc93   :  { %7291 = vrot.lane.b32.xlu1 %v7250_v47, %s9375_s7  ;;  %v7161_v42 = vmul.f32 %v12326_v53, %v7114_v49 }
 0xc94   :  { %v7214_v18 = vpop.permute.xlu1 %7213 }
 0xc95   :  { %7287 = vrot.lane.b32.xlu0 %v7248_v43, %s9375_s7  ;;  %v7251_v28 = vmul.f32 %v12383_v38, %v7214_v18 }
 0xc96   :  { %v12395_v21 = vpop.permute.xlu0 %7129 }
 0xc97   :  { %7293 = vrot.lane.b32.xlu1 %v7251_v28, %s9375_s7 }
 0xc98   :  { %v7216_v0 = vpop.permute.xlu1 %7215 }
 0xc99   :  { %5725 = vrot.lane.b32.xlu0 %v11706_v60, %s9377_s4  ;;  %v7252_v14 = vmul.f32 %v12389_v3, %v7216_v0  ;;  %v9297_v60 = vpop.eup %9296  ;;  %v7162_v0 = vmul.f32 %v12348_v30, %v12369_v58 }
 0xc9a   :  { %v7118_v34 = vpop.permute.xlu0 %7117  ;;  %v7030_v41 = vadd.f32 1.0, %v9297_v60  ;;  %v9299_v54 = vpop.eup %9298 }
 0xc9b   :  { %7295 = vrot.lane.b32.xlu1 %v7252_v14, %s9375_s7  ;;  %v7031_v40 = vadd.f32 1.0, %v9299_v54  ;;  %v7163_v43 = vmul.f32 %v12332_v9, %v7118_v34 }
 0xc9c   :  { %9304 = vrcp.f32 %v7030_v41 }
 0xc9d   :  { %5789 = vrot.lane.b32.xlu0 %v11709_v39, %s9375_s7  ;;  %v9301_v39 = vpop.eup %9300  ;;  %9306 = vrcp.f32 %v7031_v40 }
 0xc9e   :  { %v7120_v61 = vpop.permute.xlu0 %7119  ;;  %v12407_v26 = vpop.eup %9302 }
 0xc9f   :  { %v7164_v16 = vmul.f32 %v12338_v23, %v7120_v61 }
 0xca1   :  { %5823 = vrot.lane.b32.xlu0 %v11712_v55, %s9378_s0  ;;  %v7032_v55 = vadd.f32 1.0, %v9301_v39 }
 0xca2   :  { %v7122_v5 = vpop.permute.xlu0 %7121 }
 0xca3   :  { %9308 = vrcp.f32 %v7032_v55  ;;  %v7165_v60 = vmul.f32 %v12352_v13, %v7122_v5 }
 0xca5   :  { %5857 = vrot.lane.b32.xlu0 %v11715_v19, %s9377_s4 }
 0xca6   :  { %v12411_v19 = vpop.eup %9304  ;;  %v7124_v36 = vpop.permute.xlu0 %7123 }
 0xca7   :  { %v12415_v59 = vpop.eup %9306 }
 0xca9   :  { %5921 = vrot.lane.b32.xlu0 %v11699_v44, %s9375_s7 }
 0xcaa   :  { %v7126_v37 = vpop.permute.xlu0 %7125 }
 0xcac   :  { %v7218_v4 = vpop.permute.xlu1 %7217 }
 0xcad   :  { %v7253_v6 = vmul.f32 %v12407_v26, %v7218_v4  ;;  %v12419_v51 = vpop.eup %9308  ;;  %v7167_v4 = vmul.f32 %v12363_v56, %v7126_v37 }
 0xcae   :  { %v12423_v1 = vpop.permute.xlu0 %7127 }
 0xcaf   :  { %7297 = vrot.lane.b32.xlu1 %v7253_v6, %s9375_s7 }
 0xcb0   :  { %v7220_v35 = vpop.permute.xlu1 %7219 }
 0xcb1   :  { %v7254_v44 = vmul.f32 %v12411_v19, %v7220_v35 }
 0xcb3   :  { %7299 = vrot.lane.b32.xlu1 %v7254_v44, %s9375_s7  ;;  %v7169_v44 = vmul.f32 %v12371_v29, %v12395_v21 }
 0xcb4   :  { %v7222_v57 = vpop.permute.xlu1 %7221 }
 0xcb5   :  { %v7255_v12 = vmul.f32 %v12415_v59, %v7222_v57 }
 0xcb7   :  { %7301 = vrot.lane.b32.xlu1 %v7255_v12, %s9375_s7 }
 0xcb8   :  { %v7224_v32 = vpop.permute.xlu1 %7223 }
 0xcb9   :  { %v7256_v10 = vmul.f32 %v12419_v51, %v7224_v32  ;;  %v7168_v32 = vmul.f32 %v12378_v2, %v12423_v1 }
 0xcbb   :  { %7303 = vrot.lane.b32.xlu1 %v7256_v10, %s9375_s7 }
 0xcbc   :  { %v12425_v63 = vpop.permute.xlu1 %7131 }
 0xcbd   :  { %v7170_v37 = vmul.f32 %v12375_v25, %v12425_v63 }
 0xcbf   :  { %5727 = vrot.lane.b32.xlu1 %v11807_v7, %s9377_s4 }
 0xcc0   :  { %v12430_v8 = vpop.permute.xlu1 %7133 }
 0xcc3   :  { %v7274_v11 = vpop.permute.xlu0 %7273  ;;  %5791 = vrot.lane.b32.xlu1 %v11810_v50, %s9375_s7 }
 0xcc4   :  { %v7321_v47 = vadd.f32 %v7274_v11, %v7161_v42  ;;  %v12436_v17 = vpop.permute.xlu1 %7135 }
 0xcc5   :  { %v7172_v1 = vmul.f32 %v12389_v3, %v12436_v17 }
 0xcc6   :  { %7449 = vrot.lane.b32.xlu0 %v7321_v47, %s9377_s4  ;;  %9310 = vtanh.f32 %v7321_v47 }
 0xcc7   :  { %v7278_v18 = vpop.permute.xlu0 %7277  ;;  %5825 = vrot.lane.b32.xlu1 %v11813_v52, %s9378_s0 }
 0xcc8   :  { %v7323_v28 = vadd.f32 %v7278_v18, %v7163_v43  ;;  %v12441_v7 = vpop.permute.xlu1 %7137  ;;  %v7171_v43 = vmul.f32 %v12383_v38, %v12430_v8 }
 0xcca   :  { %7453 = vrot.lane.b32.xlu0 %v7323_v28, %s9377_s4 }
 0xccb   :  { %5859 = vrot.lane.b32.xlu1 %v11816_v15, %s9377_s4  ;;  %v7280_v48 = vpop.permute.xlu0 %7279 }
 0xccc   :  { %v12445_v49 = vpop.permute.xlu1 %7139  ;;  %v7324_v15 = vadd.f32 %v7280_v48, %v7164_v16 }
 0xccf   :  { %5923 = vrot.lane.b32.xlu1 %v11801_v45, %s9375_s7  ;;  %v7166_v45 = vmul.f32 %v12357_v20, %v7124_v36 }
 0xcd0   :  { %v12449_v50 = vpop.permute.xlu1 %7141  ;;  %v9311_v34 = vpop.eup %9310 }
 0xcd4   :  { %v12451_v24 = vpop.permute.xlu1 %7143 }
 0xcd8   :  { %v7276_v52 = vpop.permute.xlu1 %7275 }
 0xcd9   :  { %v7322_v14 = vadd.f32 %v7276_v52, %v7162_v0 }
 0xcdb   :  { %9312 = vtanh.f32 %v7322_v14  ;;  %7451 = vrot.lane.b32.xlu1 %v7322_v14, %s9377_s4 }
 0xcdc   :  { %9314 = vtanh.f32 %v7323_v28 }
 0xcdd   :  { %9316 = vtanh.f32 %v7324_v15 }
 0xcdf   :  { %7455 = vrot.lane.b32.xlu1 %v7324_v15, %s9377_s4 }
 0xce1   :  { %v7282_v27 = vpop.permute.xlu0 %7281 }
 0xce2   :  { %v7325_v54 = vadd.f32 %v7282_v27, %v7165_v60  ;;  %v13321_v60 = vld [vmem:[#allocation33_spill] sm:$0xff] }
 0xce3   :  { %7369 = vrot.lane.b32.xlu1 %v9311_v34, %s9375_s7 }
 0xce4   :  { %9318 = vtanh.f32 %v7325_v54 }
 0xce5   :  { %v7284_v58 = vpop.permute.xlu0 %7283  ;;  %v9313_v61 = vpop.eup %9312 }
 0xce6   :  { %v7326_v41 = vadd.f32 %v7284_v58, %v7166_v45  ;;  %7371 = vrot.lane.b32.xlu0 %v9313_v61, %s9375_s7  ;;  %v9315_v39 = vpop.eup %9314  ;;  %v7173_v61 = vmul.f32 %v12407_v26, %v12441_v7 }
 0xce7   :  { %v9317_v5 = vpop.eup %9316 }
 0xce8   :  { %7459 = vrot.lane.b32.xlu1 %v7326_v41, %s9377_s4  ;;  %9320 = vtanh.f32 %v7326_v41 }
 0xce9   :  { %v7286_v40 = vpop.permute.xlu0 %7285 }
 0xcea   :  { %7457 = vrot.lane.b32.xlu0 %v7325_v54, %s9377_s4  ;;  %v7327_v55 = vadd.f32 %v7286_v40, %v7167_v4  ;;  %v7174_v4 = vmul.f32 %v12411_v19, %v12445_v49 }
 0xcec   :  { %7373 = vrot.lane.b32.xlu1 %v9315_v39, %s9375_s7  ;;  %9322 = vtanh.f32 %v7327_v55 }
 0xcee   :  { %7461 = vrot.lane.b32.xlu0 %v7327_v55, %s9377_s4  ;;  %v9319_v6 = vpop.eup %9318 }
 0xcf0   :  { %7375 = vrot.lane.b32.xlu1 %v9317_v5, %s9375_s7 }
 0xcf2   :  { %v9321_v36 = vpop.eup %9320 }
 0xcf4   :  { %7377 = vrot.lane.b32.xlu1 %v9319_v6, %s9375_s7  ;;  %v7175_v6 = vmul.f32 %v12415_v59, %v12449_v50 }
 0xcf6   :  { %v9323_v35 = vpop.eup %9322 }
 0xcf8   :  { %7379 = vrot.lane.b32.xlu1 %v9321_v36, %s9375_s7 }
 0xcfc   :  { %7381 = vrot.lane.b32.xlu1 %v9323_v35, %s9375_s7 }
 0xd03   :  { %v7290_v57 = vpop.permute.xlu0 %7289 }
 0xd04   :  { %v7329_v12 = vadd.f32 %v7290_v57, %v7169_v44  ;;  %v7176_v44 = vmul.f32 %v12419_v51, %v12451_v24 }
 0xd05   :  { %v7292_v10 = vpop.permute.xlu1 %7291 }
 0xd06   :  { %7465 = vrot.lane.b32.xlu0 %v7329_v12, %s9377_s4  ;;  %v7330_v42 = vadd.f32 %v7292_v10, %v7170_v37 }
 0xd07   :  { %v7288_v11 = vpop.permute.xlu0 %7287 }
 0xd08   :  { %v7328_v47 = vadd.f32 %v7288_v11, %v7168_v32  ;;  %9324 = vtanh.f32 %v7330_v42 }
 0xd09   :  { %v7294_v21 = vpop.permute.xlu1 %7293 }
 0xd0a   :  { %9326 = vtanh.f32 %v7328_v47  ;;  %v12480_v18 = vadd.f32 %v7294_v21, %v7171_v43 }
 0xd0b   :  { %v5726_v28 = vpop.permute.xlu0 %5725 }
 0xd0c   :  { %v5927_v63 = vsel %vm13319_vm7, %v12322_v31, %v5726_v28  ;;  %9328 = vtanh.f32 %v12480_v18  ;;  %vm13329_vm7 = vmmov %vm13305_vm0 }
 0xd0d   :  { %9330 = vtanh.f32 %v7329_v12  ;;  %v7296_v0 = vpop.permute.xlu1 %7295  ;;  %v5929_v8 = vsel %vm2067_vm10, %v5927_v63, %v11718_v62 }
 0xd0e   :  { %v7332_v52 = vadd.f32 %v7296_v0, %v7172_v1 }
 0xd0f   :  { %v5790_v14 = vpop.permute.xlu0 %5789 }
 0xd10   :  { %v5931_v48 = vsel %vm2070_vm2, %v5929_v8, %v5790_v14  ;;  %9332 = vtanh.f32 %v7332_v52 }
 0xd11   :  { %5939 = vst [vmem:[#allocation5 + $0x40] sm:$0xff] %v5931_v48 }
 0xd12   :  { %v9325_v16 = vpop.eup %9324 }
 0xd13   :  { %v5824_v15 = vpop.permute.xlu0 %5823  ;;  %7387 = vrot.lane.b32.xlu0 %v9325_v16, %s9375_s7 }
 0xd14   :  { %v9327_v27 = vpop.eup %9326 }
 0xd15   :  { %7383 = vrot.lane.b32.xlu1 %v9327_v27, %s9375_s7 }
 0xd16   :  { %v9329_v31 = vpop.eup %9328 }
 0xd17   :  { %v5858_v17 = vpop.permute.xlu0 %5857  ;;  %v9331_v45 = vpop.eup %9330  ;;  %7389 = vrot.lane.b32.xlu0 %v9329_v31, %s9375_s7 }
 0xd18   :  { %v5933_v34 = vsel %vm13320_vm6, %v5824_v15, %v5858_v17  ;;  %vm13330_vm6 = vcmask 1045509  }
 0xd19   :  { %7385 = vrot.lane.b32.xlu1 %v9331_v45, %s9375_s7  ;;  %v5935_v58 = vsel %vm2067_vm10, %v5933_v34, %v13321_v60 }
 0xd1a   :  { %v9333_v62 = vpop.eup %9332 }
 0xd1b   :  { %v5922_v41 = vpop.permute.xlu0 %5921  ;;  %7391 = vrot.lane.b32.xlu0 %v9333_v62, %s9375_s7 }
 0xd1c   :  { %v5937_v54 = vsel %vm2070_vm2, %v5935_v58, %v5922_v41 }
 0xd1d   :  { %5940 = vst [vmem:[#allocation5 + $0x48] sm:$0xff] %v5937_v54  ;;  %7463 = vrot.lane.b32.xlu1 %v7328_v47, %s9377_s4 }
 0xd21   :  { %7467 = vrot.lane.b32.xlu1 %v7330_v42, %s9377_s4  ;;  %v7298_v40 = vpop.permute.xlu1 %7297 }
 0xd22   :  { %v7333_v39 = vadd.f32 %v7298_v40, %v7173_v61 }
 0xd24   :  { %9334 = vtanh.f32 %v7333_v39 }
 0xd25   :  { %7471 = vrot.lane.b32.xlu1 %v7332_v52, %s9377_s4  ;;  %v7300_v55 = vpop.permute.xlu1 %7299 }
 0xd26   :  { %v7334_v5 = vadd.f32 %v7300_v55, %v7174_v4 }
 0xd28   :  { %9336 = vtanh.f32 %v7334_v5 }
 0xd29   :  { %7475 = vrot.lane.b32.xlu1 %v7334_v5, %s9377_s4  ;;  %v7302_v36 = vpop.permute.xlu1 %7301 }
 0xd2a   :  { %v7335_v7 = vadd.f32 %v7302_v36, %v7175_v6 }
 0xd2c   :  { %9338 = vtanh.f32 %v7335_v7 }
 0xd2d   :  { %v7304_v57 = vpop.permute.xlu1 %7303 }
 0xd2e   :  { %v9335_v35 = vpop.eup %9334  ;;  %v7336_v12 = vadd.f32 %v7304_v57, %v7176_v44 }
 0xd2f   :  { %7393 = vrot.lane.b32.xlu0 %v9335_v35, %s9375_s7 }
 0xd30   :  { %9340 = vtanh.f32 %v7336_v12  ;;  %7479 = vrot.lane.b32.xlu1 %v7336_v12, %s9377_s4 }
 0xd31   :  { %v5728_v49 = vpop.permute.xlu1 %5727 }
 0xd32   :  { %v9337_v37 = vpop.eup %9336  ;;  %v5928_v50 = vsel %vm13322_vm4, %v12344_v33, %v5728_v49  ;;  %vm13331_vm4 = vmmov %vm13330_vm6 }
 0xd33   :  { %7395 = vrot.lane.b32.xlu0 %v9337_v37, %s9375_s7  ;;  %v5930_v32 = vsel %vm2067_vm10, %v5928_v50, %v11819_v22 }
 0xd35   :  { %v5792_v10 = vpop.permute.xlu1 %5791 }
 0xd36   :  { %v9339_v42 = vpop.eup %9338  ;;  %v5932_v11 = vsel %vm2070_vm2, %v5930_v32, %v5792_v10 }
 0xd37   :  { %5941 = vst [vmem:[#allocation5 + $0x50] sm:$0xff] %v5932_v11  ;;  %7397 = vrot.lane.b32.xlu0 %v9339_v42, %s9375_s7 }
 0xd38   :  { %v7450_v24 = vpop.permute.xlu0 %7449 }
 0xd39   :  { %7497 = vst.msk [vmem:[#allocation4] sm:$0xff] %vm13323_vm5, %v7450_v24  ;;  %v5826_v47 = vpop.permute.xlu1 %5825  ;;  %vm13332_vm5 = vcmask 1046534  }
 0xd3a   :  { %v9341_v21 = vpop.eup %9340 }
 0xd3b   :  { %7399 = vrot.lane.b32.xlu0 %v9341_v21, %s9375_s7 }
 0xd3c   :  { %v7454_v43 = vpop.permute.xlu0 %7453 }
 0xd3d   :  { %7499 = vst.msk [vmem:[#allocation4 + $0x10] sm:$0xff] %vm13324_vm9, %v7454_v43  ;;  %v5860_v33 = vpop.permute.xlu1 %5859  ;;  %vm13333_vm9 = vmmov %vm13332_vm5 }
 0xd3e   :  { %v5934_v22 = vsel %vm13305_vm0, %v5826_v47, %v5860_v33 }
 0xd3f   :  { %7469 = vrot.lane.b32.xlu0 %v12480_v18, %s9377_s4  ;;  %v5936_v28 = vsel %vm2067_vm10, %v5934_v22, %v11822_v46 }
 0xd41   :  { %v5924_v63 = vpop.permute.xlu1 %5923 }
 0xd42   :  { %v5938_v1 = vsel %vm2070_vm2, %v5936_v28, %v5924_v63 }
 0xd43   :  { %5942 = vst [vmem:[#allocation5 + $0x58] sm:$0xff] %v5938_v1  ;;  %7473 = vrot.lane.b32.xlu0 %v7333_v39, %s9377_s4 }
 0xd47   :  { %7477 = vrot.lane.b32.xlu0 %v7335_v7, %s9377_s4 }
 0xd4d   :  { %v7452_v0 = vpop.permute.xlu1 %7451 }
 0xd4e   :  { %7498 = vst.msk [vmem:[#allocation4 + $0x8] sm:$0xff] %vm13325_vm8, %v7452_v0  ;;  %vm13334_vm8 = vmmov %vm13331_vm4 }
 0xd51   :  { %v7456_v52 = vpop.permute.xlu1 %7455 }
 0xd52   :  { %7500 = vst.msk [vmem:[#allocation4 + $0x18] sm:$0xff] %vm13326_vm3, %v7456_v52  ;;  %vm13335_vm3 = vmmov %vm13332_vm5 }
 0xd55   :  { %v7370_v8 = vpop.permute.xlu1 %7369 }
 0xd56   :  { %v12534_v18 = vmul.f32 %v12326_v53, %v7370_v8 }
 0xd58   :  { %7529 = vrot.lane.b32.xlu0 %v12534_v18, %s9376_s20  ;;  %v7372_v46 = vpop.permute.xlu0 %7371  ;;  %v7793_v15 = vrot.slane %v12534_v18, 6  ;;  %v7661_v17 = vrot.slane %v12534_v18, 2  ;;  %v7823_v11 = vrot.slane %v12534_v18, 7  ;;  %v7725_v33 = vrot.slane %v12534_v18, 4 }
 0xd59   :  { %v12539_v14 = vmul.f32 %v12348_v30, %v7372_v46  ;;  %v7759_v52 = vrot.slane %v12534_v18, 5  ;;  %v7691_v8 = vrot.slane %v12534_v18, 3 }
 0xd5a   :  { %v7460_v48 = vpop.permute.xlu1 %7459 }
 0xd5b   :  { %7502 = vst.msk [vmem:[#allocation4 + $0x28] sm:$0xff] %vm13327_vm12, %v7460_v48  ;;  %7531 = vrot.lane.b32.xlu1 %v12539_v14, %s9376_s20  ;;  %v7794_v27 = vrot.slane %v12539_v14, 5  ;;  %v7662_v53 = vrot.slane %v12539_v14, 1  ;;  %v7824_v42 = vrot.slane %v12539_v14, 6  ;;  %v7593_v43 = vrot.slane %v12539_v14, 7 }
 0xd5c   :  { %v7458_v16 = vpop.permute.xlu0 %7457  ;;  %v7726_v22 = vrot.slane %v12539_v14, 3  ;;  %v7760_v28 = vrot.slane %v12539_v14, 4  ;;  %vm13336_vm12 = vcmask 1047559  }
 0xd5d   :  { %7501 = vst.msk [vmem:[#allocation4 + $0x20] sm:$0xff] %vm13328_vm11, %v7458_v16  ;;  %v7795_v45 = vsel %vm1795_vm13, %v7794_v27, %v7793_v15  ;;  %v7663_v34 = vsel %vm1795_vm13, %v7662_v53, %v7661_v17  ;;  %v7825_v48 = vsel %vm1795_vm13, %v7824_v42, %v7823_v11  ;;  %v7692_v27 = vrot.slane %v12539_v14, 2  ;;  %vm13337_vm11 = vmmov %vm13331_vm4 }
 0xd5e   :  { %v7374_v31 = vpop.permute.xlu1 %7373 }
 0xd5f   :  { %v12550_v30 = vmul.f32 %v12332_v9, %v7374_v31 }
 0xd60   :  { %v7462_v62 = vpop.permute.xlu0 %7461 }
 0xd61   :  { %7533 = vrot.lane.b32.xlu0 %v12550_v30, %s9376_s20  ;;  %7503 = vst.msk [vmem:[#allocation4 + $0x30] sm:$0xff] %vm13329_vm7, %v7462_v62  ;;  %v7796_v58 = vrot.slane %v12550_v30, 4  ;;  %v7664_v41 = vsel %vm1798_vm14, %v12550_v30, %v7663_v34  ;;  %v7826_v47 = vrot.slane %v12550_v30, 5  ;;  %v7595_v15 = vrot.slane %v12550_v30, 6  ;;  %vm13338_vm7 = vmmov %vm13305_vm0 }
 0xd62   :  { %v7376_v60 = vpop.permute.xlu1 %7375 }
 0xd63   :  { %v12561_v54 = vmul.f32 %v12338_v23, %v7376_v60  ;;  %v7797_v9 = vsel %vm1798_vm14, %v7796_v58, %v7795_v45  ;;  %v7827_v31 = vsel %vm1798_vm14, %v7826_v47, %v7825_v48  ;;  %v7594_v45 = vsel %vm1795_vm13, %v7593_v43, %v12534_v18 }
 0xd64   :  { %v7727_v60 = vsel %vm1795_vm13, %v7726_v22, %v7725_v33  ;;  %v7761_v58 = vsel %vm1795_vm13, %v7760_v28, %v7759_v52 }
 0xd65   :  { %7535 = vrot.lane.b32.xlu1 %v12561_v54, %s9376_s20  ;;  %v7798_v40 = vrot.slane %v12561_v54, 3  ;;  %v7665_v39 = vrot.slane %v12561_v54, 7  ;;  %v7828_v21 = vrot.slane %v12561_v54, 4  ;;  %v7597_v62 = vrot.slane %v12561_v54, 5 }
 0xd66   :  { %v7378_v61 = vpop.permute.xlu1 %7377  ;;  %v7764_v47 = vrot.slane %v12561_v54, 2 }
 0xd67   :  { %v12569_v4 = vmul.f32 %v12352_v13, %v7378_v61  ;;  %v7799_v55 = vsel %vm1801_vm15, %v7798_v40, %v7797_v9  ;;  %v7666_v5 = vsel %vm1801_vm15, %v7665_v39, %v7664_v41  ;;  %v7829_v34 = vsel %vm1801_vm15, %v7828_v21, %v7827_v31 }
 0xd68   :  { %v7629_v9 = vrot.slane %v12550_v30, 7  ;;  %v7596_v39 = vsel %vm1798_vm14, %v7595_v15, %v7594_v45 }
 0xd69   :  { %7537 = vrot.lane.b32.xlu0 %v12569_v4, %s9376_s20  ;;  %v7800_v6 = vrot.slane %v12569_v4, 2  ;;  %v7667_v36 = vrot.slane %v12569_v4, 6  ;;  %v7830_v1 = vrot.slane %v12569_v4, 3 }
 0xd6a   :  { %v7380_v23 = vpop.permute.xlu1 %7379 }
 0xd6b   :  { %v12578_v7 = vmul.f32 %v12357_v20, %v7380_v23  ;;  %v7801_v35 = vsel %vm1804_vm1, %v7800_v6, %v7799_v55  ;;  %v7668_v13 = vsel %vm1804_vm1, %v7667_v36, %v7666_v5  ;;  %v7762_v5 = vrot.slane %v12550_v30, 3 }
 0xd6d   :  { %7539 = vrot.lane.b32.xlu1 %v12578_v7, %s9376_s20  ;;  %v7802_v57 = vrot.slane %v12578_v7, 1  ;;  %v7669_v12 = vrot.slane %v12578_v7, 5  ;;  %v7832_v16 = vrot.slane %v12578_v7, 2  ;;  %v7601_v55 = vrot.slane %v12578_v7, 3 }
 0xd6e   :  { %v7382_v44 = vpop.permute.xlu1 %7381  ;;  %v7635_v42 = vrot.slane %v12578_v7, 4  ;;  %v7763_v28 = vsel %vm1798_vm14, %v7762_v5, %v7761_v58  ;;  %v7733_v48 = vrot.slane %v12578_v7, 7 }
 0xd6f   :  { %v12587_v49 = vmul.f32 %v12363_v56, %v7382_v44  ;;  %v7803_v37 = vsel %vm13330_vm6, %v7802_v57, %v7801_v35  ;;  %v7670_v20 = vsel %vm13331_vm4, %v7669_v12, %v7668_v13  ;;  %v7627_v56 = vrot.slane %v12534_v18, 1  ;;  %vm13339_vm6 = vmmov %vm13335_vm3 }
 0xd70   :  { %v7728_v18 = vrot.slane %v12550_v30, 2  ;;  %v7631_v35 = vrot.slane %v12561_v54, 6  ;;  %v7598_v44 = vsel %vm1801_vm15, %v7597_v62, %v7596_v39  ;;  %v7730_v12 = vrot.slane %v12561_v54, 1  ;;  %vm13340_vm4 = vmmov %vm13336_vm12 }
 0xd71   :  { %7541 = vrot.lane.b32.xlu0 %v12587_v49, %s9376_s20  ;;  %v12595_v50 = vsel %vm13332_vm5, %v12587_v49, %v7803_v37  ;;  %v7671_v32 = vrot.slane %v12587_v49, 4  ;;  %v7628_v0 = vsel %vm1795_vm13, %v12539_v14, %v7627_v56  ;;  %v7834_v17 = vrot.slane %v12587_v49, 1  ;;  %vm13341_vm5 = vmmov %vm13334_vm8 }
 0xd72   :  { %v7599_v14 = vrot.slane %v12569_v4, 4  ;;  %v7603_v36 = vrot.slane %v12587_v49, 2  ;;  %v7630_v37 = vsel %vm1798_vm14, %v7629_v9, %v7628_v0  ;;  %v7729_v11 = vsel %vm1798_vm14, %v7728_v18, %v7727_v60 }
 0xd73   :  { %v12599_v10 = vsel %vm13333_vm9, %v7671_v32, %v7670_v20  ;;  %v7633_v20 = vrot.slane %v12569_v4, 5  ;;  %v7693_v32 = vsel %vm1795_vm13, %v7692_v27, %v7691_v8  ;;  %v7637_v22 = vrot.slane %v12587_v49, 3  ;;  %vm13342_vm9 = vmmov %vm13305_vm0 }
 0xd74   :  { %v7632_v0 = vsel %vm1801_vm15, %v7631_v35, %v7630_v37  ;;  %v7731_v8 = vsel %vm1801_vm15, %v7730_v12, %v7729_v11  ;;  %v7697_v12 = vrot.slane %v12569_v4, 7  ;;  %v7701_v11 = vrot.slane %v12587_v49, 5 }
 0xd75   :  { %v7732_v45 = vsel %vm1804_vm1, %v12569_v4, %v7731_v8 }
 0xd78   :  { %v7466_v24 = vpop.permute.xlu0 %7465 }
 0xd79   :  { %7505 = vst.msk [vmem:[#allocation4 + $0x40] sm:$0xff] %vm13305_vm0, %v7466_v24  ;;  %vm13343_vm0 = vmmov %vm13335_vm3 }
 0xd85   :  { %v7388_v63 = vpop.permute.xlu0 %7387 }
 0xd87   :  { %v7384_v46 = vpop.permute.xlu1 %7383 }
 0xd88   :  { %v12621_v53 = vmul.f32 %v12378_v2, %v7384_v46  ;;  %v7831_v2 = vsel %vm1804_vm1, %v7830_v1, %v7829_v34  ;;  %v7634_v46 = vsel %vm1804_vm1, %v7633_v20, %v7632_v0  ;;  %v7735_v34 = vrot.slane %v12587_v49, 6 }
 0xd89   :  { %v7390_v41 = vpop.permute.xlu0 %7389  ;;  %v7833_v40 = vsel %vm13334_vm8, %v7832_v16, %v7831_v2  ;;  %v7766_v16 = vrot.slane %v12569_v4, 1  ;;  %v7636_v31 = vsel %vm13341_vm5, %v7635_v42, %v7634_v46  ;;  %vm13344_vm8 = vmmov %vm13340_vm4 }
 0xd8a   :  { %7543 = vrot.lane.b32.xlu1 %v12621_v53, %s9376_s20  ;;  %v7835_v6 = vsel %vm13335_vm3, %v7834_v17, %v7833_v40  ;;  %v7605_v57 = vrot.slane %v12621_v53, 1  ;;  %v12664_v43 = vmul.f32 %v12383_v38, %v7390_v41  ;;  %v7639_v52 = vrot.slane %v12621_v53, 2  ;;  %vm13345_vm3 = vmmov %vm13341_vm5 }
 0xd8b   :  { %v7386_v61 = vpop.permute.xlu1 %7385  ;;  %v7836_v13 = vsel %vm13336_vm12, %v12621_v53, %v7835_v6  ;;  %v12675_v38 = vmul.f32 %v12375_v25, %v7388_v63  ;;  %v7765_v25 = vsel %vm1801_vm15, %v7764_v47, %v7763_v28  ;;  %v7694_v63 = vrot.slane %v12550_v30, 1  ;;  %vm13346_vm12 = vmmov %vm13340_vm4 }
 0xd8c   :  { %v12642_v23 = vmul.f32 %v12371_v29, %v7386_v61  ;;  %v7600_v29 = vsel %vm1804_vm1, %v7599_v14, %v7598_v44  ;;  %v7638_v17 = vsel %vm13343_vm0, %v7637_v22, %v7636_v31  ;;  %v7737_v62 = vrot.slane %v12621_v53, 5  ;;  %vm13349_vm5 = vmmov %vm13345_vm3 }
 0xd8d   :  { %v7602_v56 = vsel %vm13337_vm11, %v7601_v55, %v7600_v29  ;;  %v7392_v21 = vpop.permute.xlu0 %7391  ;;  %v7805_v60 = vrot.slane %v12621_v53, 7  ;;  %v7673_v58 = vrot.slane %v12621_v53, 3  ;;  %v7734_v30 = vsel %vm13345_vm3, %v7733_v48, %v7732_v45  ;;  %vm13347_vm11 = vmmov %vm13340_vm4 }
 0xd8e   :  { %7545 = vrot.lane.b32.xlu0 %v12642_v23, %s9376_s20  ;;  %7851 = vrot.lane.b32.xlu1 %v7836_v13, %s9375_s7  ;;  %v7604_v33 = vsel %vm13339_vm6, %v7603_v36, %v7602_v56  ;;  %v12684_v15 = vmul.f32 %v12389_v3, %v7392_v21  ;;  %v7640_v3 = vsel %vm13344_vm8, %v7639_v52, %v7638_v17  ;;  %v7807_v41 = vrot.slane %v12642_v23, 6  ;;  %vm13348_vm6 = vmmov %vm13343_vm0 }
 0xd8f   :  { %v7464_v24 = vpop.permute.xlu1 %7463  ;;  %v7606_v1 = vsel %vm13340_vm4, %v7605_v57, %v7604_v33  ;;  %v7767_v2 = vsel %vm1804_vm1, %v7766_v16, %v7765_v25  ;;  %v7769_v14 = vrot.slane %v12587_v49, 7  ;;  %v7808_v9 = vrot.slane %v12675_v38, 5  ;;  %vm13352_vm8 = vmmov %vm13338_vm7 }
 0xd90   :  { %7504 = vst.msk [vmem:[#allocation4 + $0x38] sm:$0xff] %vm13338_vm7, %v7464_v24  ;;  %v12706_v61 = vsel %vm13346_vm12, %v7805_v60, %v12595_v50  ;;  %v12710_v40 = vsel %vm13347_vm11, %v7673_v58, %v12599_v10  ;;  %v7810_v39 = vrot.slane %v12664_v43, 4  ;;  %v7812_v55 = vrot.slane %v12684_v15, 3  ;;  %vm13353_vm12 = vmmov %vm13348_vm6 }
 0xd91   :  { %v7736_v5 = vsel %vm13348_vm6, %v7735_v34, %v7734_v30  ;;  %v7809_v6 = vsel %vm1795_vm13, %v7808_v9, %v7807_v41  ;;  %v7675_v36 = vrot.slane %v12642_v23, 2  ;;  %v7676_v35 = vrot.slane %v12675_v38, 1  ;;  %vm13355_vm6 = vmmov %vm13345_vm3 }
 0xd92   :  { %7621 = vrot.lane.b32.xlu1 %v7606_v1, %s9378_s0  ;;  %7549 = vrot.lane.b32.xlu0 %v12664_v43, %s9376_s20  ;;  %v7738_v50 = vsel %vm13340_vm4, %v7737_v62, %v7736_v5  ;;  %v7771_v13 = vrot.slane %v12621_v53, 6  ;;  %v7811_v10 = vsel %vm1798_vm14, %v7810_v39, %v7809_v6  ;;  %v7679_v44 = vrot.slane %v12684_v15, 7 }
 0xd93   :  { %v7468_v27 = vpop.permute.xlu1 %7467  ;;  %v7695_v57 = vsel %vm1798_vm14, %v7694_v63, %v7693_v32  ;;  %v7813_v29 = vsel %vm1801_vm15, %v7812_v55, %v7811_v10  ;;  %v7677_v37 = vsel %vm1795_vm13, %v7676_v35, %v7675_v36  ;;  %v7768_v20 = vsel %vm13349_vm5, %v12578_v7, %v7767_v2  ;;  %vm13357_vm5 = vmmov %vm13345_vm3 }
 0xd94   :  { %7506 = vst.msk [vmem:[#allocation4 + $0x48] sm:$0xff] %vm13342_vm9, %v7468_v27  ;;  %v7699_v24 = vrot.slane %v12578_v7, 6  ;;  %v7678_v56 = vsel %vm1798_vm14, %v12664_v43, %v7677_v37  ;;  %vm13350_vm9 = vmmov %vm13343_vm0  ;;  %v7696_v47 = vsel %vm1801_vm15, %v12561_v54, %v7695_v57  ;;  %v7703_v21 = vrot.slane %v12621_v53, 4 }
 0xd95   :  { %v7770_v42 = vsel %vm13350_vm9, %v7769_v14, %v7768_v20  ;;  %v7680_v32 = vsel %vm1801_vm15, %v7679_v44, %v7678_v56  ;;  %vm13351_vm0 = vmmov %vm13340_vm4  ;;  %v7698_v7 = vsel %vm1804_vm1, %v7697_v12, %v7696_v47  ;;  %v7837_v53 = vrot.slane %v12642_v23, 7 }
 0xd96   :  { %7655 = vrot.lane.b32.xlu1 %v7640_v3, %s9377_s4  ;;  %v7772_v4 = vsel %vm13351_vm0, %v7771_v13, %v7770_v42  ;;  %v7700_v22 = vsel %vm13345_vm3, %v7699_v24, %v7698_v7  ;;  %vm13354_vm11 = vmmov %vm13351_vm0  ;;  %v7838_v46 = vrot.slane %v12675_v38, 6  ;;  %v7607_v31 = vrot.slane %v12675_v38, 7 }
 0xd97   :  { %v7472_v18 = vpop.permute.xlu1 %7471  ;;  %v7702_v49 = vsel %vm13353_vm12, %v7701_v11, %v7700_v22  ;;  %v7840_v63 = vrot.slane %v12664_v43, 5  ;;  %v7609_v17 = vrot.slane %v12664_v43, 6  ;;  %v7842_v45 = vrot.slane %v12684_v15, 4  ;;  %vm13356_vm4 = vmmov %vm13345_vm3 }
 0xd98   :  { %7508 = vst.msk [vmem:[#allocation4 + $0x58] sm:$0xff] %vm13338_vm7, %v7472_v18  ;;  %v7704_v28 = vsel %vm13354_vm11, %v7703_v21, %v7702_v49  ;;  %v7839_v27 = vsel %vm1795_vm13, %v7838_v46, %v7837_v53  ;;  %v7608_v34 = vsel %vm1795_vm13, %v7607_v31, %v12642_v23  ;;  %v7641_v60 = vrot.slane %v12642_v23, 1  ;;  %vm13358_vm0 = vmmov %vm13350_vm9 }
 0xd99   :  { %v7841_v62 = vsel %vm1798_vm14, %v7840_v63, %v7839_v27  ;;  %v7740_v41 = vrot.slane %v12675_v38, 3  ;;  %v7610_v9 = vsel %vm1798_vm14, %v7609_v17, %v7608_v34  ;;  %v7643_v18 = vrot.slane %v12664_v43, 7  ;;  %vm13360_vm3 = vmmov %vm13354_vm11 }
 0xd9a   :  { %7753 = vrot.lane.b32.xlu1 %v7738_v50, %s9378_s0  ;;  %v7774_v39 = vrot.slane %v12675_v38, 4  ;;  %v7843_v55 = vsel %vm1801_vm15, %v7842_v45, %v7841_v62  ;;  %v7739_v5 = vrot.slane %v12642_v23, 4  ;;  %v7611_v50 = vrot.slane %v12684_v15, 5  ;;  %vm13361_vm12 = vmmov %vm13338_vm7 }
 0xd9b   :  { %v7476_v33 = vpop.permute.xlu1 %7475  ;;  %v7642_v13 = vsel %vm1795_vm13, %v12675_v38, %v7641_v60  ;;  %v7742_v56 = vrot.slane %v12664_v43, 2  ;;  %vm13362_vm11 = vmmov %vm13356_vm4 }
 0xd9c   :  { %7510 = vst.msk [vmem:[#allocation4 + $0x68] sm:$0xff] %vm13352_vm8, %v7476_v33  ;;  %v7644_v11 = vsel %vm1798_vm14, %v7643_v18, %v7642_v13  ;;  %vm13359_vm8 = vmmov %vm13358_vm0  ;;  %v7612_v47 = vsel %vm1801_vm15, %v7611_v50, %v7610_v9  ;;  %v7645_v33 = vrot.slane %v12684_v15, 6 }
 0xd9e   :  { %7787 = vrot.lane.b32.xlu1 %v7772_v4, %s9377_s4  ;;  %v7646_v31 = vsel %vm1801_vm15, %v7645_v33, %v7644_v11 }
 0xda1   :  { %v7394_v1 = vpop.permute.xlu0 %7393 }
 0xda2   :  { %7719 = vrot.lane.b32.xlu1 %v7704_v28, %s9375_s7  ;;  %v12748_v54 = vmul.f32 %v12407_v26, %v7394_v1  ;;  %v7480_v0 = vpop.permute.xlu1 %7479 }
 0xda3   :  { %7512 = vst.msk [vmem:[#allocation4 + $0x78] sm:$0xff] %vm13338_vm7, %v7480_v0  ;;  %vm13363_vm7 = vmmov %vm13358_vm0 }
 0xda4   :  { %7553 = vrot.lane.b32.xlu0 %v12748_v54, %s9376_s20  ;;  %v7814_v52 = vrot.slane %v12748_v54, 2  ;;  %v7681_v8 = vrot.slane %v12748_v54, 6  ;;  %v7844_v3 = vrot.slane %v12748_v54, 3  ;;  %v7613_v57 = vrot.slane %v12748_v54, 4 }
 0xda5   :  { %v7396_v16 = vpop.permute.xlu0 %7395  ;;  %v7647_v49 = vrot.slane %v12748_v54, 5  ;;  %v7780_v18 = vrot.slane %v12748_v54, 1 }
 0xda6   :  { %7547 = vrot.lane.b32.xlu1 %v12675_v38, %s9376_s20  ;;  %v7815_v26 = vsel %vm1804_vm1, %v7814_v52, %v7813_v29  ;;  %v7682_v48 = vsel %vm1804_vm1, %v7681_v8, %v7680_v32  ;;  %v12764_v25 = vmul.f32 %v12411_v19, %v7396_v16  ;;  %v7773_v32 = vrot.slane %v12642_v23, 5 }
 0xda7   :  { %v7614_v22 = vsel %vm1804_vm1, %v7613_v57, %v7612_v47  ;;  %v7741_v52 = vsel %vm1795_vm13, %v7740_v41, %v7739_v5  ;;  %v7744_v8 = vrot.slane %v12684_v15, 1  ;;  %v7648_v34 = vsel %vm1804_vm1, %v7647_v49, %v7646_v31 }
 0xda8   :  { %v7846_v58 = vrot.slane %v12764_v25, 2  ;;  %v7816_v30 = vrot.slane %v12764_v25, 1  ;;  %v7683_v2 = vrot.slane %v12764_v25, 5  ;;  %v7615_v24 = vrot.slane %v12764_v25, 3 }
 0xda9   :  { %v7398_v19 = vpop.permute.xlu0 %7397  ;;  %v7649_v0 = vrot.slane %v12764_v25, 4  ;;  %v7775_v17 = vsel %vm1795_vm13, %v7774_v39, %v7773_v32  ;;  %v7743_v62 = vsel %vm1798_vm14, %v7742_v56, %v7741_v52  ;;  %v7705_v41 = vrot.slane %v12642_v23, 3 }
 0xdaa   :  { %7551 = vrot.lane.b32.xlu1 %v12684_v15, %s9376_s20  ;;  %v12781_v14 = vmul.f32 %v12415_v59, %v7398_v19  ;;  %v7817_v6 = vsel %vm13355_vm6, %v7816_v30, %v7815_v26  ;;  %v7684_v36 = vsel %vm13356_vm4, %v7683_v2, %v7682_v48  ;;  %v7845_v59 = vsel %vm1804_vm1, %v7844_v3, %v7843_v55  ;;  %vm13364_vm6 = vmmov %vm13360_vm3 }
 0xdab   :  { %v7847_v44 = vsel %vm13357_vm5, %v7846_v58, %v7845_v59  ;;  %v7616_v53 = vsel %vm13362_vm11, %v7615_v24, %v7614_v22  ;;  %vm13365_vm4 = vmmov %vm13360_vm3  ;;  %v7776_v3 = vrot.slane %v12664_v43, 3  ;;  %v7747_v19 = vrot.slane %v12764_v25, 7 }
 0xdac   :  { %v7848_v35 = vrot.slane %v12781_v14, 1  ;;  %v7818_v12 = vsel %vm13350_vm9, %v12781_v14, %v7817_v6  ;;  %v7685_v29 = vrot.slane %v12781_v14, 4  ;;  %v7617_v42 = vrot.slane %v12781_v14, 2  ;;  %vm13366_vm5 = vmmov %vm13360_vm3 }
 0xdad   :  { %v7400_v10 = vpop.permute.xlu0 %7399  ;;  %v7651_v26 = vrot.slane %v12781_v14, 3  ;;  %vm13367_vm9 = vmmov %vm13361_vm12  ;;  %v7778_v58 = vrot.slane %v12684_v15, 2  ;;  %v7749_v2 = vrot.slane %v12781_v14, 6  ;;  %v7777_v9 = vsel %vm1798_vm14, %v7776_v3, %v7775_v17 }
 0xdae   :  { %7555 = vrot.lane.b32.xlu1 %v12764_v25, %s9376_s20  ;;  %v12803_v37 = vmul.f32 %v12419_v51, %v7400_v10  ;;  %v7849_v20 = vsel %vm13358_vm0, %v7848_v35, %v7847_v44  ;;  %v7686_v4 = vsel %vm13359_vm8, %v7685_v29, %v7684_v36  ;;  %v7618_v46 = vsel %vm13363_vm7, %v7617_v42, %v7616_v53  ;;  %vm13368_vm0 = vmmov %vm13362_vm11 }
 0xdaf   :  { %v7650_v60 = vsel %vm13368_vm0, %v7649_v0, %v7648_v34  ;;  %vm13369_vm8 = vmmov %vm13363_vm7  ;;  %v7745_v55 = vsel %vm1801_vm15, %v7744_v8, %v7743_v62  ;;  %v7706_v6 = vrot.slane %v12675_v38, 2  ;;  %v7779_v35 = vsel %vm1801_vm15, %v7778_v58, %v7777_v9 }
 0xdb0   :  { %v7850_v51 = vsel %vm13360_vm3, %v12803_v37, %v7849_v20  ;;  %v7619_v21 = vrot.slane %v12803_v37, 1  ;;  %v7819_v28 = vrot.slane %v12803_v37, 7  ;;  %v7687_v1 = vrot.slane %v12803_v37, 3  ;;  %vm13371_vm11 = vmmov %vm13368_vm0 }
 0xdb1   :  { %7853 = vrot.lane.b32.xlu0 %v7850_v51, %s9375_s7  ;;  %v7470_v7 = vpop.permute.xlu0 %7469  ;;  %v7653_v63 = vrot.slane %v12803_v37, 2  ;;  %v7652_v30 = vsel %vm13369_vm8, %v7651_v26, %v7650_v60  ;;  %v7751_v5 = vrot.slane %v12803_v37, 5  ;;  %v7746_v23 = vsel %vm1804_vm1, %v12748_v54, %v7745_v55 }
 0xdb2   :  { %7559 = vrot.lane.b32.xlu1 %v12803_v37, %s9376_s20  ;;  %7507 = vst.msk [vmem:[#allocation4 + $0x50] sm:$0xff] %vm13361_vm12, %v7470_v7  ;;  %v12832_v48 = vsel %vm13364_vm6, %v7819_v28, %v7818_v12  ;;  %v12835_v16 = vsel %vm13365_vm4, %v7687_v1, %v7686_v4  ;;  %v7620_v27 = vsel %vm13366_vm5, %v7619_v21, %v7618_v46  ;;  %vm13370_vm12 = vmmov %vm13367_vm9  ;;  %v7783_v38 = vrot.slane %v12781_v14, 7 }
 0xdb3   :  { %v7654_v39 = vsel %vm13360_vm3, %v7653_v63, %v7652_v30  ;;  %v7748_v59 = vsel %vm13371_vm11, %v7747_v19, %v7746_v23  ;;  %v7707_v50 = vsel %vm1795_vm13, %v7706_v6, %v7705_v41  ;;  %v7781_v10 = vsel %vm1804_vm1, %v7780_v18, %v7779_v35  ;;  %vm13372_vm6 = vmmov %vm13360_vm3 }
 0xdb4   :  { %v7750_v13 = vsel %vm13363_vm7, %v7749_v2, %v7748_v59  ;;  %v7708_v44 = vrot.slane %v12664_v43, 1  ;;  %v7785_v12 = vrot.slane %v12803_v37, 6  ;;  %v7711_v20 = vrot.slane %v12748_v54, 7  ;;  %vm13373_vm13 = vmmov %vm13368_vm0 }
 0xdb5   :  { %7623 = vrot.lane.b32.xlu0 %v7620_v27, %s9378_s0  ;;  %v7474_v45 = vpop.permute.xlu0 %7473  ;;  %v7752_v57 = vsel %vm13372_vm6, %v7751_v5, %v7750_v13  ;;  %v7782_v24 = vsel %vm13373_vm13, %v12764_v25, %v7781_v10  ;;  %v7713_v56 = vrot.slane %v12764_v25, 6  ;;  %vm13374_vm4 = vmmov %vm13363_vm7  ;;  %v7715_v11 = vrot.slane %v12781_v14, 5 }
 0xdb6   :  { %7509 = vst.msk [vmem:[#allocation4 + $0x60] sm:$0xff] %vm13367_vm9, %v7474_v45  ;;  %v7709_v29 = vsel %vm1798_vm14, %v7708_v44, %v7707_v50  ;;  %v7784_v42 = vsel %vm13374_vm4, %v7783_v38, %v7782_v24  ;;  %vm13375_vm5 = vmmov %vm13360_vm3  ;;  %v7717_v4 = vrot.slane %v12803_v37, 4  ;;  %vm13379_vm8 = vcmask 293920  }
 0xdb7   :  { %v7786_v43 = vsel %vm13375_vm5, %v7785_v12, %v7784_v42  ;;  %v7710_v32 = vsel %vm1801_vm15, %v12684_v15, %v7709_v29  ;;  %vm13376_vm14 = vmmov %vm13368_vm0  ;;  %vm13389_vm5 = vcmask 261120  }
 0xdb8   :  { %v7712_v54 = vsel %vm1804_vm1, %v7711_v20, %v7710_v32  ;;  %vm13377_vm9 = vmmov %vm13374_vm4 }
 0xdb9   :  { %7657 = vrot.lane.b32.xlu0 %v7654_v39, %s9377_s4  ;;  %v7478_v36 = vpop.permute.xlu0 %7477  ;;  %v7714_v51 = vsel %vm13376_vm14, %v7713_v56, %v7712_v54  ;;  %vm13378_vm0 = vmmov %vm13360_vm3 }
 0xdba   :  { %7511 = vst.msk [vmem:[#allocation4 + $0x70] sm:$0xff] %vm13370_vm12, %v7478_v36  ;;  %v7716_v47 = vsel %vm13377_vm9, %v7715_v11, %v7714_v51  ;;  %vm13380_vm15 = vmmov %vm13379_vm8 }
 0xdbb   :  { %v7718_v25 = vsel %vm13378_vm0, %v7717_v4, %v7716_v47  ;;  %vm13381_vm3 = vmmov %vm13379_vm8 }
 0xdbc   :  { %vm13382_vm1 = vmmov %vm13381_vm3 }
 0xdbd   :  { %7755 = vrot.lane.b32.xlu0 %v7752_v57, %s9378_s0  ;;  %vm13383_vm12 = vmmov %vm13382_vm1 }
 0xdbe   :  { %vm13384_vm11 = vmmov %vm13382_vm1 }
 0xdbf   :  { %vm13385_vm7 = vmmov %vm13382_vm1 }
 0xdc0   :  { %vm13386_vm6 = vmmov %vm13382_vm1 }
 0xdc1   :  { %7789 = vrot.lane.b32.xlu0 %v7786_v43, %s9377_s4  ;;  %vm13387_vm13 = vmmov %vm13382_vm1 }
 0xdc2   :  { %vm13388_vm4 = vmmov %vm13382_vm1 }
 0xdc3   :  { %vm13390_vm14 = vmmov %vm13389_vm5 }
 0xdc4   :  { %vm13391_vm9 = vmmov %vm13382_vm1 }
 0xdc5   :  { %7721 = vrot.lane.b32.xlu0 %v7718_v25, %s9375_s7  ;;  %vm13392_vm0 = vmmov %vm13382_vm1 }
 0xdc9   :  { %7557 = vrot.lane.b32.xlu0 %v12781_v14, %s9376_s20 }
 0xdca   :  { %v7530_v21 = vpop.permute.xlu0 %7529 }
 0xdcb   :  { %7577 = vst.msk [vmem:[#allocation2 + $0x11] sm:$0xff] %vm13379_vm8, %v7530_v21  ;;  %vm13393_vm8 = vmmov %vm13392_vm0 }
 0xdcd   :  { %v7532_v15 = vpop.permute.xlu1 %7531 }
 0xdce   :  { %7578 = vst.msk [vmem:[#allocation2 + $0x21] sm:$0xff] %vm13380_vm15, %v7532_v15  ;;  %vm13394_vm15 = vmmov %vm13392_vm0 }
 0xdd3   :  { %v7534_v37 = vpop.permute.xlu0 %7533 }
 0xdd4   :  { %7579 = vst.msk [vmem:[#allocation2 + $0x31] sm:$0xff] %vm13381_vm3, %v7534_v37  ;;  %vm13395_vm3 = vmmov %vm13392_vm0 }
 0xdd7   :  { %v7536_v33 = vpop.permute.xlu1 %7535 }
 0xdd8   :  { %7580 = vst.msk [vmem:[#allocation2 + $0x41] sm:$0xff] %vm13382_vm1, %v7536_v33  ;;  %vm13396_vm1 = vmmov %vm13389_vm5 }
 0xddb   :  { %v7538_v7 = vpop.permute.xlu0 %7537 }
 0xddc   :  { %7581 = vst.msk [vmem:[#allocation2 + $0x51] sm:$0xff] %vm13383_vm12, %v7538_v7  ;;  %vm13397_vm12 = vmmov %vm13396_vm1 }
 0xddf   :  { %v7540_v22 = vpop.permute.xlu1 %7539 }
 0xde0   :  { %7582 = vst.msk [vmem:[#allocation2 + $0x61] sm:$0xff] %vm13384_vm11, %v7540_v22 }
 0xde3   :  { %v7542_v49 = vpop.permute.xlu0 %7541 }
 0xde4   :  { %7583 = vst.msk [vmem:[#allocation2 + $0x71] sm:$0xff] %vm13385_vm7, %v7542_v49 }
 0xdfc   :  { %v7544_v14 = vpop.permute.xlu1 %7543 }
 0xdfd   :  { %7584 = vst.msk [vmem:[#allocation2 + $0x81] sm:$0xff] %vm13386_vm6, %v7544_v14 }
 0xe00   :  { %v7852_v28 = vpop.permute.xlu1 %7851  ;;  %v7546_v1 = vpop.permute.xlu0 %7545 }
 0xe01   :  { %7585 = vst.msk [vmem:[#allocation2 + $0xb1] sm:$0xff] %vm13387_vm13, %v7546_v1 }
 0xe04   :  { %v7622_v53 = vpop.permute.xlu1 %7621  ;;  %v7550_v0 = vpop.permute.xlu0 %7549 }
 0xe05   :  { %7587 = vst.msk [vmem:[#allocation2 + $0xd1] sm:$0xff] %vm13388_vm4, %v7550_v0 }
 0xe08   :  { %v7656_v52 = vpop.permute.xlu1 %7655 }
 0xe09   :  { %v7857_v26 = vsel %vm13389_vm5, %v7622_v53, %v7656_v52 }
 0xe0a   :  { %v7859_v17 = vsel %vm2067_vm10, %v7857_v26, %v12710_v40 }
 0xe0c   :  { %v7754_v8 = vpop.permute.xlu1 %7753 }
 0xe10   :  { %v7788_v46 = vpop.permute.xlu1 %7787 }
 0xe11   :  { %v7863_v27 = vsel %vm13390_vm14, %v7754_v8, %v7788_v46 }
 0xe12   :  { %v7865_v31 = vsel %vm2067_vm10, %v7863_v27, %v12706_v61 }
 0xe13   :  { %v7867_v63 = vsel %vm2070_vm2, %v7865_v31, %v7852_v28 }
 0xe14   :  { %7870 = vst [vmem:[#allocation5 + $0x68] sm:$0xff] %v7867_v63  ;;  %v7720_v45 = vpop.permute.xlu1 %7719 }
 0xe15   :  { %v7861_v34 = vsel %vm2070_vm2, %v7859_v17, %v7720_v45 }
 0xe16   :  { %7869 = vst [vmem:[#allocation5 + $0x60] sm:$0xff] %v7861_v34  ;;  %v7554_v62 = vpop.permute.xlu0 %7553 }
 0xe17   :  { %7589 = vst.msk [vmem:[#allocation2 + $0xf1] sm:$0xff] %vm13391_vm9, %v7554_v62 }
 0xe18   :  { %v7548_v3 = vpop.permute.xlu1 %7547 }
 0xe19   :  { %7586 = vst.msk [vmem:[#allocation2 + $0xc1] sm:$0xff] %vm13392_vm0, %v7548_v3 }
 0xe1c   :  { %v7552_v60 = vpop.permute.xlu1 %7551 }
 0xe1d   :  { %7588 = vst.msk [vmem:[#allocation2 + $0xe1] sm:$0xff] %vm13393_vm8, %v7552_v60 }
 0xe20   :  { %v7556_v61 = vpop.permute.xlu1 %7555 }
 0xe21   :  { %7590 = vst.msk [vmem:[#allocation2 + $0x101] sm:$0xff] %vm13394_vm15, %v7556_v61 }
 0xe23   :  { %v7854_v40 = vpop.permute.xlu0 %7853 }
 0xe24   :  { %v7560_v19 = vpop.permute.xlu1 %7559 }
 0xe25   :  { %7592 = vst.msk [vmem:[#allocation2 + $0x121] sm:$0xff] %vm13395_vm3, %v7560_v19 }
 0xe27   :  { %v7624_v58 = vpop.permute.xlu0 %7623 }
 0xe2b   :  { %v7658_v41 = vpop.permute.xlu0 %7657 }
 0xe2c   :  { %v7858_v9 = vsel %vm13396_vm1, %v7624_v58, %v7658_v41 }
 0xe2d   :  { %v7860_v5 = vsel %vm2067_vm10, %v7858_v9, %v12835_v16 }
 0xe2f   :  { %v7756_v30 = vpop.permute.xlu0 %7755 }
 0xe33   :  { %v7790_v2 = vpop.permute.xlu0 %7789 }
 0xe34   :  { %v7864_v18 = vsel %vm13397_vm12, %v7756_v30, %v7790_v2 }
 0xe35   :  { %v7866_v39 = vsel %vm2067_vm10, %v7864_v18, %v12832_v48 }
 0xe36   :  { %v7868_v55 = vsel %vm2070_vm2, %v7866_v39, %v7854_v40 }
 0xe37   :  { %7872 = vst [vmem:[#allocation5 + $0x78] sm:$0xff] %v7868_v55  ;;  %v7722_v6 = vpop.permute.xlu0 %7721 }
 0xe38   :  { %v7862_v36 = vsel %vm2070_vm2, %v7860_v5, %v7722_v6 }
 0xe39   :  { %7871 = vst [vmem:[#allocation5 + $0x70] sm:$0xff] %v7862_v36 }
 0xe3a   :  { %9353 = shalt.err (!%p9350_p4)
}
 0xe3b   :  { %s9354_s7 = scalar_lea.hbm %s12939_s3, 2048 }
 0xe3c   :  { %p9355_p5 = scmp.ne.s32.totalorder %s12939_s3, %s9354_s7  ;;  %p9358_p6 = scmp.lt.u32.totalorder %s9354_s7, %s12939_s3 }
 0xe3e   :  { %p9360_p7 = pnand %p9358_p6, %p9355_p5 }
 0xe40   :  { %9363 = shalt.err (!%p9360_p7)
}
 0xe41   :  { %s9380_s28 = smov 256   ;;  %v7558_v48 = vpop.permute.xlu0 %7557  ;;  %vm13398_vm10 = vmmov %vm13392_vm0 }
 0xe42   :  { %7889 = dma.vmem_to_hbm [thread:$0]  %s7884_s11, 2048, %s12939_s3, [#allocation6], %s9380_s28, %s9380_s28, %s9371_s12   ;;  %7591 = vst.msk [vmem:[#allocation2 + $0x111] sm:$0xff] %vm13398_vm10, %v7558_v48 }
 0xe43   :  { %9364 = dma.done.wait [#allocation6], 2048  }
 0xe44   :  { %9365 = vsyncadd [#allocation6], 4294965248 }
 0xe45   :  { %7893 = vsyncpa [#allocation6], 1 }

</bundles_post_ra>
